<compile_context>
chip_gen: v7x
topology: tpu7x:2x2x1
jax: 0.10.0
libtpu: 0.0.40
codegen_flags: <defaults>
</compile_context>

<pallas_src>
import functools

import jax
import jax.numpy as jnp
from jax.experimental import pallas as pl
from jax.experimental.pallas import tpu as pltpu

NUM_BLOCKS = 6
LR_MUL = 0.01
NEG_SLOPE = 0.2
FUSED_LRELU_SCALE = 2.0 ** 0.5


# --------------------------------------------------------------------------- kernel
def _fused_levels_mapper_kernel(x_ref, w_ref, ws_ref, b_ref, o_ref, *,
                                counts, num_blocks):
    """One grid step == one full Mapper (PixelNorm + num_blocks residual blocks).

    x_ref : [1, B, S, D] f32    this mapper's (zero-padded) level slice
    w_ref : [1, 2*nb, D, D] i8  all EqualLinear weights of this mapper, [in, out] layout
    ws_ref: [1, 2*nb, 1, D] f32 per-output-channel dequant scales (sqrt(2) of each
                                block's first linear folded into the second's scale)
    b_ref : [1, 2*nb, 1, D] f32 effective biases (already * lr_mul)
    o_ref : [1, B, S, D] f32    output
    counts: static per-mapper real style counts for the masked PixelNorm
    """
    m = pl.program_id(0)  # mapper index (coarse / medium / fine)

    x = x_ref[...].astype(jnp.float32)                        # (1, B, S, D)
    # PixelNorm over the style axis; padded styles are zero so the sum is exact,
    # divide by this mapper's real style count.
    ssq = jnp.sum(x * x, axis=2, keepdims=True)                # (1, B, 1, D)
    cnt = jnp.where(m == 0, jnp.float32(counts[0]),
          jnp.where(m == 1, jnp.float32(counts[1]), jnp.float32(counts[2])))
    xn = x * jax.lax.rsqrt(ssq / cnt + jnp.float32(1e-8))

    _, B, S, D = x_ref.shape
    h = xn.reshape(B * S, D)                                   # lane-dense [M, D]

    for blk in range(num_blocks):                              # fully unrolled (static)
        residual = h

        # linear1 (fused lrelu; its sqrt(2) gain is folded into linear2's dequant scale)
        li = 2 * blk
        y = jnp.dot(h.astype(jnp.bfloat16), w_ref[0, li].astype(jnp.bfloat16),
                    preferred_element_type=jnp.float32)
        y = y * ws_ref[0, li] + b_ref[0, li]
        h = jnp.where(y >= 0.0, y, jnp.float32(NEG_SLOPE) * y)

        # TODO(synk): nn.Dropout(p=0.1) between linear1 and linear2 is identity at inference.

        # linear2 (its own sqrt(2) gain applied explicitly) + residual
        li = 2 * blk + 1
        y = jnp.dot(h.astype(jnp.bfloat16), w_ref[0, li].astype(jnp.bfloat16),
                    preferred_element_type=jnp.float32)
        y = y * ws_ref[0, li] + b_ref[0, li]
        h = jnp.where(y >= 0.0, y, jnp.float32(NEG_SLOPE) * y)
        h = h * jnp.float32(FUSED_LRELU_SCALE) + residual

    o_ref[...] = h.reshape(o_ref.shape).astype(o_ref.dtype)


def _levels_mapper_pallas(x_stacked, w_q, w_scale, b_eff, counts):
    n_map, B, S, D = x_stacked.shape
    n_lin = w_q.shape[1]
    n_blk = n_lin // 2

    kernel = functools.partial(_fused_levels_mapper_kernel,
                               counts=tuple(float(c) for c in counts),
                               num_blocks=n_blk)

    flops = 2 * n_map * n_lin * (B * S) * D * D
    bytes_accessed = (int(w_q.size) + int(w_scale.size) * 4 + int(b_eff.size) * 4
                      + 2 * int(x_stacked.size) * 4)
    cost = pl.CostEstimate(flops=flops,
                           transcendentals=n_map * B * D,
                           bytes_accessed=bytes_accessed)

    return pl.pallas_call(
        kernel,
        out_shape=jax.ShapeDtypeStruct((n_map, B, S, D), jnp.float32),
        grid_spec=pltpu.PrefetchScalarGridSpec(
            num_scalar_prefetch=0,
            grid=(n_map,),
            in_specs=[
                pl.BlockSpec((1, B, S, D), lambda m: (m, 0, 0, 0)),      # x (per mapper)
                pl.BlockSpec((1, n_lin, D, D), lambda m: (m, 0, 0, 0)),  # int8 weights (streamed)
                pl.BlockSpec((1, n_lin, 1, D), lambda m: (m, 0, 0, 0)),  # dequant scales
                pl.BlockSpec((1, n_lin, 1, D), lambda m: (m, 0, 0, 0)),  # biases
            ],
            out_specs=pl.BlockSpec((1, B, S, D), lambda m: (m, 0, 0, 0)),
        ),
        compiler_params=pltpu.CompilerParams(
            dimension_semantics=("parallel",),
            vmem_limit_bytes=32 << 20,
        ),
        cost_estimate=cost,
    )(x_stacked, w_q, w_scale, b_eff)


# --------------------------------------------------------------------------- params
def init_levels_mapper_params(key, latent_dim, num_blocks=NUM_BLOCKS, lr_mul=LR_MUL):
    """Synthetic params for the three mappers, pre-folded into kernel layout.

    Returns:
      w_q    : [3, 2*num_blocks, D, D] int8, [in, out] layout, symmetric per-output-
               channel quantization of the EqualLinear-scaled effective weights.
      w_scale: [3, 2*num_blocks, 1, D] float32 dequant scales; the fused-lrelu sqrt(2)
               gain of each block's first linear is folded into the second's scale.
      b_eff  : [3, 2*num_blocks, 1, D] float32, bias * lr_mul.
    """
    n_lin = 2 * num_blocks
    keys = jax.random.split(key, 3)
    eq_scale = (1.0 / latent_dim ** 0.5) * lr_mul
    w_list, b_list = [], []
    for k in keys:
        kw, kb = jax.random.split(k)
        # EqualLinear.__init__: weight = randn(out, in) / lr_mul ; bias nonzero for test.
        w_list.append(jax.random.normal(kw, (n_lin, latent_dim, latent_dim), jnp.float32)
                      / lr_mul)
        b_list.append(0.1 * jax.random.normal(kb, (n_lin, latent_dim), jnp.float32))
    w_raw = jnp.stack(w_list)                                    # [3, n_lin, out, in]
    b_raw = jnp.stack(b_list)                                    # [3, n_lin, out]

    w_eff = jnp.swapaxes(w_raw, -1, -2) * jnp.float32(eq_scale)  # [3, n_lin, in, out]

    # Symmetric int8 quantization with per-output-channel scales.
    amax = jnp.max(jnp.abs(w_eff), axis=2, keepdims=True)        # [3, n_lin, 1, out]
    qscale = jnp.maximum(amax, 1e-12) / 127.0
    w_q = jnp.clip(jnp.round(w_eff / qscale), -127, 127).astype(jnp.int8)

    # Fold sqrt(2) output gain of even (first) layers into the following odd layer's scale.
    fold = jnp.where(jnp.arange(n_lin) % 2 == 1,
                     jnp.float32(FUSED_LRELU_SCALE), jnp.float32(1.0))
    w_scale = (qscale * fold[None, :, None, None]).astype(jnp.float32)

    b_eff = (b_raw * jnp.float32(lr_mul))[:, :, None, :]         # [3, n_lin, 1, D]
    return {"w_q": w_q, "w_scale": w_scale, "b_eff": b_eff}


# --------------------------------------------------------------------------- wrapper
def levels_mapper_forward(x, params,
                          no_coarse_mapper=False,
                          no_medium_mapper=False,
                          no_fine_mapper=False):
    """x: [B, N, D] -> [B, N, D]; splits at styles 4 and 8 like the PyTorch module."""
    B, N, D = x.shape
    n_fine = N - 8
    S = max(4, n_fine)                      # uniform padded style count per mapper

    levels = [x[:, :4, :], x[:, 4:8, :], x[:, 8:, :]]
    stacked = []
    for lv in levels:
        s = lv.shape[1]
        if s < S:
            lv = jnp.concatenate([lv, jnp.zeros((B, S - s, D), lv.dtype)], axis=1)
        stacked.append(lv)
    x_stacked = jnp.stack(stacked, axis=0).astype(jnp.float32)   # [3, B, S, D]

    # Clamp the fine style count to >= 1 so PixelNorm never divides by zero when N == 8.
    counts = (4.0, 4.0, float(max(1, n_fine)))
    out_stacked = _levels_mapper_pallas(x_stacked, params["w_q"], params["w_scale"],
                                        params["b_eff"], counts=counts)

    out_c = out_stacked[0, :, :4, :]
    out_m = out_stacked[1, :, :4, :]
    out_f = out_stacked[2, :, :n_fine, :]
    if no_coarse_mapper:
        out_c = jnp.zeros_like(out_c)
    if no_medium_mapper:
        out_m = jnp.zeros_like(out_m)
    if no_fine_mapper:
        out_f = jnp.zeros_like(out_f)
    return jnp.concatenate([out_c, out_m, out_f], axis=1).astype(x.dtype)


# --------------------------------------------------------------------------- reference
def _reference_forward(x, params):
    """Pure-JAX f32 reference of the original (unfolded) math on the quantized weights."""
    w_q = params["w_q"].astype(jnp.float32)                      # [3, L, in, out]
    w_scale = params["w_scale"]                                  # [3, L, 1, out] (sqrt2-folded)
    b = params["b_eff"][:, :, 0, :]                              # [3, L, D]
    n_lin = w_q.shape[1]
    unfold = jnp.where(jnp.arange(n_lin) % 2 == 1,
                       jnp.float32(1.0 / FUSED_LRELU_SCALE), jnp.float32(1.0))
    w = w_q * (w_scale * unfold[None, :, None, None])            # dequantized eff. weights

    splits = [x[:, :4, :], x[:, 4:8, :], x[:, 8:, :]]
    outs = []
    for mi, xm in enumerate(splits):
        xm = xm.astype(jnp.float32)
        xm = xm * jax.lax.rsqrt(jnp.mean(xm * xm, axis=1, keepdims=True) + 1e-8)
        for blk in range(n_lin // 2):
            res = xm
            h = xm
            for j in range(2):
                li = 2 * blk + j
                h = jnp.einsum('bsd,df->bsf', h, w[mi, li]) + b[mi, li][None, None, :]
                h = jnp.where(h >= 0, h, NEG_SLOPE * h) * FUSED_LRELU_SCALE
            xm = h + res
        outs.append(xm)
    return jnp.concatenate(outs, axis=1)


# --------------------------------------------------------------------------- main
if __name__ == "__main__":
    key = jax.random.PRNGKey(0)
    kx, kp = jax.random.split(key)

    B, N_STYLES, LATENT_DIM = 2, 10, 512   # coarse=4, medium=4, fine=2 style vectors
    x = jax.random.normal(kx, (B, N_STYLES, LATENT_DIM), dtype=jnp.float32)
    params = init_levels_mapper_params(kp, LATENT_DIM)

    out = levels_mapper_forward(x, params)
    out = jax.block_until_ready(out)

    assert out.shape == (B, N_STYLES, LATENT_DIM), out.shape
    assert bool(jnp.all(jnp.isfinite(out)))

    # Validate against the pure-JAX f32 reference on the same quantized weights
    # (bf16 activations in the kernel -> expect ~1e-2 relative error).
    ref = _reference_forward(x, params)
    max_err = float(jnp.max(jnp.abs(out - ref)))
    ref_scale = float(jnp.max(jnp.abs(ref)))
    assert max_err <= 0.05 * ref_scale + 0.05, (max_err, ref_scale)

    print("KERNEL_OK")
</pallas_src>

<mosaic_0001>
module attributes {stable_mosaic.version = 11 : i64} {
  func.func @_fused_levels_mapper_kernel(%arg0: i32, %arg1: memref<1x2x4x512xf32, #tpu.memory_space<vmem>>, %arg2: memref<1x12x512x512xi8, #tpu.memory_space<vmem>>, %arg3: memref<1x12x1x512xf32, #tpu.memory_space<vmem>>, %arg4: memref<1x12x1x512xf32, #tpu.memory_space<vmem>>, %arg5: memref<1x2x4x512xf32, #tpu.memory_space<vmem>>) attributes {dimension_semantics = [#tpu.dimension_semantics<parallel>], iteration_bounds = array<i64: 3>, scalar_prefetch = 0 : i64, scratch_operands = 0 : i64, tpu.core_type = #tpu.core_type<tc>, window_params = [{transform_indices = @transform_0, window_bounds = array<i64: 1, 2, 4, 512>}, {transform_indices = @transform_1, window_bounds = array<i64: 1, 12, 512, 512>}, {transform_indices = @transform_2, window_bounds = array<i64: 1, 12, 1, 512>}, {transform_indices = @transform_3, window_bounds = array<i64: 1, 12, 1, 512>}, {transform_indices = @transform_4, window_bounds = array<i64: 1, 2, 4, 512>}]} {
    %c0 = arith.constant 0 : index
    %c0_0 = arith.constant 0 : index
    %c0_1 = arith.constant 0 : index
    %c0_2 = arith.constant 0 : index
    %0 = vector.load %arg1[%c0, %c0_0, %c0_1, %c0_2] : memref<1x2x4x512xf32, #tpu.memory_space<vmem>>, vector<1x2x4x512xf32>
    %1 = arith.mulf %0, %0 : vector<1x2x4x512xf32>
    %cst = arith.constant dense<0.000000e+00> : vector<1x2x512xf32>
    %2 = vector.multi_reduction <add>, %1, %cst [2] : vector<1x2x4x512xf32> to vector<1x2x512xf32>
    %3 = vector.shape_cast %2 : vector<1x2x512xf32> to vector<1x2x1x512xf32>
    %c0_i32 = arith.constant 0 : i32
    %4 = arith.cmpi eq, %arg0, %c0_i32 : i32
    %c1_i32 = arith.constant 1 : i32
    %5 = arith.cmpi eq, %arg0, %c1_i32 : i32
    %cst_3 = arith.constant 4.000000e+00 : f32
    %cst_4 = arith.constant 2.000000e+00 : f32
    %6 = arith.select %5, %cst_3, %cst_4 : f32
    %cst_5 = arith.constant 4.000000e+00 : f32
    %7 = arith.select %4, %cst_5, %6 : f32
    %8 = vector.broadcast %7 : f32 to vector<1x2x1x512xf32>
    %9 = arith.divf %3, %8 : vector<1x2x1x512xf32>
    %cst_6 = arith.constant 9.99999993E-9 : f32
    %10 = vector.broadcast %cst_6 : f32 to vector<1x2x1x512xf32>
    %11 = arith.addf %9, %10 : vector<1x2x1x512xf32>
    %12 = math.rsqrt %11 : vector<1x2x1x512xf32>
    %13 = vector.broadcast %12 : vector<1x2x1x512xf32> to vector<1x2x4x512xf32>
    %14 = arith.mulf %0, %13 : vector<1x2x4x512xf32>
    %15 = vector.shape_cast %14 : vector<1x2x4x512xf32> to vector<8x512xf32>
    %16 = arith.truncf %15 : vector<8x512xf32> to vector<8x512xbf16>
    %c0_7 = arith.constant 0 : index
    %c0_8 = arith.constant 0 : index
    %c0_9 = arith.constant 0 : index
    %c0_10 = arith.constant 0 : index
    %17 = vector.load %arg2[%c0_7, %c0_8, %c0_9, %c0_10] : memref<1x12x512x512xi8, #tpu.memory_space<vmem>>, vector<1x1x512x512xi8>
    %18 = vector.shape_cast %17 : vector<1x1x512x512xi8> to vector<512x512xi8>
    %19 = arith.sitofp %18 : vector<512x512xi8> to vector<512x512xbf16>
    %cst_11 = arith.constant dense<0.000000e+00> : vector<8x512xf32>
    %20 = tpu.matmul %16, %19, %cst_11 {dimension_numbers = #tpu.dot_dimension_numbers<[1], [0], [0], [1], [0, 0, 1, 1], [], []>} : vector<8x512xbf16>, vector<512x512xbf16>, vector<8x512xf32> -> vector<8x512xf32>
    %c0_12 = arith.constant 0 : index
    %c0_13 = arith.constant 0 : index
    %c0_14 = arith.constant 0 : index
    %c0_15 = arith.constant 0 : index
    %21 = vector.load %arg3[%c0_12, %c0_13, %c0_14, %c0_15] : memref<1x12x1x512xf32, #tpu.memory_space<vmem>>, vector<1x1x1x512xf32>
    %22 = vector.shape_cast %21 : vector<1x1x1x512xf32> to vector<1x512xf32>
    %23 = vector.broadcast %22 : vector<1x512xf32> to vector<8x512xf32>
    %24 = arith.mulf %20, %23 : vector<8x512xf32>
    %c0_16 = arith.constant 0 : index
    %c0_17 = arith.constant 0 : index
    %c0_18 = arith.constant 0 : index
    %c0_19 = arith.constant 0 : index
    %25 = vector.load %arg4[%c0_16, %c0_17, %c0_18, %c0_19] : memref<1x12x1x512xf32, #tpu.memory_space<vmem>>, vector<1x1x1x512xf32>
    %26 = vector.shape_cast %25 : vector<1x1x1x512xf32> to vector<1x512xf32>
    %27 = vector.broadcast %26 : vector<1x512xf32> to vector<8x512xf32>
    %28 = arith.addf %24, %27 : vector<8x512xf32>
    %cst_20 = arith.constant 0.000000e+00 : f32
    %29 = vector.broadcast %cst_20 : f32 to vector<8x512xf32>
    %30 = arith.cmpf oge, %28, %29 : vector<8x512xf32>
    %cst_21 = arith.constant 2.000000e-01 : f32
    %31 = vector.broadcast %cst_21 : f32 to vector<8x512xf32>
    %32 = arith.mulf %31, %28 : vector<8x512xf32>
    %33 = arith.select %30, %28, %32 : vector<8x512xi1>, vector<8x512xf32>
    %34 = arith.truncf %33 : vector<8x512xf32> to vector<8x512xbf16>
    %c0_22 = arith.constant 0 : index
    %c1 = arith.constant 1 : index
    %c0_23 = arith.constant 0 : index
    %c0_24 = arith.constant 0 : index
    %35 = vector.load %arg2[%c0_22, %c1, %c0_23, %c0_24] : memref<1x12x512x512xi8, #tpu.memory_space<vmem>>, vector<1x1x512x512xi8>
    %36 = vector.shape_cast %35 : vector<1x1x512x512xi8> to vector<512x512xi8>
    %37 = arith.sitofp %36 : vector<512x512xi8> to vector<512x512xbf16>
    %cst_25 = arith.constant dense<0.000000e+00> : vector<8x512xf32>
    %38 = tpu.matmul %34, %37, %cst_25 {dimension_numbers = #tpu.dot_dimension_numbers<[1], [0], [0], [1], [0, 0, 1, 1], [], []>} : vector<8x512xbf16>, vector<512x512xbf16>, vector<8x512xf32> -> vector<8x512xf32>
    %c0_26 = arith.constant 0 : index
    %c1_27 = arith.constant 1 : index
    %c0_28 = arith.constant 0 : index
    %c0_29 = arith.constant 0 : index
    %39 = vector.load %arg3[%c0_26, %c1_27, %c0_28, %c0_29] : memref<1x12x1x512xf32, #tpu.memory_space<vmem>>, vector<1x1x1x512xf32>
    %40 = vector.shape_cast %39 : vector<1x1x1x512xf32> to vector<1x512xf32>
    %41 = vector.broadcast %40 : vector<1x512xf32> to vector<8x512xf32>
    %42 = arith.mulf %38, %41 : vector<8x512xf32>
    %c0_30 = arith.constant 0 : index
    %c1_31 = arith.constant 1 : index
    %c0_32 = arith.constant 0 : index
    %c0_33 = arith.constant 0 : index
    %43 = vector.load %arg4[%c0_30, %c1_31, %c0_32, %c0_33] : memref<1x12x1x512xf32, #tpu.memory_space<vmem>>, vector<1x1x1x512xf32>
    %44 = vector.shape_cast %43 : vector<1x1x1x512xf32> to vector<1x512xf32>
    %45 = vector.broadcast %44 : vector<1x512xf32> to vector<8x512xf32>
    %46 = arith.addf %42, %45 : vector<8x512xf32>
    %cst_34 = arith.constant 0.000000e+00 : f32
    %47 = vector.broadcast %cst_34 : f32 to vector<8x512xf32>
    %48 = arith.cmpf oge, %46, %47 : vector<8x512xf32>
    %cst_35 = arith.constant 2.000000e-01 : f32
    %49 = vector.broadcast %cst_35 : f32 to vector<8x512xf32>
    %50 = arith.mulf %49, %46 : vector<8x512xf32>
    %51 = arith.select %48, %46, %50 : vector<8x512xi1>, vector<8x512xf32>
    %cst_36 = arith.constant 1.41421354 : f32
    %52 = vector.broadcast %cst_36 : f32 to vector<8x512xf32>
    %53 = arith.mulf %51, %52 : vector<8x512xf32>
    %54 = arith.addf %53, %15 : vector<8x512xf32>
    %55 = arith.truncf %54 : vector<8x512xf32> to vector<8x512xbf16>
    %c0_37 = arith.constant 0 : index
    %c2 = arith.constant 2 : index
    %c0_38 = arith.constant 0 : index
    %c0_39 = arith.constant 0 : index
    %56 = vector.load %arg2[%c0_37, %c2, %c0_38, %c0_39] : memref<1x12x512x512xi8, #tpu.memory_space<vmem>>, vector<1x1x512x512xi8>
    %57 = vector.shape_cast %56 : vector<1x1x512x512xi8> to vector<512x512xi8>
    %58 = arith.sitofp %57 : vector<512x512xi8> to vector<512x512xbf16>
    %cst_40 = arith.constant dense<0.000000e+00> : vector<8x512xf32>
    %59 = tpu.matmul %55, %58, %cst_40 {dimension_numbers = #tpu.dot_dimension_numbers<[1], [0], [0], [1], [0, 0, 1, 1], [], []>} : vector<8x512xbf16>, vector<512x512xbf16>, vector<8x512xf32> -> vector<8x512xf32>
    %c0_41 = arith.constant 0 : index
    %c2_42 = arith.constant 2 : index
    %c0_43 = arith.constant 0 : index
    %c0_44 = arith.constant 0 : index
    %60 = vector.load %arg3[%c0_41, %c2_42, %c0_43, %c0_44] : memref<1x12x1x512xf32, #tpu.memory_space<vmem>>, vector<1x1x1x512xf32>
    %61 = vector.shape_cast %60 : vector<1x1x1x512xf32> to vector<1x512xf32>
    %62 = vector.broadcast %61 : vector<1x512xf32> to vector<8x512xf32>
    %63 = arith.mulf %59, %62 : vector<8x512xf32>
    %c0_45 = arith.constant 0 : index
    %c2_46 = arith.constant 2 : index
    %c0_47 = arith.constant 0 : index
    %c0_48 = arith.constant 0 : index
    %64 = vector.load %arg4[%c0_45, %c2_46, %c0_47, %c0_48] : memref<1x12x1x512xf32, #tpu.memory_space<vmem>>, vector<1x1x1x512xf32>
    %65 = vector.shape_cast %64 : vector<1x1x1x512xf32> to vector<1x512xf32>
    %66 = vector.broadcast %65 : vector<1x512xf32> to vector<8x512xf32>
    %67 = arith.addf %63, %66 : vector<8x512xf32>
    %cst_49 = arith.constant 0.000000e+00 : f32
    %68 = vector.broadcast %cst_49 : f32 to vector<8x512xf32>
    %69 = arith.cmpf oge, %67, %68 : vector<8x512xf32>
    %cst_50 = arith.constant 2.000000e-01 : f32
    %70 = vector.broadcast %cst_50 : f32 to vector<8x512xf32>
    %71 = arith.mulf %70, %67 : vector<8x512xf32>
    %72 = arith.select %69, %67, %71 : vector<8x512xi1>, vector<8x512xf32>
    %73 = arith.truncf %72 : vector<8x512xf32> to vector<8x512xbf16>
    %c0_51 = arith.constant 0 : index
    %c3 = arith.constant 3 : index
    %c0_52 = arith.constant 0 : index
    %c0_53 = arith.constant 0 : index
    %74 = vector.load %arg2[%c0_51, %c3, %c0_52, %c0_53] : memref<1x12x512x512xi8, #tpu.memory_space<vmem>>, vector<1x1x512x512xi8>
    %75 = vector.shape_cast %74 : vector<1x1x512x512xi8> to vector<512x512xi8>
    %76 = arith.sitofp %75 : vector<512x512xi8> to vector<512x512xbf16>
    %cst_54 = arith.constant dense<0.000000e+00> : vector<8x512xf32>
    %77 = tpu.matmul %73, %76, %cst_54 {dimension_numbers = #tpu.dot_dimension_numbers<[1], [0], [0], [1], [0, 0, 1, 1], [], []>} : vector<8x512xbf16>, vector<512x512xbf16>, vector<8x512xf32> -> vector<8x512xf32>
    %c0_55 = arith.constant 0 : index
    %c3_56 = arith.constant 3 : index
    %c0_57 = arith.constant 0 : index
    %c0_58 = arith.constant 0 : index
    %78 = vector.load %arg3[%c0_55, %c3_56, %c0_57, %c0_58] : memref<1x12x1x512xf32, #tpu.memory_space<vmem>>, vector<1x1x1x512xf32>
    %79 = vector.shape_cast %78 : vector<1x1x1x512xf32> to vector<1x512xf32>
    %80 = vector.broadcast %79 : vector<1x512xf32> to vector<8x512xf32>
    %81 = arith.mulf %77, %80 : vector<8x512xf32>
    %c0_59 = arith.constant 0 : index
    %c3_60 = arith.constant 3 : index
    %c0_61 = arith.constant 0 : index
    %c0_62 = arith.constant 0 : index
    %82 = vector.load %arg4[%c0_59, %c3_60, %c0_61, %c0_62] : memref<1x12x1x512xf32, #tpu.memory_space<vmem>>, vector<1x1x1x512xf32>
    %83 = vector.shape_cast %82 : vector<1x1x1x512xf32> to vector<1x512xf32>
    %84 = vector.broadcast %83 : vector<1x512xf32> to vector<8x512xf32>
    %85 = arith.addf %81, %84 : vector<8x512xf32>
    %cst_63 = arith.constant 0.000000e+00 : f32
    %86 = vector.broadcast %cst_63 : f32 to vector<8x512xf32>
    %87 = arith.cmpf oge, %85, %86 : vector<8x512xf32>
    %cst_64 = arith.constant 2.000000e-01 : f32
    %88 = vector.broadcast %cst_64 : f32 to vector<8x512xf32>
    %89 = arith.mulf %88, %85 : vector<8x512xf32>
    %90 = arith.select %87, %85, %89 : vector<8x512xi1>, vector<8x512xf32>
    %cst_65 = arith.constant 1.41421354 : f32
    %91 = vector.broadcast %cst_65 : f32 to vector<8x512xf32>
    %92 = arith.mulf %90, %91 : vector<8x512xf32>
    %93 = arith.addf %92, %54 : vector<8x512xf32>
    %94 = arith.truncf %93 : vector<8x512xf32> to vector<8x512xbf16>
    %c0_66 = arith.constant 0 : index
    %c4 = arith.constant 4 : index
    %c0_67 = arith.constant 0 : index
    %c0_68 = arith.constant 0 : index
    %95 = vector.load %arg2[%c0_66, %c4, %c0_67, %c0_68] : memref<1x12x512x512xi8, #tpu.memory_space<vmem>>, vector<1x1x512x512xi8>
    %96 = vector.shape_cast %95 : vector<1x1x512x512xi8> to vector<512x512xi8>
    %97 = arith.sitofp %96 : vector<512x512xi8> to vector<512x512xbf16>
    %cst_69 = arith.constant dense<0.000000e+00> : vector<8x512xf32>
    %98 = tpu.matmul %94, %97, %cst_69 {dimension_numbers = #tpu.dot_dimension_numbers<[1], [0], [0], [1], [0, 0, 1, 1], [], []>} : vector<8x512xbf16>, vector<512x512xbf16>, vector<8x512xf32> -> vector<8x512xf32>
    %c0_70 = arith.constant 0 : index
    %c4_71 = arith.constant 4 : index
    %c0_72 = arith.constant 0 : index
    %c0_73 = arith.constant 0 : index
    %99 = vector.load %arg3[%c0_70, %c4_71, %c0_72, %c0_73] : memref<1x12x1x512xf32, #tpu.memory_space<vmem>>, vector<1x1x1x512xf32>
    %100 = vector.shape_cast %99 : vector<1x1x1x512xf32> to vector<1x512xf32>
    %101 = vector.broadcast %100 : vector<1x512xf32> to vector<8x512xf32>
    %102 = arith.mulf %98, %101 : vector<8x512xf32>
    %c0_74 = arith.constant 0 : index
    %c4_75 = arith.constant 4 : index
    %c0_76 = arith.constant 0 : index
    %c0_77 = arith.constant 0 : index
    %103 = vector.load %arg4[%c0_74, %c4_75, %c0_76, %c0_77] : memref<1x12x1x512xf32, #tpu.memory_space<vmem>>, vector<1x1x1x512xf32>
    %104 = vector.shape_cast %103 : vector<1x1x1x512xf32> to vector<1x512xf32>
    %105 = vector.broadcast %104 : vector<1x512xf32> to vector<8x512xf32>
    %106 = arith.addf %102, %105 : vector<8x512xf32>
    %cst_78 = arith.constant 0.000000e+00 : f32
    %107 = vector.broadcast %cst_78 : f32 to vector<8x512xf32>
    %108 = arith.cmpf oge, %106, %107 : vector<8x512xf32>
    %cst_79 = arith.constant 2.000000e-01 : f32
    %109 = vector.broadcast %cst_79 : f32 to vector<8x512xf32>
    %110 = arith.mulf %109, %106 : vector<8x512xf32>
    %111 = arith.select %108, %106, %110 : vector<8x512xi1>, vector<8x512xf32>
    %112 = arith.truncf %111 : vector<8x512xf32> to vector<8x512xbf16>
    %c0_80 = arith.constant 0 : index
    %c5 = arith.constant 5 : index
    %c0_81 = arith.constant 0 : index
    %c0_82 = arith.constant 0 : index
    %113 = vector.load %arg2[%c0_80, %c5, %c0_81, %c0_82] : memref<1x12x512x512xi8, #tpu.memory_space<vmem>>, vector<1x1x512x512xi8>
    %114 = vector.shape_cast %113 : vector<1x1x512x512xi8> to vector<512x512xi8>
    %115 = arith.sitofp %114 : vector<512x512xi8> to vector<512x512xbf16>
    %cst_83 = arith.constant dense<0.000000e+00> : vector<8x512xf32>
    %116 = tpu.matmul %112, %115, %cst_83 {dimension_numbers = #tpu.dot_dimension_numbers<[1], [0], [0], [1], [0, 0, 1, 1], [], []>} : vector<8x512xbf16>, vector<512x512xbf16>, vector<8x512xf32> -> vector<8x512xf32>
    %c0_84 = arith.constant 0 : index
    %c5_85 = arith.constant 5 : index
    %c0_86 = arith.constant 0 : index
    %c0_87 = arith.constant 0 : index
    %117 = vector.load %arg3[%c0_84, %c5_85, %c0_86, %c0_87] : memref<1x12x1x512xf32, #tpu.memory_space<vmem>>, vector<1x1x1x512xf32>
    %118 = vector.shape_cast %117 : vector<1x1x1x512xf32> to vector<1x512xf32>
    %119 = vector.broadcast %118 : vector<1x512xf32> to vector<8x512xf32>
    %120 = arith.mulf %116, %119 : vector<8x512xf32>
    %c0_88 = arith.constant 0 : index
    %c5_89 = arith.constant 5 : index
    %c0_90 = arith.constant 0 : index
    %c0_91 = arith.constant 0 : index
    %121 = vector.load %arg4[%c0_88, %c5_89, %c0_90, %c0_91] : memref<1x12x1x512xf32, #tpu.memory_space<vmem>>, vector<1x1x1x512xf32>
    %122 = vector.shape_cast %121 : vector<1x1x1x512xf32> to vector<1x512xf32>
    %123 = vector.broadcast %122 : vector<1x512xf32> to vector<8x512xf32>
    %124 = arith.addf %120, %123 : vector<8x512xf32>
    %cst_92 = arith.constant 0.000000e+00 : f32
    %125 = vector.broadcast %cst_92 : f32 to vector<8x512xf32>
    %126 = arith.cmpf oge, %124, %125 : vector<8x512xf32>
    %cst_93 = arith.constant 2.000000e-01 : f32
    %127 = vector.broadcast %cst_93 : f32 to vector<8x512xf32>
    %128 = arith.mulf %127, %124 : vector<8x512xf32>
    %129 = arith.select %126, %124, %128 : vector<8x512xi1>, vector<8x512xf32>
    %cst_94 = arith.constant 1.41421354 : f32
    %130 = vector.broadcast %cst_94 : f32 to vector<8x512xf32>
    %131 = arith.mulf %129, %130 : vector<8x512xf32>
    %132 = arith.addf %131, %93 : vector<8x512xf32>
    %133 = arith.truncf %132 : vector<8x512xf32> to vector<8x512xbf16>
    %c0_95 = arith.constant 0 : index
    %c6 = arith.constant 6 : index
    %c0_96 = arith.constant 0 : index
    %c0_97 = arith.constant 0 : index
    %134 = vector.load %arg2[%c0_95, %c6, %c0_96, %c0_97] : memref<1x12x512x512xi8, #tpu.memory_space<vmem>>, vector<1x1x512x512xi8>
    %135 = vector.shape_cast %134 : vector<1x1x512x512xi8> to vector<512x512xi8>
    %136 = arith.sitofp %135 : vector<512x512xi8> to vector<512x512xbf16>
    %cst_98 = arith.constant dense<0.000000e+00> : vector<8x512xf32>
    %137 = tpu.matmul %133, %136, %cst_98 {dimension_numbers = #tpu.dot_dimension_numbers<[1], [0], [0], [1], [0, 0, 1, 1], [], []>} : vector<8x512xbf16>, vector<512x512xbf16>, vector<8x512xf32> -> vector<8x512xf32>
    %c0_99 = arith.constant 0 : index
    %c6_100 = arith.constant 6 : index
    %c0_101 = arith.constant 0 : index
    %c0_102 = arith.constant 0 : index
    %138 = vector.load %arg3[%c0_99, %c6_100, %c0_101, %c0_102] : memref<1x12x1x512xf32, #tpu.memory_space<vmem>>, vector<1x1x1x512xf32>
    %139 = vector.shape_cast %138 : vector<1x1x1x512xf32> to vector<1x512xf32>
    %140 = vector.broadcast %139 : vector<1x512xf32> to vector<8x512xf32>
    %141 = arith.mulf %137, %140 : vector<8x512xf32>
    %c0_103 = arith.constant 0 : index
    %c6_104 = arith.constant 6 : index
    %c0_105 = arith.constant 0 : index
    %c0_106 = arith.constant 0 : index
    %142 = vector.load %arg4[%c0_103, %c6_104, %c0_105, %c0_106] : memref<1x12x1x512xf32, #tpu.memory_space<vmem>>, vector<1x1x1x512xf32>
    %143 = vector.shape_cast %142 : vector<1x1x1x512xf32> to vector<1x512xf32>
    %144 = vector.broadcast %143 : vector<1x512xf32> to vector<8x512xf32>
    %145 = arith.addf %141, %144 : vector<8x512xf32>
    %cst_107 = arith.constant 0.000000e+00 : f32
    %146 = vector.broadcast %cst_107 : f32 to vector<8x512xf32>
    %147 = arith.cmpf oge, %145, %146 : vector<8x512xf32>
    %cst_108 = arith.constant 2.000000e-01 : f32
    %148 = vector.broadcast %cst_108 : f32 to vector<8x512xf32>
    %149 = arith.mulf %148, %145 : vector<8x512xf32>
    %150 = arith.select %147, %145, %149 : vector<8x512xi1>, vector<8x512xf32>
    %151 = arith.truncf %150 : vector<8x512xf32> to vector<8x512xbf16>
    %c0_109 = arith.constant 0 : index
    %c7 = arith.constant 7 : index
    %c0_110 = arith.constant 0 : index
    %c0_111 = arith.constant 0 : index
    %152 = vector.load %arg2[%c0_109, %c7, %c0_110, %c0_111] : memref<1x12x512x512xi8, #tpu.memory_space<vmem>>, vector<1x1x512x512xi8>
    %153 = vector.shape_cast %152 : vector<1x1x512x512xi8> to vector<512x512xi8>
    %154 = arith.sitofp %153 : vector<512x512xi8> to vector<512x512xbf16>
    %cst_112 = arith.constant dense<0.000000e+00> : vector<8x512xf32>
    %155 = tpu.matmul %151, %154, %cst_112 {dimension_numbers = #tpu.dot_dimension_numbers<[1], [0], [0], [1], [0, 0, 1, 1], [], []>} : vector<8x512xbf16>, vector<512x512xbf16>, vector<8x512xf32> -> vector<8x512xf32>
    %c0_113 = arith.constant 0 : index
    %c7_114 = arith.constant 7 : index
    %c0_115 = arith.constant 0 : index
    %c0_116 = arith.constant 0 : index
    %156 = vector.load %arg3[%c0_113, %c7_114, %c0_115, %c0_116] : memref<1x12x1x512xf32, #tpu.memory_space<vmem>>, vector<1x1x1x512xf32>
    %157 = vector.shape_cast %156 : vector<1x1x1x512xf32> to vector<1x512xf32>
    %158 = vector.broadcast %157 : vector<1x512xf32> to vector<8x512xf32>
    %159 = arith.mulf %155, %158 : vector<8x512xf32>
    %c0_117 = arith.constant 0 : index
    %c7_118 = arith.constant 7 : index
    %c0_119 = arith.constant 0 : index
    %c0_120 = arith.constant 0 : index
    %160 = vector.load %arg4[%c0_117, %c7_118, %c0_119, %c0_120] : memref<1x12x1x512xf32, #tpu.memory_space<vmem>>, vector<1x1x1x512xf32>
    %161 = vector.shape_cast %160 : vector<1x1x1x512xf32> to vector<1x512xf32>
    %162 = vector.broadcast %161 : vector<1x512xf32> to vector<8x512xf32>
    %163 = arith.addf %159, %162 : vector<8x512xf32>
    %cst_121 = arith.constant 0.000000e+00 : f32
    %164 = vector.broadcast %cst_121 : f32 to vector<8x512xf32>
    %165 = arith.cmpf oge, %163, %164 : vector<8x512xf32>
    %cst_122 = arith.constant 2.000000e-01 : f32
    %166 = vector.broadcast %cst_122 : f32 to vector<8x512xf32>
    %167 = arith.mulf %166, %163 : vector<8x512xf32>
    %168 = arith.select %165, %163, %167 : vector<8x512xi1>, vector<8x512xf32>
    %cst_123 = arith.constant 1.41421354 : f32
    %169 = vector.broadcast %cst_123 : f32 to vector<8x512xf32>
    %170 = arith.mulf %168, %169 : vector<8x512xf32>
    %171 = arith.addf %170, %132 : vector<8x512xf32>
    %172 = arith.truncf %171 : vector<8x512xf32> to vector<8x512xbf16>
    %c0_124 = arith.constant 0 : index
    %c8 = arith.constant 8 : index
    %c0_125 = arith.constant 0 : index
    %c0_126 = arith.constant 0 : index
    %173 = vector.load %arg2[%c0_124, %c8, %c0_125, %c0_126] : memref<1x12x512x512xi8, #tpu.memory_space<vmem>>, vector<1x1x512x512xi8>
    %174 = vector.shape_cast %173 : vector<1x1x512x512xi8> to vector<512x512xi8>
    %175 = arith.sitofp %174 : vector<512x512xi8> to vector<512x512xbf16>
    %cst_127 = arith.constant dense<0.000000e+00> : vector<8x512xf32>
    %176 = tpu.matmul %172, %175, %cst_127 {dimension_numbers = #tpu.dot_dimension_numbers<[1], [0], [0], [1], [0, 0, 1, 1], [], []>} : vector<8x512xbf16>, vector<512x512xbf16>, vector<8x512xf32> -> vector<8x512xf32>
    %c0_128 = arith.constant 0 : index
    %c8_129 = arith.constant 8 : index
    %c0_130 = arith.constant 0 : index
    %c0_131 = arith.constant 0 : index
    %177 = vector.load %arg3[%c0_128, %c8_129, %c0_130, %c0_131] : memref<1x12x1x512xf32, #tpu.memory_space<vmem>>, vector<1x1x1x512xf32>
    %178 = vector.shape_cast %177 : vector<1x1x1x512xf32> to vector<1x512xf32>
    %179 = vector.broadcast %178 : vector<1x512xf32> to vector<8x512xf32>
    %180 = arith.mulf %176, %179 : vector<8x512xf32>
    %c0_132 = arith.constant 0 : index
    %c8_133 = arith.constant 8 : index
    %c0_134 = arith.constant 0 : index
    %c0_135 = arith.constant 0 : index
    %181 = vector.load %arg4[%c0_132, %c8_133, %c0_134, %c0_135] : memref<1x12x1x512xf32, #tpu.memory_space<vmem>>, vector<1x1x1x512xf32>
    %182 = vector.shape_cast %181 : vector<1x1x1x512xf32> to vector<1x512xf32>
    %183 = vector.broadcast %182 : vector<1x512xf32> to vector<8x512xf32>
    %184 = arith.addf %180, %183 : vector<8x512xf32>
    %cst_136 = arith.constant 0.000000e+00 : f32
    %185 = vector.broadcast %cst_136 : f32 to vector<8x512xf32>
    %186 = arith.cmpf oge, %184, %185 : vector<8x512xf32>
    %cst_137 = arith.constant 2.000000e-01 : f32
    %187 = vector.broadcast %cst_137 : f32 to vector<8x512xf32>
    %188 = arith.mulf %187, %184 : vector<8x512xf32>
    %189 = arith.select %186, %184, %188 : vector<8x512xi1>, vector<8x512xf32>
    %190 = arith.truncf %189 : vector<8x512xf32> to vector<8x512xbf16>
    %c0_138 = arith.constant 0 : index
    %c9 = arith.constant 9 : index
    %c0_139 = arith.constant 0 : index
    %c0_140 = arith.constant 0 : index
    %191 = vector.load %arg2[%c0_138, %c9, %c0_139, %c0_140] : memref<1x12x512x512xi8, #tpu.memory_space<vmem>>, vector<1x1x512x512xi8>
    %192 = vector.shape_cast %191 : vector<1x1x512x512xi8> to vector<512x512xi8>
    %193 = arith.sitofp %192 : vector<512x512xi8> to vector<512x512xbf16>
    %cst_141 = arith.constant dense<0.000000e+00> : vector<8x512xf32>
    %194 = tpu.matmul %190, %193, %cst_141 {dimension_numbers = #tpu.dot_dimension_numbers<[1], [0], [0], [1], [0, 0, 1, 1], [], []>} : vector<8x512xbf16>, vector<512x512xbf16>, vector<8x512xf32> -> vector<8x512xf32>
    %c0_142 = arith.constant 0 : index
    %c9_143 = arith.constant 9 : index
    %c0_144 = arith.constant 0 : index
    %c0_145 = arith.constant 0 : index
    %195 = vector.load %arg3[%c0_142, %c9_143, %c0_144, %c0_145] : memref<1x12x1x512xf32, #tpu.memory_space<vmem>>, vector<1x1x1x512xf32>
    %196 = vector.shape_cast %195 : vector<1x1x1x512xf32> to vector<1x512xf32>
    %197 = vector.broadcast %196 : vector<1x512xf32> to vector<8x512xf32>
    %198 = arith.mulf %194, %197 : vector<8x512xf32>
    %c0_146 = arith.constant 0 : index
    %c9_147 = arith.constant 9 : index
    %c0_148 = arith.constant 0 : index
    %c0_149 = arith.constant 0 : index
    %199 = vector.load %arg4[%c0_146, %c9_147, %c0_148, %c0_149] : memref<1x12x1x512xf32, #tpu.memory_space<vmem>>, vector<1x1x1x512xf32>
    %200 = vector.shape_cast %199 : vector<1x1x1x512xf32> to vector<1x512xf32>
    %201 = vector.broadcast %200 : vector<1x512xf32> to vector<8x512xf32>
    %202 = arith.addf %198, %201 : vector<8x512xf32>
    %cst_150 = arith.constant 0.000000e+00 : f32
    %203 = vector.broadcast %cst_150 : f32 to vector<8x512xf32>
    %204 = arith.cmpf oge, %202, %203 : vector<8x512xf32>
    %cst_151 = arith.constant 2.000000e-01 : f32
    %205 = vector.broadcast %cst_151 : f32 to vector<8x512xf32>
    %206 = arith.mulf %205, %202 : vector<8x512xf32>
    %207 = arith.select %204, %202, %206 : vector<8x512xi1>, vector<8x512xf32>
    %cst_152 = arith.constant 1.41421354 : f32
    %208 = vector.broadcast %cst_152 : f32 to vector<8x512xf32>
    %209 = arith.mulf %207, %208 : vector<8x512xf32>
    %210 = arith.addf %209, %171 : vector<8x512xf32>
    %211 = arith.truncf %210 : vector<8x512xf32> to vector<8x512xbf16>
    %c0_153 = arith.constant 0 : index
    %c10 = arith.constant 10 : index
    %c0_154 = arith.constant 0 : index
    %c0_155 = arith.constant 0 : index
    %212 = vector.load %arg2[%c0_153, %c10, %c0_154, %c0_155] : memref<1x12x512x512xi8, #tpu.memory_space<vmem>>, vector<1x1x512x512xi8>
    %213 = vector.shape_cast %212 : vector<1x1x512x512xi8> to vector<512x512xi8>
    %214 = arith.sitofp %213 : vector<512x512xi8> to vector<512x512xbf16>
    %cst_156 = arith.constant dense<0.000000e+00> : vector<8x512xf32>
    %215 = tpu.matmul %211, %214, %cst_156 {dimension_numbers = #tpu.dot_dimension_numbers<[1], [0], [0], [1], [0, 0, 1, 1], [], []>} : vector<8x512xbf16>, vector<512x512xbf16>, vector<8x512xf32> -> vector<8x512xf32>
    %c0_157 = arith.constant 0 : index
    %c10_158 = arith.constant 10 : index
    %c0_159 = arith.constant 0 : index
    %c0_160 = arith.constant 0 : index
    %216 = vector.load %arg3[%c0_157, %c10_158, %c0_159, %c0_160] : memref<1x12x1x512xf32, #tpu.memory_space<vmem>>, vector<1x1x1x512xf32>
    %217 = vector.shape_cast %216 : vector<1x1x1x512xf32> to vector<1x512xf32>
    %218 = vector.broadcast %217 : vector<1x512xf32> to vector<8x512xf32>
    %219 = arith.mulf %215, %218 : vector<8x512xf32>
    %c0_161 = arith.constant 0 : index
    %c10_162 = arith.constant 10 : index
    %c0_163 = arith.constant 0 : index
    %c0_164 = arith.constant 0 : index
    %220 = vector.load %arg4[%c0_161, %c10_162, %c0_163, %c0_164] : memref<1x12x1x512xf32, #tpu.memory_space<vmem>>, vector<1x1x1x512xf32>
    %221 = vector.shape_cast %220 : vector<1x1x1x512xf32> to vector<1x512xf32>
    %222 = vector.broadcast %221 : vector<1x512xf32> to vector<8x512xf32>
    %223 = arith.addf %219, %222 : vector<8x512xf32>
    %cst_165 = arith.constant 0.000000e+00 : f32
    %224 = vector.broadcast %cst_165 : f32 to vector<8x512xf32>
    %225 = arith.cmpf oge, %223, %224 : vector<8x512xf32>
    %cst_166 = arith.constant 2.000000e-01 : f32
    %226 = vector.broadcast %cst_166 : f32 to vector<8x512xf32>
    %227 = arith.mulf %226, %223 : vector<8x512xf32>
    %228 = arith.select %225, %223, %227 : vector<8x512xi1>, vector<8x512xf32>
    %229 = arith.truncf %228 : vector<8x512xf32> to vector<8x512xbf16>
    %c0_167 = arith.constant 0 : index
    %c11 = arith.constant 11 : index
    %c0_168 = arith.constant 0 : index
    %c0_169 = arith.constant 0 : index
    %230 = vector.load %arg2[%c0_167, %c11, %c0_168, %c0_169] : memref<1x12x512x512xi8, #tpu.memory_space<vmem>>, vector<1x1x512x512xi8>
    %231 = vector.shape_cast %230 : vector<1x1x512x512xi8> to vector<512x512xi8>
    %232 = arith.sitofp %231 : vector<512x512xi8> to vector<512x512xbf16>
    %cst_170 = arith.constant dense<0.000000e+00> : vector<8x512xf32>
    %233 = tpu.matmul %229, %232, %cst_170 {dimension_numbers = #tpu.dot_dimension_numbers<[1], [0], [0], [1], [0, 0, 1, 1], [], []>} : vector<8x512xbf16>, vector<512x512xbf16>, vector<8x512xf32> -> vector<8x512xf32>
    %c0_171 = arith.constant 0 : index
    %c11_172 = arith.constant 11 : index
    %c0_173 = arith.constant 0 : index
    %c0_174 = arith.constant 0 : index
    %234 = vector.load %arg3[%c0_171, %c11_172, %c0_173, %c0_174] : memref<1x12x1x512xf32, #tpu.memory_space<vmem>>, vector<1x1x1x512xf32>
    %235 = vector.shape_cast %234 : vector<1x1x1x512xf32> to vector<1x512xf32>
    %236 = vector.broadcast %235 : vector<1x512xf32> to vector<8x512xf32>
    %237 = arith.mulf %233, %236 : vector<8x512xf32>
    %c0_175 = arith.constant 0 : index
    %c11_176 = arith.constant 11 : index
    %c0_177 = arith.constant 0 : index
    %c0_178 = arith.constant 0 : index
    %238 = vector.load %arg4[%c0_175, %c11_176, %c0_177, %c0_178] : memref<1x12x1x512xf32, #tpu.memory_space<vmem>>, vector<1x1x1x512xf32>
    %239 = vector.shape_cast %238 : vector<1x1x1x512xf32> to vector<1x512xf32>
    %240 = vector.broadcast %239 : vector<1x512xf32> to vector<8x512xf32>
    %241 = arith.addf %237, %240 : vector<8x512xf32>
    %cst_179 = arith.constant 0.000000e+00 : f32
    %242 = vector.broadcast %cst_179 : f32 to vector<8x512xf32>
    %243 = arith.cmpf oge, %241, %242 : vector<8x512xf32>
    %cst_180 = arith.constant 2.000000e-01 : f32
    %244 = vector.broadcast %cst_180 : f32 to vector<8x512xf32>
    %245 = arith.mulf %244, %241 : vector<8x512xf32>
    %246 = arith.select %243, %241, %245 : vector<8x512xi1>, vector<8x512xf32>
    %cst_181 = arith.constant 1.41421354 : f32
    %247 = vector.broadcast %cst_181 : f32 to vector<8x512xf32>
    %248 = arith.mulf %246, %247 : vector<8x512xf32>
    %249 = arith.addf %248, %210 : vector<8x512xf32>
    %250 = vector.shape_cast %249 : vector<8x512xf32> to vector<1x2x4x512xf32>
    %c0_182 = arith.constant 0 : index
    %c0_183 = arith.constant 0 : index
    %c0_184 = arith.constant 0 : index
    %c0_185 = arith.constant 0 : index
    %251 = vector.load %arg5[%c0_182, %c0_183, %c0_184, %c0_185] : memref<1x2x4x512xf32, #tpu.memory_space<vmem>>, vector<1x2x4x512xf32>
    tpu.vector_store %arg5[%c0_182, %c0_183, %c0_184, %c0_185], %250 {strides = array<i32>} : memref<1x2x4x512xf32, #tpu.memory_space<vmem>>, vector<1x2x4x512xf32>,
    return
  }
  func.func @transform_0(%arg0: i32) -> (i32, i32, i32, i32) {
    %c0_i32 = arith.constant 0 : i32
    %c0_i32_0 = arith.constant 0 : i32
    %c0_i32_1 = arith.constant 0 : i32
    %c0_i32_2 = arith.constant 0 : i32
    return %arg0, %c0_i32, %c0_i32_0, %c0_i32_1 : i32, i32, i32, i32
  }
  func.func @transform_1(%arg0: i32) -> (i32, i32, i32, i32) {
    %c0_i32 = arith.constant 0 : i32
    %c0_i32_0 = arith.constant 0 : i32
    %c0_i32_1 = arith.constant 0 : i32
    %c0_i32_2 = arith.constant 0 : i32
    return %arg0, %c0_i32, %c0_i32_0, %c0_i32_1 : i32, i32, i32, i32
  }
  func.func @transform_2(%arg0: i32) -> (i32, i32, i32, i32) {
    %c0_i32 = arith.constant 0 : i32
    %c0_i32_0 = arith.constant 0 : i32
    %c0_i32_1 = arith.constant 0 : i32
    %c0_i32_2 = arith.constant 0 : i32
    return %arg0, %c0_i32, %c0_i32_0, %c0_i32_1 : i32, i32, i32, i32
  }
  func.func @transform_3(%arg0: i32) -> (i32, i32, i32, i32) {
    %c0_i32 = arith.constant 0 : i32
    %c0_i32_0 = arith.constant 0 : i32
    %c0_i32_1 = arith.constant 0 : i32
    %c0_i32_2 = arith.constant 0 : i32
    return %arg0, %c0_i32, %c0_i32_0, %c0_i32_1 : i32, i32, i32, i32
  }
  func.func @transform_4(%arg0: i32) -> (i32, i32, i32, i32) {
    %c0_i32 = arith.constant 0 : i32
    %c0_i32_0 = arith.constant 0 : i32
    %c0_i32_1 = arith.constant 0 : i32
    %c0_i32_2 = arith.constant 0 : i32
    return %arg0, %c0_i32, %c0_i32_0, %c0_i32_1 : i32, i32, i32, i32
  }
}

</mosaic_0001>

<bundles_post_ra>
// kernel: tpu_custom_call.1
= control target key start
LH: loop header
LB: loop body
LE: loop exit
PB: predicated region body
PF: predicated region fallthrough
CT: control target
= control target key end

     0   :  { %s8495_s0 = inlined_call_operand.hbm [shape: f32[3,2,4,512], index: 0, kind: input, shape index: {}]   ;;  %s8496_s1 = inlined_call_operand.hbm [shape: s8[3,12,512,512], index: 1, kind: input, shape index: {}]   ;;  %s8497_s2 = inlined_call_operand.hbm [shape: f32[3,12,1,512], index: 2, kind: input, shape index: {}]   ;;  %s8498_s3 = inlined_call_operand.hbm [shape: f32[3,12,1,512], index: 3, kind: input, shape index: {}]   ;;  %s8499_s4 = inlined_call_operand.hbm [shape: f32[3,2,4,512], index: 4, kind: output, shape index: {}]  }
   0x1   :  { %8503 = sst [smem:[#allocation15_spill]] %s8495_s0 }
   0x2   :  { %8504 = sst [smem:[#allocation16_spill]] %s8496_s1 }
   0x3   :  { %9 = vsyncpa [#allocation3], 0 }
   0x4   :  { %11 = vsyncpa [#allocation3 + $0x1], 0 }
   0x5   :  { %12 = vsyncpa [#allocation6], 0 }
   0x6   :  { %14 = vsyncpa [#allocation6 + $0x1], 0 }
   0x7   :  { %15 = vsyncpa [#allocation9], 0 }
   0x8   :  { %17 = vsyncpa [#allocation9 + $0x1], 0 }
   0x9   :  { %18 = vsyncpa [#allocation4], 0 }
   0xa   :  { %20 = vsyncpa [#allocation4 + $0x1], 0  ;;  %s6980_s15 = smov 0   ;;  %s6982_s16 = smov 0  }
   0xb   :  { %s6984_s17 = smov 0   ;;  %s6986_s18 = smov 0  }
   0xc LB: > { %s7001_s19 = sadd.s32 4294967295, %s6940_s18   ;;  %s5810_s20 = sadd.s32 4294967294, %s6940_s18   ;;  %s6940_s18 = sphi %s6986_s18, %s8522_s18   ;;  %s6936_s17 = sphi %s6984_s17, %s8521_s17   ;;  %s6932_s16 = sphi %s6982_s16, %s8520_s16   ;;  %s6928_s15 = sphi %s6980_s15, %s8519_s15  }
   0xd   : > { %s7005_s21 = sadd.s32 1, %s6940_s18   ;;  %s33_s22 = sadd.s32 1, %s6936_s17 }
   0xe   : > { %s30_s23 = ssub.s32 %s6940_s18, %s7005_s21  ;;  %p40_p0 = scmp.ne.s32.totalorder %s6936_s17, %s6932_s16 }
   0xf   : > { %p31_p1 = scmp.eq.s32.totalorder %s30_s23, 0  ;;  %p41_p2 = scmp.eq.s32.totalorder %s6940_s18, 0 }
  0x10   : > { %p46_p3 = scmp.ne.s32.totalorder %s6932_s16, %s6928_s15  ;;  %p8500_p4 = scmp.eq.s32.totalorder %s7001_s19, 0 }
  0x11   : > { %s7017_s24 = scalar_select %p31_p1, %s6936_s17, %s33_s22  }
  0x12   : > { %p42_p5 = por %p41_p2, %p40_p0  ;;  %p7021_p6 = por %p8500_p4, %p46_p3 }
  0x13   : > { %p148_p7 = scmp.eq.s32.totalorder %s7001_s19, 2  ;;  %p154_p8 = scmp.eq.s32.totalorder %s5810_s20, 2 }
  0x14   : > { %s8505_s25 = scalar_select %p7021_p6, 1, 0 }
  0x15   : > { %p6686_p9 = scmp.lt.s32.totalorder %s6940_s18, 3  ;;  %p7027_p10 = por %p148_p7, %p40_p0 }
  0x16   : > { %p7031_p11 = por %p154_p8, %p46_p3  ;;  %s7036_s28 = sand.u32 1, %s6936_s17  }
  0x17   : > { %s8506_s26 = scalar_select %p7027_p10, 1, 0 }
  0x18   : > { %s8507_s27 = scalar_select %p7031_p11, 1, 0 }
  0x19   : > { %p7038_p12 = pnand %p6686_p9, %p42_p5  ;;  %s195_s30 = sand.u32 1, %s6940_s18  }
  0x1a   : > { %s6651_s5 = smul.u32 6144, %s7036_s28  ;;  %s8509_s1 = sld [smem:[#allocation16_spill]] }
  0x1b   : > { %s6652_s6 = smul.u32 98304, %s6940_s18  ;;  %s7053_s12 = scalar_lea.sflag [#allocation6], %s195_s30 }
  0x1c   : > { %s199_s7 = scalar_lea.vmem [#allocation5], %s6651_s5  ;;  %p7059_p1 = pneg %p7038_p12 }
  0x1d   : > { %s206_s8 = sshll.u32 %s199_s7, 4  ;;  %s7050_s8 = int_to_ptr.vmem [resolvable:$true] %s206_s8 }
  0x20   : > { %s7048_s11 = scalar_lea.hbm %s8509_s1, %s6652_s6  ;;  %s6751_s23 = scalar_lea.hbm %s8509_s1, 294912 }
  0x21   : > { %s6746_s13 = scalar_lea.hbm %s7048_s11, 98304  ;;  %p6752_p5 = scmp.lt.u32.totalorder %s7048_s11, %s8509_s1 }
  0x22   : > { %p6747_p0 = scmp.ne.s32.totalorder %s7048_s11, %s6746_s13  ;;  %p6753_p7 = scmp.lt.u32.totalorder %s6751_s23, %s6746_s13 }
  0x23   : > { %p6755_p9 = scmp.lt.u32.totalorder %s6746_s13, %s7048_s11 }
  0x24   : > { %p6749_p2 = pnand %p7059_p1, %p6747_p0  ;;  %p6754_p8 = por %p6753_p7, %p6752_p5 }
  0x26   : > { %p6750_p3 = pneg %p6749_p2  ;;  %p6756_p4 = por %p6755_p9, %p6754_p8 }
  0x28   : > { %p6757_p13 = pnand %p6756_p4, %p6750_p3 }
  0x2a   : > { %6760 = shalt.err (!%p6757_p13)
}
  0x2b   : > { %s6761_s30 = scalar_lea.vmem %s7050_s8, 98304  ;;  %s6942_s7 = smov [#allocation5]  }
  0x2c   : > { %p6762_p0 = scmp.ne.s32.totalorder %s7050_s8, %s6761_s30  ;;  %s6766_s9 = sshll.u32 %s6942_s7, 4  ;;  %s6767_s9 = int_to_ptr.vmem [resolvable:$false] %s6766_s9 }
  0x2d   : > { %s6768_s10 = scalar_lea.vmem %s6767_s9, 196608  ;;  %p6769_p10 = scmp.lt.s32.totalorder %s7050_s8, %s6767_s9 }
  0x2e   : > { %p6764_p2 = pnand %p6762_p0, %p7059_p1  ;;  %p6770_p6 = scmp.lt.s32.totalorder %s6768_s10, %s6761_s30 }
  0x30   : > { %p6765_p11 = pneg %p6764_p2  ;;  %p6771_p5 = por %p6770_p6, %p6769_p10 }
  0x32   : > { %p6772_p7 = pnand %p6771_p5, %p6765_p11 }
  0x34   : > { %6775 = shalt.err (!%p6772_p7)
}
  0x35   : > { %s6943_s13 = smov 512   ;;  %s6944_s20 = smov 32  }
  0x36   : > { %6675 = dma.hbm_to_vmem [thread:$0]  (!%p7038_p12), %s7048_s11, 98304, %s7050_s8, %s7053_s12, %s6943_s13, %s6943_s13, %s6944_s20  }
  0x37   : > { %p256_p4 = scmp.lt.s32.totalorder %s6940_s18, 4  ;;  %s5813_s22 = sshll.u32 %s7036_s28, 5 }
  0x38   : > { %s6553_s23 = sshll.u32 %s6940_s18, 9  ;;  %p8511_p6 = scmp.ge.s32.totalorder %s6940_s18, 1 }
  0x39   : > { %s8513_s0 = sld [smem:[#allocation15_spill]]  ;;  %s178_s9 = scalar_lea.vmem [#allocation2], %s5813_s22 }
  0x3a   : > { %p7088_p10 = pnand %p8511_p6, %p256_p4  ;;  %s185_s10 = sshll.u32 %s178_s9, 4  ;;  %s7097_s10 = int_to_ptr.vmem [resolvable:$true] %s185_s10 }
  0x3b   : > { %s6653_s8 = smul.u32 48, %s7036_s28  ;;  %s175_s11 = scalar_lea.sflag [#allocation3], %s7036_s28 }
  0x3c   : > { %s8512_s5 = scalar_select %p7088_p10, 1, 0 }
  0x3f   : > { %s7095_s7 = scalar_lea.hbm %s8513_s0, %s6553_s23  ;;  %s6781_s23 = scalar_lea.hbm %s8513_s0, 1536 }
  0x40   : > { %s6776_s13 = scalar_lea.hbm %s7095_s7, 512  ;;  %p6782_p8 = scmp.lt.u32.totalorder %s7095_s7, %s8513_s0 }
  0x41   : > { %p6777_p11 = scmp.ne.s32.totalorder %s7095_s7, %s6776_s13  ;;  %p6783_p9 = scmp.lt.u32.totalorder %s6781_s23, %s6776_s13 }
  0x42   : > { %p6785_p2 = scmp.lt.u32.totalorder %s6776_s13, %s7095_s7 }
  0x43   : > { %p6779_p13 = pnand %p6777_p11, %p7059_p1  ;;  %p6784_p0 = por %p6783_p9, %p6782_p8 }
  0x45   : > { %p6780_p3 = pneg %p6779_p13  ;;  %p6786_p5 = por %p6785_p2, %p6784_p0 }
  0x47   : > { %p6787_p7 = pnand %p6786_p5, %p6780_p3 }
  0x49   : > { %6790 = shalt.err (!%p6787_p7)
}
  0x4a   : > { %s6791_s22 = scalar_lea.vmem %s7097_s10, 512  ;;  %s6945_s1 = smov [#allocation2]  }
  0x4b   : > { %p6792_p4 = scmp.ne.s32.totalorder %s7097_s10, %s6791_s22  ;;  %s6796_s9 = sshll.u32 %s6945_s1, 4  ;;  %s6797_s9 = int_to_ptr.vmem [resolvable:$false] %s6796_s9 }
  0x4c   : > { %s6798_s20 = scalar_lea.vmem %s6797_s9, 1024  ;;  %p6799_p13 = scmp.lt.s32.totalorder %s7097_s10, %s6797_s9 }
  0x4d   : > { %p6794_p6 = pnand %p6792_p4, %p7059_p1  ;;  %p6800_p10 = scmp.lt.s32.totalorder %s6798_s20, %s6791_s22 }
  0x4f   : > { %p6795_p11 = pneg %p6794_p6  ;;  %p6801_p8 = por %p6800_p10, %p6799_p13 }
  0x51   : > { %p6802_p9 = pnand %p6801_p8, %p6795_p11 }
  0x53   : > { %6805 = shalt.err (!%p6802_p9)
}
  0x54   : > { %s6946_s13 = smov 256   ;;  %s6947_s23 = smov 16  }
  0x55   : > { %6672 = dma.hbm_to_vmem [thread:$0]  (!%p7038_p12), %s7095_s7, 512, %s7097_s10, %s175_s11, %s6946_s13, %s6946_s13, %s6947_s23  }
  0x56   : > { %s6654_s6 = smul.u32 768, %s6940_s18  ;;  %s220_s30 = scalar_lea.vmem [#allocation7], %s6653_s8 }
  0x57   : > { %s227_s22 = sshll.u32 %s220_s30, 4  ;;  %s6811_s11 = scalar_lea.hbm %s8497_s2, 2304  ;;  %s7134_s22 = int_to_ptr.vmem [resolvable:$true] %s227_s22 }
  0x58   : > { %s7132_s20 = scalar_lea.hbm %s8497_s2, %s6654_s6 }
  0x59   : > { %s6806_s0 = scalar_lea.hbm %s7132_s20, 768  ;;  %p6812_p2 = scmp.lt.u32.totalorder %s7132_s20, %s8497_s2 }
  0x5a   : > { %p6807_p10 = scmp.ne.s32.totalorder %s7132_s20, %s6806_s0  ;;  %p6813_p5 = scmp.lt.u32.totalorder %s6811_s11, %s6806_s0 }
  0x5b   : > { %p6815_p4 = scmp.lt.u32.totalorder %s6806_s0, %s7132_s20 }
  0x5c   : > { %p6809_p3 = pnand %p6807_p10, %p7059_p1  ;;  %p6814_p7 = por %p6813_p5, %p6812_p2 }
  0x5e   : > { %p6810_p0 = pneg %p6809_p3  ;;  %p6816_p6 = por %p6815_p4, %p6814_p7 }
  0x60   : > { %p6817_p11 = pnand %p6816_p6, %p6810_p0 }
  0x62   : > { %6820 = shalt.err (!%p6817_p11)
}
  0x63   : > { %s6821_s30 = scalar_lea.vmem %s7134_s22, 768  ;;  %s6948_s1 = smov [#allocation7]  }
  0x64   : > { %p6822_p13 = scmp.ne.s32.totalorder %s7134_s22, %s6821_s30  ;;  %s6826_s9 = sshll.u32 %s6948_s1, 4  ;;  %s6827_s9 = int_to_ptr.vmem [resolvable:$false] %s6826_s9 }
  0x65   : > { %s6828_s7 = scalar_lea.vmem %s6827_s9, 1536  ;;  %p6829_p10 = scmp.lt.s32.totalorder %s7134_s22, %s6827_s9 }
  0x66   : > { %p6824_p8 = pnand %p6822_p13, %p7059_p1  ;;  %p6830_p3 = scmp.lt.s32.totalorder %s6828_s7, %s6821_s30 }
  0x68   : > { %p6825_p9 = pneg %p6824_p8  ;;  %p6831_p2 = por %p6830_p3, %p6829_p10 }
  0x6a   : > { %p6832_p5 = pnand %p6831_p2, %p6825_p9 }
  0x6c   : > { %6835 = shalt.err (!%p6832_p5)
}
  0x6d   : > { %s6949_s0 = smov 64   ;;  %s6950_s10 = smov 4  }
  0x6e   : > { %6678 = dma.hbm_to_vmem [thread:$0]  (!%p7038_p12), %s7132_s20, 768, %s7134_s22, %s7053_s12, %s6949_s0, %s6949_s0, %s6950_s10  }
  0x6f   : > { %s7166_s23 = scalar_lea.hbm %s8498_s3, %s6654_s6  ;;  %s241_s30 = scalar_lea.vmem [#allocation8], %s6653_s8 }
  0x70   : > { %s248_s1 = sshll.u32 %s241_s30, 4  ;;  %s238_s9 = scalar_lea.sflag [#allocation9], %s7036_s28  ;;  %s7170_s1 = int_to_ptr.vmem [resolvable:$true] %s248_s1 }
  0x71   : > { %s6836_s7 = scalar_lea.hbm %s7166_s23, 768  ;;  %s6841_s6 = scalar_lea.hbm %s8498_s3, 2304 }
  0x72   : > { %p6837_p0 = scmp.ne.s32.totalorder %s7166_s23, %s6836_s7  ;;  %p6842_p6 = scmp.lt.u32.totalorder %s7166_s23, %s8498_s3 }
  0x73   : > { %p6843_p11 = scmp.lt.u32.totalorder %s6841_s6, %s6836_s7  ;;  %p6845_p8 = scmp.lt.u32.totalorder %s6836_s7, %s7166_s23 }
  0x74   : > { %p6839_p7 = pnand %p6837_p0, %p7059_p1 }
  0x75   : > { %p6844_p13 = por %p6843_p11, %p6842_p6 }
  0x76   : > { %p6840_p4 = pneg %p6839_p7 }
  0x77   : > { %p6846_p9 = por %p6845_p8, %p6844_p13 }
  0x79   : > { %p6847_p10 = pnand %p6846_p9, %p6840_p4 }
  0x7b   : > { %6850 = shalt.err (!%p6847_p10)
}
  0x7c   : > { %s6851_s8 = scalar_lea.vmem %s7170_s1, 768  ;;  %s6951_s13 = smov [#allocation8]  }
  0x7d   : > { %p6852_p3 = scmp.ne.s32.totalorder %s7170_s1, %s6851_s8  ;;  %s6856_s30 = sshll.u32 %s6951_s13, 4  ;;  %s6857_s30 = int_to_ptr.vmem [resolvable:$false] %s6856_s30 }
  0x7e   : > { %s6858_s12 = scalar_lea.vmem %s6857_s30, 1536  ;;  %p6859_p0 = scmp.lt.s32.totalorder %s7170_s1, %s6857_s30 }
  0x7f   : > { %p6854_p2 = pnand %p6852_p3, %p7059_p1  ;;  %p6860_p7 = scmp.lt.s32.totalorder %s6858_s12, %s6851_s8 }
  0x81   : > { %p6855_p5 = pneg %p6854_p2  ;;  %p6861_p6 = por %p6860_p7, %p6859_p0 }
  0x83   : > { %p6862_p11 = pnand %p6861_p6, %p6855_p5 }
  0x85   : > { %6865 = shalt.err (!%p6862_p11)
}
  0x86   : > { %6681 = dma.hbm_to_vmem [thread:$0]  (!%p7038_p12), %s7166_s23, 768, %s7170_s1, %s238_s9, %s6949_s0, %s6949_s0, %s6950_s10  }
  0x87   : > { %p8514_p1 = scmp.ne.s32.totalorder %s8512_s5, 0 }
  0x88   : > { %s7202_s14 = sand.u32 (!%p8514_p1), 1, %s6932_s16   ;;  %p8515_p4 = scmp.ne.s32.totalorder (!%p8514_p1), %s8505_s25, 0 }
  0x89   : > { %260 = sbr.rel (%p8514_p1) target bundleno = 3703 (0xe77), region = 36  ;;  %s5820_s7 = sshll.u32 (!%p8514_p1), %s7202_s14, 5 }
  0x8a   : > { %s263_s29 = scalar_lea.sflag (!%p8514_p1), [#allocation3], %s7202_s14  ;;  %s7208_s22 = scalar_lea.vmem (!%p8514_p1), [#allocation2], %s5820_s7 }
  0x90   : > { %6911 = dma.done.wait (%p8515_p4), %s263_s29, 512  }
  0x91   : > { %6913 = vsyncadd (%p8515_p4), %s263_s29, 4294966784  ;;  %s271_s28 = sand.u32 1, %s7001_s19   ;;  %s6657_s5 = smul.u32 6144, %s7202_s14 }
  0x92   : > { %s272_s0 = scalar_lea.sflag [#allocation6], %s271_s28 }
  0x93   : > { %s7216_s10 = scalar_lea.vmem [#allocation5], %s6657_s5 }
  0x94   : > { %6915 = dma.done.wait (%p8515_p4), %s272_s0, 99072  }
  0x95   : > { %6917 = vsyncadd (%p8515_p4), %s272_s0, 4294868224  ;;  %s6658_s23 = smul.u32 48, %s7202_s14  ;;  %s290_s9 = scalar_lea.sflag [#allocation9], %s7202_s14 }
  0x97   : > { %s7223_s1 = scalar_lea.vmem [#allocation7], %s6658_s23  ;;  %s7226_s6 = scalar_lea.vmem [#allocation8], %s6658_s23 }
  0x98   : > { %6919 = dma.done.wait (%p8515_p4), %s290_s9, 768  }
  0x99   : > { %6921 = vsyncadd (%p8515_p4), %s290_s9, 4294966528  ;;  %v477_v0 = vld [vmem:[%s7216_s10 + $0x8] sm:$0xff]  ;;  %v479_v1 = vld [vmem:[%s7216_s10 + $0x18] sm:$0xff]  ;;  %p411_p12 = scmp.eq.s32.totalorder %s7001_s19, 1  ;;  %p8516_p13 = scmp.eq.s32.totalorder %s7001_s19, 0  ;;  %vm353_vm0 = vcmask 1043456  }
  0x9a   : > { %v476_v2 = vld [vmem:[%s7216_s10] sm:$0xff]  ;;  %v541_v3 = vunpack.c.l.s8.bf16 %v477_v0  ;;  %v545_v4 = vunpack.c.h.s8.bf16 %v477_v0  ;;  %v543_v5 = vunpack.c.l.s8.bf16 %v479_v1  ;;  %v547_v6 = vunpack.c.h.s8.bf16 %v479_v1  ;;  %v478_v7 = vld [vmem:[%s7216_s10 + $0x10] sm:$0xff]  ;;  %v481_v10 = vld [vmem:[%s7216_s10 + $0x28] sm:$0xff]  ;;  %s6554_s20 = sshll.u32 %s7001_s19, 9  ;;  %s332_s11 = scalar_lea.vmem [#allocation10], %s5820_s7 }
  0x9b   : > { %v540_v8 = vunpack.c.l.s8.bf16 %v476_v2  ;;  %v542_v9 = vunpack.c.l.s8.bf16 %v478_v7  ;;  %v483_v11 = vld [vmem:[%s7216_s10 + $0x38] sm:$0xff]  ;;  %v544_v12 = vunpack.c.h.s8.bf16 %v476_v2  ;;  %v546_v13 = vunpack.c.h.s8.bf16 %v478_v7  ;;  %v480_v16 = vld [vmem:[%s7216_s10 + $0x20] sm:$0xff]  ;;  %v482_v17 = vld [vmem:[%s7216_s10 + $0x30] sm:$0xff]  ;;  %s412_s25 = scalar_select %p411_p12, 4.0, 2.0 }
  0x9c   : > { %668 = vmatprep.subr.bf16.mxu0 %v541_v3  ;;  %750 = vmatprep.subr.bf16.mxu1 %v543_v5  ;;  %v549_v14 = vunpack.c.l.s8.bf16 %v481_v10  ;;  %v551_v15 = vunpack.c.l.s8.bf16 %v483_v11  ;;  %v548_v18 = vunpack.c.l.s8.bf16 %v480_v16  ;;  %v550_v19 = vunpack.c.l.s8.bf16 %v482_v17  ;;  %v485_v22 = vld [vmem:[%s7216_s10 + $0x48] sm:$0xff]  ;;  %v487_v23 = vld [vmem:[%s7216_s10 + $0x58] sm:$0xff]  ;;  %v484_v28 = vld [vmem:[%s7216_s10 + $0x40] sm:$0xff]  ;;  %s5671_s8 = sshll.u32 %s332_s11, 4  ;;  %s8450_s12 = scalar_lea.hbm %s8499_s4, %s6554_s20  ;;  %s8452_s8 = int_to_ptr.vmem [resolvable:$true] %s5671_s8 }
  0x9d   : > { %669 = vmatpush1.bf16.msra.mxu0 %v540_v8  ;;  %751 = vmatpush1.bf16.msra.mxu1 %v542_v9  ;;  %v553_v20 = vunpack.c.h.s8.bf16 %v481_v10  ;;  %v555_v21 = vunpack.c.h.s8.bf16 %v483_v11  ;;  %s8524_s25 = smov (%p8516_p13, %s412_s25), 4.0  ;;  %v552_v24 = vunpack.c.h.s8.bf16 %v480_v16  ;;  %v554_v25 = vunpack.c.h.s8.bf16 %v482_v17  ;;  %v486_v29 = vld [vmem:[%s7216_s10 + $0x50] sm:$0xff]  ;;  %v7248_v30 = vld [vmem:[%s7208_s22] sm:$0xff]  ;;  %v489_v39 = vld [vmem:[%s7216_s10 + $0x68] sm:$0xff]  ;;  %s5658_s19 = scalar_lea.sflag [#allocation4], %s7202_s14 }
  0x9e   : > { %670 = vmatprep.subr.bf16.mxu0 %v545_v4  ;;  %752 = vmatprep.subr.bf16.mxu1 %v547_v6  ;;  %v557_v26 = vunpack.c.l.s8.bf16 %v485_v22  ;;  %v559_v27 = vunpack.c.l.s8.bf16 %v487_v23  ;;  %v7251_v31 = vld [vmem:[%s7208_s22 + $0x10] sm:$0xff]  ;;  %v414_v32 = vstv %s8524_s25  ;;  %v556_v33 = vunpack.c.l.s8.bf16 %v484_v28  ;;  %v491_v40 = vld [vmem:[%s7216_s10 + $0x78] sm:$0xff]  ;;  %v488_v47 = vld [vmem:[%s7216_s10 + $0x60] sm:$0xff]  ;;  %s6866_s7 = scalar_lea.vmem %s8452_s8, 512  ;;  %p8517_p9 = scmp.ne.s32.totalorder %s8506_s26, 0 }
  0x9f   : > { %v558_v34 = vunpack.c.l.s8.bf16 %v486_v29  ;;  %v561_v35 = vunpack.c.h.s8.bf16 %v485_v22  ;;  %v563_v36 = vunpack.c.h.s8.bf16 %v487_v23  ;;  %v337_v37 = vmul.f32 %v7248_v30, %v7248_v30  ;;  %v490_v48 = vld [vmem:[%s7216_s10 + $0x70] sm:$0xff]  ;;  %v493_v3 = vld [vmem:[%s7216_s10 + $0x88] sm:$0xff]  ;;  %v495_v4 = vld [vmem:[%s7216_s10 + $0x98] sm:$0xff]  ;;  %p6867_p8 = scmp.ne.s32.totalorder %s8452_s8, %s6866_s7  ;;  %s6952_s29 = smov [#allocation10]  }
  0xa0   : > { %v339_v38 = vmul.f32 %v7251_v31, %v7251_v31  ;;  %6728 = vrcp.f32 %v414_v32  ;;  %v560_v45 = vunpack.c.h.s8.bf16 %v484_v28  ;;  %v562_v46 = vunpack.c.h.s8.bf16 %v486_v29 }
  0xa1   : > { %671 = vmatpush1.bf16.msra.mxu0 %v544_v12  ;;  %753 = vmatpush1.bf16.msra.mxu1 %v546_v13  ;;  %v345_v41 = vcombine.high %v337_v37, %v337_v37  ;;  %v354_v43 = vsel %vm353_vm0, %v337_v37, 0.0  ;;  %v565_v51 = vunpack.c.l.s8.bf16 %v489_v39  ;;  %v567_v52 = vunpack.c.l.s8.bf16 %v491_v40  ;;  %v492_v12 = vld [vmem:[%s7216_s10 + $0x80] sm:$0xff]  ;;  %p6868_p10 = pnand %p6867_p8, %p8517_p9 }
  0xa2   : > { %672 = vmatprep.subr.bf16.mxu0 %v549_v14  ;;  %754 = vmatprep.subr.bf16.mxu1 %v551_v15  ;;  %v347_v42 = vcombine.high %v339_v38, %v339_v38  ;;  %v382_v44 = vsel %vm353_vm0, %v339_v38, 0.0  ;;  %v355_v49 = vrot.slane %v354_v43, 4  ;;  %v564_v59 = vunpack.c.l.s8.bf16 %v488_v47 }
  0xa3   : > { %v383_v50 = vrot.slane %v382_v44, 4  ;;  %v361_v53 = vsel %vm353_vm0, %v345_v41, 0.0  ;;  %v566_v60 = vunpack.c.l.s8.bf16 %v490_v48  ;;  %v569_v1 = vunpack.c.h.s8.bf16 %v489_v39  ;;  %p6869_p3 = pneg %p6868_p10 }
  0xa4   : > { %v389_v54 = vsel %vm353_vm0, %v347_v42, 0.0  ;;  %v356_v55 = vadd.f32 %v355_v49, %v354_v43  ;;  %v362_v56 = vrot.slane %v361_v53, 4  ;;  %v571_v2 = vunpack.c.h.s8.bf16 %v491_v40 }
  0xa5   : > { %673 = vmatpush1.bf16.msra.mxu0 %v548_v18  ;;  %755 = vmatpush1.bf16.msra.mxu1 %v550_v19  ;;  %v384_v57 = vadd.f32 %v383_v50, %v382_v44  ;;  %v390_v58 = vrot.slane %v389_v54, 4  ;;  %v568_v9 = vunpack.c.h.s8.bf16 %v488_v47  ;;  %v570_v10 = vunpack.c.h.s8.bf16 %v490_v48  ;;  %v494_v19 = vld [vmem:[%s7216_s10 + $0x90] sm:$0xff] }
  0xa6   : > { %674 = vmatprep.subr.bf16.mxu0 %v553_v20  ;;  %756 = vmatprep.subr.bf16.mxu1 %v555_v21  ;;  %v357_v61 = vrot.slane %v356_v55, 2  ;;  %v363_v62 = vadd.f32 %v362_v56, %v361_v53  ;;  %v573_v17 = vunpack.c.l.s8.bf16 %v493_v3  ;;  %v575_v18 = vunpack.c.l.s8.bf16 %v495_v4  ;;  %v498_v47 = vld [vmem:[%s7216_s10 + $0xb0] sm:$0xff]  ;;  %v7283_v53 = vld [vmem:[%s7208_s22 + $0x18] sm:$0xff] }
  0xa7   : > { %v385_v63 = vrot.slane %v384_v57, 2  ;;  %v391_v0 = vadd.f32 %v390_v58, %v389_v54  ;;  %v577_v29 = vunpack.c.h.s8.bf16 %v493_v3  ;;  %v579_v32 = vunpack.c.h.s8.bf16 %v495_v4  ;;  %v501_v54 = vld [vmem:[%s7216_s10 + $0xc8] sm:$0xff]  ;;  %v500_v58 = vld [vmem:[%s7216_s10 + $0xc0] sm:$0xff] }
  0xa8   : > { %v358_v5 = vadd.f32 %v357_v61, %v356_v55  ;;  %v364_v6 = vrot.slane %v363_v62, 2  ;;  %v576_v39 = vunpack.c.h.s8.bf16 %v492_v12  ;;  %v578_v41 = vunpack.c.h.s8.bf16 %v494_v19  ;;  %v503_v55 = vld [vmem:[%s7216_s10 + $0xd8] sm:$0xff] }
  0xa9   : > { %675 = vmatpush1.bf16.msra.mxu0 %v552_v24  ;;  %757 = vmatpush1.bf16.msra.mxu1 %v554_v25  ;;  %v386_v7 = vadd.f32 %v385_v63, %v384_v57  ;;  %v392_v8 = vrot.slane %v391_v0, 2  ;;  %v572_v24 = vunpack.c.l.s8.bf16 %v492_v12  ;;  %v574_v25 = vunpack.c.l.s8.bf16 %v494_v19 }
  0xaa   : > { %676 = vmatprep.subr.bf16.mxu0 %v557_v26  ;;  %758 = vmatprep.subr.bf16.mxu1 %v559_v27  ;;  %v7267_v11 = vpop.eup %6728  ;;  %v359_v13 = vrot.slane %v358_v5, 1  ;;  %v365_v14 = vadd.f32 %v364_v6, %v363_v62  ;;  %v582_v49 = vunpack.c.l.s8.bf16 %v498_v47  ;;  %v586_v57 = vunpack.c.h.s8.bf16 %v498_v47 }
  0xab   : > { %v387_v15 = vrot.slane %v386_v7, 1  ;;  %v393_v16 = vadd.f32 %v392_v8, %v391_v0  ;;  %v340_v61 = vmul.f32 %v7283_v53, %v7283_v53  ;;  %v589_v62 = vunpack.c.l.s8.bf16 %v501_v54 }
  0xac   : > { %v360_v20 = vadd.f32 %v359_v13, %v358_v5  ;;  %v366_v21 = vrot.slane %v365_v14, 1  ;;  %v591_v63 = vunpack.c.l.s8.bf16 %v503_v55  ;;  %v588_v6 = vunpack.c.l.s8.bf16 %v500_v58 }
  0xad   : > { %677 = vmatpush1.bf16.msra.mxu0 %v556_v33  ;;  %759 = vmatpush1.bf16.msra.mxu1 %v558_v34  ;;  %v388_v22 = vadd.f32 %v387_v15, %v386_v7  ;;  %v394_v23 = vrot.slane %v393_v16, 1  ;;  %v497_v34 = vld [vmem:[%s7216_s10 + $0xa8] sm:$0xff]  ;;  %v396_v4 = vsel %vm353_vm0, %v340_v61, 0.0  ;;  %v593_v12 = vunpack.c.h.s8.bf16 %v501_v54 }
  0xae   : > { %678 = vmatprep.subr.bf16.mxu0 %v561_v35  ;;  %760 = vmatprep.subr.bf16.mxu1 %v563_v36  ;;  %v367_v26 = vadd.f32 %v366_v21, %v365_v14  ;;  %v416_v28 = vmul.f32 %v7267_v11, %v360_v20  ;;  %v499_v35 = vld [vmem:[%s7216_s10 + $0xb8] sm:$0xff]  ;;  %v581_v44 = vunpack.c.l.s8.bf16 %v497_v34  ;;  %v585_v50 = vunpack.c.h.s8.bf16 %v497_v34  ;;  %v504_v34 = vld [vmem:[%s7216_s10 + $0xe0] sm:$0xff] }
  0xaf   : > { %v395_v27 = vadd.f32 %v394_v23, %v393_v16  ;;  %v420_v33 = vmul.f32 %v7267_v11, %v388_v22  ;;  %v595_v13 = vunpack.c.h.s8.bf16 %v503_v55  ;;  %v592_v22 = vunpack.c.h.s8.bf16 %v500_v58  ;;  %v507_v23 = vld [vmem:[%s7216_s10 + $0xf8] sm:$0xff] }
  0xb0   : > { %v417_v36 = vmul.f32 %v7267_v11, %v367_v26  ;;  %v424_v38 = vadd.f32 1e-08, %v416_v28 }
  0xb1   : > { %679 = vmatpush1.bf16.msra.mxu0 %v560_v45  ;;  %761 = vmatpush1.bf16.msra.mxu1 %v562_v46  ;;  %v421_v37 = vmul.f32 %v7267_v11, %v395_v27  ;;  %v428_v40 = vadd.f32 1e-08, %v420_v33  ;;  %v583_v45 = vunpack.c.l.s8.bf16 %v499_v35  ;;  %v496_v46 = vld [vmem:[%s7216_s10 + $0xa0] sm:$0xff] }
  0xb2   : > { %680 = vmatprep.subr.bf16.mxu0 %v565_v51  ;;  %762 = vmatprep.subr.bf16.mxu1 %v567_v52  ;;  %v425_v42 = vadd.f32 1e-08, %v417_v36  ;;  %6730 = vrsqrt.f32 %v424_v38  ;;  %v580_v48 = vunpack.c.l.s8.bf16 %v496_v46  ;;  %v587_v51 = vunpack.c.h.s8.bf16 %v499_v35  ;;  %v7280_v52 = vld [vmem:[%s7208_s22 + $0x8] sm:$0xff]  ;;  %v506_v38 = vld [vmem:[%s7216_s10 + $0xf0] sm:$0xff]  ;;  %s6870_s22 = sshll.u32 %s6952_s29, 4  ;;  %s6871_s22 = int_to_ptr.vmem [resolvable:$false] %s6870_s22 }
  0xb3   : > { %v429_v43 = vadd.f32 1e-08, %v421_v37  ;;  %6732 = vrsqrt.f32 %v428_v40  ;;  %v584_v56 = vunpack.c.h.s8.bf16 %v496_v46  ;;  %v599_v37 = vunpack.c.l.s8.bf16 %v507_v23  ;;  %s6872_s28 = scalar_lea.vmem %s6871_s22, 1024  ;;  %p6873_p2 = scmp.lt.s32.totalorder %s8452_s8, %s6871_s22 }
  0xb4   : > { %6734 = vrsqrt.f32 %v425_v42  ;;  %p6874_p5 = scmp.lt.s32.totalorder %s6872_s28, %s6866_s7 }
  0xb5   : > { %681 = vmatpush1.bf16.msra.mxu0 %v564_v59  ;;  %763 = vmatpush1.bf16.msra.mxu1 %v566_v60  ;;  %6736 = vrsqrt.f32 %v429_v43  ;;  %v502_v59 = vld [vmem:[%s7216_s10 + $0xd0] sm:$0xff]  ;;  %v338_v60 = vmul.f32 %v7280_v52, %v7280_v52  ;;  %v596_v43 = vunpack.c.l.s8.bf16 %v504_v34 }
  0xb6   : > { %682 = vmatprep.subr.bf16.mxu0 %v569_v1  ;;  %764 = vmatprep.subr.bf16.mxu1 %v571_v2  ;;  %v348_v2 = vcombine.high %v340_v61, %v340_v61  ;;  %v590_v7 = vunpack.c.l.s8.bf16 %v502_v59  ;;  %p6875_p0 = por %p6874_p5, %p6873_p2 }
  0xb7   : > { %v346_v1 = vcombine.high %v338_v60, %v338_v60  ;;  %v368_v3 = vsel %vm353_vm0, %v338_v60, 0.0 }
  0xb8   : > { %v369_v8 = vrot.slane %v368_v3, 4  ;;  %v403_v15 = vsel %vm353_vm0, %v348_v2, 0.0  ;;  %p6876_p7 = pnand %p6875_p0, %p6869_p3 }
  0xb9   : > { %683 = vmatpush1.bf16.msra.mxu0 %v568_v9  ;;  %765 = vmatpush1.bf16.msra.mxu1 %v570_v10  ;;  %v397_v9 = vrot.slane %v396_v4, 4  ;;  %v375_v14 = vsel %vm353_vm0, %v346_v1, 0.0 }
  0xba   : > { %684 = vmatprep.subr.bf16.mxu0 %v573_v17  ;;  %766 = vmatprep.subr.bf16.mxu1 %v575_v18  ;;  %v505_v17 = vld [vmem:[%s7216_s10 + $0xe8] sm:$0xff]  ;;  %v370_v19 = vadd.f32 %v369_v8, %v368_v3  ;;  %v376_v20 = vrot.slane %v375_v14, 4 }
  0xbb   : > { %v398_v21 = vadd.f32 %v397_v9, %v396_v4  ;;  %v597_v33 = vunpack.c.l.s8.bf16 %v505_v17  ;;  %v601_v47 = vunpack.c.h.s8.bf16 %v505_v17  ;;  %v508_v4 = vld [vmem:[%s7216_s10 + $0x100] sm:$0xff] }
  0xbc   : > { %v6731_v0 = vpop.eup %6730  ;;  %v371_v27 = vrot.slane %v370_v19, 2  ;;  %v377_v28 = vadd.f32 %v376_v20, %v375_v14 }
  0xbd   : > { %685 = vmatpush1.bf16.msra.mxu0 %v572_v24  ;;  %767 = vmatpush1.bf16.msra.mxu1 %v574_v25  ;;  %v6733_v5 = vpop.eup %6732  ;;  %v404_v25 = vrot.slane %v403_v15, 4 }
  0xbe   : > { %686 = vmatprep.subr.bf16.mxu0 %v577_v29  ;;  %768 = vmatprep.subr.bf16.mxu1 %v579_v32  ;;  %v6735_v10 = vpop.eup %6734  ;;  %v399_v29 = vrot.slane %v398_v21, 2  ;;  %v594_v32 = vunpack.c.h.s8.bf16 %v502_v59  ;;  %v378_v40 = vrot.slane %v377_v28, 2 }
  0xbf   : > { %v6737_v16 = vpop.eup %6736  ;;  %v448_v18 = vcombine.low %v6731_v0, %v6735_v10  ;;  %v405_v36 = vadd.f32 %v404_v25, %v403_v15  ;;  %v602_v0 = vunpack.c.h.s8.bf16 %v506_v38 }
  0xc0   : > { %v450_v24 = vcombine.low %v6733_v5, %v6737_v16  ;;  %v510_v5 = vld [vmem:[%s7216_s10 + $0x110] sm:$0xff] }
  0xc1   : > { %687 = vmatpush1.bf16.msra.mxu0 %v576_v39  ;;  %769 = vmatpush1.bf16.msra.mxu1 %v578_v41  ;;  %v456_v26 = vmul.f32 %v448_v18, %v7248_v30  ;;  %v372_v39 = vadd.f32 %v371_v27, %v370_v19  ;;  %v400_v41 = vadd.f32 %v399_v29, %v398_v21  ;;  %v406_v42 = vrot.slane %v405_v36, 2  ;;  %v515_v18 = vld [vmem:[%s7216_s10 + $0x138] sm:$0xff] }
  0xc2   : > { %688 = vmatprep.subr.bf16.mxu0 %v581_v44  ;;  %770 = vmatprep.subr.bf16.mxu1 %v583_v45  ;;  %v458_v35 = vmul.f32 %v450_v24, %v7251_v31  ;;  %v379_v45 = vadd.f32 %v378_v40, %v377_v28  ;;  %v598_v31 = vunpack.c.l.s8.bf16 %v506_v38  ;;  %v606_v14 = vunpack.c.l.s8.bf16 %v510_v5  ;;  %v514_v24 = vld [vmem:[%s7216_s10 + $0x130] sm:$0xff] }
  0xc3   : > { %v373_v44 = vrot.slane %v372_v39, 1  ;;  %v401_v46 = vrot.slane %v400_v41, 1  ;;  %v608_v19 = vunpack.c.h.s8.bf16 %v508_v4  ;;  %v610_v20 = vunpack.c.h.s8.bf16 %v510_v5 }
  0xc4   : > { %v7303_v30 = vcombine.high %v456_v26, %v458_v35  ;;  %v380_v55 = vrot.slane %v379_v45, 1  ;;  %v7309_v59 = vcombine.low %v456_v26, %v458_v35  ;;  %v614_v26 = vunpack.c.l.s8.bf16 %v514_v24 }
  0xc5   : > { %689 = vmatpush1.bf16.msra.mxu0 %v580_v48  ;;  %771 = vmatpush1.bf16.msra.mxu1 %v582_v49  ;;  %v407_v49 = vadd.f32 %v406_v42, %v405_v36  ;;  %v374_v54 = vadd.f32 %v373_v44, %v372_v39  ;;  %v619_v29 = vunpack.c.h.s8.bf16 %v515_v18  ;;  %v618_v38 = vunpack.c.h.s8.bf16 %v514_v24  ;;  %v516_v42 = vld [vmem:[%s7216_s10 + $0x140] sm:$0xff] }
  0xc6   : > { %690 = vmatprep.subr.bf16.mxu0 %v585_v50  ;;  %772 = vmatprep.subr.bf16.mxu1 %v587_v51  ;;  %v473_v48 = vpack.c.bf16 %v7303_v30, %v7303_v30  ;;  %v603_v50 = vunpack.c.h.s8.bf16 %v507_v23  ;;  %v509_v51 = vld [vmem:[%s7216_s10 + $0x108] sm:$0xff]  ;;  %v381_v60 = vadd.f32 %v380_v55, %v379_v45  ;;  %v472_v10 = vpack.c.bf16 %v7309_v59, %v7309_v59  ;;  %v512_v23 = vld [vmem:[%s7216_s10 + $0x120] sm:$0xff] }
  0xc7   : > { %v408_v58 = vrot.slane %v407_v49, 1  ;;  %v418_v61 = vmul.f32 %v7267_v11, %v374_v54  ;;  %v605_v1 = vunpack.c.l.s8.bf16 %v509_v51  ;;  %v609_v16 = vunpack.c.h.s8.bf16 %v509_v51  ;;  %v521_v51 = vld [vmem:[%s7216_s10 + $0x168] sm:$0xff] }
  0xc8   : > { %700 = vmatprep.mubr.bf16.mxu0 %v473_v48  ;;  %782 = vmatprep.mubr.bf16.mxu1 %v473_v48  ;;  %v612_v25 = vunpack.c.l.s8.bf16 %v512_v23  ;;  %v624_v54 = vunpack.c.h.s8.bf16 %v516_v42 }
  0xc9   : > { %691 = vmatpush1.bf16.msra.mxu0 %v584_v56  ;;  %773 = vmatpush1.bf16.msra.mxu1 %v586_v57  ;;  %v402_v56 = vadd.f32 %v401_v46, %v400_v41  ;;  %v511_v57 = vld [vmem:[%s7216_s10 + $0x118] sm:$0xff]  ;;  %v409_v2 = vadd.f32 %v408_v58, %v407_v49  ;;  %v520_v58 = vld [vmem:[%s7216_s10 + $0x160] sm:$0xff] }
  0xca   : > { %692 = vmatprep.subr.bf16.mxu0 %v589_v62  ;;  %774 = vmatprep.subr.bf16.mxu1 %v591_v63  ;;  %v600_v63 = vunpack.c.h.s8.bf16 %v504_v34  ;;  %v607_v3 = vunpack.c.l.s8.bf16 %v511_v57  ;;  %v611_v17 = vunpack.c.h.s8.bf16 %v511_v57  ;;  %v519_v34 = vld [vmem:[%s7216_s10 + $0x158] sm:$0xff] }
  0xcb   : > { %v422_v62 = vmul.f32 %v7267_v11, %v402_v56  ;;  %v423_v9 = vmul.f32 %v7267_v11, %v409_v2  ;;  %v623_v41 = vunpack.c.l.s8.bf16 %v519_v34  ;;  %v627_v49 = vunpack.c.h.s8.bf16 %v519_v34  ;;  %v527_v2 = vld [vmem:[%s7216_s10 + $0x198] sm:$0xff]  ;;  %v534_v34 = vld [vmem:[%s7216_s10 + $0x1d0] sm:$0xff] }
  0xcc   : > { %v629_v56 = vunpack.c.l.s8.bf16 %v521_v51 }
  0xcd   : > { %693 = vmatpush1.bf16.msra.mxu0 %v588_v6  ;;  %775 = vmatpush1.bf16.msra.mxu1 %v590_v7  ;;  %v419_v6 = vmul.f32 %v7267_v11, %v381_v60  ;;  %v426_v7 = vadd.f32 1e-08, %v418_v61  ;;  %v430_v8 = vadd.f32 1e-08, %v422_v62  ;;  %v431_v15 = vadd.f32 1e-08, %v423_v9 }
  0xce   : > { %694 = vmatprep.subr.bf16.mxu0 %v593_v12  ;;  %776 = vmatprep.subr.bf16.mxu1 %v595_v13  ;;  %v604_v13 = vunpack.c.l.s8.bf16 %v508_v4  ;;  %v513_v11 = vld [vmem:[%s7216_s10 + $0x128] sm:$0xff]  ;;  %v522_v60 = vld [vmem:[%s7216_s10 + $0x170] sm:$0xff]  ;;  %v628_v61 = vunpack.c.l.s8.bf16 %v520_v58 }
  0xcf   : > { %v427_v12 = vadd.f32 1e-08, %v419_v6  ;;  %6738 = vrsqrt.f32 %v426_v7  ;;  %v613_v21 = vunpack.c.l.s8.bf16 %v513_v11  ;;  %v617_v28 = vunpack.c.h.s8.bf16 %v513_v11  ;;  %v524_v7 = vld [vmem:[%s7216_s10 + $0x180] sm:$0xff] }
  0xd0   : > { %6740 = vrsqrt.f32 %v430_v8  ;;  %v630_v62 = vunpack.c.l.s8.bf16 %v522_v60  ;;  %v634_v4 = vunpack.c.h.s8.bf16 %v522_v60  ;;  %v639_v6 = vunpack.c.l.s8.bf16 %v527_v2  ;;  %v526_v8 = vld [vmem:[%s7216_s10 + $0x190] sm:$0xff] }
  0xd1   : > { %695 = vmatpush1.bf16.msra.mxu0 %v592_v22  ;;  %777 = vmatpush1.bf16.msra.mxu1 %v594_v32  ;;  %6742 = vrsqrt.f32 %v427_v12  ;;  %v615_v22 = vunpack.c.l.s8.bf16 %v515_v18  ;;  %v636_v9 = vunpack.c.l.s8.bf16 %v524_v7 }
  0xd2   : > { %696 = vmatprep.subr.bf16.mxu0 %v597_v33  ;;  %778 = vmatprep.subr.bf16.mxu1 %v599_v37  ;;  %6744 = vrsqrt.f32 %v431_v15  ;;  %v517_v33 = vld [vmem:[%s7216_s10 + $0x148] sm:$0xff]  ;;  %v616_v37 = vunpack.c.h.s8.bf16 %v512_v23  ;;  %v531_v15 = vld [vmem:[%s7216_s10 + $0x1b8] sm:$0xff] }
  0xd3   : > { %v621_v40 = vunpack.c.l.s8.bf16 %v517_v33  ;;  %v625_v48 = vunpack.c.h.s8.bf16 %v517_v33  ;;  %v647_v18 = vunpack.c.l.s8.bf16 %v531_v15  ;;  %v651_v24 = vunpack.c.h.s8.bf16 %v531_v15  ;;  %v532_v33 = vld [vmem:[%s7216_s10 + $0x1c0] sm:$0xff]  ;;  %v5831_v15 = vld [vmem:[%s7216_s10 + $0x248] sm:$0xff] }
  0xd5   : > { %697 = vmatpush1.bf16.msra.mxu0 %v596_v43  ;;  %779 = vmatpush1.bf16.msra.mxu1 %v598_v31  ;;  %v518_v43 = vld [vmem:[%s7216_s10 + $0x150] sm:$0xff]  ;;  %v620_v31 = vunpack.c.l.s8.bf16 %v516_v42  ;;  %v658_v42 = vunpack.c.h.s8.bf16 %v534_v34 }
  0xd6   : > { %698 = vmatprep.subr.bf16.mxu0 %v601_v47  ;;  %780 = vmatprep.subr.bf16.mxu1 %v603_v50  ;;  %v622_v47 = vunpack.c.l.s8.bf16 %v518_v43  ;;  %v626_v55 = vunpack.c.h.s8.bf16 %v518_v43 }
  0xd9   : > { %699 = vmatpush1.bf16.msra.mxu0 %v600_v63  ;;  %781 = vmatpush1.bf16.msra.mxu1 %v602_v0  ;;  %v6739_v27 = vpop.eup %6738  ;;  %v633_v63 = vunpack.c.h.s8.bf16 %v521_v51 }
  0xda   : > { %709 = vmatprep.subr.bf16.mxu0 %v605_v1  ;;  %791 = vmatprep.subr.bf16.mxu1 %v607_v3  ;;  %v6741_v32 = vpop.eup %6740  ;;  %v525_v1 = vld [vmem:[%s7216_s10 + $0x188] sm:$0xff]  ;;  %v632_v3 = vunpack.c.h.s8.bf16 %v520_v58 }
  0xdb   : > { %v6743_v35 = vpop.eup %6742  ;;  %v637_v5 = vunpack.c.l.s8.bf16 %v525_v1  ;;  %v641_v12 = vunpack.c.h.s8.bf16 %v525_v1 }
  0xdc   : > { %701 = vmatmul.mubr.bf16.vlgmr.msra.gmra.mrb[0].mxu0 %v472_v10  ;;  %783 = vmatmul.mubr.bf16.vlgmr.msra.gmra.mrb[0].mxu1 %v472_v10  ;;  %v6745_v36 = vpop.eup %6744  ;;  %v449_v39 = vcombine.low %v6739_v27, %v6743_v35  ;;  %v638_v10 = vunpack.c.l.s8.bf16 %v526_v8  ;;  %v652_v35 = vunpack.c.l.s8.bf16 %v532_v33 }
  0xdd   : > { %710 = vmatpush1.bf16.msra.mxu0 %v604_v13  ;;  %792 = vmatpush1.bf16.msra.mxu1 %v606_v14  ;;  %v451_v44 = vcombine.low %v6741_v32, %v6745_v36  ;;  %v643_v13 = vunpack.c.h.s8.bf16 %v527_v2  ;;  %v529_v14 = vld [vmem:[%s7216_s10 + $0x1a8] sm:$0xff]  ;;  %v654_v36 = vunpack.c.l.s8.bf16 %v534_v34  ;;  %v5834_v34 = vld [vmem:[%s7216_s10 + $0x260] sm:$0xff] }
  0xde   : > { %711 = vmatprep.subr.bf16.mxu0 %v609_v16  ;;  %793 = vmatprep.subr.bf16.mxu1 %v611_v17  ;;  %v7328_v45 = vmul.f32 %v449_v39, %v7280_v52  ;;  %v523_v52 = vld [vmem:[%s7216_s10 + $0x178] sm:$0xff]  ;;  %v640_v16 = vunpack.c.h.s8.bf16 %v524_v7  ;;  %v642_v17 = vunpack.c.h.s8.bf16 %v526_v8  ;;  %v645_v11 = vunpack.c.l.s8.bf16 %v529_v14  ;;  %v537_v39 = vld [vmem:[%s7216_s10 + $0x1e8] sm:$0xff]  ;;  %v5826_v8 = vld [vmem:[%s7216_s10 + $0x220] sm:$0xff] }
  0xdf   : > { %v7331_v46 = vmul.f32 %v451_v44, %v7283_v53  ;;  %v631_v57 = vunpack.c.l.s8.bf16 %v523_v52  ;;  %v635_v0 = vunpack.c.h.s8.bf16 %v523_v52  ;;  %v649_v23 = vunpack.c.h.s8.bf16 %v529_v14  ;;  %v5827_v2 = vld [vmem:[%s7216_s10 + $0x228] sm:$0xff] }
  0xe0   : > { %v661_v43 = vunpack.c.l.s8.bf16 %v537_v39  ;;  %v665_v51 = vunpack.c.h.s8.bf16 %v537_v39 }
  0xe1   : > { %712 = vmatpush1.bf16.msra.mxu0 %v608_v19  ;;  %794 = vmatpush1.bf16.msra.mxu1 %v610_v20  ;;  %v7335_v50 = vcombine.high %v7328_v45, %v7331_v46  ;;  %v528_v19 = vld [vmem:[%s7216_s10 + $0x1a0] sm:$0xff]  ;;  %v530_v20 = vld [vmem:[%s7216_s10 + $0x1b0] sm:$0xff] }
  0xe2   : > { %713 = vmatprep.subr.bf16.mxu0 %v613_v21  ;;  %795 = vmatprep.subr.bf16.mxu1 %v615_v22  ;;  %v644_v21 = vunpack.c.l.s8.bf16 %v528_v19  ;;  %v646_v22 = vunpack.c.l.s8.bf16 %v530_v20  ;;  %v648_v27 = vunpack.c.h.s8.bf16 %v528_v19 }
  0xe3   : > { %v475_v53 = vpack.c.bf16 %v7335_v50, %v7335_v50 }
  0xe5   : > { %714 = vmatpush1.bf16.msra.mxu0 %v612_v25  ;;  %796 = vmatpush1.bf16.msra.mxu1 %v614_v26  ;;  %v533_v25 = vld [vmem:[%s7216_s10 + $0x1c8] sm:$0xff]  ;;  %v535_v26 = vld [vmem:[%s7216_s10 + $0x1d8] sm:$0xff] }
  0xe6   : > { %715 = vmatprep.subr.bf16.mxu0 %v617_v28  ;;  %797 = vmatprep.subr.bf16.mxu1 %v619_v29  ;;  %v650_v28 = vunpack.c.h.s8.bf16 %v530_v20  ;;  %v653_v29 = vunpack.c.l.s8.bf16 %v533_v25  ;;  %v655_v32 = vunpack.c.l.s8.bf16 %v535_v26  ;;  %v5830_v20 = vld [vmem:[%s7216_s10 + $0x240] sm:$0xff] }
  0xe7   : > { %741 = vmatprep.mubr.bf16.mxu0 %v475_v53  ;;  %823 = vmatprep.mubr.bf16.mxu1 %v475_v53  ;;  %v5823_v53 = vld [vmem:[%s7216_s10 + $0x208] sm:$0xff] }
  0xe8   : > { %v966_v58 = vunpack.c.l.s8.bf16 %v5823_v53 }
  0xe9   : > { %716 = vmatpush1.bf16.msra.mxu0 %v616_v37  ;;  %798 = vmatpush1.bf16.msra.mxu1 %v618_v38  ;;  %v657_v37 = vunpack.c.h.s8.bf16 %v533_v25  ;;  %v659_v38 = vunpack.c.h.s8.bf16 %v535_v26  ;;  %v5835_v26 = vld [vmem:[%s7216_s10 + $0x268] sm:$0xff] }
  0xea   : > { %717 = vmatprep.subr.bf16.mxu0 %v621_v40  ;;  %799 = vmatprep.subr.bf16.mxu1 %v623_v41  ;;  %v539_v40 = vld [vmem:[%s7216_s10 + $0x1f8] sm:$0xff]  ;;  %v656_v41 = vunpack.c.h.s8.bf16 %v532_v33 }
  0xeb   : > { %v663_v44 = vunpack.c.l.s8.bf16 %v539_v40  ;;  %v667_v52 = vunpack.c.h.s8.bf16 %v539_v40  ;;  %v5839_v40 = vld [vmem:[%s7216_s10 + $0x288] sm:$0xff] }
  0xed   : > { %718 = vmatpush1.bf16.msra.mxu0 %v620_v31  ;;  %800 = vmatpush1.bf16.msra.mxu1 %v622_v47  ;;  %v536_v31 = vld [vmem:[%s7216_s10 + $0x1e0] sm:$0xff]  ;;  %v538_v47 = vld [vmem:[%s7216_s10 + $0x1f0] sm:$0xff] }
  0xee   : > { %719 = vmatprep.subr.bf16.mxu0 %v625_v48  ;;  %801 = vmatprep.subr.bf16.mxu1 %v627_v49  ;;  %v660_v48 = vunpack.c.l.s8.bf16 %v536_v31  ;;  %v662_v49 = vunpack.c.l.s8.bf16 %v538_v47 }
  0xf1   : > { %720 = vmatpush1.bf16.msra.mxu0 %v624_v54  ;;  %802 = vmatpush1.bf16.msra.mxu1 %v626_v55  ;;  %v5825_v54 = vld [vmem:[%s7216_s10 + $0x218] sm:$0xff]  ;;  %v7363_v55 = vcombine.low %v7328_v45, %v7331_v46  ;;  %v970_v46 = vunpack.c.h.s8.bf16 %v5823_v53 }
  0xf2   : > { %721 = vmatprep.subr.bf16.mxu0 %v629_v56  ;;  %803 = vmatprep.subr.bf16.mxu1 %v631_v57  ;;  %v664_v56 = vunpack.c.h.s8.bf16 %v536_v31  ;;  %v666_v57 = vunpack.c.h.s8.bf16 %v538_v47  ;;  %v968_v60 = vunpack.c.l.s8.bf16 %v5825_v54  ;;  %v972_v1 = vunpack.c.h.s8.bf16 %v5825_v54  ;;  %v5838_v47 = vld [vmem:[%s7216_s10 + $0x280] sm:$0xff]  ;;  %v5843_v54 = vld [vmem:[%s7216_s10 + $0x2a8] sm:$0xff] }
  0xf5   : > { %722 = vmatpush1.bf16.msra.mxu0 %v628_v61  ;;  %804 = vmatpush1.bf16.msra.mxu1 %v630_v62  ;;  %v5822_v61 = vld [vmem:[%s7216_s10 + $0x200] sm:$0xff]  ;;  %v5824_v62 = vld [vmem:[%s7216_s10 + $0x210] sm:$0xff] }
  0xf6   : > { %723 = vmatprep.subr.bf16.mxu0 %v633_v63  ;;  %805 = vmatprep.subr.bf16.mxu1 %v635_v0  ;;  %v474_v63 = vpack.c.bf16 %v7363_v55, %v7363_v55  ;;  %v965_v0 = vunpack.c.l.s8.bf16 %v5822_v61  ;;  %v967_v45 = vunpack.c.l.s8.bf16 %v5824_v62 }
  0xf9   : > { %724 = vmatpush1.bf16.msra.mxu0 %v632_v3  ;;  %806 = vmatpush1.bf16.msra.mxu1 %v634_v4  ;;  %v5829_v3 = vld [vmem:[%s7216_s10 + $0x238] sm:$0xff]  ;;  %v969_v4 = vunpack.c.h.s8.bf16 %v5822_v61 }
  0xfa   : > { %725 = vmatprep.subr.bf16.mxu0 %v637_v5  ;;  %807 = vmatprep.subr.bf16.mxu1 %v639_v6  ;;  %v971_v5 = vunpack.c.h.s8.bf16 %v5824_v62  ;;  %v974_v6 = vunpack.c.l.s8.bf16 %v5827_v2  ;;  %v976_v7 = vunpack.c.l.s8.bf16 %v5829_v3  ;;  %v980_v14 = vunpack.c.h.s8.bf16 %v5829_v3  ;;  %v5842_v62 = vld [vmem:[%s7216_s10 + $0x2a0] sm:$0xff]  ;;  %v5849_v3 = vld [vmem:[%s7216_s10 + $0x2d8] sm:$0xff] }
  0xfd   : > { %726 = vmatpush1.bf16.msra.mxu0 %v636_v9  ;;  %808 = vmatpush1.bf16.msra.mxu1 %v638_v10  ;;  %v5828_v9 = vld [vmem:[%s7216_s10 + $0x230] sm:$0xff]  ;;  %v973_v10 = vunpack.c.l.s8.bf16 %v5826_v8 }
  0xfe   : > { %727 = vmatprep.subr.bf16.mxu0 %v641_v12  ;;  %809 = vmatprep.subr.bf16.mxu1 %v643_v13  ;;  %v975_v12 = vunpack.c.l.s8.bf16 %v5828_v9  ;;  %v978_v13 = vunpack.c.h.s8.bf16 %v5827_v2  ;;  %v5847_v2 = vld [vmem:[%s7216_s10 + $0x2c8] sm:$0xff] }
 0x101   : > { %728 = vmatpush1.bf16.msra.mxu0 %v640_v16  ;;  %810 = vmatpush1.bf16.msra.mxu1 %v642_v17  ;;  %v5833_v16 = vld [vmem:[%s7216_s10 + $0x258] sm:$0xff]  ;;  %v977_v17 = vunpack.c.h.s8.bf16 %v5826_v8  ;;  %v5846_v8 = vld [vmem:[%s7216_s10 + $0x2c0] sm:$0xff] }
 0x102   : > { %729 = vmatprep.subr.bf16.mxu0 %v645_v11  ;;  %811 = vmatprep.subr.bf16.mxu1 %v647_v18  ;;  %v979_v11 = vunpack.c.h.s8.bf16 %v5828_v9  ;;  %v982_v18 = vunpack.c.l.s8.bf16 %v5831_v15  ;;  %v984_v19 = vunpack.c.l.s8.bf16 %v5833_v16  ;;  %v988_v25 = vunpack.c.h.s8.bf16 %v5833_v16  ;;  %v5848_v9 = vld [vmem:[%s7216_s10 + $0x2d0] sm:$0xff] }
 0x103   : > { %v1019_v16 = vunpack.c.h.s8.bf16 %v5848_v9 }
 0x105   : > { %730 = vmatpush1.bf16.msra.mxu0 %v644_v21  ;;  %812 = vmatpush1.bf16.msra.mxu1 %v646_v22  ;;  %v5832_v21 = vld [vmem:[%s7216_s10 + $0x250] sm:$0xff]  ;;  %v981_v22 = vunpack.c.l.s8.bf16 %v5830_v20 }
 0x106   : > { %731 = vmatprep.subr.bf16.mxu0 %v649_v23  ;;  %813 = vmatprep.subr.bf16.mxu1 %v651_v24  ;;  %v983_v23 = vunpack.c.l.s8.bf16 %v5832_v21  ;;  %v986_v24 = vunpack.c.h.s8.bf16 %v5831_v15  ;;  %v1017_v15 = vunpack.c.h.s8.bf16 %v5846_v8 }
 0x109   : > { %732 = vmatpush1.bf16.msra.mxu0 %v648_v27  ;;  %814 = vmatpush1.bf16.msra.mxu1 %v650_v28  ;;  %v5837_v27 = vld [vmem:[%s7216_s10 + $0x278] sm:$0xff]  ;;  %v985_v28 = vunpack.c.h.s8.bf16 %v5830_v20  ;;  %v5850_v20 = vld [vmem:[%s7216_s10 + $0x2e0] sm:$0xff] }
 0x10a   : > { %733 = vmatprep.subr.bf16.mxu0 %v653_v29  ;;  %815 = vmatprep.subr.bf16.mxu1 %v655_v32  ;;  %v987_v29 = vunpack.c.h.s8.bf16 %v5832_v21  ;;  %v990_v32 = vunpack.c.l.s8.bf16 %v5835_v26  ;;  %v992_v33 = vunpack.c.l.s8.bf16 %v5837_v27  ;;  %v996_v39 = vunpack.c.h.s8.bf16 %v5837_v27  ;;  %v5852_v21 = vld [vmem:[%s7216_s10 + $0x2f0] sm:$0xff] }
 0x10b   : > { %v1027_v27 = vunpack.c.h.s8.bf16 %v5852_v21 }
 0x10d   : > { %734 = vmatpush1.bf16.msra.mxu0 %v652_v35  ;;  %816 = vmatpush1.bf16.msra.mxu1 %v654_v36  ;;  %v5836_v35 = vld [vmem:[%s7216_s10 + $0x270] sm:$0xff]  ;;  %v989_v36 = vunpack.c.l.s8.bf16 %v5834_v34 }
 0x10e   : > { %735 = vmatprep.subr.bf16.mxu0 %v657_v37  ;;  %817 = vmatprep.subr.bf16.mxu1 %v659_v38  ;;  %v991_v37 = vunpack.c.l.s8.bf16 %v5836_v35  ;;  %v994_v38 = vunpack.c.h.s8.bf16 %v5835_v26  ;;  %v1025_v26 = vunpack.c.h.s8.bf16 %v5850_v20 }
 0x111   : > { %736 = vmatpush1.bf16.msra.mxu0 %v656_v41  ;;  %818 = vmatpush1.bf16.msra.mxu1 %v658_v42  ;;  %v5841_v41 = vld [vmem:[%s7216_s10 + $0x298] sm:$0xff]  ;;  %v993_v42 = vunpack.c.h.s8.bf16 %v5834_v34  ;;  %v834_v34 = vlaneseq }
 0x112   : > { %737 = vmatprep.subr.bf16.mxu0 %v661_v43  ;;  %819 = vmatprep.subr.bf16.mxu1 %v663_v44  ;;  %v995_v43 = vunpack.c.h.s8.bf16 %v5836_v35  ;;  %v998_v44 = vunpack.c.l.s8.bf16 %v5839_v40  ;;  %v1000_v31 = vunpack.c.l.s8.bf16 %v5841_v41  ;;  %v1004_v53 = vunpack.c.h.s8.bf16 %v5841_v41  ;;  %v858_v41 = vld [vmem:[%s7226_s6] sm:$0xf] }
 0x113   : > { %v835_v35 = vshrl.u32 %v834_v34, 7  ;;  %v5865_v34 = vld [vmem:[%s7216_s10 + $0x358] sm:$0xff] }
 0x115   : > { %738 = vmatpush1.bf16.msra.mxu0 %v660_v48  ;;  %820 = vmatpush1.bf16.msra.mxu1 %v662_v49  ;;  %v5840_v48 = vld [vmem:[%s7216_s10 + $0x290] sm:$0xff]  ;;  %v997_v49 = vunpack.c.l.s8.bf16 %v5838_v47 }
 0x116   : > { %739 = vmatprep.subr.bf16.mxu0 %v665_v51  ;;  %821 = vmatprep.subr.bf16.mxu1 %v667_v52  ;;  %v999_v51 = vunpack.c.l.s8.bf16 %v5840_v48  ;;  %v1002_v52 = vunpack.c.h.s8.bf16 %v5839_v40  ;;  %v7412_v40 = vsub.s32 3, %v835_v35 }
 0x119   : > { %740 = vmatpush1.bf16.msra.mxu0 %v664_v56  ;;  %822 = vmatpush1.bf16.msra.mxu1 %v666_v57  ;;  %v5845_v56 = vld [vmem:[%s7216_s10 + $0x2b8] sm:$0xff]  ;;  %v1001_v57 = vunpack.c.h.s8.bf16 %v5838_v47 }
 0x11a   : > { %1093 = vmatprep.subr.bf16.mxu0 %v966_v58  ;;  %1175 = vmatprep.subr.bf16.mxu1 %v968_v60  ;;  %v1003_v58 = vunpack.c.h.s8.bf16 %v5840_v48  ;;  %v1006_v60 = vunpack.c.l.s8.bf16 %v5843_v54  ;;  %v1008_v61 = vunpack.c.l.s8.bf16 %v5845_v56 }
 0x11c   : > { %742 = vmatmul.mubr.bf16.vlgmr.msra.gmra.mrb[0].mxu0 %v474_v63  ;;  %824 = vmatmul.mubr.bf16.vlgmr.msra.gmra.mrb[0].mxu1 %v474_v63  ;;  %v5844_v63 = vld [vmem:[%s7216_s10 + $0x2b0] sm:$0xff] }
 0x11d   : > { %1094 = vmatpush1.bf16.msra.mxu0 %v965_v0  ;;  %1176 = vmatpush1.bf16.msra.mxu1 %v967_v45  ;;  %v1005_v0 = vunpack.c.l.s8.bf16 %v5842_v62  ;;  %v1007_v45 = vunpack.c.l.s8.bf16 %v5844_v63 }
 0x11e   : > { %1095 = vmatprep.subr.bf16.mxu0 %v970_v46  ;;  %1177 = vmatprep.subr.bf16.mxu1 %v972_v1  ;;  %v1010_v46 = vunpack.c.h.s8.bf16 %v5843_v54  ;;  %v1012_v1 = vunpack.c.h.s8.bf16 %v5845_v56 }
 0x121   : > { %1096 = vmatpush1.bf16.msra.mxu0 %v969_v4  ;;  %1178 = vmatpush1.bf16.msra.mxu1 %v971_v5  ;;  %v1009_v4 = vunpack.c.h.s8.bf16 %v5842_v62  ;;  %v1011_v5 = vunpack.c.h.s8.bf16 %v5844_v63 }
 0x122   : > { %1097 = vmatprep.subr.bf16.mxu0 %v974_v6  ;;  %1179 = vmatprep.subr.bf16.mxu1 %v976_v7  ;;  %v1014_v6 = vunpack.c.l.s8.bf16 %v5847_v2  ;;  %v1016_v7 = vunpack.c.l.s8.bf16 %v5849_v3 }
 0x125   : > { %1098 = vmatpush1.bf16.msra.mxu0 %v973_v10  ;;  %1180 = vmatpush1.bf16.msra.mxu1 %v975_v12  ;;  %v1013_v10 = vunpack.c.l.s8.bf16 %v5846_v8  ;;  %v1015_v12 = vunpack.c.l.s8.bf16 %v5848_v9 }
 0x126   : > { %1099 = vmatprep.subr.bf16.mxu0 %v978_v13  ;;  %1181 = vmatprep.subr.bf16.mxu1 %v980_v14  ;;  %v1018_v13 = vunpack.c.h.s8.bf16 %v5847_v2  ;;  %v1020_v14 = vunpack.c.h.s8.bf16 %v5849_v3 }
 0x129   : > { %1100 = vmatpush1.bf16.msra.mxu0 %v977_v17  ;;  %1182 = vmatpush1.bf16.msra.mxu1 %v979_v11  ;;  %v5851_v17 = vld [vmem:[%s7216_s10 + $0x2e8] sm:$0xff]  ;;  %v5853_v11 = vld [vmem:[%s7216_s10 + $0x2f8] sm:$0xff] }
 0x12a   : > { %1101 = vmatprep.subr.bf16.mxu0 %v982_v18  ;;  %1183 = vmatprep.subr.bf16.mxu1 %v984_v19  ;;  %v1022_v18 = vunpack.c.l.s8.bf16 %v5851_v17  ;;  %v1024_v19 = vunpack.c.l.s8.bf16 %v5853_v11 }
 0x12d   : > { %1102 = vmatpush1.bf16.msra.mxu0 %v981_v22  ;;  %1184 = vmatpush1.bf16.msra.mxu1 %v983_v23  ;;  %v1021_v22 = vunpack.c.l.s8.bf16 %v5850_v20  ;;  %v1023_v23 = vunpack.c.l.s8.bf16 %v5852_v21 }
 0x12e   : > { %1103 = vmatprep.subr.bf16.mxu0 %v986_v24  ;;  %1185 = vmatprep.subr.bf16.mxu1 %v988_v25  ;;  %v1026_v24 = vunpack.c.h.s8.bf16 %v5851_v17  ;;  %v1028_v25 = vunpack.c.h.s8.bf16 %v5853_v11 }
 0x131   : > { %1104 = vmatpush1.bf16.msra.mxu0 %v985_v28  ;;  %1186 = vmatpush1.bf16.msra.mxu1 %v987_v29  ;;  %v7398_v28 = vld [vmem:[%s7216_s10 + $0x308] sm:$0xff]  ;;  %v7401_v29 = vld [vmem:[%s7216_s10 + $0x318] sm:$0xff] }
 0x132   : > { %1105 = vmatprep.subr.bf16.mxu0 %v990_v32  ;;  %1187 = vmatprep.subr.bf16.mxu1 %v992_v33  ;;  %v1030_v32 = vunpack.c.l.s8.bf16 %v7398_v28  ;;  %v1032_v33 = vunpack.c.l.s8.bf16 %v7401_v29  ;;  %v1034_v17 = vunpack.c.h.s8.bf16 %v7398_v28  ;;  %v1036_v11 = vunpack.c.h.s8.bf16 %v7401_v29 }
 0x135   : > { %1106 = vmatpush1.bf16.msra.mxu0 %v989_v36  ;;  %1188 = vmatpush1.bf16.msra.mxu1 %v991_v37  ;;  %v7405_v36 = vsub.s32 0, %v835_v35  ;;  %v7407_v37 = vsub.s32 2, %v835_v35 }
 0x136   : > { %1107 = vmatprep.subr.bf16.mxu0 %v994_v38  ;;  %1189 = vmatprep.subr.bf16.mxu1 %v996_v39  ;;  %v832_v38 = vld [vmem:[%s7223_s1] sm:$0xf]  ;;  %v7410_v39 = vsub.s32 1, %v835_v35 }
 0x137   : > { %v863_v47 = vrot.slane %v858_v41, %v7405_v36  ;;  %v871_v48 = vrot.slane %v858_v41, %v7407_v37 }
 0x139   : > { %1108 = vmatpush1.bf16.msra.mxu0 %v993_v42  ;;  %1190 = vmatpush1.bf16.msra.mxu1 %v995_v43  ;;  %v837_v42 = vrot.slane %v832_v38, %v7405_v36  ;;  %v845_v43 = vrot.slane %v832_v38, %v7407_v37 }
 0x13a   : > { %1109 = vmatprep.subr.bf16.mxu0 %v998_v44  ;;  %1191 = vmatprep.subr.bf16.mxu1 %v1000_v31  ;;  %v841_v44 = vrot.slane %v832_v38, %v7410_v39  ;;  %v849_v31 = vrot.slane %v832_v38, %v7412_v40 }
 0x13d   : > { %1110 = vmatpush1.bf16.msra.mxu0 %v997_v49  ;;  %1192 = vmatpush1.bf16.msra.mxu1 %v999_v51 }
 0x13e   : > { %1111 = vmatprep.subr.bf16.mxu0 %v1002_v52  ;;  %1193 = vmatprep.subr.bf16.mxu1 %v1004_v53  ;;  %v867_v52 = vrot.slane %v858_v41, %v7410_v39  ;;  %v875_v53 = vrot.slane %v858_v41, %v7412_v40 }
 0x141   : > { %1112 = vmatpush1.bf16.msra.mxu0 %v1001_v57  ;;  %1194 = vmatpush1.bf16.msra.mxu1 %v1003_v58 }
 0x142   : > { %1113 = vmatprep.subr.bf16.mxu0 %v1006_v60  ;;  %1195 = vmatprep.subr.bf16.mxu1 %v1008_v61 }
 0x145   : > { %1114 = vmatpush1.bf16.msra.mxu0 %v1005_v0  ;;  %1196 = vmatpush1.bf16.msra.mxu1 %v1007_v45 }
 0x146   : > { %1115 = vmatprep.subr.bf16.mxu0 %v1010_v46  ;;  %1197 = vmatprep.subr.bf16.mxu1 %v1012_v1 }
 0x149   : > { %1116 = vmatpush1.bf16.msra.mxu0 %v1009_v4  ;;  %1198 = vmatpush1.bf16.msra.mxu1 %v1011_v5  ;;  %v5854_v5 = vld [vmem:[%s7216_s10 + $0x300] sm:$0xff] }
 0x14a   : > { %1117 = vmatprep.subr.bf16.mxu0 %v1014_v6  ;;  %1199 = vmatprep.subr.bf16.mxu1 %v1016_v7  ;;  %v5856_v6 = vld [vmem:[%s7216_s10 + $0x310] sm:$0xff]  ;;  %v1033_v21 = vunpack.c.h.s8.bf16 %v5854_v5 }
 0x14d   : > { %1118 = vmatpush1.bf16.msra.mxu0 %v1013_v10  ;;  %1200 = vmatpush1.bf16.msra.mxu1 %v1015_v12 }
 0x14e   : > { %1119 = vmatprep.subr.bf16.mxu0 %v1018_v13  ;;  %1201 = vmatprep.subr.bf16.mxu1 %v1020_v14  ;;  %v1029_v13 = vunpack.c.l.s8.bf16 %v5854_v5  ;;  %v1031_v14 = vunpack.c.l.s8.bf16 %v5856_v6 }
 0x151   : > { %1120 = vmatpush1.bf16.msra.mxu0 %v1017_v15  ;;  %1202 = vmatpush1.bf16.msra.mxu1 %v1019_v16 }
 0x152   : > { %1121 = vmatprep.subr.bf16.mxu0 %v1022_v18  ;;  %1203 = vmatprep.subr.bf16.mxu1 %v1024_v19  ;;  %v5859_v18 = vld [vmem:[%s7216_s10 + $0x328] sm:$0xff]  ;;  %v5861_v19 = vld [vmem:[%s7216_s10 + $0x338] sm:$0xff] }
 0x153   : > { %v1042_v29 = vunpack.c.h.s8.bf16 %v5859_v18 }
 0x155   : > { %1122 = vmatpush1.bf16.msra.mxu0 %v1021_v22  ;;  %1204 = vmatpush1.bf16.msra.mxu1 %v1023_v23  ;;  %v1035_v22 = vunpack.c.h.s8.bf16 %v5856_v6  ;;  %v1038_v23 = vunpack.c.l.s8.bf16 %v5859_v18  ;;  %v5870_v6 = vld [vmem:[%s7216_s10 + $0x380] sm:$0xff] }
 0x156   : > { %1123 = vmatprep.subr.bf16.mxu0 %v1026_v24  ;;  %1205 = vmatprep.subr.bf16.mxu1 %v1028_v25  ;;  %v1040_v24 = vunpack.c.l.s8.bf16 %v5861_v19  ;;  %v5858_v25 = vld [vmem:[%s7216_s10 + $0x320] sm:$0xff] }
 0x157   : > { %v1041_v35 = vunpack.c.h.s8.bf16 %v5858_v25  ;;  %v5874_v18 = vld [vmem:[%s7216_s10 + $0x3a0] sm:$0xff] }
 0x159   : > { %1124 = vmatpush1.bf16.msra.mxu0 %v1025_v26  ;;  %1206 = vmatpush1.bf16.msra.mxu1 %v1027_v27  ;;  %v5860_v26 = vld [vmem:[%s7216_s10 + $0x330] sm:$0xff]  ;;  %v1037_v27 = vunpack.c.l.s8.bf16 %v5858_v25  ;;  %v5881_v25 = vld [vmem:[%s7216_s10 + $0x3d8] sm:$0xff] }
 0x15a   : > { %1134 = vmatprep.subr.bf16.mxu0 %v1030_v32  ;;  %1216 = vmatprep.subr.bf16.mxu1 %v1032_v33  ;;  %v1039_v28 = vunpack.c.l.s8.bf16 %v5860_v26  ;;  %v1044_v32 = vunpack.c.h.s8.bf16 %v5861_v19  ;;  %v5863_v33 = vld [vmem:[%s7216_s10 + $0x348] sm:$0xff]  ;;  %v1043_v38 = vunpack.c.h.s8.bf16 %v5860_v26  ;;  %v5876_v19 = vld [vmem:[%s7216_s10 + $0x3b0] sm:$0xff]  ;;  %v1073_v26 = vunpack.c.h.s8.bf16 %v5874_v18 }
 0x15b   : > { %v1046_v41 = vunpack.c.l.s8.bf16 %v5863_v33 }
 0x1ef   : > { %v743_v49 = vpop.f32.mrb[0].mxu0  ;;  %v825_v51 = vpop.f32.mrb[0].mxu1 }
 0x1f0   : > { %v854_v54 = vmul.f32 %v837_v42, %v743_v49  ;;  %v856_v56 = vmul.f32 %v845_v43, %v825_v51  ;;  %v745_v57 = vpop.f32.mrb[1].mxu0  ;;  %v827_v58 = vpop.f32.mrb[1].mxu1  ;;  %v1048_v42 = vunpack.c.l.s8.bf16 %v5865_v34  ;;  %v5862_v43 = vld [vmem:[%s7216_s10 + $0x340] sm:$0xff]  ;;  %v1052_v49 = vunpack.c.h.s8.bf16 %v5865_v34  ;;  %v5867_v51 = vld [vmem:[%s7216_s10 + $0x368] sm:$0xff] }
 0x1f1   : > { %v855_v60 = vmul.f32 %v841_v44, %v745_v57  ;;  %v857_v61 = vmul.f32 %v849_v31, %v827_v58  ;;  %v747_v62 = vpop.f32.mrb[2].mxu0  ;;  %v829_v63 = vpop.f32.mrb[2].mxu1  ;;  %v5864_v44 = vld [vmem:[%s7216_s10 + $0x350] sm:$0xff]  ;;  %v1045_v31 = vunpack.c.l.s8.bf16 %v5862_v43  ;;  %v5866_v58 = vld [vmem:[%s7216_s10 + $0x360] sm:$0xff] }
 0x1f2   : > { %v880_v0 = vadd.f32 %v863_v47, %v854_v54  ;;  %v7423_v45 = vadd.f32 %v871_v48, %v856_v56  ;;  %v748_v46 = vpop.f32.mrb[3].mxu0  ;;  %v830_v1 = vpop.f32.mrb[3].mxu1  ;;  %v1047_v47 = vunpack.c.l.s8.bf16 %v5864_v44  ;;  %v1050_v48 = vunpack.c.h.s8.bf16 %v5863_v33  ;;  %v5880_v33 = vld [vmem:[%s7216_s10 + $0x3d0] sm:$0xff] }
 0x1f3   : > { %v881_v2 = vadd.f32 %v867_v52, %v855_v60  ;;  %v883_v3 = vadd.f32 %v875_v53, %v857_v61  ;;  %v5869_v52 = vld [vmem:[%s7216_s10 + $0x378] sm:$0xff]  ;;  %v1049_v53 = vunpack.c.h.s8.bf16 %v5862_v43  ;;  %v1051_v54 = vunpack.c.h.s8.bf16 %v5864_v44  ;;  %v5868_v60 = vld [vmem:[%s7216_s10 + $0x370] sm:$0xff]  ;;  %v5871_v46 = vld [vmem:[%s7216_s10 + $0x388] sm:$0xff] }
 0x1f4   : > { %vm884_vm1 = vcmp.ge.f32.partialorder %v880_v0, 0.0  ;;  %v888_v4 = vmul.f32 0.2, %v880_v0  ;;  %v1054_v56 = vunpack.c.l.s8.bf16 %v5867_v51  ;;  %v1056_v57 = vunpack.c.l.s8.bf16 %v5869_v52  ;;  %v5873_v1 = vld [vmem:[%s7216_s10 + $0x398] sm:$0xff] }
 0x1f5   : > { %v889_v7 = vmul.f32 0.2, %v881_v2  ;;  %v891_v8 = vmul.f32 0.2, %v883_v3  ;;  %vm885_vm2 = vcmp.ge.f32.partialorder %v881_v2, 0.0  ;;  %vm887_vm3 = vcmp.ge.f32.partialorder %v883_v3, 0.0 }
 0x1f6   : > { %v892_v9 = vsel %vm884_vm1, %v880_v0, %v888_v4  ;;  %v1053_v61 = vunpack.c.l.s8.bf16 %v5866_v58  ;;  %v1055_v62 = vunpack.c.l.s8.bf16 %v5868_v60  ;;  %v1058_v63 = vunpack.c.h.s8.bf16 %v5867_v51  ;;  %v5885_v43 = vld [vmem:[%s7216_s10 + $0x3f8] sm:$0xff]  ;;  %v5884_v51 = vld [vmem:[%s7216_s10 + $0x3f0] sm:$0xff] }
 0x1f7   : > { %v893_v10 = vsel %vm885_vm2, %v881_v2, %v889_v7  ;;  %v895_v15 = vsel %vm887_vm3, %v883_v3, %v891_v8  ;;  %v896_v16 = vpack.c.bf16 %v892_v9, %v892_v9  ;;  %v1060_v0 = vunpack.c.h.s8.bf16 %v5869_v52  ;;  %v5872_v7 = vld [vmem:[%s7216_s10 + $0x390] sm:$0xff] }
 0x1f8   : > { %v897_v12 = vpack.c.bf16 %v893_v10, %v893_v10  ;;  %v899_v20 = vpack.c.bf16 %v895_v15, %v895_v15  ;;  %v1057_v2 = vunpack.c.h.s8.bf16 %v5866_v58  ;;  %v1059_v3 = vunpack.c.h.s8.bf16 %v5868_v60  ;;  %v5889_v58 = vld [vmem:[%s7216_s10 + $0x408] sm:$0xff]  ;;  %v5891_v60 = vld [vmem:[%s7216_s10 + $0x418] sm:$0xff] }
 0x1f9   : > { %v1062_v4 = vunpack.c.l.s8.bf16 %v5871_v46  ;;  %v1064_v5 = vunpack.c.l.s8.bf16 %v5873_v1  ;;  %v1061_v8 = vunpack.c.l.s8.bf16 %v5870_v6  ;;  %v1063_v9 = vunpack.c.l.s8.bf16 %v5872_v7 }
 0x1fa   : > { %1125 = vmatprep.mubr.bf16.mxu0 %v897_v12  ;;  %1207 = vmatprep.mubr.bf16.mxu1 %v897_v12  ;;  %v1066_v10 = vunpack.c.h.s8.bf16 %v5871_v46  ;;  %v1068_v12 = vunpack.c.h.s8.bf16 %v5873_v1  ;;  %v1065_v15 = vunpack.c.h.s8.bf16 %v5870_v6  ;;  %vm886_vm4 = vcmp.ge.f32.partialorder %v7423_v45, 0.0  ;;  %v5888_v46 = vld [vmem:[%s7216_s10 + $0x400] sm:$0xff]  ;;  %v5890_v1 = vld [vmem:[%s7216_s10 + $0x410] sm:$0xff] }
 0x1fb   : > { %1126 = vmatmul.mubr.bf16.vlgmr.msra.gmra.mrb[4].mxu0 %v896_v16  ;;  %1208 = vmatmul.mubr.bf16.vlgmr.msra.gmra.mrb[4].mxu1 %v896_v16  ;;  %v1067_v16 = vunpack.c.h.s8.bf16 %v5872_v7  ;;  %v1405_v6 = vunpack.c.h.s8.bf16 %v5889_v58  ;;  %v1407_v7 = vunpack.c.h.s8.bf16 %v5891_v60 }
 0x1fc   : > { %1135 = vmatpush1.bf16.msra.mxu0 %v1029_v13  ;;  %1217 = vmatpush1.bf16.msra.mxu1 %v1031_v14  ;;  %v5875_v13 = vld [vmem:[%s7216_s10 + $0x3a8] sm:$0xff]  ;;  %v5877_v14 = vld [vmem:[%s7216_s10 + $0x3b8] sm:$0xff] }
 0x1fd   : > { %1166 = vmatprep.mubr.bf16.mxu0 %v899_v20  ;;  %1248 = vmatprep.mubr.bf16.mxu1 %v899_v20  ;;  %v1069_v20 = vunpack.c.l.s8.bf16 %v5874_v18 }
 0x1fe   : > { %1136 = vmatprep.subr.bf16.mxu0 %v1034_v17  ;;  %1218 = vmatprep.subr.bf16.mxu1 %v1036_v11  ;;  %v1070_v17 = vunpack.c.l.s8.bf16 %v5875_v13  ;;  %v1072_v11 = vunpack.c.l.s8.bf16 %v5877_v14 }
 0x200   : > { %1137 = vmatpush1.bf16.msra.mxu0 %v1033_v21  ;;  %1219 = vmatpush1.bf16.msra.mxu1 %v1035_v22  ;;  %v1071_v21 = vunpack.c.l.s8.bf16 %v5876_v19  ;;  %v1074_v22 = vunpack.c.h.s8.bf16 %v5875_v13 }
 0x201   : > { %1138 = vmatprep.subr.bf16.mxu0 %v1038_v23  ;;  %1220 = vmatprep.subr.bf16.mxu1 %v1040_v24  ;;  %v1076_v23 = vunpack.c.h.s8.bf16 %v5877_v14  ;;  %v5879_v24 = vld [vmem:[%s7216_s10 + $0x3c8] sm:$0xff]  ;;  %v5892_v14 = vld [vmem:[%s7216_s10 + $0x420] sm:$0xff] }
 0x204   : > { %1139 = vmatpush1.bf16.msra.mxu0 %v1037_v27  ;;  %1221 = vmatpush1.bf16.msra.mxu1 %v1039_v28  ;;  %v1075_v27 = vunpack.c.h.s8.bf16 %v5876_v19  ;;  %v1078_v28 = vunpack.c.l.s8.bf16 %v5879_v24  ;;  %v5897_v19 = vld [vmem:[%s7216_s10 + $0x448] sm:$0xff] }
 0x205   : > { %1140 = vmatprep.subr.bf16.mxu0 %v1042_v29  ;;  %1222 = vmatprep.subr.bf16.mxu1 %v1044_v32  ;;  %v1080_v29 = vunpack.c.l.s8.bf16 %v5881_v25  ;;  %v5878_v32 = vld [vmem:[%s7216_s10 + $0x3c0] sm:$0xff] }
 0x206   : > { %v1077_v34 = vunpack.c.l.s8.bf16 %v5878_v32  ;;  %v1081_v44 = vunpack.c.h.s8.bf16 %v5878_v32 }
 0x208   : > { %1141 = vmatpush1.bf16.msra.mxu0 %v1041_v35  ;;  %1223 = vmatpush1.bf16.msra.mxu1 %v1043_v38  ;;  %v1079_v35 = vunpack.c.l.s8.bf16 %v5880_v33  ;;  %v1082_v38 = vunpack.c.h.s8.bf16 %v5879_v24 }
 0x209   : > { %1142 = vmatprep.subr.bf16.mxu0 %v1046_v41  ;;  %1224 = vmatprep.subr.bf16.mxu1 %v1048_v42  ;;  %v1084_v41 = vunpack.c.h.s8.bf16 %v5881_v25  ;;  %v5883_v42 = vld [vmem:[%s7216_s10 + $0x3e8] sm:$0xff]  ;;  %v5896_v25 = vld [vmem:[%s7216_s10 + $0x440] sm:$0xff] }
 0x20c   : > { %1143 = vmatpush1.bf16.msra.mxu0 %v1045_v31  ;;  %1225 = vmatpush1.bf16.msra.mxu1 %v1047_v47  ;;  %v1083_v31 = vunpack.c.h.s8.bf16 %v5880_v33  ;;  %v1086_v47 = vunpack.c.l.s8.bf16 %v5883_v42  ;;  %v5901_v33 = vld [vmem:[%s7216_s10 + $0x468] sm:$0xff] }
 0x20d   : > { %1144 = vmatprep.subr.bf16.mxu0 %v1050_v48  ;;  %1226 = vmatprep.subr.bf16.mxu1 %v1052_v49  ;;  %v1088_v48 = vunpack.c.l.s8.bf16 %v5885_v43  ;;  %v5882_v49 = vld [vmem:[%s7216_s10 + $0x3e0] sm:$0xff] }
 0x20e   : > { %v1085_v52 = vunpack.c.l.s8.bf16 %v5882_v49 }
 0x210   : > { %1145 = vmatpush1.bf16.msra.mxu0 %v1049_v53  ;;  %1227 = vmatpush1.bf16.msra.mxu1 %v1051_v54  ;;  %v1087_v53 = vunpack.c.l.s8.bf16 %v5884_v51  ;;  %v1090_v54 = vunpack.c.h.s8.bf16 %v5883_v42 }
 0x211   : > { %1146 = vmatprep.subr.bf16.mxu0 %v1054_v56  ;;  %1228 = vmatprep.subr.bf16.mxu1 %v1056_v57  ;;  %v1092_v56 = vunpack.c.h.s8.bf16 %v5885_v43  ;;  %v890_v57 = vmul.f32 0.2, %v7423_v45  ;;  %v5900_v43 = vld [vmem:[%s7216_s10 + $0x460] sm:$0xff] }
 0x214   : > { %1147 = vmatpush1.bf16.msra.mxu0 %v1053_v61  ;;  %1229 = vmatpush1.bf16.msra.mxu1 %v1055_v62  ;;  %v1089_v61 = vunpack.c.h.s8.bf16 %v5882_v49  ;;  %v1091_v62 = vunpack.c.h.s8.bf16 %v5884_v51  ;;  %v5905_v51 = vld [vmem:[%s7216_s10 + $0x488] sm:$0xff] }
 0x215   : > { %1148 = vmatprep.subr.bf16.mxu0 %v1058_v63  ;;  %1230 = vmatprep.subr.bf16.mxu1 %v1060_v0  ;;  %v1401_v63 = vunpack.c.l.s8.bf16 %v5889_v58  ;;  %v1403_v0 = vunpack.c.l.s8.bf16 %v5891_v60  ;;  %v5904_v58 = vld [vmem:[%s7216_s10 + $0x480] sm:$0xff]  ;;  %v5906_v60 = vld [vmem:[%s7216_s10 + $0x490] sm:$0xff] }
 0x218   : > { %1149 = vmatpush1.bf16.msra.mxu0 %v1057_v2  ;;  %1231 = vmatpush1.bf16.msra.mxu1 %v1059_v3  ;;  %v894_v2 = vsel %vm886_vm4, %v7423_v45, %v890_v57  ;;  %v1400_v3 = vunpack.c.l.s8.bf16 %v5888_v46  ;;  %v1406_v45 = vunpack.c.h.s8.bf16 %v5890_v1 }
 0x219   : > { %1150 = vmatprep.subr.bf16.mxu0 %v1062_v4  ;;  %1232 = vmatprep.subr.bf16.mxu1 %v1064_v5  ;;  %v1402_v4 = vunpack.c.l.s8.bf16 %v5890_v1  ;;  %v898_v5 = vpack.c.bf16 %v894_v2, %v894_v2  ;;  %v5911_v1 = vld [vmem:[%s7216_s10 + $0x4b8] sm:$0xff]  ;;  %v1436_v2 = vunpack.c.h.s8.bf16 %v5904_v58 }
 0x21c   : > { %1151 = vmatpush1.bf16.msra.mxu0 %v1061_v8  ;;  %1233 = vmatpush1.bf16.msra.mxu1 %v1063_v9  ;;  %v5893_v8 = vld [vmem:[%s7216_s10 + $0x428] sm:$0xff]  ;;  %v5895_v9 = vld [vmem:[%s7216_s10 + $0x438] sm:$0xff] }
 0x21d   : > { %1152 = vmatprep.subr.bf16.mxu0 %v1066_v10  ;;  %1234 = vmatprep.subr.bf16.mxu1 %v1068_v12  ;;  %v1404_v10 = vunpack.c.h.s8.bf16 %v5888_v46  ;;  %v1409_v12 = vunpack.c.l.s8.bf16 %v5893_v8  ;;  %v1411_v13 = vunpack.c.l.s8.bf16 %v5895_v9  ;;  %v1415_v18 = vunpack.c.h.s8.bf16 %v5895_v9  ;;  %v5909_v46 = vld [vmem:[%s7216_s10 + $0x4a8] sm:$0xff] }
 0x220   : > { %1153 = vmatpush1.bf16.msra.mxu0 %v1065_v15  ;;  %1235 = vmatpush1.bf16.msra.mxu1 %v1067_v16  ;;  %v5894_v15 = vld [vmem:[%s7216_s10 + $0x430] sm:$0xff]  ;;  %v1408_v16 = vunpack.c.l.s8.bf16 %v5892_v14 }
 0x221   : > { %1154 = vmatprep.subr.bf16.mxu0 %v1070_v17  ;;  %1236 = vmatprep.subr.bf16.mxu1 %v1072_v11  ;;  %v1410_v17 = vunpack.c.l.s8.bf16 %v5894_v15  ;;  %v1413_v11 = vunpack.c.h.s8.bf16 %v5893_v8 }
 0x224   : > { %1155 = vmatpush1.bf16.msra.mxu0 %v1069_v20  ;;  %1237 = vmatpush1.bf16.msra.mxu1 %v1071_v21  ;;  %v5899_v20 = vld [vmem:[%s7216_s10 + $0x458] sm:$0xff]  ;;  %v1412_v21 = vunpack.c.h.s8.bf16 %v5892_v14 }
 0x225   : > { %1156 = vmatprep.subr.bf16.mxu0 %v1074_v22  ;;  %1238 = vmatprep.subr.bf16.mxu1 %v1076_v23  ;;  %v1414_v22 = vunpack.c.h.s8.bf16 %v5894_v15  ;;  %v1417_v23 = vunpack.c.l.s8.bf16 %v5897_v19  ;;  %v1419_v24 = vunpack.c.l.s8.bf16 %v5899_v20  ;;  %v1423_v32 = vunpack.c.h.s8.bf16 %v5899_v20 }
 0x228   : > { %1157 = vmatpush1.bf16.msra.mxu0 %v1073_v26  ;;  %1239 = vmatpush1.bf16.msra.mxu1 %v1075_v27  ;;  %v5898_v26 = vld [vmem:[%s7216_s10 + $0x450] sm:$0xff]  ;;  %v1416_v27 = vunpack.c.l.s8.bf16 %v5896_v25 }
 0x229   : > { %1158 = vmatprep.subr.bf16.mxu0 %v1078_v28  ;;  %1240 = vmatprep.subr.bf16.mxu1 %v1080_v29  ;;  %v1418_v28 = vunpack.c.l.s8.bf16 %v5898_v26  ;;  %v1421_v29 = vunpack.c.h.s8.bf16 %v5897_v19 }
 0x22c   : > { %1159 = vmatpush1.bf16.msra.mxu0 %v1077_v34  ;;  %1241 = vmatpush1.bf16.msra.mxu1 %v1079_v35  ;;  %v5903_v34 = vld [vmem:[%s7216_s10 + $0x478] sm:$0xff]  ;;  %v1420_v35 = vunpack.c.h.s8.bf16 %v5896_v25  ;;  %v5917_v25 = vld [vmem:[%s7216_s10 + $0x4e8] sm:$0xff] }
 0x22d   : > { %1160 = vmatprep.subr.bf16.mxu0 %v1082_v38  ;;  %1242 = vmatprep.subr.bf16.mxu1 %v1084_v41  ;;  %v1422_v38 = vunpack.c.h.s8.bf16 %v5898_v26  ;;  %v1425_v41 = vunpack.c.l.s8.bf16 %v5901_v33  ;;  %v1427_v42 = vunpack.c.l.s8.bf16 %v5903_v34  ;;  %v1431_v49 = vunpack.c.h.s8.bf16 %v5903_v34  ;;  %v5919_v26 = vld [vmem:[%s7216_s10 + $0x4f8] sm:$0xff] }
 0x230   : > { %1161 = vmatpush1.bf16.msra.mxu0 %v1081_v44  ;;  %1243 = vmatpush1.bf16.msra.mxu1 %v1083_v31  ;;  %v5902_v44 = vld [vmem:[%s7216_s10 + $0x470] sm:$0xff]  ;;  %v1424_v31 = vunpack.c.l.s8.bf16 %v5900_v43 }
 0x231   : > { %1162 = vmatprep.subr.bf16.mxu0 %v1086_v47  ;;  %1244 = vmatprep.subr.bf16.mxu1 %v1088_v48  ;;  %v1426_v47 = vunpack.c.l.s8.bf16 %v5902_v44  ;;  %v1429_v48 = vunpack.c.h.s8.bf16 %v5901_v33 }
 0x234   : > { %1163 = vmatpush1.bf16.msra.mxu0 %v1085_v52  ;;  %1245 = vmatpush1.bf16.msra.mxu1 %v1087_v53  ;;  %v5907_v52 = vld [vmem:[%s7216_s10 + $0x498] sm:$0xff]  ;;  %v1428_v53 = vunpack.c.h.s8.bf16 %v5900_v43  ;;  %v7493_v43 = vld [vmem:[%s7216_s10 + $0x508] sm:$0xff] }
 0x235   : > { %1164 = vmatprep.subr.bf16.mxu0 %v1090_v54  ;;  %1246 = vmatprep.subr.bf16.mxu1 %v1092_v56  ;;  %v1430_v54 = vunpack.c.h.s8.bf16 %v5902_v44  ;;  %v1433_v56 = vunpack.c.l.s8.bf16 %v5905_v51  ;;  %v1435_v57 = vunpack.c.l.s8.bf16 %v5907_v52  ;;  %v7496_v44 = vld [vmem:[%s7216_s10 + $0x518] sm:$0xff] }
 0x238   : > { %1165 = vmatpush1.bf16.msra.mxu0 %v1089_v61  ;;  %1247 = vmatpush1.bf16.msra.mxu1 %v1091_v62  ;;  %v1432_v61 = vunpack.c.l.s8.bf16 %v5904_v58  ;;  %v1434_v62 = vunpack.c.l.s8.bf16 %v5906_v60 }
 0x239   : > { %1528 = vmatprep.subr.bf16.mxu0 %v1401_v63  ;;  %1610 = vmatprep.subr.bf16.mxu1 %v1403_v0  ;;  %v1437_v63 = vunpack.c.h.s8.bf16 %v5905_v51  ;;  %v1439_v0 = vunpack.c.h.s8.bf16 %v5907_v52 }
 0x23b   : > { %1167 = vmatmul.mubr.bf16.vlgmr.msra.gmra.mrb[4].mxu0 %v898_v5  ;;  %1249 = vmatmul.mubr.bf16.vlgmr.msra.gmra.mrb[4].mxu1 %v898_v5  ;;  %v1443_v5 = vunpack.c.l.s8.bf16 %v5911_v1 }
 0x23c   : > { %1529 = vmatpush1.bf16.msra.mxu0 %v1400_v3  ;;  %1611 = vmatpush1.bf16.msra.mxu1 %v1402_v4  ;;  %v1438_v3 = vunpack.c.h.s8.bf16 %v5906_v60  ;;  %v1441_v4 = vunpack.c.l.s8.bf16 %v5909_v46 }
 0x23d   : > { %1530 = vmatprep.subr.bf16.mxu0 %v1405_v6  ;;  %1612 = vmatprep.subr.bf16.mxu1 %v1407_v7  ;;  %v5908_v6 = vld [vmem:[%s7216_s10 + $0x4a0] sm:$0xff]  ;;  %v5910_v7 = vld [vmem:[%s7216_s10 + $0x4b0] sm:$0xff] }
 0x23e   : > { %v1440_v8 = vunpack.c.l.s8.bf16 %v5908_v6  ;;  %v1442_v9 = vunpack.c.l.s8.bf16 %v5910_v7  ;;  %v1444_v14 = vunpack.c.h.s8.bf16 %v5908_v6  ;;  %v1446_v15 = vunpack.c.h.s8.bf16 %v5910_v7 }
 0x240   : > { %1531 = vmatpush1.bf16.msra.mxu0 %v1404_v10  ;;  %1613 = vmatpush1.bf16.msra.mxu1 %v1406_v45  ;;  %v1445_v10 = vunpack.c.h.s8.bf16 %v5909_v46  ;;  %v1447_v45 = vunpack.c.h.s8.bf16 %v5911_v1 }
 0x241   : > { %1532 = vmatprep.subr.bf16.mxu0 %v1409_v12  ;;  %1614 = vmatprep.subr.bf16.mxu1 %v1411_v13  ;;  %v5913_v12 = vld [vmem:[%s7216_s10 + $0x4c8] sm:$0xff]  ;;  %v5915_v13 = vld [vmem:[%s7216_s10 + $0x4d8] sm:$0xff] }
 0x244   : > { %1533 = vmatpush1.bf16.msra.mxu0 %v1408_v16  ;;  %1615 = vmatpush1.bf16.msra.mxu1 %v1410_v17  ;;  %v1449_v16 = vunpack.c.l.s8.bf16 %v5913_v12  ;;  %v1451_v17 = vunpack.c.l.s8.bf16 %v5915_v13 }
 0x245   : > { %1534 = vmatprep.subr.bf16.mxu0 %v1413_v11  ;;  %1616 = vmatprep.subr.bf16.mxu1 %v1415_v18  ;;  %v5912_v11 = vld [vmem:[%s7216_s10 + $0x4c0] sm:$0xff]  ;;  %v5914_v18 = vld [vmem:[%s7216_s10 + $0x4d0] sm:$0xff] }
 0x246   : > { %v1448_v19 = vunpack.c.l.s8.bf16 %v5912_v11  ;;  %v1450_v20 = vunpack.c.l.s8.bf16 %v5914_v18 }
 0x248   : > { %1535 = vmatpush1.bf16.msra.mxu0 %v1412_v21  ;;  %1617 = vmatpush1.bf16.msra.mxu1 %v1414_v22  ;;  %v1453_v21 = vunpack.c.h.s8.bf16 %v5913_v12  ;;  %v1455_v22 = vunpack.c.h.s8.bf16 %v5915_v13 }
 0x249   : > { %1536 = vmatprep.subr.bf16.mxu0 %v1417_v23  ;;  %1618 = vmatprep.subr.bf16.mxu1 %v1419_v24  ;;  %v1452_v23 = vunpack.c.h.s8.bf16 %v5912_v11  ;;  %v1454_v24 = vunpack.c.h.s8.bf16 %v5914_v18 }
 0x24c   : > { %1537 = vmatpush1.bf16.msra.mxu0 %v1416_v27  ;;  %1619 = vmatpush1.bf16.msra.mxu1 %v1418_v28  ;;  %v1457_v27 = vunpack.c.l.s8.bf16 %v5917_v25  ;;  %v1459_v28 = vunpack.c.l.s8.bf16 %v5919_v26 }
 0x24d   : > { %1538 = vmatprep.subr.bf16.mxu0 %v1421_v29  ;;  %1620 = vmatprep.subr.bf16.mxu1 %v1423_v32  ;;  %v5916_v29 = vld [vmem:[%s7216_s10 + $0x4e0] sm:$0xff]  ;;  %v5918_v32 = vld [vmem:[%s7216_s10 + $0x4f0] sm:$0xff] }
 0x24e   : > { %v1456_v33 = vunpack.c.l.s8.bf16 %v5916_v29  ;;  %v1458_v34 = vunpack.c.l.s8.bf16 %v5918_v32 }
 0x250   : > { %1539 = vmatpush1.bf16.msra.mxu0 %v1420_v35  ;;  %1621 = vmatpush1.bf16.msra.mxu1 %v1422_v38  ;;  %v1461_v35 = vunpack.c.h.s8.bf16 %v5917_v25  ;;  %v1463_v38 = vunpack.c.h.s8.bf16 %v5919_v26 }
 0x251   : > { %1540 = vmatprep.subr.bf16.mxu0 %v1425_v41  ;;  %1622 = vmatprep.subr.bf16.mxu1 %v1427_v42  ;;  %v1460_v41 = vunpack.c.h.s8.bf16 %v5916_v29  ;;  %v1462_v42 = vunpack.c.h.s8.bf16 %v5918_v32  ;;  %v5925_v29 = vld [vmem:[%s7216_s10 + $0x528] sm:$0xff]  ;;  %v5927_v32 = vld [vmem:[%s7216_s10 + $0x538] sm:$0xff] }
 0x254   : > { %1541 = vmatpush1.bf16.msra.mxu0 %v1424_v31  ;;  %1623 = vmatpush1.bf16.msra.mxu1 %v1426_v47  ;;  %v1465_v31 = vunpack.c.l.s8.bf16 %v7493_v43  ;;  %v1467_v47 = vunpack.c.l.s8.bf16 %v7496_v44 }
 0x255   : > { %1542 = vmatprep.subr.bf16.mxu0 %v1429_v48  ;;  %1624 = vmatprep.subr.bf16.mxu1 %v1431_v49  ;;  %v5886_v48 = vld [vmem:[%s7223_s1 + $0x4] sm:$0xf] }
 0x256   : > { %v5887_v49 = vld [vmem:[%s7226_s6 + $0x4] sm:$0xf]  ;;  %v1263_v51 = vrot.slane %v5886_v48, %v7405_v36  ;;  %v1271_v52 = vrot.slane %v5886_v48, %v7407_v37 }
 0x258   : > { %1543 = vmatpush1.bf16.msra.mxu0 %v1428_v53  ;;  %1625 = vmatpush1.bf16.msra.mxu1 %v1430_v54  ;;  %v1267_v53 = vrot.slane %v5886_v48, %v7410_v39  ;;  %v1275_v54 = vrot.slane %v5886_v48, %v7412_v40  ;;  %v5929_v48 = vld [vmem:[%s7216_s10 + $0x548] sm:$0xff] }
 0x259   : > { %1544 = vmatprep.subr.bf16.mxu0 %v1433_v56  ;;  %1626 = vmatprep.subr.bf16.mxu1 %v1435_v57  ;;  %v1290_v56 = vrot.slane %v5887_v49, %v7405_v36  ;;  %v1298_v57 = vrot.slane %v5887_v49, %v7407_v37 }
 0x25c   : > { %1545 = vmatpush1.bf16.msra.mxu0 %v1432_v61  ;;  %1627 = vmatpush1.bf16.msra.mxu1 %v1434_v62  ;;  %v1294_v61 = vrot.slane %v5887_v49, %v7410_v39  ;;  %v1302_v62 = vrot.slane %v5887_v49, %v7412_v40  ;;  %v5931_v49 = vld [vmem:[%s7216_s10 + $0x558] sm:$0xff] }
 0x25d   : > { %1546 = vmatprep.subr.bf16.mxu0 %v1437_v63  ;;  %1628 = vmatprep.subr.bf16.mxu1 %v1439_v0 }
 0x260   : > { %1547 = vmatpush1.bf16.msra.mxu0 %v1436_v2  ;;  %1629 = vmatpush1.bf16.msra.mxu1 %v1438_v3 }
 0x261   : > { %1548 = vmatprep.subr.bf16.mxu0 %v1441_v4  ;;  %1630 = vmatprep.subr.bf16.mxu1 %v1443_v5 }
 0x264   : > { %1549 = vmatpush1.bf16.msra.mxu0 %v1440_v8  ;;  %1631 = vmatpush1.bf16.msra.mxu1 %v1442_v9 }
 0x265   : > { %1550 = vmatprep.subr.bf16.mxu0 %v1445_v10  ;;  %1632 = vmatprep.subr.bf16.mxu1 %v1447_v45 }
 0x268   : > { %1551 = vmatpush1.bf16.msra.mxu0 %v1444_v14  ;;  %1633 = vmatpush1.bf16.msra.mxu1 %v1446_v15 }
 0x269   : > { %1552 = vmatprep.subr.bf16.mxu0 %v1449_v16  ;;  %1634 = vmatprep.subr.bf16.mxu1 %v1451_v17 }
 0x26c   : > { %1553 = vmatpush1.bf16.msra.mxu0 %v1448_v19  ;;  %1635 = vmatpush1.bf16.msra.mxu1 %v1450_v20 }
 0x26d   : > { %1554 = vmatprep.subr.bf16.mxu0 %v1453_v21  ;;  %1636 = vmatprep.subr.bf16.mxu1 %v1455_v22  ;;  %v5920_v21 = vld [vmem:[%s7216_s10 + $0x500] sm:$0xff]  ;;  %v5922_v22 = vld [vmem:[%s7216_s10 + $0x510] sm:$0xff] }
 0x26e   : > { %v1464_v26 = vunpack.c.l.s8.bf16 %v5920_v21 }
 0x270   : > { %1555 = vmatpush1.bf16.msra.mxu0 %v1452_v23  ;;  %1637 = vmatpush1.bf16.msra.mxu1 %v1454_v24 }
 0x271   : > { %1556 = vmatprep.subr.bf16.mxu0 %v1457_v27  ;;  %1638 = vmatprep.subr.bf16.mxu1 %v1459_v28  ;;  %v1466_v27 = vunpack.c.l.s8.bf16 %v5922_v22 }
 0x274   : > { %1557 = vmatpush1.bf16.msra.mxu0 %v1456_v33  ;;  %1639 = vmatpush1.bf16.msra.mxu1 %v1458_v34  ;;  %v1468_v33 = vunpack.c.h.s8.bf16 %v5920_v21  ;;  %v1470_v34 = vunpack.c.h.s8.bf16 %v5922_v22 }
 0x275   : > { %1558 = vmatprep.subr.bf16.mxu0 %v1461_v35  ;;  %1640 = vmatprep.subr.bf16.mxu1 %v1463_v38  ;;  %v1473_v35 = vunpack.c.l.s8.bf16 %v5925_v29  ;;  %v1475_v38 = vunpack.c.l.s8.bf16 %v5927_v32 }
 0x278   : > { %1559 = vmatpush1.bf16.msra.mxu0 %v1460_v41  ;;  %1641 = vmatpush1.bf16.msra.mxu1 %v1462_v42  ;;  %v5924_v41 = vld [vmem:[%s7216_s10 + $0x520] sm:$0xff]  ;;  %v5926_v42 = vld [vmem:[%s7216_s10 + $0x530] sm:$0xff] }
 0x279   : > { %1569 = vmatprep.subr.bf16.mxu0 %v1465_v31  ;;  %1651 = vmatprep.subr.bf16.mxu1 %v1467_v47  ;;  %v1477_v31 = vunpack.c.h.s8.bf16 %v5925_v29  ;;  %v1479_v47 = vunpack.c.h.s8.bf16 %v5927_v32  ;;  %v5940_v29 = vld [vmem:[%s7216_s10 + $0x5a0] sm:$0xff]  ;;  %v5942_v32 = vld [vmem:[%s7216_s10 + $0x5b0] sm:$0xff] }
 0x30e   : > { %v1168_v58 = vpop.f32.mrb[4].mxu0  ;;  %v1250_v60 = vpop.f32.mrb[4].mxu1 }
 0x30f   : > { %v1280_v63 = vmul.f32 %v1263_v51, %v1168_v58  ;;  %v1282_v0 = vmul.f32 %v1271_v52, %v1250_v60  ;;  %v1170_v46 = vpop.f32.mrb[5].mxu0  ;;  %v1252_v1 = vpop.f32.mrb[5].mxu1  ;;  %v1476_v51 = vunpack.c.h.s8.bf16 %v5924_v41  ;;  %v1478_v52 = vunpack.c.h.s8.bf16 %v5926_v42 }
 0x310   : > { %v1281_v2 = vmul.f32 %v1267_v53, %v1170_v46  ;;  %v1283_v3 = vmul.f32 %v1275_v54, %v1252_v1  ;;  %v1172_v4 = vpop.f32.mrb[6].mxu0  ;;  %v1254_v5 = vpop.f32.mrb[6].mxu1  ;;  %v1481_v53 = vunpack.c.l.s8.bf16 %v5929_v48  ;;  %v1483_v54 = vunpack.c.l.s8.bf16 %v5931_v49 }
 0x311   : > { %v1307_v6 = vadd.f32 %v1290_v56, %v1280_v63  ;;  %v7510_v7 = vadd.f32 %v1298_v57, %v1282_v0  ;;  %v1173_v8 = vpop.f32.mrb[7].mxu0  ;;  %v1255_v9 = vpop.f32.mrb[7].mxu1  ;;  %v5928_v56 = vld [vmem:[%s7216_s10 + $0x540] sm:$0xff]  ;;  %v5930_v57 = vld [vmem:[%s7216_s10 + $0x550] sm:$0xff]  ;;  %v5933_v63 = vld [vmem:[%s7216_s10 + $0x568] sm:$0xff] }
 0x312   : > { %v1308_v10 = vadd.f32 %v1294_v61, %v1281_v2  ;;  %v1310_v45 = vadd.f32 %v1302_v62, %v1283_v3  ;;  %v1480_v58 = vunpack.c.l.s8.bf16 %v5928_v56  ;;  %v1482_v60 = vunpack.c.l.s8.bf16 %v5930_v57  ;;  %v5935_v0 = vld [vmem:[%s7216_s10 + $0x578] sm:$0xff]  ;;  %v5932_v4 = vld [vmem:[%s7216_s10 + $0x560] sm:$0xff]  ;;  %v5934_v5 = vld [vmem:[%s7216_s10 + $0x570] sm:$0xff] }
 0x313   : > { %vm1311_vm5 = vcmp.ge.f32.partialorder %v1307_v6, 0.0  ;;  %v1315_v12 = vmul.f32 0.2, %v1307_v6  ;;  %v1485_v61 = vunpack.c.h.s8.bf16 %v5929_v48  ;;  %v1487_v62 = vunpack.c.h.s8.bf16 %v5931_v49  ;;  %v5946_v48 = vld [vmem:[%s7216_s10 + $0x5d0] sm:$0xff] }
 0x314   : > { %vm1312_vm6 = vcmp.ge.f32.partialorder %v1308_v10, 0.0  ;;  %v1316_v13 = vmul.f32 0.2, %v1308_v10  ;;  %vm1314_vm7 = vcmp.ge.f32.partialorder %v1310_v45, 0.0  ;;  %v1318_v14 = vmul.f32 0.2, %v1310_v45 }
 0x315   : > { %v1319_v15 = vsel %vm1311_vm5, %v1307_v6, %v1315_v12  ;;  %v1484_v46 = vunpack.c.h.s8.bf16 %v5928_v56  ;;  %v1486_v1 = vunpack.c.h.s8.bf16 %v5930_v57  ;;  %v1489_v2 = vunpack.c.l.s8.bf16 %v5933_v63  ;;  %v5939_v12 = vld [vmem:[%s7216_s10 + $0x598] sm:$0xff]  ;;  %v5949_v56 = vld [vmem:[%s7216_s10 + $0x5e8] sm:$0xff] }
 0x316   : > { %v1323_v16 = vmul.f32 1.4142135, %v1319_v15  ;;  %v1320_v17 = vsel %vm1312_vm6, %v1308_v10, %v1316_v13  ;;  %v1322_v11 = vsel %vm1314_vm7, %v1310_v45, %v1318_v14  ;;  %v1491_v3 = vunpack.c.l.s8.bf16 %v5935_v0  ;;  %v5937_v45 = vld [vmem:[%s7216_s10 + $0x588] sm:$0xff]  ;;  %v5951_v57 = vld [vmem:[%s7216_s10 + $0x5f8] sm:$0xff] }
 0x317   : > { %v1324_v18 = vmul.f32 1.4142135, %v1320_v17  ;;  %v1326_v19 = vmul.f32 1.4142135, %v1322_v11  ;;  %v1488_v6 = vunpack.c.l.s8.bf16 %v5932_v4  ;;  %v1490_v8 = vunpack.c.l.s8.bf16 %v5934_v5  ;;  %v5936_v17 = vld [vmem:[%s7216_s10 + $0x580] sm:$0xff]  ;;  %v5938_v11 = vld [vmem:[%s7216_s10 + $0x590] sm:$0xff] }
 0x318   : > { %v7513_v20 = vadd.f32 %v1323_v16, %v7309_v59  ;;  %v1469_v59 = vunpack.c.h.s8.bf16 %v7493_v43  ;;  %v1472_v43 = vunpack.c.l.s8.bf16 %v5924_v41  ;;  %v1493_v9 = vunpack.c.h.s8.bf16 %v5933_v63  ;;  %v5947_v41 = vld [vmem:[%s7216_s10 + $0x5d8] sm:$0xff]  ;;  %v5948_v63 = vld [vmem:[%s7216_s10 + $0x5e0] sm:$0xff] }
 0x319   : > { %v7518_v23 = vadd.f32 %v1324_v18, %v7303_v30  ;;  %v7521_v24 = vadd.f32 %v1326_v19, %v7335_v50  ;;  %v1471_v30 = vunpack.c.h.s8.bf16 %v7496_v44  ;;  %v1474_v44 = vunpack.c.l.s8.bf16 %v5926_v42 }
 0x31a   : > { %v1331_v28 = vpack.c.bf16 %v7513_v20, %v7513_v20  ;;  %v1495_v10 = vunpack.c.h.s8.bf16 %v5935_v0  ;;  %v1492_v13 = vunpack.c.h.s8.bf16 %v5932_v4  ;;  %v1494_v14 = vunpack.c.h.s8.bf16 %v5934_v5  ;;  %v5950_v0 = vld [vmem:[%s7216_s10 + $0x5f0] sm:$0xff] }
 0x31b   : > { %v1332_v25 = vpack.c.bf16 %v7518_v23, %v7518_v23  ;;  %v1334_v50 = vpack.c.bf16 %v7521_v24, %v7521_v24  ;;  %v1497_v15 = vunpack.c.l.s8.bf16 %v5937_v45  ;;  %v1499_v16 = vunpack.c.l.s8.bf16 %v5939_v12 }
 0x31c   : > { %v1496_v18 = vunpack.c.l.s8.bf16 %v5936_v17  ;;  %v1498_v19 = vunpack.c.l.s8.bf16 %v5938_v11  ;;  %v1501_v21 = vunpack.c.h.s8.bf16 %v5937_v45  ;;  %v1503_v22 = vunpack.c.h.s8.bf16 %v5939_v12 }
 0x31d   : > { %1560 = vmatprep.mubr.bf16.mxu0 %v1332_v25  ;;  %1642 = vmatprep.mubr.bf16.mxu1 %v1332_v25  ;;  %v5941_v25 = vld [vmem:[%s7216_s10 + $0x5a8] sm:$0xff]  ;;  %v1508_v42 = vunpack.c.h.s8.bf16 %v5940_v29  ;;  %vm1313_vm8 = vcmp.ge.f32.partialorder %v7510_v7, 0.0  ;;  %v1525_v4 = vunpack.c.h.s8.bf16 %v5949_v56  ;;  %v1527_v5 = vunpack.c.h.s8.bf16 %v5951_v57 }
 0x31e   : > { %1561 = vmatmul.mubr.bf16.vlgmr.msra.gmra.mrb[8].mxu0 %v1331_v28  ;;  %1643 = vmatmul.mubr.bf16.vlgmr.msra.gmra.mrb[8].mxu1 %v1331_v28  ;;  %v1502_v28 = vunpack.c.h.s8.bf16 %v5938_v11 }
 0x31f   : > { %1570 = vmatpush1.bf16.msra.mxu0 %v1464_v26  ;;  %1652 = vmatpush1.bf16.msra.mxu1 %v1466_v27  ;;  %v5943_v26 = vld [vmem:[%s7216_s10 + $0x5b8] sm:$0xff]  ;;  %v1500_v27 = vunpack.c.h.s8.bf16 %v5936_v17 }
 0x320   : > { %1601 = vmatprep.mubr.bf16.mxu0 %v1334_v50  ;;  %1683 = vmatprep.mubr.bf16.mxu1 %v1334_v50  ;;  %v1504_v50 = vunpack.c.l.s8.bf16 %v5940_v29 }
 0x321   : > { %1571 = vmatprep.subr.bf16.mxu0 %v1469_v59  ;;  %1653 = vmatprep.subr.bf16.mxu1 %v1471_v30  ;;  %v1505_v59 = vunpack.c.l.s8.bf16 %v5941_v25  ;;  %v1507_v30 = vunpack.c.l.s8.bf16 %v5943_v26 }
 0x323   : > { %1572 = vmatpush1.bf16.msra.mxu0 %v1468_v33  ;;  %1654 = vmatpush1.bf16.msra.mxu1 %v1470_v34  ;;  %v1506_v33 = vunpack.c.l.s8.bf16 %v5942_v32  ;;  %v1509_v34 = vunpack.c.h.s8.bf16 %v5941_v25 }
 0x324   : > { %1573 = vmatprep.subr.bf16.mxu0 %v1473_v35  ;;  %1655 = vmatprep.subr.bf16.mxu1 %v1475_v38  ;;  %v1511_v35 = vunpack.c.h.s8.bf16 %v5943_v26  ;;  %v5945_v38 = vld [vmem:[%s7216_s10 + $0x5c8] sm:$0xff] }
 0x327   : > { %1574 = vmatpush1.bf16.msra.mxu0 %v1472_v43  ;;  %1656 = vmatpush1.bf16.msra.mxu1 %v1474_v44  ;;  %v1510_v43 = vunpack.c.h.s8.bf16 %v5942_v32  ;;  %v1513_v44 = vunpack.c.l.s8.bf16 %v5945_v38 }
 0x328   : > { %1575 = vmatprep.subr.bf16.mxu0 %v1477_v31  ;;  %1657 = vmatprep.subr.bf16.mxu1 %v1479_v47  ;;  %v1515_v31 = vunpack.c.l.s8.bf16 %v5947_v41  ;;  %v5944_v47 = vld [vmem:[%s7216_s10 + $0x5c0] sm:$0xff] }
 0x329   : > { %v1512_v49 = vunpack.c.l.s8.bf16 %v5944_v47 }
 0x32b   : > { %1576 = vmatpush1.bf16.msra.mxu0 %v1476_v51  ;;  %1658 = vmatpush1.bf16.msra.mxu1 %v1478_v52  ;;  %v1514_v51 = vunpack.c.l.s8.bf16 %v5946_v48  ;;  %v1517_v52 = vunpack.c.h.s8.bf16 %v5945_v38 }
 0x32c   : > { %1577 = vmatprep.subr.bf16.mxu0 %v1481_v53  ;;  %1659 = vmatprep.subr.bf16.mxu1 %v1483_v54  ;;  %v1519_v53 = vunpack.c.h.s8.bf16 %v5947_v41  ;;  %v1317_v54 = vmul.f32 0.2, %v7510_v7 }
 0x32f   : > { %1578 = vmatpush1.bf16.msra.mxu0 %v1480_v58  ;;  %1660 = vmatpush1.bf16.msra.mxu1 %v1482_v60  ;;  %v1516_v58 = vunpack.c.h.s8.bf16 %v5944_v47  ;;  %v1518_v60 = vunpack.c.h.s8.bf16 %v5946_v48 }
 0x330   : > { %1579 = vmatprep.subr.bf16.mxu0 %v1485_v61  ;;  %1661 = vmatprep.subr.bf16.mxu1 %v1487_v62  ;;  %v1521_v61 = vunpack.c.l.s8.bf16 %v5949_v56  ;;  %v1523_v62 = vunpack.c.l.s8.bf16 %v5951_v57  ;;  %v5966_v57 = vld [vmem:[%s7216_s10 + $0x660] sm:$0xff] }
 0x333   : > { %1580 = vmatpush1.bf16.msra.mxu0 %v1484_v46  ;;  %1662 = vmatpush1.bf16.msra.mxu1 %v1486_v1  ;;  %v1321_v46 = vsel %vm1313_vm8, %v7510_v7, %v1317_v54  ;;  %v1520_v1 = vunpack.c.l.s8.bf16 %v5948_v63 }
 0x334   : > { %1581 = vmatprep.subr.bf16.mxu0 %v1489_v2  ;;  %1663 = vmatprep.subr.bf16.mxu1 %v1491_v3  ;;  %v1522_v2 = vunpack.c.l.s8.bf16 %v5950_v0  ;;  %v1325_v3 = vmul.f32 1.4142135, %v1321_v46  ;;  %v5973_v46 = vld [vmem:[%s7216_s10 + $0x698] sm:$0xff] }
 0x336   : > { %v7565_v45 = vadd.f32 %v1325_v3, %v7363_v55 }
 0x337   : > { %1582 = vmatpush1.bf16.msra.mxu0 %v1488_v6  ;;  %1664 = vmatpush1.bf16.msra.mxu1 %v1490_v8  ;;  %v5955_v6 = vld [vmem:[%s7216_s10 + $0x608] sm:$0xff]  ;;  %v5957_v8 = vld [vmem:[%s7216_s10 + $0x618] sm:$0xff] }
 0x338   : > { %1583 = vmatprep.subr.bf16.mxu0 %v1493_v9  ;;  %1665 = vmatprep.subr.bf16.mxu1 %v1495_v10  ;;  %v1524_v9 = vunpack.c.h.s8.bf16 %v5948_v63  ;;  %v1526_v10 = vunpack.c.h.s8.bf16 %v5950_v0  ;;  %v1828_v7 = vunpack.c.l.s8.bf16 %v5955_v6  ;;  %v1830_v12 = vunpack.c.l.s8.bf16 %v5957_v8  ;;  %v5971_v0 = vld [vmem:[%s7216_s10 + $0x688] sm:$0xff] }
 0x339   : > { %v1333_v17 = vpack.c.bf16 %v7565_v45, %v7565_v45  ;;  %v1832_v55 = vunpack.c.h.s8.bf16 %v5955_v6  ;;  %v1834_v11 = vunpack.c.h.s8.bf16 %v5957_v8  ;;  %v1860_v3 = vunpack.c.l.s8.bf16 %v5971_v0  ;;  %v5972_v6 = vld [vmem:[%s7216_s10 + $0x690] sm:$0xff] }
 0x33b   : > { %1584 = vmatpush1.bf16.msra.mxu0 %v1492_v13  ;;  %1666 = vmatpush1.bf16.msra.mxu1 %v1494_v14  ;;  %v5954_v13 = vld [vmem:[%s7216_s10 + $0x600] sm:$0xff]  ;;  %v5956_v14 = vld [vmem:[%s7216_s10 + $0x610] sm:$0xff] }
 0x33c   : > { %1585 = vmatprep.subr.bf16.mxu0 %v1497_v15  ;;  %1667 = vmatprep.subr.bf16.mxu1 %v1499_v16  ;;  %v1827_v15 = vunpack.c.l.s8.bf16 %v5954_v13  ;;  %v1829_v16 = vunpack.c.l.s8.bf16 %v5956_v14 }
 0x33f   : > { %1586 = vmatpush1.bf16.msra.mxu0 %v1496_v18  ;;  %1668 = vmatpush1.bf16.msra.mxu1 %v1498_v19  ;;  %v5959_v18 = vld [vmem:[%s7216_s10 + $0x628] sm:$0xff]  ;;  %v5961_v19 = vld [vmem:[%s7216_s10 + $0x638] sm:$0xff] }
 0x340   : > { %1587 = vmatprep.subr.bf16.mxu0 %v1501_v21  ;;  %1669 = vmatprep.subr.bf16.mxu1 %v1503_v22  ;;  %v1831_v21 = vunpack.c.h.s8.bf16 %v5954_v13  ;;  %v1833_v22 = vunpack.c.h.s8.bf16 %v5956_v14  ;;  %v1836_v25 = vunpack.c.l.s8.bf16 %v5959_v18  ;;  %v1838_v26 = vunpack.c.l.s8.bf16 %v5961_v19  ;;  %v5977_v13 = vld [vmem:[%s7216_s10 + $0x6b8] sm:$0xff] }
 0x341   : > { %v1840_v29 = vunpack.c.h.s8.bf16 %v5959_v18  ;;  %v1842_v32 = vunpack.c.h.s8.bf16 %v5961_v19 }
 0x343   : > { %1588 = vmatpush1.bf16.msra.mxu0 %v1500_v27  ;;  %1670 = vmatpush1.bf16.msra.mxu1 %v1502_v28  ;;  %v5958_v27 = vld [vmem:[%s7216_s10 + $0x620] sm:$0xff]  ;;  %v5960_v28 = vld [vmem:[%s7216_s10 + $0x630] sm:$0xff] }
 0x344   : > { %1589 = vmatprep.subr.bf16.mxu0 %v1505_v59  ;;  %1671 = vmatprep.subr.bf16.mxu1 %v1507_v30  ;;  %v1835_v59 = vunpack.c.l.s8.bf16 %v5958_v27  ;;  %v1837_v30 = vunpack.c.l.s8.bf16 %v5960_v28 }
 0x347   : > { %1590 = vmatpush1.bf16.msra.mxu0 %v1504_v50  ;;  %1672 = vmatpush1.bf16.msra.mxu1 %v1506_v33  ;;  %v5963_v50 = vld [vmem:[%s7216_s10 + $0x648] sm:$0xff]  ;;  %v5965_v33 = vld [vmem:[%s7216_s10 + $0x658] sm:$0xff] }
 0x348   : > { %1591 = vmatprep.subr.bf16.mxu0 %v1509_v34  ;;  %1673 = vmatprep.subr.bf16.mxu1 %v1511_v35  ;;  %v1839_v34 = vunpack.c.h.s8.bf16 %v5958_v27  ;;  %v1841_v35 = vunpack.c.h.s8.bf16 %v5960_v28  ;;  %v1844_v38 = vunpack.c.l.s8.bf16 %v5963_v50  ;;  %v1846_v41 = vunpack.c.l.s8.bf16 %v5965_v33 }
 0x349   : > { %v1848_v47 = vunpack.c.h.s8.bf16 %v5963_v50  ;;  %v1850_v48 = vunpack.c.h.s8.bf16 %v5965_v33 }
 0x34b   : > { %1592 = vmatpush1.bf16.msra.mxu0 %v1508_v42  ;;  %1674 = vmatpush1.bf16.msra.mxu1 %v1510_v43  ;;  %v5962_v42 = vld [vmem:[%s7216_s10 + $0x640] sm:$0xff]  ;;  %v5964_v43 = vld [vmem:[%s7216_s10 + $0x650] sm:$0xff] }
 0x34c   : > { %1593 = vmatprep.subr.bf16.mxu0 %v1513_v44  ;;  %1675 = vmatprep.subr.bf16.mxu1 %v1515_v31  ;;  %v1843_v44 = vunpack.c.l.s8.bf16 %v5962_v42  ;;  %v1845_v31 = vunpack.c.l.s8.bf16 %v5964_v43 }
 0x34f   : > { %1594 = vmatpush1.bf16.msra.mxu0 %v1512_v49  ;;  %1676 = vmatpush1.bf16.msra.mxu1 %v1514_v51  ;;  %v5967_v49 = vld [vmem:[%s7216_s10 + $0x668] sm:$0xff]  ;;  %v5969_v51 = vld [vmem:[%s7216_s10 + $0x678] sm:$0xff] }
 0x350   : > { %1595 = vmatprep.subr.bf16.mxu0 %v1517_v52  ;;  %1677 = vmatprep.subr.bf16.mxu1 %v1519_v53  ;;  %v1847_v52 = vunpack.c.h.s8.bf16 %v5962_v42  ;;  %v1849_v53 = vunpack.c.h.s8.bf16 %v5964_v43  ;;  %v1852_v54 = vunpack.c.l.s8.bf16 %v5967_v49  ;;  %v1854_v56 = vunpack.c.l.s8.bf16 %v5969_v51  ;;  %v5983_v42 = vld [vmem:[%s7216_s10 + $0x6e8] sm:$0xff]  ;;  %v5985_v43 = vld [vmem:[%s7216_s10 + $0x6f8] sm:$0xff] }
 0x351   : > { %v1858_v63 = vunpack.c.h.s8.bf16 %v5969_v51 }
 0x353   : > { %1596 = vmatpush1.bf16.msra.mxu0 %v1516_v58  ;;  %1678 = vmatpush1.bf16.msra.mxu1 %v1518_v60  ;;  %v5968_v58 = vld [vmem:[%s7216_s10 + $0x670] sm:$0xff]  ;;  %v1851_v60 = vunpack.c.l.s8.bf16 %v5966_v57 }
 0x354   : > { %1597 = vmatprep.subr.bf16.mxu0 %v1521_v61  ;;  %1679 = vmatprep.subr.bf16.mxu1 %v1523_v62  ;;  %v1853_v61 = vunpack.c.l.s8.bf16 %v5968_v58  ;;  %v1856_v62 = vunpack.c.h.s8.bf16 %v5967_v49 }
 0x357   : > { %1598 = vmatpush1.bf16.msra.mxu0 %v1520_v1  ;;  %1680 = vmatpush1.bf16.msra.mxu1 %v1522_v2  ;;  %v1855_v1 = vunpack.c.h.s8.bf16 %v5966_v57  ;;  %v1857_v2 = vunpack.c.h.s8.bf16 %v5968_v58  ;;  %v7600_v57 = vld [vmem:[%s7216_s10 + $0x708] sm:$0xff]  ;;  %v7603_v58 = vld [vmem:[%s7216_s10 + $0x718] sm:$0xff] }
 0x358   : > { %1599 = vmatprep.subr.bf16.mxu0 %v1525_v4  ;;  %1681 = vmatprep.subr.bf16.mxu1 %v1527_v5  ;;  %v1862_v4 = vunpack.c.l.s8.bf16 %v5973_v46  ;;  %v5970_v5 = vld [vmem:[%s7216_s10 + $0x680] sm:$0xff] }
 0x359   : > { %v1859_v8 = vunpack.c.l.s8.bf16 %v5970_v5  ;;  %v1863_v14 = vunpack.c.h.s8.bf16 %v5970_v5 }
 0x35b   : > { %1600 = vmatpush1.bf16.msra.mxu0 %v1524_v9  ;;  %1682 = vmatpush1.bf16.msra.mxu1 %v1526_v10  ;;  %v1861_v9 = vunpack.c.l.s8.bf16 %v5972_v6  ;;  %v1864_v10 = vunpack.c.h.s8.bf16 %v5971_v0 }
 0x35c   : > { %1955 = vmatprep.subr.bf16.mxu0 %v1828_v7  ;;  %2037 = vmatprep.subr.bf16.mxu1 %v1830_v12  ;;  %v1866_v7 = vunpack.c.h.s8.bf16 %v5973_v46  ;;  %v5975_v12 = vld [vmem:[%s7216_s10 + $0x6a8] sm:$0xff] }
 0x35e   : > { %1602 = vmatmul.mubr.bf16.vlgmr.msra.gmra.mrb[8].mxu0 %v1333_v17  ;;  %1684 = vmatmul.mubr.bf16.vlgmr.msra.gmra.mrb[8].mxu1 %v1333_v17  ;;  %v1870_v17 = vunpack.c.l.s8.bf16 %v5977_v13 }
 0x35f   : > { %1956 = vmatpush1.bf16.msra.mxu0 %v1827_v15  ;;  %2038 = vmatpush1.bf16.msra.mxu1 %v1829_v16  ;;  %v1865_v15 = vunpack.c.h.s8.bf16 %v5972_v6  ;;  %v1868_v16 = vunpack.c.l.s8.bf16 %v5975_v12 }
 0x360   : > { %1957 = vmatprep.subr.bf16.mxu0 %v1832_v55  ;;  %2039 = vmatprep.subr.bf16.mxu1 %v1834_v11  ;;  %v5974_v55 = vld [vmem:[%s7216_s10 + $0x6a0] sm:$0xff]  ;;  %v5976_v11 = vld [vmem:[%s7216_s10 + $0x6b0] sm:$0xff] }
 0x361   : > { %v1867_v18 = vunpack.c.l.s8.bf16 %v5974_v55  ;;  %v1869_v19 = vunpack.c.l.s8.bf16 %v5976_v11  ;;  %v1871_v27 = vunpack.c.h.s8.bf16 %v5974_v55  ;;  %v1873_v28 = vunpack.c.h.s8.bf16 %v5976_v11 }
 0x363   : > { %1958 = vmatpush1.bf16.msra.mxu0 %v1831_v21  ;;  %2040 = vmatpush1.bf16.msra.mxu1 %v1833_v22  ;;  %v1872_v21 = vunpack.c.h.s8.bf16 %v5975_v12  ;;  %v1874_v22 = vunpack.c.h.s8.bf16 %v5977_v13 }
 0x364   : > { %1959 = vmatprep.subr.bf16.mxu0 %v1836_v25  ;;  %2041 = vmatprep.subr.bf16.mxu1 %v1838_v26  ;;  %v5979_v25 = vld [vmem:[%s7216_s10 + $0x6c8] sm:$0xff]  ;;  %v5981_v26 = vld [vmem:[%s7216_s10 + $0x6d8] sm:$0xff] }
 0x367   : > { %1960 = vmatpush1.bf16.msra.mxu0 %v1835_v59  ;;  %2042 = vmatpush1.bf16.msra.mxu1 %v1837_v30  ;;  %v1876_v59 = vunpack.c.l.s8.bf16 %v5979_v25  ;;  %v1878_v30 = vunpack.c.l.s8.bf16 %v5981_v26 }
 0x368   : > { %1961 = vmatprep.subr.bf16.mxu0 %v1840_v29  ;;  %2043 = vmatprep.subr.bf16.mxu1 %v1842_v32  ;;  %v5978_v29 = vld [vmem:[%s7216_s10 + $0x6c0] sm:$0xff]  ;;  %v5980_v32 = vld [vmem:[%s7216_s10 + $0x6d0] sm:$0xff] }
 0x369   : > { %v1875_v50 = vunpack.c.l.s8.bf16 %v5978_v29  ;;  %v1877_v33 = vunpack.c.l.s8.bf16 %v5980_v32 }
 0x36b   : > { %1962 = vmatpush1.bf16.msra.mxu0 %v1839_v34  ;;  %2044 = vmatpush1.bf16.msra.mxu1 %v1841_v35  ;;  %v1880_v34 = vunpack.c.h.s8.bf16 %v5979_v25  ;;  %v1882_v35 = vunpack.c.h.s8.bf16 %v5981_v26  ;;  %v5986_v26 = vld [vmem:[%s7216_s10 + $0x700] sm:$0xff] }
 0x36c   : > { %1963 = vmatprep.subr.bf16.mxu0 %v1844_v38  ;;  %2045 = vmatprep.subr.bf16.mxu1 %v1846_v41  ;;  %v1879_v38 = vunpack.c.h.s8.bf16 %v5978_v29  ;;  %v1881_v41 = vunpack.c.h.s8.bf16 %v5980_v32 }
 0x36f   : > { %1964 = vmatpush1.bf16.msra.mxu0 %v1843_v44  ;;  %2046 = vmatpush1.bf16.msra.mxu1 %v1845_v31  ;;  %v1884_v44 = vunpack.c.l.s8.bf16 %v5983_v42  ;;  %v1886_v31 = vunpack.c.l.s8.bf16 %v5985_v43 }
 0x370   : > { %1965 = vmatprep.subr.bf16.mxu0 %v1848_v47  ;;  %2047 = vmatprep.subr.bf16.mxu1 %v1850_v48  ;;  %v5982_v47 = vld [vmem:[%s7216_s10 + $0x6e0] sm:$0xff]  ;;  %v5984_v48 = vld [vmem:[%s7216_s10 + $0x6f0] sm:$0xff] }
 0x371   : > { %v1883_v49 = vunpack.c.l.s8.bf16 %v5982_v47  ;;  %v1885_v51 = vunpack.c.l.s8.bf16 %v5984_v48 }
 0x373   : > { %1966 = vmatpush1.bf16.msra.mxu0 %v1847_v52  ;;  %2048 = vmatpush1.bf16.msra.mxu1 %v1849_v53  ;;  %v1888_v52 = vunpack.c.h.s8.bf16 %v5983_v42  ;;  %v1890_v53 = vunpack.c.h.s8.bf16 %v5985_v43  ;;  %v5991_v42 = vld [vmem:[%s7216_s10 + $0x728] sm:$0xff]  ;;  %v5993_v43 = vld [vmem:[%s7216_s10 + $0x738] sm:$0xff] }
 0x374   : > { %1967 = vmatprep.subr.bf16.mxu0 %v1852_v54  ;;  %2049 = vmatprep.subr.bf16.mxu1 %v1854_v56  ;;  %v1887_v54 = vunpack.c.h.s8.bf16 %v5982_v47  ;;  %v1889_v56 = vunpack.c.h.s8.bf16 %v5984_v48  ;;  %v1900_v48 = vunpack.c.l.s8.bf16 %v5991_v42 }
 0x377   : > { %1968 = vmatpush1.bf16.msra.mxu0 %v1851_v60  ;;  %2050 = vmatpush1.bf16.msra.mxu1 %v1853_v61  ;;  %v1892_v60 = vunpack.c.l.s8.bf16 %v7600_v57  ;;  %v1894_v61 = vunpack.c.l.s8.bf16 %v7603_v58 }
 0x378   : > { %1969 = vmatprep.subr.bf16.mxu0 %v1856_v62  ;;  %2051 = vmatprep.subr.bf16.mxu1 %v1858_v63  ;;  %v5952_v62 = vld [vmem:[%s7223_s1 + $0x8] sm:$0xf] }
 0x379   : > { %v5953_v63 = vld [vmem:[%s7226_s6 + $0x8] sm:$0xf]  ;;  %v1698_v0 = vrot.slane %v5952_v62, %v7405_v36  ;;  %v1706_v46 = vrot.slane %v5952_v62, %v7407_v37 }
 0x37b   : > { %1970 = vmatpush1.bf16.msra.mxu0 %v1855_v1  ;;  %2052 = vmatpush1.bf16.msra.mxu1 %v1857_v2  ;;  %v1702_v1 = vrot.slane %v5952_v62, %v7410_v39  ;;  %v1710_v2 = vrot.slane %v5952_v62, %v7412_v40 }
 0x37c   : > { %1971 = vmatprep.subr.bf16.mxu0 %v1860_v3  ;;  %2053 = vmatprep.subr.bf16.mxu1 %v1862_v4  ;;  %v1725_v3 = vrot.slane %v5953_v63, %v7405_v36  ;;  %v1733_v4 = vrot.slane %v5953_v63, %v7407_v37 }
 0x37f   : > { %1972 = vmatpush1.bf16.msra.mxu0 %v1859_v8  ;;  %2054 = vmatpush1.bf16.msra.mxu1 %v1861_v9  ;;  %v1729_v8 = vrot.slane %v5953_v63, %v7410_v39  ;;  %v1737_v9 = vrot.slane %v5953_v63, %v7412_v40 }
 0x380   : > { %1973 = vmatprep.subr.bf16.mxu0 %v1864_v10  ;;  %2055 = vmatprep.subr.bf16.mxu1 %v1866_v7 }
 0x383   : > { %1974 = vmatpush1.bf16.msra.mxu0 %v1863_v14  ;;  %2056 = vmatpush1.bf16.msra.mxu1 %v1865_v15 }
 0x384   : > { %1975 = vmatprep.subr.bf16.mxu0 %v1868_v16  ;;  %2057 = vmatprep.subr.bf16.mxu1 %v1870_v17 }
 0x387   : > { %1976 = vmatpush1.bf16.msra.mxu0 %v1867_v18  ;;  %2058 = vmatpush1.bf16.msra.mxu1 %v1869_v19 }
 0x388   : > { %1977 = vmatprep.subr.bf16.mxu0 %v1872_v21  ;;  %2059 = vmatprep.subr.bf16.mxu1 %v1874_v22 }
 0x38b   : > { %1978 = vmatpush1.bf16.msra.mxu0 %v1871_v27  ;;  %2060 = vmatpush1.bf16.msra.mxu1 %v1873_v28  ;;  %v5988_v27 = vld [vmem:[%s7216_s10 + $0x710] sm:$0xff] }
 0x38c   : > { %1979 = vmatprep.subr.bf16.mxu0 %v1876_v59  ;;  %2061 = vmatprep.subr.bf16.mxu1 %v1878_v30  ;;  %v1897_v47 = vunpack.c.h.s8.bf16 %v5988_v27 }
 0x38f   : > { %1980 = vmatpush1.bf16.msra.mxu0 %v1875_v50  ;;  %2062 = vmatpush1.bf16.msra.mxu1 %v1877_v33  ;;  %v1891_v50 = vunpack.c.l.s8.bf16 %v5986_v26  ;;  %v1893_v33 = vunpack.c.l.s8.bf16 %v5988_v27  ;;  %v6002_v27 = vld [vmem:[%s7216_s10 + $0x780] sm:$0xff] }
 0x390   : > { %1981 = vmatprep.subr.bf16.mxu0 %v1880_v34  ;;  %2063 = vmatprep.subr.bf16.mxu1 %v1882_v35 }
 0x393   : > { %1982 = vmatpush1.bf16.msra.mxu0 %v1879_v38  ;;  %2064 = vmatpush1.bf16.msra.mxu1 %v1881_v41  ;;  %v1896_v38 = vunpack.c.h.s8.bf16 %v7600_v57  ;;  %v1898_v41 = vunpack.c.h.s8.bf16 %v7603_v58  ;;  %v1906_v57 = vunpack.c.h.s8.bf16 %v5993_v43  ;;  %v5995_v58 = vld [vmem:[%s7216_s10 + $0x748] sm:$0xff] }
 0x394   : > { %1983 = vmatprep.subr.bf16.mxu0 %v1884_v44  ;;  %2065 = vmatprep.subr.bf16.mxu1 %v1886_v31  ;;  %v1895_v31 = vunpack.c.h.s8.bf16 %v5986_v26  ;;  %v1908_v63 = vunpack.c.l.s8.bf16 %v5995_v58 }
 0x397   : > { %1984 = vmatpush1.bf16.msra.mxu0 %v1883_v49  ;;  %2066 = vmatpush1.bf16.msra.mxu1 %v1885_v51  ;;  %v1902_v49 = vunpack.c.l.s8.bf16 %v5993_v43  ;;  %v5990_v51 = vld [vmem:[%s7216_s10 + $0x720] sm:$0xff]  ;;  %v6008_v43 = vld [vmem:[%s7216_s10 + $0x7b0] sm:$0xff] }
 0x398   : > { %1985 = vmatprep.subr.bf16.mxu0 %v1888_v52  ;;  %2067 = vmatprep.subr.bf16.mxu1 %v1890_v53  ;;  %v5992_v52 = vld [vmem:[%s7216_s10 + $0x730] sm:$0xff]  ;;  %v1899_v53 = vunpack.c.l.s8.bf16 %v5990_v51 }
 0x399   : > { %v1905_v62 = vunpack.c.h.s8.bf16 %v5992_v52 }
 0x39b   : > { %1986 = vmatpush1.bf16.msra.mxu0 %v1887_v54  ;;  %2068 = vmatpush1.bf16.msra.mxu1 %v1889_v56  ;;  %v1901_v54 = vunpack.c.l.s8.bf16 %v5992_v52  ;;  %v1904_v56 = vunpack.c.h.s8.bf16 %v5991_v42  ;;  %v6006_v42 = vld [vmem:[%s7216_s10 + $0x7a0] sm:$0xff] }
 0x39c   : > { %1996 = vmatprep.subr.bf16.mxu0 %v1892_v60  ;;  %2078 = vmatprep.subr.bf16.mxu1 %v1894_v61  ;;  %v5997_v60 = vld [vmem:[%s7216_s10 + $0x758] sm:$0xff]  ;;  %v1903_v61 = vunpack.c.h.s8.bf16 %v5990_v51  ;;  %v1935_v52 = vunpack.c.h.s8.bf16 %v6006_v42 }
 0x39d   : > { %v6013_v51 = vld [vmem:[%s7216_s10 + $0x7d8] sm:$0xff] }
 0x431   : > { %v1603_v5 = vpop.f32.mrb[8].mxu0  ;;  %v1685_v6 = vpop.f32.mrb[8].mxu1 }
 0x432   : > { %v1715_v10 = vmul.f32 %v1698_v0, %v1603_v5  ;;  %v1717_v7 = vmul.f32 %v1706_v46, %v1685_v6  ;;  %v1605_v12 = vpop.f32.mrb[9].mxu0  ;;  %v1687_v13 = vpop.f32.mrb[9].mxu1  ;;  %v1910_v0 = vunpack.c.l.s8.bf16 %v5997_v60  ;;  %v5994_v46 = vld [vmem:[%s7216_s10 + $0x740] sm:$0xff]  ;;  %v1914_v5 = vunpack.c.h.s8.bf16 %v5997_v60  ;;  %v5999_v6 = vld [vmem:[%s7216_s10 + $0x768] sm:$0xff] }
 0x433   : > { %v1716_v14 = vmul.f32 %v1702_v1, %v1605_v12  ;;  %v1718_v15 = vmul.f32 %v1710_v2, %v1687_v13  ;;  %v1607_v16 = vpop.f32.mrb[10].mxu0  ;;  %v1689_v17 = vpop.f32.mrb[10].mxu1  ;;  %v5996_v1 = vld [vmem:[%s7216_s10 + $0x750] sm:$0xff]  ;;  %v1907_v2 = vunpack.c.l.s8.bf16 %v5994_v46  ;;  %v5998_v13 = vld [vmem:[%s7216_s10 + $0x760] sm:$0xff] }
 0x434   : > { %v1742_v55 = vadd.f32 %v1725_v3, %v1715_v10  ;;  %v7617_v11 = vadd.f32 %v1733_v4, %v1717_v7  ;;  %v1608_v18 = vpop.f32.mrb[11].mxu0  ;;  %v1690_v19 = vpop.f32.mrb[11].mxu1  ;;  %v1909_v3 = vunpack.c.l.s8.bf16 %v5996_v1  ;;  %v1912_v4 = vunpack.c.h.s8.bf16 %v5995_v58  ;;  %v6012_v58 = vld [vmem:[%s7216_s10 + $0x7d0] sm:$0xff] }
 0x435   : > { %v1743_v21 = vadd.f32 %v1729_v8, %v1716_v14  ;;  %v1745_v22 = vadd.f32 %v1737_v9, %v1718_v15  ;;  %v6001_v8 = vld [vmem:[%s7216_s10 + $0x778] sm:$0xff]  ;;  %v1911_v9 = vunpack.c.h.s8.bf16 %v5994_v46  ;;  %v1913_v10 = vunpack.c.h.s8.bf16 %v5996_v1  ;;  %v6000_v14 = vld [vmem:[%s7216_s10 + $0x770] sm:$0xff]  ;;  %v6003_v18 = vld [vmem:[%s7216_s10 + $0x788] sm:$0xff] }
 0x436   : > { %vm1746_vm9 = vcmp.ge.f32.partialorder %v1742_v55, 0.0  ;;  %v1750_v25 = vmul.f32 0.2, %v1742_v55  ;;  %v1916_v7 = vunpack.c.l.s8.bf16 %v5999_v6  ;;  %v1918_v12 = vunpack.c.l.s8.bf16 %v6001_v8  ;;  %v6005_v19 = vld [vmem:[%s7216_s10 + $0x798] sm:$0xff] }
 0x437   : > { %v1751_v28 = vmul.f32 0.2, %v1743_v21  ;;  %v1753_v59 = vmul.f32 0.2, %v1745_v22  ;;  %vm1747_vm10 = vcmp.ge.f32.partialorder %v1743_v21, 0.0  ;;  %vm1749_vm11 = vcmp.ge.f32.partialorder %v1745_v22, 0.0 }
 0x438   : > { %v1754_v30 = vsel %vm1746_vm9, %v1742_v55, %v1750_v25  ;;  %v1915_v15 = vunpack.c.l.s8.bf16 %v5998_v13  ;;  %v1917_v16 = vunpack.c.l.s8.bf16 %v6000_v14  ;;  %v1920_v17 = vunpack.c.h.s8.bf16 %v5999_v6  ;;  %v6017_v46 = vld [vmem:[%s7216_s10 + $0x7f8] sm:$0xff]  ;;  %v6016_v6 = vld [vmem:[%s7216_s10 + $0x7f0] sm:$0xff] }
 0x439   : > { %v1755_v29 = vsel %vm1747_vm10, %v1743_v21, %v1751_v28  ;;  %v1757_v34 = vsel %vm1749_vm11, %v1745_v22, %v1753_v59  ;;  %v1758_v35 = vpack.c.bf16 %v1754_v30, %v1754_v30  ;;  %v1922_v55 = vunpack.c.h.s8.bf16 %v6001_v8  ;;  %v6004_v28 = vld [vmem:[%s7216_s10 + $0x790] sm:$0xff] }
 0x43a   : > { %v1759_v32 = vpack.c.bf16 %v1755_v29, %v1755_v29  ;;  %v1761_v44 = vpack.c.bf16 %v1757_v34, %v1757_v34  ;;  %v1919_v21 = vunpack.c.h.s8.bf16 %v5998_v13  ;;  %v1921_v22 = vunpack.c.h.s8.bf16 %v6000_v14  ;;  %v6021_v13 = vld [vmem:[%s7216_s10 + $0x808] sm:$0xff]  ;;  %v6023_v14 = vld [vmem:[%s7216_s10 + $0x818] sm:$0xff] }
 0x43b   : > { %v1924_v25 = vunpack.c.l.s8.bf16 %v6003_v18  ;;  %v1926_v26 = vunpack.c.l.s8.bf16 %v6005_v19  ;;  %v1923_v59 = vunpack.c.l.s8.bf16 %v6002_v27  ;;  %v1925_v30 = vunpack.c.l.s8.bf16 %v6004_v28 }
 0x43c   : > { %1987 = vmatprep.mubr.bf16.mxu0 %v1759_v32  ;;  %2069 = vmatprep.mubr.bf16.mxu1 %v1759_v32  ;;  %v1928_v29 = vunpack.c.h.s8.bf16 %v6003_v18  ;;  %v1930_v32 = vunpack.c.h.s8.bf16 %v6005_v19  ;;  %v1927_v34 = vunpack.c.h.s8.bf16 %v6002_v27  ;;  %vm1748_vm12 = vcmp.ge.f32.partialorder %v7617_v11, 0.0  ;;  %v6020_v18 = vld [vmem:[%s7216_s10 + $0x800] sm:$0xff]  ;;  %v6022_v19 = vld [vmem:[%s7216_s10 + $0x810] sm:$0xff] }
 0x43d   : > { %1988 = vmatmul.mubr.bf16.vlgmr.msra.gmra.mrb[12].mxu0 %v1758_v35  ;;  %2070 = vmatmul.mubr.bf16.vlgmr.msra.gmra.mrb[12].mxu1 %v1758_v35  ;;  %v1929_v35 = vunpack.c.h.s8.bf16 %v6004_v28  ;;  %v2267_v27 = vunpack.c.h.s8.bf16 %v6021_v13  ;;  %v2269_v28 = vunpack.c.h.s8.bf16 %v6023_v14 }
 0x43e   : > { %1997 = vmatpush1.bf16.msra.mxu0 %v1891_v50  ;;  %2079 = vmatpush1.bf16.msra.mxu1 %v1893_v33  ;;  %v6007_v50 = vld [vmem:[%s7216_s10 + $0x7a8] sm:$0xff]  ;;  %v6009_v33 = vld [vmem:[%s7216_s10 + $0x7b8] sm:$0xff] }
 0x43f   : > { %2028 = vmatprep.mubr.bf16.mxu0 %v1761_v44  ;;  %2110 = vmatprep.mubr.bf16.mxu1 %v1761_v44  ;;  %v1931_v44 = vunpack.c.l.s8.bf16 %v6006_v42 }
 0x440   : > { %1998 = vmatprep.subr.bf16.mxu0 %v1896_v38  ;;  %2080 = vmatprep.subr.bf16.mxu1 %v1898_v41  ;;  %v1932_v38 = vunpack.c.l.s8.bf16 %v6007_v50  ;;  %v1934_v41 = vunpack.c.l.s8.bf16 %v6009_v33 }
 0x442   : > { %1999 = vmatpush1.bf16.msra.mxu0 %v1895_v31  ;;  %2081 = vmatpush1.bf16.msra.mxu1 %v1897_v47  ;;  %v1933_v31 = vunpack.c.l.s8.bf16 %v6008_v43  ;;  %v1936_v47 = vunpack.c.h.s8.bf16 %v6007_v50 }
 0x443   : > { %2000 = vmatprep.subr.bf16.mxu0 %v1900_v48  ;;  %2082 = vmatprep.subr.bf16.mxu1 %v1902_v49  ;;  %v1938_v48 = vunpack.c.h.s8.bf16 %v6009_v33  ;;  %v6011_v49 = vld [vmem:[%s7216_s10 + $0x7c8] sm:$0xff]  ;;  %v6024_v33 = vld [vmem:[%s7216_s10 + $0x820] sm:$0xff] }
 0x446   : > { %2001 = vmatpush1.bf16.msra.mxu0 %v1899_v53  ;;  %2083 = vmatpush1.bf16.msra.mxu1 %v1901_v54  ;;  %v1937_v53 = vunpack.c.h.s8.bf16 %v6008_v43  ;;  %v1940_v54 = vunpack.c.l.s8.bf16 %v6011_v49  ;;  %v6029_v43 = vld [vmem:[%s7216_s10 + $0x848] sm:$0xff] }
 0x447   : > { %2002 = vmatprep.subr.bf16.mxu0 %v1904_v56  ;;  %2084 = vmatprep.subr.bf16.mxu1 %v1906_v57  ;;  %v1942_v56 = vunpack.c.l.s8.bf16 %v6013_v51  ;;  %v6010_v57 = vld [vmem:[%s7216_s10 + $0x7c0] sm:$0xff] }
 0x448   : > { %v1939_v60 = vunpack.c.l.s8.bf16 %v6010_v57  ;;  %v1943_v1 = vunpack.c.h.s8.bf16 %v6010_v57 }
 0x44a   : > { %2003 = vmatpush1.bf16.msra.mxu0 %v1903_v61  ;;  %2085 = vmatpush1.bf16.msra.mxu1 %v1905_v62  ;;  %v1941_v61 = vunpack.c.l.s8.bf16 %v6012_v58  ;;  %v1944_v62 = vunpack.c.h.s8.bf16 %v6011_v49 }
 0x44b   : > { %2004 = vmatprep.subr.bf16.mxu0 %v1908_v63  ;;  %2086 = vmatprep.subr.bf16.mxu1 %v1910_v0  ;;  %v1946_v63 = vunpack.c.h.s8.bf16 %v6013_v51  ;;  %v6015_v0 = vld [vmem:[%s7216_s10 + $0x7e8] sm:$0xff]  ;;  %v6028_v51 = vld [vmem:[%s7216_s10 + $0x840] sm:$0xff] }
 0x44e   : > { %2005 = vmatpush1.bf16.msra.mxu0 %v1907_v2  ;;  %2087 = vmatpush1.bf16.msra.mxu1 %v1909_v3  ;;  %v1945_v2 = vunpack.c.h.s8.bf16 %v6012_v58  ;;  %v1948_v3 = vunpack.c.l.s8.bf16 %v6015_v0  ;;  %v6033_v58 = vld [vmem:[%s7216_s10 + $0x868] sm:$0xff] }
 0x44f   : > { %2006 = vmatprep.subr.bf16.mxu0 %v1912_v4  ;;  %2088 = vmatprep.subr.bf16.mxu1 %v1914_v5  ;;  %v1950_v4 = vunpack.c.l.s8.bf16 %v6017_v46  ;;  %v6014_v5 = vld [vmem:[%s7216_s10 + $0x7e0] sm:$0xff] }
 0x450   : > { %v1947_v8 = vunpack.c.l.s8.bf16 %v6014_v5 }
 0x452   : > { %2007 = vmatpush1.bf16.msra.mxu0 %v1911_v9  ;;  %2089 = vmatpush1.bf16.msra.mxu1 %v1913_v10  ;;  %v1949_v9 = vunpack.c.l.s8.bf16 %v6016_v6  ;;  %v1952_v10 = vunpack.c.h.s8.bf16 %v6015_v0 }
 0x453   : > { %2008 = vmatprep.subr.bf16.mxu0 %v1916_v7  ;;  %2090 = vmatprep.subr.bf16.mxu1 %v1918_v12  ;;  %v1954_v7 = vunpack.c.h.s8.bf16 %v6017_v46  ;;  %v1752_v12 = vmul.f32 0.2, %v7617_v11  ;;  %v6032_v46 = vld [vmem:[%s7216_s10 + $0x860] sm:$0xff] }
 0x456   : > { %2009 = vmatpush1.bf16.msra.mxu0 %v1915_v15  ;;  %2091 = vmatpush1.bf16.msra.mxu1 %v1917_v16  ;;  %v1951_v15 = vunpack.c.h.s8.bf16 %v6014_v5  ;;  %v1953_v16 = vunpack.c.h.s8.bf16 %v6016_v6  ;;  %v6037_v6 = vld [vmem:[%s7216_s10 + $0x888] sm:$0xff] }
 0x457   : > { %2010 = vmatprep.subr.bf16.mxu0 %v1920_v17  ;;  %2092 = vmatprep.subr.bf16.mxu1 %v1922_v55  ;;  %v2263_v17 = vunpack.c.l.s8.bf16 %v6021_v13  ;;  %v2265_v55 = vunpack.c.l.s8.bf16 %v6023_v14  ;;  %v6036_v13 = vld [vmem:[%s7216_s10 + $0x880] sm:$0xff]  ;;  %v6038_v14 = vld [vmem:[%s7216_s10 + $0x890] sm:$0xff] }
 0x45a   : > { %2011 = vmatpush1.bf16.msra.mxu0 %v1919_v21  ;;  %2093 = vmatpush1.bf16.msra.mxu1 %v1921_v22  ;;  %v1756_v21 = vsel %vm1748_vm12, %v7617_v11, %v1752_v12  ;;  %v2262_v22 = vunpack.c.l.s8.bf16 %v6020_v18  ;;  %v2268_v11 = vunpack.c.h.s8.bf16 %v6022_v19 }
 0x45b   : > { %2012 = vmatprep.subr.bf16.mxu0 %v1924_v25  ;;  %2094 = vmatprep.subr.bf16.mxu1 %v1926_v26  ;;  %v2264_v25 = vunpack.c.l.s8.bf16 %v6022_v19  ;;  %v1760_v26 = vpack.c.bf16 %v1756_v21, %v1756_v21  ;;  %v6043_v19 = vld [vmem:[%s7216_s10 + $0x8b8] sm:$0xff]  ;;  %v2298_v21 = vunpack.c.h.s8.bf16 %v6036_v13 }
 0x45e   : > { %2013 = vmatpush1.bf16.msra.mxu0 %v1923_v59  ;;  %2095 = vmatpush1.bf16.msra.mxu1 %v1925_v30  ;;  %v6025_v59 = vld [vmem:[%s7216_s10 + $0x828] sm:$0xff]  ;;  %v6027_v30 = vld [vmem:[%s7216_s10 + $0x838] sm:$0xff] }
 0x45f   : > { %2014 = vmatprep.subr.bf16.mxu0 %v1928_v29  ;;  %2096 = vmatprep.subr.bf16.mxu1 %v1930_v32  ;;  %v2266_v29 = vunpack.c.h.s8.bf16 %v6020_v18  ;;  %v2271_v32 = vunpack.c.l.s8.bf16 %v6025_v59  ;;  %v2273_v50 = vunpack.c.l.s8.bf16 %v6027_v30  ;;  %v2277_v42 = vunpack.c.h.s8.bf16 %v6027_v30  ;;  %v6041_v18 = vld [vmem:[%s7216_s10 + $0x8a8] sm:$0xff] }
 0x462   : > { %2015 = vmatpush1.bf16.msra.mxu0 %v1927_v34  ;;  %2097 = vmatpush1.bf16.msra.mxu1 %v1929_v35  ;;  %v6026_v34 = vld [vmem:[%s7216_s10 + $0x830] sm:$0xff]  ;;  %v2270_v35 = vunpack.c.l.s8.bf16 %v6024_v33 }
 0x463   : > { %2016 = vmatprep.subr.bf16.mxu0 %v1932_v38  ;;  %2098 = vmatprep.subr.bf16.mxu1 %v1934_v41  ;;  %v2272_v38 = vunpack.c.l.s8.bf16 %v6026_v34  ;;  %v2275_v41 = vunpack.c.h.s8.bf16 %v6025_v59 }
 0x466   : > { %2017 = vmatpush1.bf16.msra.mxu0 %v1931_v44  ;;  %2099 = vmatpush1.bf16.msra.mxu1 %v1933_v31  ;;  %v6031_v44 = vld [vmem:[%s7216_s10 + $0x858] sm:$0xff]  ;;  %v2274_v31 = vunpack.c.h.s8.bf16 %v6024_v33 }
 0x467   : > { %2018 = vmatprep.subr.bf16.mxu0 %v1936_v47  ;;  %2100 = vmatprep.subr.bf16.mxu1 %v1938_v48  ;;  %v2276_v47 = vunpack.c.h.s8.bf16 %v6026_v34  ;;  %v2279_v48 = vunpack.c.l.s8.bf16 %v6029_v43  ;;  %v2281_v49 = vunpack.c.l.s8.bf16 %v6031_v44  ;;  %v2285_v57 = vunpack.c.h.s8.bf16 %v6031_v44 }
 0x46a   : > { %2019 = vmatpush1.bf16.msra.mxu0 %v1935_v52  ;;  %2101 = vmatpush1.bf16.msra.mxu1 %v1937_v53  ;;  %v6030_v52 = vld [vmem:[%s7216_s10 + $0x850] sm:$0xff]  ;;  %v2278_v53 = vunpack.c.l.s8.bf16 %v6028_v51 }
 0x46b   : > { %2020 = vmatprep.subr.bf16.mxu0 %v1940_v54  ;;  %2102 = vmatprep.subr.bf16.mxu1 %v1942_v56  ;;  %v2280_v54 = vunpack.c.l.s8.bf16 %v6030_v52  ;;  %v2283_v56 = vunpack.c.h.s8.bf16 %v6029_v43 }
 0x46e   : > { %2021 = vmatpush1.bf16.msra.mxu0 %v1939_v60  ;;  %2103 = vmatpush1.bf16.msra.mxu1 %v1941_v61  ;;  %v6035_v60 = vld [vmem:[%s7216_s10 + $0x878] sm:$0xff]  ;;  %v2282_v61 = vunpack.c.h.s8.bf16 %v6028_v51  ;;  %v6049_v51 = vld [vmem:[%s7216_s10 + $0x8e8] sm:$0xff] }
 0x46f   : > { %2022 = vmatprep.subr.bf16.mxu0 %v1944_v62  ;;  %2104 = vmatprep.subr.bf16.mxu1 %v1946_v63  ;;  %v2284_v62 = vunpack.c.h.s8.bf16 %v6030_v52  ;;  %v2287_v63 = vunpack.c.l.s8.bf16 %v6033_v58  ;;  %v2289_v0 = vunpack.c.l.s8.bf16 %v6035_v60  ;;  %v2293_v5 = vunpack.c.h.s8.bf16 %v6035_v60  ;;  %v6051_v52 = vld [vmem:[%s7216_s10 + $0x8f8] sm:$0xff] }
 0x472   : > { %2023 = vmatpush1.bf16.msra.mxu0 %v1943_v1  ;;  %2105 = vmatpush1.bf16.msra.mxu1 %v1945_v2  ;;  %v6034_v1 = vld [vmem:[%s7216_s10 + $0x870] sm:$0xff]  ;;  %v2286_v2 = vunpack.c.l.s8.bf16 %v6032_v46 }
 0x473   : > { %2024 = vmatprep.subr.bf16.mxu0 %v1948_v3  ;;  %2106 = vmatprep.subr.bf16.mxu1 %v1950_v4  ;;  %v2288_v3 = vunpack.c.l.s8.bf16 %v6034_v1  ;;  %v2291_v4 = vunpack.c.h.s8.bf16 %v6033_v58 }
 0x476   : > { %2025 = vmatpush1.bf16.msra.mxu0 %v1947_v8  ;;  %2107 = vmatpush1.bf16.msra.mxu1 %v1949_v9  ;;  %v6039_v8 = vld [vmem:[%s7216_s10 + $0x898] sm:$0xff]  ;;  %v2290_v9 = vunpack.c.h.s8.bf16 %v6032_v46  ;;  %v7687_v46 = vld [vmem:[%s7216_s10 + $0x908] sm:$0xff] }
 0x477   : > { %2026 = vmatprep.subr.bf16.mxu0 %v1952_v10  ;;  %2108 = vmatprep.subr.bf16.mxu1 %v1954_v7  ;;  %v2292_v10 = vunpack.c.h.s8.bf16 %v6034_v1  ;;  %v2295_v7 = vunpack.c.l.s8.bf16 %v6037_v6  ;;  %v2297_v12 = vunpack.c.l.s8.bf16 %v6039_v8  ;;  %v7690_v1 = vld [vmem:[%s7216_s10 + $0x918] sm:$0xff] }
 0x47a   : > { %2027 = vmatpush1.bf16.msra.mxu0 %v1951_v15  ;;  %2109 = vmatpush1.bf16.msra.mxu1 %v1953_v16  ;;  %v2294_v15 = vunpack.c.l.s8.bf16 %v6036_v13  ;;  %v2296_v16 = vunpack.c.l.s8.bf16 %v6038_v14 }
 0x47b   : > { %2390 = vmatprep.subr.bf16.mxu0 %v2263_v17  ;;  %2472 = vmatprep.subr.bf16.mxu1 %v2265_v55  ;;  %v2299_v17 = vunpack.c.h.s8.bf16 %v6037_v6  ;;  %v2301_v55 = vunpack.c.h.s8.bf16 %v6039_v8 }
 0x47d   : > { %2029 = vmatmul.mubr.bf16.vlgmr.msra.gmra.mrb[12].mxu0 %v1760_v26  ;;  %2111 = vmatmul.mubr.bf16.vlgmr.msra.gmra.mrb[12].mxu1 %v1760_v26  ;;  %v2305_v26 = vunpack.c.l.s8.bf16 %v6043_v19 }
 0x47e   : > { %2391 = vmatpush1.bf16.msra.mxu0 %v2262_v22  ;;  %2473 = vmatpush1.bf16.msra.mxu1 %v2264_v25  ;;  %v2300_v22 = vunpack.c.h.s8.bf16 %v6038_v14  ;;  %v2303_v25 = vunpack.c.l.s8.bf16 %v6041_v18 }
 0x47f   : > { %2392 = vmatprep.subr.bf16.mxu0 %v2267_v27  ;;  %2474 = vmatprep.subr.bf16.mxu1 %v2269_v28  ;;  %v6040_v27 = vld [vmem:[%s7216_s10 + $0x8a0] sm:$0xff]  ;;  %v6042_v28 = vld [vmem:[%s7216_s10 + $0x8b0] sm:$0xff] }
 0x480   : > { %v2302_v59 = vunpack.c.l.s8.bf16 %v6040_v27  ;;  %v2304_v30 = vunpack.c.l.s8.bf16 %v6042_v28  ;;  %v2306_v33 = vunpack.c.h.s8.bf16 %v6040_v27  ;;  %v2308_v34 = vunpack.c.h.s8.bf16 %v6042_v28 }
 0x482   : > { %2393 = vmatpush1.bf16.msra.mxu0 %v2266_v29  ;;  %2475 = vmatpush1.bf16.msra.mxu1 %v2268_v11  ;;  %v2307_v29 = vunpack.c.h.s8.bf16 %v6041_v18  ;;  %v2309_v11 = vunpack.c.h.s8.bf16 %v6043_v19 }
 0x483   : > { %2394 = vmatprep.subr.bf16.mxu0 %v2271_v32  ;;  %2476 = vmatprep.subr.bf16.mxu1 %v2273_v50  ;;  %v6045_v32 = vld [vmem:[%s7216_s10 + $0x8c8] sm:$0xff]  ;;  %v6047_v50 = vld [vmem:[%s7216_s10 + $0x8d8] sm:$0xff] }
 0x486   : > { %2395 = vmatpush1.bf16.msra.mxu0 %v2270_v35  ;;  %2477 = vmatpush1.bf16.msra.mxu1 %v2272_v38  ;;  %v2311_v35 = vunpack.c.l.s8.bf16 %v6045_v32  ;;  %v2313_v38 = vunpack.c.l.s8.bf16 %v6047_v50 }
 0x487   : > { %2396 = vmatprep.subr.bf16.mxu0 %v2275_v41  ;;  %2478 = vmatprep.subr.bf16.mxu1 %v2277_v42  ;;  %v6044_v41 = vld [vmem:[%s7216_s10 + $0x8c0] sm:$0xff]  ;;  %v6046_v42 = vld [vmem:[%s7216_s10 + $0x8d0] sm:$0xff] }
 0x488   : > { %v2310_v43 = vunpack.c.l.s8.bf16 %v6044_v41  ;;  %v2312_v44 = vunpack.c.l.s8.bf16 %v6046_v42 }
 0x48a   : > { %2397 = vmatpush1.bf16.msra.mxu0 %v2274_v31  ;;  %2479 = vmatpush1.bf16.msra.mxu1 %v2276_v47  ;;  %v2315_v31 = vunpack.c.h.s8.bf16 %v6045_v32  ;;  %v2317_v47 = vunpack.c.h.s8.bf16 %v6047_v50 }
 0x48b   : > { %2398 = vmatprep.subr.bf16.mxu0 %v2279_v48  ;;  %2480 = vmatprep.subr.bf16.mxu1 %v2281_v49  ;;  %v2314_v48 = vunpack.c.h.s8.bf16 %v6044_v41  ;;  %v2316_v49 = vunpack.c.h.s8.bf16 %v6046_v42 }
 0x48e   : > { %2399 = vmatpush1.bf16.msra.mxu0 %v2278_v53  ;;  %2481 = vmatpush1.bf16.msra.mxu1 %v2280_v54  ;;  %v2319_v53 = vunpack.c.l.s8.bf16 %v6049_v51  ;;  %v2321_v54 = vunpack.c.l.s8.bf16 %v6051_v52 }
 0x48f   : > { %2400 = vmatprep.subr.bf16.mxu0 %v2283_v56  ;;  %2482 = vmatprep.subr.bf16.mxu1 %v2285_v57  ;;  %v6048_v56 = vld [vmem:[%s7216_s10 + $0x8e0] sm:$0xff]  ;;  %v6050_v57 = vld [vmem:[%s7216_s10 + $0x8f0] sm:$0xff] }
 0x490   : > { %v2318_v58 = vunpack.c.l.s8.bf16 %v6048_v56  ;;  %v2320_v60 = vunpack.c.l.s8.bf16 %v6050_v57 }
 0x492   : > { %2401 = vmatpush1.bf16.msra.mxu0 %v2282_v61  ;;  %2483 = vmatpush1.bf16.msra.mxu1 %v2284_v62  ;;  %v2323_v61 = vunpack.c.h.s8.bf16 %v6049_v51  ;;  %v2325_v62 = vunpack.c.h.s8.bf16 %v6051_v52 }
 0x493   : > { %2402 = vmatprep.subr.bf16.mxu0 %v2287_v63  ;;  %2484 = vmatprep.subr.bf16.mxu1 %v2289_v0  ;;  %v2322_v63 = vunpack.c.h.s8.bf16 %v6048_v56  ;;  %v2324_v0 = vunpack.c.h.s8.bf16 %v6050_v57  ;;  %v6057_v56 = vld [vmem:[%s7216_s10 + $0x928] sm:$0xff]  ;;  %v6059_v57 = vld [vmem:[%s7216_s10 + $0x938] sm:$0xff] }
 0x496   : > { %2403 = vmatpush1.bf16.msra.mxu0 %v2286_v2  ;;  %2485 = vmatpush1.bf16.msra.mxu1 %v2288_v3  ;;  %v2327_v2 = vunpack.c.l.s8.bf16 %v7687_v46  ;;  %v2329_v3 = vunpack.c.l.s8.bf16 %v7690_v1 }
 0x497   : > { %2404 = vmatprep.subr.bf16.mxu0 %v2291_v4  ;;  %2486 = vmatprep.subr.bf16.mxu1 %v2293_v5  ;;  %v6018_v4 = vld [vmem:[%s7223_s1 + $0xc] sm:$0xf] }
 0x498   : > { %v6019_v5 = vld [vmem:[%s7226_s6 + $0xc] sm:$0xf]  ;;  %v2125_v6 = vrot.slane %v6018_v4, %v7405_v36  ;;  %v2133_v8 = vrot.slane %v6018_v4, %v7407_v37 }
 0x49a   : > { %2405 = vmatpush1.bf16.msra.mxu0 %v2290_v9  ;;  %2487 = vmatpush1.bf16.msra.mxu1 %v2292_v10  ;;  %v2129_v9 = vrot.slane %v6018_v4, %v7410_v39  ;;  %v2137_v10 = vrot.slane %v6018_v4, %v7412_v40  ;;  %v6061_v4 = vld [vmem:[%s7216_s10 + $0x948] sm:$0xff] }
 0x49b   : > { %2406 = vmatprep.subr.bf16.mxu0 %v2295_v7  ;;  %2488 = vmatprep.subr.bf16.mxu1 %v2297_v12  ;;  %v2152_v7 = vrot.slane %v6019_v5, %v7405_v36  ;;  %v2160_v12 = vrot.slane %v6019_v5, %v7407_v37 }
 0x49e   : > { %2407 = vmatpush1.bf16.msra.mxu0 %v2294_v15  ;;  %2489 = vmatpush1.bf16.msra.mxu1 %v2296_v16  ;;  %v2156_v15 = vrot.slane %v6019_v5, %v7410_v39  ;;  %v2164_v16 = vrot.slane %v6019_v5, %v7412_v40  ;;  %v6063_v5 = vld [vmem:[%s7216_s10 + $0x958] sm:$0xff] }
 0x49f   : > { %2408 = vmatprep.subr.bf16.mxu0 %v2299_v17  ;;  %2490 = vmatprep.subr.bf16.mxu1 %v2301_v55 }
 0x4a2   : > { %2409 = vmatpush1.bf16.msra.mxu0 %v2298_v21  ;;  %2491 = vmatpush1.bf16.msra.mxu1 %v2300_v22 }
 0x4a3   : > { %2410 = vmatprep.subr.bf16.mxu0 %v2303_v25  ;;  %2492 = vmatprep.subr.bf16.mxu1 %v2305_v26 }
 0x4a6   : > { %2411 = vmatpush1.bf16.msra.mxu0 %v2302_v59  ;;  %2493 = vmatpush1.bf16.msra.mxu1 %v2304_v30 }
 0x4a7   : > { %2412 = vmatprep.subr.bf16.mxu0 %v2307_v29  ;;  %2494 = vmatprep.subr.bf16.mxu1 %v2309_v11 }
 0x4aa   : > { %2413 = vmatpush1.bf16.msra.mxu0 %v2306_v33  ;;  %2495 = vmatpush1.bf16.msra.mxu1 %v2308_v34 }
 0x4ab   : > { %2414 = vmatprep.subr.bf16.mxu0 %v2311_v35  ;;  %2496 = vmatprep.subr.bf16.mxu1 %v2313_v38 }
 0x4ae   : > { %2415 = vmatpush1.bf16.msra.mxu0 %v2310_v43  ;;  %2497 = vmatpush1.bf16.msra.mxu1 %v2312_v44 }
 0x4af   : > { %2416 = vmatprep.subr.bf16.mxu0 %v2315_v31  ;;  %2498 = vmatprep.subr.bf16.mxu1 %v2317_v47  ;;  %v6052_v31 = vld [vmem:[%s7216_s10 + $0x900] sm:$0xff]  ;;  %v6054_v47 = vld [vmem:[%s7216_s10 + $0x910] sm:$0xff] }
 0x4b0   : > { %v2326_v52 = vunpack.c.l.s8.bf16 %v6052_v31 }
 0x4b2   : > { %2417 = vmatpush1.bf16.msra.mxu0 %v2314_v48  ;;  %2499 = vmatpush1.bf16.msra.mxu1 %v2316_v49 }
 0x4b3   : > { %2418 = vmatprep.subr.bf16.mxu0 %v2319_v53  ;;  %2500 = vmatprep.subr.bf16.mxu1 %v2321_v54  ;;  %v2328_v53 = vunpack.c.l.s8.bf16 %v6054_v47 }
 0x4b6   : > { %2419 = vmatpush1.bf16.msra.mxu0 %v2318_v58  ;;  %2501 = vmatpush1.bf16.msra.mxu1 %v2320_v60  ;;  %v2330_v58 = vunpack.c.h.s8.bf16 %v6052_v31  ;;  %v2332_v60 = vunpack.c.h.s8.bf16 %v6054_v47 }
 0x4b7   : > { %2420 = vmatprep.subr.bf16.mxu0 %v2323_v61  ;;  %2502 = vmatprep.subr.bf16.mxu1 %v2325_v62  ;;  %v2335_v61 = vunpack.c.l.s8.bf16 %v6057_v56  ;;  %v2337_v62 = vunpack.c.l.s8.bf16 %v6059_v57 }
 0x4ba   : > { %2421 = vmatpush1.bf16.msra.mxu0 %v2322_v63  ;;  %2503 = vmatpush1.bf16.msra.mxu1 %v2324_v0  ;;  %v6056_v63 = vld [vmem:[%s7216_s10 + $0x920] sm:$0xff]  ;;  %v6058_v0 = vld [vmem:[%s7216_s10 + $0x930] sm:$0xff] }
 0x4bb   : > { %2431 = vmatprep.subr.bf16.mxu0 %v2327_v2  ;;  %2513 = vmatprep.subr.bf16.mxu1 %v2329_v3  ;;  %v2339_v2 = vunpack.c.h.s8.bf16 %v6057_v56  ;;  %v2341_v3 = vunpack.c.h.s8.bf16 %v6059_v57  ;;  %v6072_v56 = vld [vmem:[%s7216_s10 + $0x9a0] sm:$0xff]  ;;  %v6074_v57 = vld [vmem:[%s7216_s10 + $0x9b0] sm:$0xff] }
 0x550   : > { %v2030_v13 = vpop.f32.mrb[12].mxu0  ;;  %v2112_v14 = vpop.f32.mrb[12].mxu1 }
 0x551   : > { %v2142_v17 = vmul.f32 %v2125_v6, %v2030_v13  ;;  %v2144_v55 = vmul.f32 %v2133_v8, %v2112_v14  ;;  %v2032_v18 = vpop.f32.mrb[13].mxu0  ;;  %v2114_v19 = vpop.f32.mrb[13].mxu1  ;;  %v2338_v6 = vunpack.c.h.s8.bf16 %v6056_v63  ;;  %v2340_v8 = vunpack.c.h.s8.bf16 %v6058_v0 }
 0x552   : > { %v2143_v21 = vmul.f32 %v2129_v9, %v2032_v18  ;;  %v2145_v22 = vmul.f32 %v2137_v10, %v2114_v19  ;;  %v2034_v25 = vpop.f32.mrb[14].mxu0  ;;  %v2116_v26 = vpop.f32.mrb[14].mxu1  ;;  %v2343_v9 = vunpack.c.l.s8.bf16 %v6061_v4  ;;  %v2345_v10 = vunpack.c.l.s8.bf16 %v6063_v5 }
 0x553   : > { %v2169_v27 = vadd.f32 %v2152_v7, %v2142_v17  ;;  %v7704_v28 = vadd.f32 %v2160_v12, %v2144_v55  ;;  %v2035_v59 = vpop.f32.mrb[15].mxu0  ;;  %v2117_v30 = vpop.f32.mrb[15].mxu1  ;;  %v6060_v7 = vld [vmem:[%s7216_s10 + $0x940] sm:$0xff]  ;;  %v6062_v12 = vld [vmem:[%s7216_s10 + $0x950] sm:$0xff]  ;;  %v6065_v17 = vld [vmem:[%s7216_s10 + $0x968] sm:$0xff] }
 0x554   : > { %v2170_v29 = vadd.f32 %v2156_v15, %v2143_v21  ;;  %v2172_v11 = vadd.f32 %v2164_v16, %v2145_v22  ;;  %v2342_v13 = vunpack.c.l.s8.bf16 %v6060_v7  ;;  %v2344_v14 = vunpack.c.l.s8.bf16 %v6062_v12  ;;  %v6067_v55 = vld [vmem:[%s7216_s10 + $0x978] sm:$0xff]  ;;  %v6064_v25 = vld [vmem:[%s7216_s10 + $0x960] sm:$0xff]  ;;  %v6066_v26 = vld [vmem:[%s7216_s10 + $0x970] sm:$0xff] }
 0x555   : > { %vm2173_vm13 = vcmp.ge.f32.partialorder %v2169_v27, 0.0  ;;  %v2177_v32 = vmul.f32 0.2, %v2169_v27  ;;  %v2347_v15 = vunpack.c.h.s8.bf16 %v6061_v4  ;;  %v2349_v16 = vunpack.c.h.s8.bf16 %v6063_v5  ;;  %v6078_v4 = vld [vmem:[%s7216_s10 + $0x9d0] sm:$0xff] }
 0x556   : > { %vm2174_vm14 = vcmp.ge.f32.partialorder %v2170_v29, 0.0  ;;  %v2178_v50 = vmul.f32 0.2, %v2170_v29  ;;  %vm2176_vm15 = vcmp.ge.f32.partialorder %v2172_v11, 0.0  ;;  %v2180_v33 = vmul.f32 0.2, %v2172_v11 }
 0x557   : > { %v2181_v34 = vsel %vm2173_vm13, %v2169_v27, %v2177_v32  ;;  %v2346_v18 = vunpack.c.h.s8.bf16 %v6060_v7  ;;  %v2348_v19 = vunpack.c.h.s8.bf16 %v6062_v12  ;;  %v2351_v21 = vunpack.c.l.s8.bf16 %v6065_v17  ;;  %v6071_v32 = vld [vmem:[%s7216_s10 + $0x998] sm:$0xff]  ;;  %v6081_v7 = vld [vmem:[%s7216_s10 + $0x9e8] sm:$0xff] }
 0x558   : > { %v2185_v35 = vmul.f32 1.4142135, %v2181_v34  ;;  %v2182_v38 = vsel %vm2174_vm14, %v2170_v29, %v2178_v50  ;;  %v2184_v41 = vsel %vm2176_vm15, %v2172_v11, %v2180_v33  ;;  %v2353_v22 = vunpack.c.l.s8.bf16 %v6067_v55  ;;  %v6069_v11 = vld [vmem:[%s7216_s10 + $0x988] sm:$0xff]  ;;  %v6083_v12 = vld [vmem:[%s7216_s10 + $0x9f8] sm:$0xff] }
 0x559   : > { %v2186_v42 = vmul.f32 1.4142135, %v2182_v38  ;;  %v2188_v43 = vmul.f32 1.4142135, %v2184_v41  ;;  %v2350_v27 = vunpack.c.l.s8.bf16 %v6064_v25  ;;  %v2352_v59 = vunpack.c.l.s8.bf16 %v6066_v26  ;;  %v6068_v38 = vld [vmem:[%s7216_s10 + $0x980] sm:$0xff]  ;;  %v6070_v41 = vld [vmem:[%s7216_s10 + $0x990] sm:$0xff] }
 0x55a   : > { %v7707_v44 = vadd.f32 %v2185_v35, %v7513_v20  ;;  %v2331_v20 = vunpack.c.h.s8.bf16 %v7687_v46  ;;  %v2334_v46 = vunpack.c.l.s8.bf16 %v6056_v63  ;;  %v2355_v30 = vunpack.c.h.s8.bf16 %v6065_v17  ;;  %v6079_v63 = vld [vmem:[%s7216_s10 + $0x9d8] sm:$0xff]  ;;  %v6080_v17 = vld [vmem:[%s7216_s10 + $0x9e0] sm:$0xff] }
 0x55b   : > { %v7712_v48 = vadd.f32 %v2186_v42, %v7518_v23  ;;  %v7715_v49 = vadd.f32 %v2188_v43, %v7521_v24  ;;  %v2333_v23 = vunpack.c.h.s8.bf16 %v7690_v1  ;;  %v2336_v1 = vunpack.c.l.s8.bf16 %v6058_v0 }
 0x55c   : > { %v2193_v54 = vpack.c.bf16 %v7707_v44, %v7707_v44  ;;  %v2357_v29 = vunpack.c.h.s8.bf16 %v6067_v55  ;;  %v2354_v50 = vunpack.c.h.s8.bf16 %v6064_v25  ;;  %v2356_v33 = vunpack.c.h.s8.bf16 %v6066_v26  ;;  %v6082_v55 = vld [vmem:[%s7216_s10 + $0x9f0] sm:$0xff] }
 0x55d   : > { %v2194_v51 = vpack.c.bf16 %v7712_v48, %v7712_v48  ;;  %v2196_v24 = vpack.c.bf16 %v7715_v49, %v7715_v49  ;;  %v2359_v34 = vunpack.c.l.s8.bf16 %v6069_v11  ;;  %v2361_v35 = vunpack.c.l.s8.bf16 %v6071_v32 }
 0x55e   : > { %v2358_v42 = vunpack.c.l.s8.bf16 %v6068_v38  ;;  %v2360_v43 = vunpack.c.l.s8.bf16 %v6070_v41  ;;  %v2363_v31 = vunpack.c.h.s8.bf16 %v6069_v11  ;;  %v2365_v47 = vunpack.c.h.s8.bf16 %v6071_v32 }
 0x55f   : > { %2422 = vmatprep.mubr.bf16.mxu0 %v2194_v51  ;;  %2504 = vmatprep.mubr.bf16.mxu1 %v2194_v51  ;;  %v6073_v51 = vld [vmem:[%s7216_s10 + $0x9a8] sm:$0xff]  ;;  %v2370_v0 = vunpack.c.h.s8.bf16 %v6072_v56  ;;  %vm2175_vm0 = vcmp.ge.f32.partialorder %v7704_v28, 0.0  ;;  %v2387_v25 = vunpack.c.h.s8.bf16 %v6081_v7  ;;  %v2389_v26 = vunpack.c.h.s8.bf16 %v6083_v12 }
 0x560   : > { %2423 = vmatmul.mubr.bf16.vlgmr.msra.gmra.mrb[16].mxu0 %v2193_v54  ;;  %2505 = vmatmul.mubr.bf16.vlgmr.msra.gmra.mrb[16].mxu1 %v2193_v54  ;;  %v2364_v54 = vunpack.c.h.s8.bf16 %v6070_v41 }
 0x561   : > { %2432 = vmatpush1.bf16.msra.mxu0 %v2326_v52  ;;  %2514 = vmatpush1.bf16.msra.mxu1 %v2328_v53  ;;  %v6075_v52 = vld [vmem:[%s7216_s10 + $0x9b8] sm:$0xff]  ;;  %v2362_v53 = vunpack.c.h.s8.bf16 %v6068_v38 }
 0x562   : > { %2463 = vmatprep.mubr.bf16.mxu0 %v2196_v24  ;;  %2545 = vmatprep.mubr.bf16.mxu1 %v2196_v24  ;;  %v2366_v24 = vunpack.c.l.s8.bf16 %v6072_v56 }
 0x563   : > { %2433 = vmatprep.subr.bf16.mxu0 %v2331_v20  ;;  %2515 = vmatprep.subr.bf16.mxu1 %v2333_v23  ;;  %v2367_v20 = vunpack.c.l.s8.bf16 %v6073_v51  ;;  %v2369_v23 = vunpack.c.l.s8.bf16 %v6075_v52 }
 0x565   : > { %2434 = vmatpush1.bf16.msra.mxu0 %v2330_v58  ;;  %2516 = vmatpush1.bf16.msra.mxu1 %v2332_v60  ;;  %v2368_v58 = vunpack.c.l.s8.bf16 %v6074_v57  ;;  %v2371_v60 = vunpack.c.h.s8.bf16 %v6073_v51 }
 0x566   : > { %2435 = vmatprep.subr.bf16.mxu0 %v2335_v61  ;;  %2517 = vmatprep.subr.bf16.mxu1 %v2337_v62  ;;  %v2373_v61 = vunpack.c.h.s8.bf16 %v6075_v52  ;;  %v6077_v62 = vld [vmem:[%s7216_s10 + $0x9c8] sm:$0xff] }
 0x569   : > { %2436 = vmatpush1.bf16.msra.mxu0 %v2334_v46  ;;  %2518 = vmatpush1.bf16.msra.mxu1 %v2336_v1  ;;  %v2372_v46 = vunpack.c.h.s8.bf16 %v6074_v57  ;;  %v2375_v1 = vunpack.c.l.s8.bf16 %v6077_v62 }
 0x56a   : > { %2437 = vmatprep.subr.bf16.mxu0 %v2339_v2  ;;  %2519 = vmatprep.subr.bf16.mxu1 %v2341_v3  ;;  %v2377_v2 = vunpack.c.l.s8.bf16 %v6079_v63  ;;  %v6076_v3 = vld [vmem:[%s7216_s10 + $0x9c0] sm:$0xff] }
 0x56b   : > { %v2374_v5 = vunpack.c.l.s8.bf16 %v6076_v3 }
 0x56d   : > { %2438 = vmatpush1.bf16.msra.mxu0 %v2338_v6  ;;  %2520 = vmatpush1.bf16.msra.mxu1 %v2340_v8  ;;  %v2376_v6 = vunpack.c.l.s8.bf16 %v6078_v4  ;;  %v2379_v8 = vunpack.c.h.s8.bf16 %v6077_v62 }
 0x56e   : > { %2439 = vmatprep.subr.bf16.mxu0 %v2343_v9  ;;  %2521 = vmatprep.subr.bf16.mxu1 %v2345_v10  ;;  %v2381_v9 = vunpack.c.h.s8.bf16 %v6079_v63  ;;  %v2179_v10 = vmul.f32 0.2, %v7704_v28 }
 0x571   : > { %2440 = vmatpush1.bf16.msra.mxu0 %v2342_v13  ;;  %2522 = vmatpush1.bf16.msra.mxu1 %v2344_v14  ;;  %v2378_v13 = vunpack.c.h.s8.bf16 %v6076_v3  ;;  %v2380_v14 = vunpack.c.h.s8.bf16 %v6078_v4 }
 0x572   : > { %2441 = vmatprep.subr.bf16.mxu0 %v2347_v15  ;;  %2523 = vmatprep.subr.bf16.mxu1 %v2349_v16  ;;  %v2383_v15 = vunpack.c.l.s8.bf16 %v6081_v7  ;;  %v2385_v16 = vunpack.c.l.s8.bf16 %v6083_v12  ;;  %v6098_v12 = vld [vmem:[%s7216_s10 + $0xa60] sm:$0xff] }
 0x575   : > { %2442 = vmatpush1.bf16.msra.mxu0 %v2346_v18  ;;  %2524 = vmatpush1.bf16.msra.mxu1 %v2348_v19  ;;  %v2183_v18 = vsel %vm2175_vm0, %v7704_v28, %v2179_v10  ;;  %v2382_v19 = vunpack.c.l.s8.bf16 %v6080_v17 }
 0x576   : > { %2443 = vmatprep.subr.bf16.mxu0 %v2351_v21  ;;  %2525 = vmatprep.subr.bf16.mxu1 %v2353_v22  ;;  %v2384_v21 = vunpack.c.l.s8.bf16 %v6082_v55  ;;  %v2187_v22 = vmul.f32 1.4142135, %v2183_v18  ;;  %v6105_v18 = vld [vmem:[%s7216_s10 + $0xa98] sm:$0xff] }
 0x578   : > { %v7759_v11 = vadd.f32 %v2187_v22, %v7565_v45 }
 0x579   : > { %2444 = vmatpush1.bf16.msra.mxu0 %v2350_v27  ;;  %2526 = vmatpush1.bf16.msra.mxu1 %v2352_v59  ;;  %v6087_v27 = vld [vmem:[%s7216_s10 + $0xa08] sm:$0xff]  ;;  %v6089_v59 = vld [vmem:[%s7216_s10 + $0xa18] sm:$0xff] }
 0x57a   : > { %2445 = vmatprep.subr.bf16.mxu0 %v2355_v30  ;;  %2527 = vmatprep.subr.bf16.mxu1 %v2357_v29  ;;  %v2386_v30 = vunpack.c.h.s8.bf16 %v6080_v17  ;;  %v2388_v29 = vunpack.c.h.s8.bf16 %v6082_v55  ;;  %v2690_v28 = vunpack.c.l.s8.bf16 %v6087_v27  ;;  %v2692_v32 = vunpack.c.l.s8.bf16 %v6089_v59  ;;  %v6103_v55 = vld [vmem:[%s7216_s10 + $0xa88] sm:$0xff] }
 0x57b   : > { %v2195_v38 = vpack.c.bf16 %v7759_v11, %v7759_v11  ;;  %v2694_v45 = vunpack.c.h.s8.bf16 %v6087_v27  ;;  %v2696_v41 = vunpack.c.h.s8.bf16 %v6089_v59  ;;  %v2722_v22 = vunpack.c.l.s8.bf16 %v6103_v55  ;;  %v6104_v27 = vld [vmem:[%s7216_s10 + $0xa90] sm:$0xff] }
 0x57d   : > { %2446 = vmatpush1.bf16.msra.mxu0 %v2354_v50  ;;  %2528 = vmatpush1.bf16.msra.mxu1 %v2356_v33  ;;  %v6086_v50 = vld [vmem:[%s7216_s10 + $0xa00] sm:$0xff]  ;;  %v6088_v33 = vld [vmem:[%s7216_s10 + $0xa10] sm:$0xff] }
 0x57e   : > { %2447 = vmatprep.subr.bf16.mxu0 %v2359_v34  ;;  %2529 = vmatprep.subr.bf16.mxu1 %v2361_v35  ;;  %v2689_v34 = vunpack.c.l.s8.bf16 %v6086_v50  ;;  %v2691_v35 = vunpack.c.l.s8.bf16 %v6088_v33 }
 0x581   : > { %2448 = vmatpush1.bf16.msra.mxu0 %v2358_v42  ;;  %2530 = vmatpush1.bf16.msra.mxu1 %v2360_v43  ;;  %v6091_v42 = vld [vmem:[%s7216_s10 + $0xa28] sm:$0xff]  ;;  %v6093_v43 = vld [vmem:[%s7216_s10 + $0xa38] sm:$0xff] }
 0x582   : > { %2449 = vmatprep.subr.bf16.mxu0 %v2363_v31  ;;  %2531 = vmatprep.subr.bf16.mxu1 %v2365_v47  ;;  %v2693_v31 = vunpack.c.h.s8.bf16 %v6086_v50  ;;  %v2695_v47 = vunpack.c.h.s8.bf16 %v6088_v33  ;;  %v2698_v51 = vunpack.c.l.s8.bf16 %v6091_v42  ;;  %v2700_v52 = vunpack.c.l.s8.bf16 %v6093_v43  ;;  %v6109_v50 = vld [vmem:[%s7216_s10 + $0xab8] sm:$0xff] }
 0x583   : > { %v2702_v56 = vunpack.c.h.s8.bf16 %v6091_v42  ;;  %v2704_v57 = vunpack.c.h.s8.bf16 %v6093_v43 }
 0x585   : > { %2450 = vmatpush1.bf16.msra.mxu0 %v2362_v53  ;;  %2532 = vmatpush1.bf16.msra.mxu1 %v2364_v54  ;;  %v6090_v53 = vld [vmem:[%s7216_s10 + $0xa20] sm:$0xff]  ;;  %v6092_v54 = vld [vmem:[%s7216_s10 + $0xa30] sm:$0xff] }
 0x586   : > { %2451 = vmatprep.subr.bf16.mxu0 %v2367_v20  ;;  %2533 = vmatprep.subr.bf16.mxu1 %v2369_v23  ;;  %v2697_v20 = vunpack.c.l.s8.bf16 %v6090_v53  ;;  %v2699_v23 = vunpack.c.l.s8.bf16 %v6092_v54 }
 0x589   : > { %2452 = vmatpush1.bf16.msra.mxu0 %v2366_v24  ;;  %2534 = vmatpush1.bf16.msra.mxu1 %v2368_v58  ;;  %v6095_v24 = vld [vmem:[%s7216_s10 + $0xa48] sm:$0xff]  ;;  %v6097_v58 = vld [vmem:[%s7216_s10 + $0xa58] sm:$0xff] }
 0x58a   : > { %2453 = vmatprep.subr.bf16.mxu0 %v2371_v60  ;;  %2535 = vmatprep.subr.bf16.mxu1 %v2373_v61  ;;  %v2701_v60 = vunpack.c.h.s8.bf16 %v6090_v53  ;;  %v2703_v61 = vunpack.c.h.s8.bf16 %v6092_v54  ;;  %v2706_v62 = vunpack.c.l.s8.bf16 %v6095_v24  ;;  %v2708_v63 = vunpack.c.l.s8.bf16 %v6097_v58 }
 0x58b   : > { %v2710_v3 = vunpack.c.h.s8.bf16 %v6095_v24  ;;  %v2712_v4 = vunpack.c.h.s8.bf16 %v6097_v58 }
 0x58d   : > { %2454 = vmatpush1.bf16.msra.mxu0 %v2370_v0  ;;  %2536 = vmatpush1.bf16.msra.mxu1 %v2372_v46  ;;  %v6094_v0 = vld [vmem:[%s7216_s10 + $0xa40] sm:$0xff]  ;;  %v6096_v46 = vld [vmem:[%s7216_s10 + $0xa50] sm:$0xff] }
 0x58e   : > { %2455 = vmatprep.subr.bf16.mxu0 %v2375_v1  ;;  %2537 = vmatprep.subr.bf16.mxu1 %v2377_v2  ;;  %v2705_v1 = vunpack.c.l.s8.bf16 %v6094_v0  ;;  %v2707_v2 = vunpack.c.l.s8.bf16 %v6096_v46 }
 0x591   : > { %2456 = vmatpush1.bf16.msra.mxu0 %v2374_v5  ;;  %2538 = vmatpush1.bf16.msra.mxu1 %v2376_v6  ;;  %v6099_v5 = vld [vmem:[%s7216_s10 + $0xa68] sm:$0xff]  ;;  %v6101_v6 = vld [vmem:[%s7216_s10 + $0xa78] sm:$0xff] }
 0x592   : > { %2457 = vmatprep.subr.bf16.mxu0 %v2379_v8  ;;  %2539 = vmatprep.subr.bf16.mxu1 %v2381_v9  ;;  %v2709_v8 = vunpack.c.h.s8.bf16 %v6094_v0  ;;  %v2711_v9 = vunpack.c.h.s8.bf16 %v6096_v46  ;;  %v2714_v10 = vunpack.c.l.s8.bf16 %v6099_v5  ;;  %v2716_v7 = vunpack.c.l.s8.bf16 %v6101_v6  ;;  %v6115_v0 = vld [vmem:[%s7216_s10 + $0xae8] sm:$0xff]  ;;  %v6117_v46 = vld [vmem:[%s7216_s10 + $0xaf8] sm:$0xff] }
 0x593   : > { %v2720_v17 = vunpack.c.h.s8.bf16 %v6101_v6 }
 0x595   : > { %2458 = vmatpush1.bf16.msra.mxu0 %v2378_v13  ;;  %2540 = vmatpush1.bf16.msra.mxu1 %v2380_v14  ;;  %v6100_v13 = vld [vmem:[%s7216_s10 + $0xa70] sm:$0xff]  ;;  %v2713_v14 = vunpack.c.l.s8.bf16 %v6098_v12 }
 0x596   : > { %2459 = vmatprep.subr.bf16.mxu0 %v2383_v15  ;;  %2541 = vmatprep.subr.bf16.mxu1 %v2385_v16  ;;  %v2715_v15 = vunpack.c.l.s8.bf16 %v6100_v13  ;;  %v2718_v16 = vunpack.c.h.s8.bf16 %v6099_v5 }
 0x599   : > { %2460 = vmatpush1.bf16.msra.mxu0 %v2382_v19  ;;  %2542 = vmatpush1.bf16.msra.mxu1 %v2384_v21  ;;  %v2717_v19 = vunpack.c.h.s8.bf16 %v6098_v12  ;;  %v2719_v21 = vunpack.c.h.s8.bf16 %v6100_v13  ;;  %v7794_v12 = vld [vmem:[%s7216_s10 + $0xb08] sm:$0xff]  ;;  %v7797_v13 = vld [vmem:[%s7216_s10 + $0xb18] sm:$0xff] }
 0x59a   : > { %2461 = vmatprep.subr.bf16.mxu0 %v2387_v25  ;;  %2543 = vmatprep.subr.bf16.mxu1 %v2389_v26  ;;  %v2724_v25 = vunpack.c.l.s8.bf16 %v6105_v18  ;;  %v6102_v26 = vld [vmem:[%s7216_s10 + $0xa80] sm:$0xff] }
 0x59b   : > { %v2721_v59 = vunpack.c.l.s8.bf16 %v6102_v26  ;;  %v2725_v33 = vunpack.c.h.s8.bf16 %v6102_v26 }
 0x59d   : > { %2462 = vmatpush1.bf16.msra.mxu0 %v2386_v30  ;;  %2544 = vmatpush1.bf16.msra.mxu1 %v2388_v29  ;;  %v2723_v30 = vunpack.c.l.s8.bf16 %v6104_v27  ;;  %v2726_v29 = vunpack.c.h.s8.bf16 %v6103_v55 }
 0x59e   : > { %2817 = vmatprep.subr.bf16.mxu0 %v2690_v28  ;;  %2899 = vmatprep.subr.bf16.mxu1 %v2692_v32  ;;  %v2728_v28 = vunpack.c.h.s8.bf16 %v6105_v18  ;;  %v6107_v32 = vld [vmem:[%s7216_s10 + $0xaa8] sm:$0xff] }
 0x5a0   : > { %2464 = vmatmul.mubr.bf16.vlgmr.msra.gmra.mrb[16].mxu0 %v2195_v38  ;;  %2546 = vmatmul.mubr.bf16.vlgmr.msra.gmra.mrb[16].mxu1 %v2195_v38  ;;  %v2732_v38 = vunpack.c.l.s8.bf16 %v6109_v50 }
 0x5a1   : > { %2818 = vmatpush1.bf16.msra.mxu0 %v2689_v34  ;;  %2900 = vmatpush1.bf16.msra.mxu1 %v2691_v35  ;;  %v2727_v34 = vunpack.c.h.s8.bf16 %v6104_v27  ;;  %v2730_v35 = vunpack.c.l.s8.bf16 %v6107_v32 }
 0x5a2   : > { %2819 = vmatprep.subr.bf16.mxu0 %v2694_v45  ;;  %2901 = vmatprep.subr.bf16.mxu1 %v2696_v41  ;;  %v6106_v45 = vld [vmem:[%s7216_s10 + $0xaa0] sm:$0xff]  ;;  %v6108_v41 = vld [vmem:[%s7216_s10 + $0xab0] sm:$0xff] }
 0x5a3   : > { %v2729_v42 = vunpack.c.l.s8.bf16 %v6106_v45  ;;  %v2731_v43 = vunpack.c.l.s8.bf16 %v6108_v41  ;;  %v2733_v53 = vunpack.c.h.s8.bf16 %v6106_v45  ;;  %v2735_v54 = vunpack.c.h.s8.bf16 %v6108_v41 }
 0x5a5   : > { %2820 = vmatpush1.bf16.msra.mxu0 %v2693_v31  ;;  %2902 = vmatpush1.bf16.msra.mxu1 %v2695_v47  ;;  %v2734_v31 = vunpack.c.h.s8.bf16 %v6107_v32  ;;  %v2736_v47 = vunpack.c.h.s8.bf16 %v6109_v50 }
 0x5a6   : > { %2821 = vmatprep.subr.bf16.mxu0 %v2698_v51  ;;  %2903 = vmatprep.subr.bf16.mxu1 %v2700_v52  ;;  %v6111_v51 = vld [vmem:[%s7216_s10 + $0xac8] sm:$0xff]  ;;  %v6113_v52 = vld [vmem:[%s7216_s10 + $0xad8] sm:$0xff] }
 0x5a9   : > { %2822 = vmatpush1.bf16.msra.mxu0 %v2697_v20  ;;  %2904 = vmatpush1.bf16.msra.mxu1 %v2699_v23  ;;  %v2738_v20 = vunpack.c.l.s8.bf16 %v6111_v51  ;;  %v2740_v23 = vunpack.c.l.s8.bf16 %v6113_v52 }
 0x5aa   : > { %2823 = vmatprep.subr.bf16.mxu0 %v2702_v56  ;;  %2905 = vmatprep.subr.bf16.mxu1 %v2704_v57  ;;  %v6110_v56 = vld [vmem:[%s7216_s10 + $0xac0] sm:$0xff]  ;;  %v6112_v57 = vld [vmem:[%s7216_s10 + $0xad0] sm:$0xff] }
 0x5ab   : > { %v2737_v24 = vunpack.c.l.s8.bf16 %v6110_v56  ;;  %v2739_v58 = vunpack.c.l.s8.bf16 %v6112_v57 }
 0x5ad   : > { %2824 = vmatpush1.bf16.msra.mxu0 %v2701_v60  ;;  %2906 = vmatpush1.bf16.msra.mxu1 %v2703_v61  ;;  %v2742_v60 = vunpack.c.h.s8.bf16 %v6111_v51  ;;  %v2744_v61 = vunpack.c.h.s8.bf16 %v6113_v52  ;;  %v6118_v52 = vld [vmem:[%s7216_s10 + $0xb00] sm:$0xff] }
 0x5ae   : > { %2825 = vmatprep.subr.bf16.mxu0 %v2706_v62  ;;  %2907 = vmatprep.subr.bf16.mxu1 %v2708_v63  ;;  %v2741_v62 = vunpack.c.h.s8.bf16 %v6110_v56  ;;  %v2743_v63 = vunpack.c.h.s8.bf16 %v6112_v57 }
 0x5b1   : > { %2826 = vmatpush1.bf16.msra.mxu0 %v2705_v1  ;;  %2908 = vmatpush1.bf16.msra.mxu1 %v2707_v2  ;;  %v2746_v1 = vunpack.c.l.s8.bf16 %v6115_v0  ;;  %v2748_v2 = vunpack.c.l.s8.bf16 %v6117_v46 }
 0x5b2   : > { %2827 = vmatprep.subr.bf16.mxu0 %v2710_v3  ;;  %2909 = vmatprep.subr.bf16.mxu1 %v2712_v4  ;;  %v6114_v3 = vld [vmem:[%s7216_s10 + $0xae0] sm:$0xff]  ;;  %v6116_v4 = vld [vmem:[%s7216_s10 + $0xaf0] sm:$0xff] }
 0x5b3   : > { %v2745_v5 = vunpack.c.l.s8.bf16 %v6114_v3  ;;  %v2747_v6 = vunpack.c.l.s8.bf16 %v6116_v4 }
 0x5b5   : > { %2828 = vmatpush1.bf16.msra.mxu0 %v2709_v8  ;;  %2910 = vmatpush1.bf16.msra.mxu1 %v2711_v9  ;;  %v2750_v8 = vunpack.c.h.s8.bf16 %v6115_v0  ;;  %v2752_v9 = vunpack.c.h.s8.bf16 %v6117_v46  ;;  %v6123_v0 = vld [vmem:[%s7216_s10 + $0xb28] sm:$0xff]  ;;  %v6125_v46 = vld [vmem:[%s7216_s10 + $0xb38] sm:$0xff] }
 0x5b6   : > { %2829 = vmatprep.subr.bf16.mxu0 %v2714_v10  ;;  %2911 = vmatprep.subr.bf16.mxu1 %v2716_v7  ;;  %v2749_v10 = vunpack.c.h.s8.bf16 %v6114_v3  ;;  %v2751_v7 = vunpack.c.h.s8.bf16 %v6116_v4  ;;  %v2762_v4 = vunpack.c.l.s8.bf16 %v6123_v0 }
 0x5b9   : > { %2830 = vmatpush1.bf16.msra.mxu0 %v2713_v14  ;;  %2912 = vmatpush1.bf16.msra.mxu1 %v2715_v15  ;;  %v2754_v14 = vunpack.c.l.s8.bf16 %v7794_v12  ;;  %v2756_v15 = vunpack.c.l.s8.bf16 %v7797_v13 }
 0x5ba   : > { %2831 = vmatprep.subr.bf16.mxu0 %v2718_v16  ;;  %2913 = vmatprep.subr.bf16.mxu1 %v2720_v17  ;;  %v6084_v16 = vld [vmem:[%s7223_s1 + $0x10] sm:$0xf] }
 0x5bb   : > { %v6085_v17 = vld [vmem:[%s7226_s6 + $0x10] sm:$0xf]  ;;  %v2560_v55 = vrot.slane %v6084_v16, %v7405_v36  ;;  %v2568_v18 = vrot.slane %v6084_v16, %v7407_v37 }
 0x5bd   : > { %2832 = vmatpush1.bf16.msra.mxu0 %v2717_v19  ;;  %2914 = vmatpush1.bf16.msra.mxu1 %v2719_v21  ;;  %v2564_v19 = vrot.slane %v6084_v16, %v7410_v39  ;;  %v2572_v21 = vrot.slane %v6084_v16, %v7412_v40 }
 0x5be   : > { %2833 = vmatprep.subr.bf16.mxu0 %v2722_v22  ;;  %2915 = vmatprep.subr.bf16.mxu1 %v2724_v25  ;;  %v2587_v22 = vrot.slane %v6085_v17, %v7405_v36  ;;  %v2595_v25 = vrot.slane %v6085_v17, %v7407_v37 }
 0x5c1   : > { %2834 = vmatpush1.bf16.msra.mxu0 %v2721_v59  ;;  %2916 = vmatpush1.bf16.msra.mxu1 %v2723_v30  ;;  %v2591_v59 = vrot.slane %v6085_v17, %v7410_v39  ;;  %v2599_v30 = vrot.slane %v6085_v17, %v7412_v40 }
 0x5c2   : > { %2835 = vmatprep.subr.bf16.mxu0 %v2726_v29  ;;  %2917 = vmatprep.subr.bf16.mxu1 %v2728_v28 }
 0x5c5   : > { %2836 = vmatpush1.bf16.msra.mxu0 %v2725_v33  ;;  %2918 = vmatpush1.bf16.msra.mxu1 %v2727_v34 }
 0x5c6   : > { %2837 = vmatprep.subr.bf16.mxu0 %v2730_v35  ;;  %2919 = vmatprep.subr.bf16.mxu1 %v2732_v38 }
 0x5c9   : > { %2838 = vmatpush1.bf16.msra.mxu0 %v2729_v42  ;;  %2920 = vmatpush1.bf16.msra.mxu1 %v2731_v43 }
 0x5ca   : > { %2839 = vmatprep.subr.bf16.mxu0 %v2734_v31  ;;  %2921 = vmatprep.subr.bf16.mxu1 %v2736_v47 }
 0x5cd   : > { %2840 = vmatpush1.bf16.msra.mxu0 %v2733_v53  ;;  %2922 = vmatpush1.bf16.msra.mxu1 %v2735_v54  ;;  %v6120_v53 = vld [vmem:[%s7216_s10 + $0xb10] sm:$0xff] }
 0x5ce   : > { %2841 = vmatprep.subr.bf16.mxu0 %v2738_v20  ;;  %2923 = vmatprep.subr.bf16.mxu1 %v2740_v23  ;;  %v2759_v3 = vunpack.c.h.s8.bf16 %v6120_v53 }
 0x5d1   : > { %2842 = vmatpush1.bf16.msra.mxu0 %v2737_v24  ;;  %2924 = vmatpush1.bf16.msra.mxu1 %v2739_v58  ;;  %v2753_v24 = vunpack.c.l.s8.bf16 %v6118_v52  ;;  %v2755_v58 = vunpack.c.l.s8.bf16 %v6120_v53  ;;  %v6134_v53 = vld [vmem:[%s7216_s10 + $0xb80] sm:$0xff] }
 0x5d2   : > { %2843 = vmatprep.subr.bf16.mxu0 %v2742_v60  ;;  %2925 = vmatprep.subr.bf16.mxu1 %v2744_v61 }
 0x5d5   : > { %2844 = vmatpush1.bf16.msra.mxu0 %v2741_v62  ;;  %2926 = vmatpush1.bf16.msra.mxu1 %v2743_v63  ;;  %v2758_v62 = vunpack.c.h.s8.bf16 %v7794_v12  ;;  %v2760_v63 = vunpack.c.h.s8.bf16 %v7797_v13  ;;  %v2768_v12 = vunpack.c.h.s8.bf16 %v6125_v46  ;;  %v6127_v13 = vld [vmem:[%s7216_s10 + $0xb48] sm:$0xff] }
 0x5d6   : > { %2845 = vmatprep.subr.bf16.mxu0 %v2746_v1  ;;  %2927 = vmatprep.subr.bf16.mxu1 %v2748_v2  ;;  %v2757_v2 = vunpack.c.h.s8.bf16 %v6118_v52  ;;  %v2770_v17 = vunpack.c.l.s8.bf16 %v6127_v13 }
 0x5d9   : > { %2846 = vmatpush1.bf16.msra.mxu0 %v2745_v5  ;;  %2928 = vmatpush1.bf16.msra.mxu1 %v2747_v6  ;;  %v2764_v5 = vunpack.c.l.s8.bf16 %v6125_v46  ;;  %v6122_v6 = vld [vmem:[%s7216_s10 + $0xb20] sm:$0xff]  ;;  %v6140_v46 = vld [vmem:[%s7216_s10 + $0xbb0] sm:$0xff] }
 0x5da   : > { %2847 = vmatprep.subr.bf16.mxu0 %v2750_v8  ;;  %2929 = vmatprep.subr.bf16.mxu1 %v2752_v9  ;;  %v6124_v8 = vld [vmem:[%s7216_s10 + $0xb30] sm:$0xff]  ;;  %v2761_v9 = vunpack.c.l.s8.bf16 %v6122_v6 }
 0x5db   : > { %v2767_v16 = vunpack.c.h.s8.bf16 %v6124_v8 }
 0x5dd   : > { %2848 = vmatpush1.bf16.msra.mxu0 %v2749_v10  ;;  %2930 = vmatpush1.bf16.msra.mxu1 %v2751_v7  ;;  %v2763_v10 = vunpack.c.l.s8.bf16 %v6124_v8  ;;  %v2766_v7 = vunpack.c.h.s8.bf16 %v6123_v0  ;;  %v6138_v0 = vld [vmem:[%s7216_s10 + $0xba0] sm:$0xff] }
 0x5de   : > { %2858 = vmatprep.subr.bf16.mxu0 %v2754_v14  ;;  %2940 = vmatprep.subr.bf16.mxu1 %v2756_v15  ;;  %v6129_v14 = vld [vmem:[%s7216_s10 + $0xb58] sm:$0xff]  ;;  %v2765_v15 = vunpack.c.h.s8.bf16 %v6122_v6  ;;  %v2797_v8 = vunpack.c.h.s8.bf16 %v6138_v0 }
 0x5df   : > { %v6145_v6 = vld [vmem:[%s7216_s10 + $0xbd8] sm:$0xff] }
 0x673   : > { %v2465_v26 = vpop.f32.mrb[16].mxu0  ;;  %v2547_v27 = vpop.f32.mrb[16].mxu1 }
 0x674   : > { %v2577_v29 = vmul.f32 %v2560_v55, %v2465_v26  ;;  %v2579_v28 = vmul.f32 %v2568_v18, %v2547_v27  ;;  %v2467_v32 = vpop.f32.mrb[17].mxu0  ;;  %v2549_v50 = vpop.f32.mrb[17].mxu1  ;;  %v2772_v55 = vunpack.c.l.s8.bf16 %v6129_v14  ;;  %v6126_v18 = vld [vmem:[%s7216_s10 + $0xb40] sm:$0xff]  ;;  %v2776_v26 = vunpack.c.h.s8.bf16 %v6129_v14  ;;  %v6131_v27 = vld [vmem:[%s7216_s10 + $0xb68] sm:$0xff] }
 0x675   : > { %v2578_v33 = vmul.f32 %v2564_v19, %v2467_v32  ;;  %v2580_v34 = vmul.f32 %v2572_v21, %v2549_v50  ;;  %v2469_v35 = vpop.f32.mrb[18].mxu0  ;;  %v2551_v38 = vpop.f32.mrb[18].mxu1  ;;  %v6128_v19 = vld [vmem:[%s7216_s10 + $0xb50] sm:$0xff]  ;;  %v2769_v21 = vunpack.c.l.s8.bf16 %v6126_v18  ;;  %v6130_v50 = vld [vmem:[%s7216_s10 + $0xb60] sm:$0xff] }
 0x676   : > { %v2604_v45 = vadd.f32 %v2587_v22, %v2577_v29  ;;  %v7811_v41 = vadd.f32 %v2595_v25, %v2579_v28  ;;  %v2470_v42 = vpop.f32.mrb[19].mxu0  ;;  %v2552_v43 = vpop.f32.mrb[19].mxu1  ;;  %v2771_v22 = vunpack.c.l.s8.bf16 %v6128_v19  ;;  %v2774_v25 = vunpack.c.h.s8.bf16 %v6127_v13  ;;  %v6144_v13 = vld [vmem:[%s7216_s10 + $0xbd0] sm:$0xff] }
 0x677   : > { %v2605_v31 = vadd.f32 %v2591_v59, %v2578_v33  ;;  %v2607_v47 = vadd.f32 %v2599_v30, %v2580_v34  ;;  %v6133_v59 = vld [vmem:[%s7216_s10 + $0xb78] sm:$0xff]  ;;  %v2773_v30 = vunpack.c.h.s8.bf16 %v6126_v18  ;;  %v2775_v29 = vunpack.c.h.s8.bf16 %v6128_v19  ;;  %v6132_v33 = vld [vmem:[%s7216_s10 + $0xb70] sm:$0xff]  ;;  %v6135_v42 = vld [vmem:[%s7216_s10 + $0xb88] sm:$0xff] }
 0x678   : > { %vm2608_vm1 = vcmp.ge.f32.partialorder %v2604_v45, 0.0  ;;  %v2612_v51 = vmul.f32 0.2, %v2604_v45  ;;  %v2778_v28 = vunpack.c.l.s8.bf16 %v6131_v27  ;;  %v2780_v32 = vunpack.c.l.s8.bf16 %v6133_v59  ;;  %v6137_v43 = vld [vmem:[%s7216_s10 + $0xb98] sm:$0xff] }
 0x679   : > { %v2613_v54 = vmul.f32 0.2, %v2605_v31  ;;  %v2615_v20 = vmul.f32 0.2, %v2607_v47  ;;  %vm2609_vm2 = vcmp.ge.f32.partialorder %v2605_v31, 0.0  ;;  %vm2611_vm3 = vcmp.ge.f32.partialorder %v2607_v47, 0.0 }
 0x67a   : > { %v2616_v23 = vsel %vm2608_vm1, %v2604_v45, %v2612_v51  ;;  %v2777_v34 = vunpack.c.l.s8.bf16 %v6130_v50  ;;  %v2779_v35 = vunpack.c.l.s8.bf16 %v6132_v33  ;;  %v2782_v38 = vunpack.c.h.s8.bf16 %v6131_v27  ;;  %v6149_v18 = vld [vmem:[%s7216_s10 + $0xbf8] sm:$0xff]  ;;  %v6148_v27 = vld [vmem:[%s7216_s10 + $0xbf0] sm:$0xff] }
 0x67b   : > { %v2617_v56 = vsel %vm2609_vm2, %v2605_v31, %v2613_v54  ;;  %v2619_v60 = vsel %vm2611_vm3, %v2607_v47, %v2615_v20  ;;  %v2620_v61 = vpack.c.bf16 %v2616_v23, %v2616_v23  ;;  %v2784_v45 = vunpack.c.h.s8.bf16 %v6133_v59  ;;  %v6136_v54 = vld [vmem:[%s7216_s10 + $0xb90] sm:$0xff] }
 0x67c   : > { %v2621_v57 = vpack.c.bf16 %v2617_v56, %v2617_v56  ;;  %v2623_v1 = vpack.c.bf16 %v2619_v60, %v2619_v60  ;;  %v2781_v31 = vunpack.c.h.s8.bf16 %v6130_v50  ;;  %v2783_v47 = vunpack.c.h.s8.bf16 %v6132_v33  ;;  %v6153_v50 = vld [vmem:[%s7216_s10 + $0xc08] sm:$0xff]  ;;  %v6155_v33 = vld [vmem:[%s7216_s10 + $0xc18] sm:$0xff] }
 0x67d   : > { %v2786_v51 = vunpack.c.l.s8.bf16 %v6135_v42  ;;  %v2788_v52 = vunpack.c.l.s8.bf16 %v6137_v43  ;;  %v2785_v20 = vunpack.c.l.s8.bf16 %v6134_v53  ;;  %v2787_v23 = vunpack.c.l.s8.bf16 %v6136_v54 }
 0x67e   : > { %2849 = vmatprep.mubr.bf16.mxu0 %v2621_v57  ;;  %2931 = vmatprep.mubr.bf16.mxu1 %v2621_v57  ;;  %v2790_v56 = vunpack.c.h.s8.bf16 %v6135_v42  ;;  %v2792_v57 = vunpack.c.h.s8.bf16 %v6137_v43  ;;  %v2789_v60 = vunpack.c.h.s8.bf16 %v6134_v53  ;;  %vm2610_vm4 = vcmp.ge.f32.partialorder %v7811_v41, 0.0  ;;  %v6152_v42 = vld [vmem:[%s7216_s10 + $0xc00] sm:$0xff]  ;;  %v6154_v43 = vld [vmem:[%s7216_s10 + $0xc10] sm:$0xff] }
 0x67f   : > { %2850 = vmatmul.mubr.bf16.vlgmr.msra.gmra.mrb[20].mxu0 %v2620_v61  ;;  %2932 = vmatmul.mubr.bf16.vlgmr.msra.gmra.mrb[20].mxu1 %v2620_v61  ;;  %v2791_v61 = vunpack.c.h.s8.bf16 %v6136_v54  ;;  %v3129_v53 = vunpack.c.h.s8.bf16 %v6153_v50  ;;  %v3131_v54 = vunpack.c.h.s8.bf16 %v6155_v33 }
 0x680   : > { %2859 = vmatpush1.bf16.msra.mxu0 %v2753_v24  ;;  %2941 = vmatpush1.bf16.msra.mxu1 %v2755_v58  ;;  %v6139_v24 = vld [vmem:[%s7216_s10 + $0xba8] sm:$0xff]  ;;  %v6141_v58 = vld [vmem:[%s7216_s10 + $0xbb8] sm:$0xff] }
 0x681   : > { %2890 = vmatprep.mubr.bf16.mxu0 %v2623_v1  ;;  %2972 = vmatprep.mubr.bf16.mxu1 %v2623_v1  ;;  %v2793_v1 = vunpack.c.l.s8.bf16 %v6138_v0 }
 0x682   : > { %2860 = vmatprep.subr.bf16.mxu0 %v2758_v62  ;;  %2942 = vmatprep.subr.bf16.mxu1 %v2760_v63  ;;  %v2794_v62 = vunpack.c.l.s8.bf16 %v6139_v24  ;;  %v2796_v63 = vunpack.c.l.s8.bf16 %v6141_v58 }
 0x684   : > { %2861 = vmatpush1.bf16.msra.mxu0 %v2757_v2  ;;  %2943 = vmatpush1.bf16.msra.mxu1 %v2759_v3  ;;  %v2795_v2 = vunpack.c.l.s8.bf16 %v6140_v46  ;;  %v2798_v3 = vunpack.c.h.s8.bf16 %v6139_v24 }
 0x685   : > { %2862 = vmatprep.subr.bf16.mxu0 %v2762_v4  ;;  %2944 = vmatprep.subr.bf16.mxu1 %v2764_v5  ;;  %v2800_v4 = vunpack.c.h.s8.bf16 %v6141_v58  ;;  %v6143_v5 = vld [vmem:[%s7216_s10 + $0xbc8] sm:$0xff]  ;;  %v6156_v58 = vld [vmem:[%s7216_s10 + $0xc20] sm:$0xff] }
 0x688   : > { %2863 = vmatpush1.bf16.msra.mxu0 %v2761_v9  ;;  %2945 = vmatpush1.bf16.msra.mxu1 %v2763_v10  ;;  %v2799_v9 = vunpack.c.h.s8.bf16 %v6140_v46  ;;  %v2802_v10 = vunpack.c.l.s8.bf16 %v6143_v5  ;;  %v6161_v46 = vld [vmem:[%s7216_s10 + $0xc48] sm:$0xff] }
 0x689   : > { %2864 = vmatprep.subr.bf16.mxu0 %v2766_v7  ;;  %2946 = vmatprep.subr.bf16.mxu1 %v2768_v12  ;;  %v2804_v7 = vunpack.c.l.s8.bf16 %v6145_v6  ;;  %v6142_v12 = vld [vmem:[%s7216_s10 + $0xbc0] sm:$0xff] }
 0x68a   : > { %v2801_v14 = vunpack.c.l.s8.bf16 %v6142_v12  ;;  %v2805_v19 = vunpack.c.h.s8.bf16 %v6142_v12 }
 0x68c   : > { %2865 = vmatpush1.bf16.msra.mxu0 %v2765_v15  ;;  %2947 = vmatpush1.bf16.msra.mxu1 %v2767_v16  ;;  %v2803_v15 = vunpack.c.l.s8.bf16 %v6144_v13  ;;  %v2806_v16 = vunpack.c.h.s8.bf16 %v6143_v5 }
 0x68d   : > { %2866 = vmatprep.subr.bf16.mxu0 %v2770_v17  ;;  %2948 = vmatprep.subr.bf16.mxu1 %v2772_v55  ;;  %v2808_v17 = vunpack.c.h.s8.bf16 %v6145_v6  ;;  %v6147_v55 = vld [vmem:[%s7216_s10 + $0xbe8] sm:$0xff]  ;;  %v6160_v6 = vld [vmem:[%s7216_s10 + $0xc40] sm:$0xff] }
 0x690   : > { %2867 = vmatpush1.bf16.msra.mxu0 %v2769_v21  ;;  %2949 = vmatpush1.bf16.msra.mxu1 %v2771_v22  ;;  %v2807_v21 = vunpack.c.h.s8.bf16 %v6144_v13  ;;  %v2810_v22 = vunpack.c.l.s8.bf16 %v6147_v55  ;;  %v6165_v13 = vld [vmem:[%s7216_s10 + $0xc68] sm:$0xff] }
 0x691   : > { %2868 = vmatprep.subr.bf16.mxu0 %v2774_v25  ;;  %2950 = vmatprep.subr.bf16.mxu1 %v2776_v26  ;;  %v2812_v25 = vunpack.c.l.s8.bf16 %v6149_v18  ;;  %v6146_v26 = vld [vmem:[%s7216_s10 + $0xbe0] sm:$0xff] }
 0x692   : > { %v2809_v59 = vunpack.c.l.s8.bf16 %v6146_v26 }
 0x694   : > { %2869 = vmatpush1.bf16.msra.mxu0 %v2773_v30  ;;  %2951 = vmatpush1.bf16.msra.mxu1 %v2775_v29  ;;  %v2811_v30 = vunpack.c.l.s8.bf16 %v6148_v27  ;;  %v2814_v29 = vunpack.c.h.s8.bf16 %v6147_v55 }
 0x695   : > { %2870 = vmatprep.subr.bf16.mxu0 %v2778_v28  ;;  %2952 = vmatprep.subr.bf16.mxu1 %v2780_v32  ;;  %v2816_v28 = vunpack.c.h.s8.bf16 %v6149_v18  ;;  %v2614_v32 = vmul.f32 0.2, %v7811_v41  ;;  %v6164_v18 = vld [vmem:[%s7216_s10 + $0xc60] sm:$0xff] }
 0x698   : > { %2871 = vmatpush1.bf16.msra.mxu0 %v2777_v34  ;;  %2953 = vmatpush1.bf16.msra.mxu1 %v2779_v35  ;;  %v2813_v34 = vunpack.c.h.s8.bf16 %v6146_v26  ;;  %v2815_v35 = vunpack.c.h.s8.bf16 %v6148_v27  ;;  %v6169_v27 = vld [vmem:[%s7216_s10 + $0xc88] sm:$0xff] }
 0x699   : > { %2872 = vmatprep.subr.bf16.mxu0 %v2782_v38  ;;  %2954 = vmatprep.subr.bf16.mxu1 %v2784_v45  ;;  %v3125_v38 = vunpack.c.l.s8.bf16 %v6153_v50  ;;  %v3127_v45 = vunpack.c.l.s8.bf16 %v6155_v33  ;;  %v6168_v50 = vld [vmem:[%s7216_s10 + $0xc80] sm:$0xff]  ;;  %v6170_v33 = vld [vmem:[%s7216_s10 + $0xc90] sm:$0xff] }
 0x69c   : > { %2873 = vmatpush1.bf16.msra.mxu0 %v2781_v31  ;;  %2955 = vmatpush1.bf16.msra.mxu1 %v2783_v47  ;;  %v2618_v31 = vsel %vm2610_vm4, %v7811_v41, %v2614_v32  ;;  %v3124_v47 = vunpack.c.l.s8.bf16 %v6152_v42  ;;  %v3130_v41 = vunpack.c.h.s8.bf16 %v6154_v43 }
 0x69d   : > { %2874 = vmatprep.subr.bf16.mxu0 %v2786_v51  ;;  %2956 = vmatprep.subr.bf16.mxu1 %v2788_v52  ;;  %v3126_v51 = vunpack.c.l.s8.bf16 %v6154_v43  ;;  %v2622_v52 = vpack.c.bf16 %v2618_v31, %v2618_v31  ;;  %v6175_v43 = vld [vmem:[%s7216_s10 + $0xcb8] sm:$0xff]  ;;  %v3160_v31 = vunpack.c.h.s8.bf16 %v6168_v50 }
 0x6a0   : > { %2875 = vmatpush1.bf16.msra.mxu0 %v2785_v20  ;;  %2957 = vmatpush1.bf16.msra.mxu1 %v2787_v23  ;;  %v6157_v20 = vld [vmem:[%s7216_s10 + $0xc28] sm:$0xff]  ;;  %v6159_v23 = vld [vmem:[%s7216_s10 + $0xc38] sm:$0xff] }
 0x6a1   : > { %2876 = vmatprep.subr.bf16.mxu0 %v2790_v56  ;;  %2958 = vmatprep.subr.bf16.mxu1 %v2792_v57  ;;  %v3128_v56 = vunpack.c.h.s8.bf16 %v6152_v42  ;;  %v3133_v57 = vunpack.c.l.s8.bf16 %v6157_v20  ;;  %v3135_v24 = vunpack.c.l.s8.bf16 %v6159_v23  ;;  %v3139_v0 = vunpack.c.h.s8.bf16 %v6159_v23  ;;  %v6173_v42 = vld [vmem:[%s7216_s10 + $0xca8] sm:$0xff] }
 0x6a4   : > { %2877 = vmatpush1.bf16.msra.mxu0 %v2789_v60  ;;  %2959 = vmatpush1.bf16.msra.mxu1 %v2791_v61  ;;  %v6158_v60 = vld [vmem:[%s7216_s10 + $0xc30] sm:$0xff]  ;;  %v3132_v61 = vunpack.c.l.s8.bf16 %v6156_v58 }
 0x6a5   : > { %2878 = vmatprep.subr.bf16.mxu0 %v2794_v62  ;;  %2960 = vmatprep.subr.bf16.mxu1 %v2796_v63  ;;  %v3134_v62 = vunpack.c.l.s8.bf16 %v6158_v60  ;;  %v3137_v63 = vunpack.c.h.s8.bf16 %v6157_v20 }
 0x6a8   : > { %2879 = vmatpush1.bf16.msra.mxu0 %v2793_v1  ;;  %2961 = vmatpush1.bf16.msra.mxu1 %v2795_v2  ;;  %v6163_v1 = vld [vmem:[%s7216_s10 + $0xc58] sm:$0xff]  ;;  %v3136_v2 = vunpack.c.h.s8.bf16 %v6156_v58 }
 0x6a9   : > { %2880 = vmatprep.subr.bf16.mxu0 %v2798_v3  ;;  %2962 = vmatprep.subr.bf16.mxu1 %v2800_v4  ;;  %v3138_v3 = vunpack.c.h.s8.bf16 %v6158_v60  ;;  %v3141_v4 = vunpack.c.l.s8.bf16 %v6161_v46  ;;  %v3143_v5 = vunpack.c.l.s8.bf16 %v6163_v1  ;;  %v3147_v12 = vunpack.c.h.s8.bf16 %v6163_v1 }
 0x6ac   : > { %2881 = vmatpush1.bf16.msra.mxu0 %v2797_v8  ;;  %2963 = vmatpush1.bf16.msra.mxu1 %v2799_v9  ;;  %v6162_v8 = vld [vmem:[%s7216_s10 + $0xc50] sm:$0xff]  ;;  %v3140_v9 = vunpack.c.l.s8.bf16 %v6160_v6 }
 0x6ad   : > { %2882 = vmatprep.subr.bf16.mxu0 %v2802_v10  ;;  %2964 = vmatprep.subr.bf16.mxu1 %v2804_v7  ;;  %v3142_v10 = vunpack.c.l.s8.bf16 %v6162_v8  ;;  %v3145_v7 = vunpack.c.h.s8.bf16 %v6161_v46 }
 0x6b0   : > { %2883 = vmatpush1.bf16.msra.mxu0 %v2801_v14  ;;  %2965 = vmatpush1.bf16.msra.mxu1 %v2803_v15  ;;  %v6167_v14 = vld [vmem:[%s7216_s10 + $0xc78] sm:$0xff]  ;;  %v3144_v15 = vunpack.c.h.s8.bf16 %v6160_v6  ;;  %v6181_v6 = vld [vmem:[%s7216_s10 + $0xce8] sm:$0xff] }
 0x6b1   : > { %2884 = vmatprep.subr.bf16.mxu0 %v2806_v16  ;;  %2966 = vmatprep.subr.bf16.mxu1 %v2808_v17  ;;  %v3146_v16 = vunpack.c.h.s8.bf16 %v6162_v8  ;;  %v3149_v17 = vunpack.c.l.s8.bf16 %v6165_v13  ;;  %v3151_v55 = vunpack.c.l.s8.bf16 %v6167_v14  ;;  %v3155_v26 = vunpack.c.h.s8.bf16 %v6167_v14  ;;  %v6183_v8 = vld [vmem:[%s7216_s10 + $0xcf8] sm:$0xff] }
 0x6b4   : > { %2885 = vmatpush1.bf16.msra.mxu0 %v2805_v19  ;;  %2967 = vmatpush1.bf16.msra.mxu1 %v2807_v21  ;;  %v6166_v19 = vld [vmem:[%s7216_s10 + $0xc70] sm:$0xff]  ;;  %v3148_v21 = vunpack.c.l.s8.bf16 %v6164_v18 }
 0x6b5   : > { %2886 = vmatprep.subr.bf16.mxu0 %v2810_v22  ;;  %2968 = vmatprep.subr.bf16.mxu1 %v2812_v25  ;;  %v3150_v22 = vunpack.c.l.s8.bf16 %v6166_v19  ;;  %v3153_v25 = vunpack.c.h.s8.bf16 %v6165_v13 }
 0x6b8   : > { %2887 = vmatpush1.bf16.msra.mxu0 %v2809_v59  ;;  %2969 = vmatpush1.bf16.msra.mxu1 %v2811_v30  ;;  %v6171_v59 = vld [vmem:[%s7216_s10 + $0xc98] sm:$0xff]  ;;  %v3152_v30 = vunpack.c.h.s8.bf16 %v6164_v18  ;;  %v7881_v18 = vld [vmem:[%s7216_s10 + $0xd08] sm:$0xff] }
 0x6b9   : > { %2888 = vmatprep.subr.bf16.mxu0 %v2814_v29  ;;  %2970 = vmatprep.subr.bf16.mxu1 %v2816_v28  ;;  %v3154_v29 = vunpack.c.h.s8.bf16 %v6166_v19  ;;  %v3157_v28 = vunpack.c.l.s8.bf16 %v6169_v27  ;;  %v3159_v32 = vunpack.c.l.s8.bf16 %v6171_v59  ;;  %v7884_v19 = vld [vmem:[%s7216_s10 + $0xd18] sm:$0xff] }
 0x6bc   : > { %2889 = vmatpush1.bf16.msra.mxu0 %v2813_v34  ;;  %2971 = vmatpush1.bf16.msra.mxu1 %v2815_v35  ;;  %v3156_v34 = vunpack.c.l.s8.bf16 %v6168_v50  ;;  %v3158_v35 = vunpack.c.l.s8.bf16 %v6170_v33 }
 0x6bd   : > { %3252 = vmatprep.subr.bf16.mxu0 %v3125_v38  ;;  %3334 = vmatprep.subr.bf16.mxu1 %v3127_v45  ;;  %v3161_v38 = vunpack.c.h.s8.bf16 %v6169_v27  ;;  %v3163_v45 = vunpack.c.h.s8.bf16 %v6171_v59 }
 0x6bf   : > { %2891 = vmatmul.mubr.bf16.vlgmr.msra.gmra.mrb[20].mxu0 %v2622_v52  ;;  %2973 = vmatmul.mubr.bf16.vlgmr.msra.gmra.mrb[20].mxu1 %v2622_v52  ;;  %v3167_v52 = vunpack.c.l.s8.bf16 %v6175_v43 }
 0x6c0   : > { %3253 = vmatpush1.bf16.msra.mxu0 %v3124_v47  ;;  %3335 = vmatpush1.bf16.msra.mxu1 %v3126_v51  ;;  %v3162_v47 = vunpack.c.h.s8.bf16 %v6170_v33  ;;  %v3165_v51 = vunpack.c.l.s8.bf16 %v6173_v42 }
 0x6c1   : > { %3254 = vmatprep.subr.bf16.mxu0 %v3129_v53  ;;  %3336 = vmatprep.subr.bf16.mxu1 %v3131_v54  ;;  %v6172_v53 = vld [vmem:[%s7216_s10 + $0xca0] sm:$0xff]  ;;  %v6174_v54 = vld [vmem:[%s7216_s10 + $0xcb0] sm:$0xff] }
 0x6c2   : > { %v3164_v20 = vunpack.c.l.s8.bf16 %v6172_v53  ;;  %v3166_v23 = vunpack.c.l.s8.bf16 %v6174_v54  ;;  %v3168_v58 = vunpack.c.h.s8.bf16 %v6172_v53  ;;  %v3170_v60 = vunpack.c.h.s8.bf16 %v6174_v54 }
 0x6c4   : > { %3255 = vmatpush1.bf16.msra.mxu0 %v3128_v56  ;;  %3337 = vmatpush1.bf16.msra.mxu1 %v3130_v41  ;;  %v3169_v56 = vunpack.c.h.s8.bf16 %v6173_v42  ;;  %v3171_v41 = vunpack.c.h.s8.bf16 %v6175_v43 }
 0x6c5   : > { %3256 = vmatprep.subr.bf16.mxu0 %v3133_v57  ;;  %3338 = vmatprep.subr.bf16.mxu1 %v3135_v24  ;;  %v6177_v57 = vld [vmem:[%s7216_s10 + $0xcc8] sm:$0xff]  ;;  %v6179_v24 = vld [vmem:[%s7216_s10 + $0xcd8] sm:$0xff] }
 0x6c8   : > { %3257 = vmatpush1.bf16.msra.mxu0 %v3132_v61  ;;  %3339 = vmatpush1.bf16.msra.mxu1 %v3134_v62  ;;  %v3173_v61 = vunpack.c.l.s8.bf16 %v6177_v57  ;;  %v3175_v62 = vunpack.c.l.s8.bf16 %v6179_v24 }
 0x6c9   : > { %3258 = vmatprep.subr.bf16.mxu0 %v3137_v63  ;;  %3340 = vmatprep.subr.bf16.mxu1 %v3139_v0  ;;  %v6176_v63 = vld [vmem:[%s7216_s10 + $0xcc0] sm:$0xff]  ;;  %v6178_v0 = vld [vmem:[%s7216_s10 + $0xcd0] sm:$0xff] }
 0x6ca   : > { %v3172_v46 = vunpack.c.l.s8.bf16 %v6176_v63  ;;  %v3174_v1 = vunpack.c.l.s8.bf16 %v6178_v0 }
 0x6cc   : > { %3259 = vmatpush1.bf16.msra.mxu0 %v3136_v2  ;;  %3341 = vmatpush1.bf16.msra.mxu1 %v3138_v3  ;;  %v3177_v2 = vunpack.c.h.s8.bf16 %v6177_v57  ;;  %v3179_v3 = vunpack.c.h.s8.bf16 %v6179_v24 }
 0x6cd   : > { %3260 = vmatprep.subr.bf16.mxu0 %v3141_v4  ;;  %3342 = vmatprep.subr.bf16.mxu1 %v3143_v5  ;;  %v3176_v4 = vunpack.c.h.s8.bf16 %v6176_v63  ;;  %v3178_v5 = vunpack.c.h.s8.bf16 %v6178_v0 }
 0x6d0   : > { %3261 = vmatpush1.bf16.msra.mxu0 %v3140_v9  ;;  %3343 = vmatpush1.bf16.msra.mxu1 %v3142_v10  ;;  %v3181_v9 = vunpack.c.l.s8.bf16 %v6181_v6  ;;  %v3183_v10 = vunpack.c.l.s8.bf16 %v6183_v8 }
 0x6d1   : > { %3262 = vmatprep.subr.bf16.mxu0 %v3145_v7  ;;  %3344 = vmatprep.subr.bf16.mxu1 %v3147_v12  ;;  %v6180_v7 = vld [vmem:[%s7216_s10 + $0xce0] sm:$0xff]  ;;  %v6182_v12 = vld [vmem:[%s7216_s10 + $0xcf0] sm:$0xff] }
 0x6d2   : > { %v3180_v13 = vunpack.c.l.s8.bf16 %v6180_v7  ;;  %v3182_v14 = vunpack.c.l.s8.bf16 %v6182_v12 }
 0x6d4   : > { %3263 = vmatpush1.bf16.msra.mxu0 %v3144_v15  ;;  %3345 = vmatpush1.bf16.msra.mxu1 %v3146_v16  ;;  %v3185_v15 = vunpack.c.h.s8.bf16 %v6181_v6  ;;  %v3187_v16 = vunpack.c.h.s8.bf16 %v6183_v8 }
 0x6d5   : > { %3264 = vmatprep.subr.bf16.mxu0 %v3149_v17  ;;  %3346 = vmatprep.subr.bf16.mxu1 %v3151_v55  ;;  %v3184_v17 = vunpack.c.h.s8.bf16 %v6180_v7  ;;  %v3186_v55 = vunpack.c.h.s8.bf16 %v6182_v12  ;;  %v6189_v7 = vld [vmem:[%s7216_s10 + $0xd28] sm:$0xff]  ;;  %v6191_v12 = vld [vmem:[%s7216_s10 + $0xd38] sm:$0xff] }
 0x6d8   : > { %3265 = vmatpush1.bf16.msra.mxu0 %v3148_v21  ;;  %3347 = vmatpush1.bf16.msra.mxu1 %v3150_v22  ;;  %v3189_v21 = vunpack.c.l.s8.bf16 %v7881_v18  ;;  %v3191_v22 = vunpack.c.l.s8.bf16 %v7884_v19 }
 0x6d9   : > { %3266 = vmatprep.subr.bf16.mxu0 %v3153_v25  ;;  %3348 = vmatprep.subr.bf16.mxu1 %v3155_v26  ;;  %v6150_v25 = vld [vmem:[%s7223_s1 + $0x14] sm:$0xf] }
 0x6da   : > { %v6151_v26 = vld [vmem:[%s7226_s6 + $0x14] sm:$0xf]  ;;  %v2987_v27 = vrot.slane %v6150_v25, %v7405_v36  ;;  %v2995_v59 = vrot.slane %v6150_v25, %v7407_v37 }
 0x6dc   : > { %3267 = vmatpush1.bf16.msra.mxu0 %v3152_v30  ;;  %3349 = vmatpush1.bf16.msra.mxu1 %v3154_v29  ;;  %v2991_v30 = vrot.slane %v6150_v25, %v7410_v39  ;;  %v2999_v29 = vrot.slane %v6150_v25, %v7412_v40  ;;  %v6193_v25 = vld [vmem:[%s7216_s10 + $0xd48] sm:$0xff] }
 0x6dd   : > { %3268 = vmatprep.subr.bf16.mxu0 %v3157_v28  ;;  %3350 = vmatprep.subr.bf16.mxu1 %v3159_v32  ;;  %v3014_v28 = vrot.slane %v6151_v26, %v7405_v36  ;;  %v3022_v32 = vrot.slane %v6151_v26, %v7407_v37 }
 0x6e0   : > { %3269 = vmatpush1.bf16.msra.mxu0 %v3156_v34  ;;  %3351 = vmatpush1.bf16.msra.mxu1 %v3158_v35  ;;  %v3018_v34 = vrot.slane %v6151_v26, %v7410_v39  ;;  %v3026_v35 = vrot.slane %v6151_v26, %v7412_v40  ;;  %v6195_v26 = vld [vmem:[%s7216_s10 + $0xd58] sm:$0xff] }
 0x6e1   : > { %3270 = vmatprep.subr.bf16.mxu0 %v3161_v38  ;;  %3352 = vmatprep.subr.bf16.mxu1 %v3163_v45 }
 0x6e4   : > { %3271 = vmatpush1.bf16.msra.mxu0 %v3160_v31  ;;  %3353 = vmatpush1.bf16.msra.mxu1 %v3162_v47 }
 0x6e5   : > { %3272 = vmatprep.subr.bf16.mxu0 %v3165_v51  ;;  %3354 = vmatprep.subr.bf16.mxu1 %v3167_v52 }
 0x6e8   : > { %3273 = vmatpush1.bf16.msra.mxu0 %v3164_v20  ;;  %3355 = vmatpush1.bf16.msra.mxu1 %v3166_v23 }
 0x6e9   : > { %3274 = vmatprep.subr.bf16.mxu0 %v3169_v56  ;;  %3356 = vmatprep.subr.bf16.mxu1 %v3171_v41 }
 0x6ec   : > { %3275 = vmatpush1.bf16.msra.mxu0 %v3168_v58  ;;  %3357 = vmatpush1.bf16.msra.mxu1 %v3170_v60 }
 0x6ed   : > { %3276 = vmatprep.subr.bf16.mxu0 %v3173_v61  ;;  %3358 = vmatprep.subr.bf16.mxu1 %v3175_v62 }
 0x6f0   : > { %3277 = vmatpush1.bf16.msra.mxu0 %v3172_v46  ;;  %3359 = vmatpush1.bf16.msra.mxu1 %v3174_v1 }
 0x6f1   : > { %3278 = vmatprep.subr.bf16.mxu0 %v3177_v2  ;;  %3360 = vmatprep.subr.bf16.mxu1 %v3179_v3  ;;  %v6184_v2 = vld [vmem:[%s7216_s10 + $0xd00] sm:$0xff]  ;;  %v6186_v3 = vld [vmem:[%s7216_s10 + $0xd10] sm:$0xff] }
 0x6f2   : > { %v3188_v8 = vunpack.c.l.s8.bf16 %v6184_v2 }
 0x6f4   : > { %3279 = vmatpush1.bf16.msra.mxu0 %v3176_v4  ;;  %3361 = vmatpush1.bf16.msra.mxu1 %v3178_v5 }
 0x6f5   : > { %3280 = vmatprep.subr.bf16.mxu0 %v3181_v9  ;;  %3362 = vmatprep.subr.bf16.mxu1 %v3183_v10  ;;  %v3190_v9 = vunpack.c.l.s8.bf16 %v6186_v3 }
 0x6f8   : > { %3281 = vmatpush1.bf16.msra.mxu0 %v3180_v13  ;;  %3363 = vmatpush1.bf16.msra.mxu1 %v3182_v14  ;;  %v3192_v13 = vunpack.c.h.s8.bf16 %v6184_v2  ;;  %v3194_v14 = vunpack.c.h.s8.bf16 %v6186_v3 }
 0x6f9   : > { %3282 = vmatprep.subr.bf16.mxu0 %v3185_v15  ;;  %3364 = vmatprep.subr.bf16.mxu1 %v3187_v16  ;;  %v3197_v15 = vunpack.c.l.s8.bf16 %v6189_v7  ;;  %v3199_v16 = vunpack.c.l.s8.bf16 %v6191_v12 }
 0x6fc   : > { %3283 = vmatpush1.bf16.msra.mxu0 %v3184_v17  ;;  %3365 = vmatpush1.bf16.msra.mxu1 %v3186_v55  ;;  %v6188_v17 = vld [vmem:[%s7216_s10 + $0xd20] sm:$0xff]  ;;  %v6190_v55 = vld [vmem:[%s7216_s10 + $0xd30] sm:$0xff] }
 0x6fd   : > { %3293 = vmatprep.subr.bf16.mxu0 %v3189_v21  ;;  %3375 = vmatprep.subr.bf16.mxu1 %v3191_v22  ;;  %v3201_v21 = vunpack.c.h.s8.bf16 %v6189_v7  ;;  %v3203_v22 = vunpack.c.h.s8.bf16 %v6191_v12  ;;  %v6204_v7 = vld [vmem:[%s7216_s10 + $0xda0] sm:$0xff]  ;;  %v6206_v12 = vld [vmem:[%s7216_s10 + $0xdb0] sm:$0xff] }
 0x792   : > { %v2892_v50 = vpop.f32.mrb[20].mxu0  ;;  %v2974_v33 = vpop.f32.mrb[20].mxu1 }
 0x793   : > { %v3004_v38 = vmul.f32 %v2987_v27, %v2892_v50  ;;  %v3006_v45 = vmul.f32 %v2995_v59, %v2974_v33  ;;  %v2894_v42 = vpop.f32.mrb[21].mxu0  ;;  %v2976_v43 = vpop.f32.mrb[21].mxu1  ;;  %v3200_v27 = vunpack.c.h.s8.bf16 %v6188_v17  ;;  %v3202_v59 = vunpack.c.h.s8.bf16 %v6190_v55 }
 0x794   : > { %v3005_v31 = vmul.f32 %v2991_v30, %v2894_v42  ;;  %v3007_v47 = vmul.f32 %v2999_v29, %v2976_v43  ;;  %v2896_v51 = vpop.f32.mrb[22].mxu0  ;;  %v2978_v52 = vpop.f32.mrb[22].mxu1  ;;  %v3205_v30 = vunpack.c.l.s8.bf16 %v6193_v25  ;;  %v3207_v29 = vunpack.c.l.s8.bf16 %v6195_v26 }
 0x795   : > { %v3031_v53 = vadd.f32 %v3014_v28, %v3004_v38  ;;  %v7898_v54 = vadd.f32 %v3022_v32, %v3006_v45  ;;  %v2897_v20 = vpop.f32.mrb[23].mxu0  ;;  %v2979_v23 = vpop.f32.mrb[23].mxu1  ;;  %v6192_v28 = vld [vmem:[%s7216_s10 + $0xd40] sm:$0xff]  ;;  %v6194_v32 = vld [vmem:[%s7216_s10 + $0xd50] sm:$0xff]  ;;  %v6197_v38 = vld [vmem:[%s7216_s10 + $0xd68] sm:$0xff] }
 0x796   : > { %v3032_v56 = vadd.f32 %v3018_v34, %v3005_v31  ;;  %v3034_v41 = vadd.f32 %v3026_v35, %v3007_v47  ;;  %v3204_v50 = vunpack.c.l.s8.bf16 %v6192_v28  ;;  %v3206_v33 = vunpack.c.l.s8.bf16 %v6194_v32  ;;  %v6199_v45 = vld [vmem:[%s7216_s10 + $0xd78] sm:$0xff]  ;;  %v6196_v51 = vld [vmem:[%s7216_s10 + $0xd60] sm:$0xff]  ;;  %v6198_v52 = vld [vmem:[%s7216_s10 + $0xd70] sm:$0xff] }
 0x797   : > { %vm3035_vm5 = vcmp.ge.f32.partialorder %v3031_v53, 0.0  ;;  %v3039_v57 = vmul.f32 0.2, %v3031_v53  ;;  %v3209_v34 = vunpack.c.h.s8.bf16 %v6193_v25  ;;  %v3211_v35 = vunpack.c.h.s8.bf16 %v6195_v26  ;;  %v6210_v25 = vld [vmem:[%s7216_s10 + $0xdd0] sm:$0xff] }
 0x798   : > { %vm3036_vm6 = vcmp.ge.f32.partialorder %v3032_v56, 0.0  ;;  %v3040_v24 = vmul.f32 0.2, %v3032_v56  ;;  %vm3038_vm7 = vcmp.ge.f32.partialorder %v3034_v41, 0.0  ;;  %v3042_v58 = vmul.f32 0.2, %v3034_v41 }
 0x799   : > { %v3043_v60 = vsel %vm3035_vm5, %v3031_v53, %v3039_v57  ;;  %v3208_v42 = vunpack.c.h.s8.bf16 %v6192_v28  ;;  %v3210_v43 = vunpack.c.h.s8.bf16 %v6194_v32  ;;  %v3213_v31 = vunpack.c.l.s8.bf16 %v6197_v38  ;;  %v6203_v57 = vld [vmem:[%s7216_s10 + $0xd98] sm:$0xff]  ;;  %v6213_v28 = vld [vmem:[%s7216_s10 + $0xde8] sm:$0xff] }
 0x79a   : > { %v3047_v61 = vmul.f32 1.4142135, %v3043_v60  ;;  %v3044_v62 = vsel %vm3036_vm6, %v3032_v56, %v3040_v24  ;;  %v3046_v63 = vsel %vm3038_vm7, %v3034_v41, %v3042_v58  ;;  %v3215_v47 = vunpack.c.l.s8.bf16 %v6199_v45  ;;  %v6201_v41 = vld [vmem:[%s7216_s10 + $0xd88] sm:$0xff]  ;;  %v6215_v32 = vld [vmem:[%s7216_s10 + $0xdf8] sm:$0xff] }
 0x79b   : > { %v3048_v0 = vmul.f32 1.4142135, %v3044_v62  ;;  %v3050_v46 = vmul.f32 1.4142135, %v3046_v63  ;;  %v3212_v53 = vunpack.c.l.s8.bf16 %v6196_v51  ;;  %v3214_v20 = vunpack.c.l.s8.bf16 %v6198_v52  ;;  %v6200_v62 = vld [vmem:[%s7216_s10 + $0xd80] sm:$0xff]  ;;  %v6202_v63 = vld [vmem:[%s7216_s10 + $0xd90] sm:$0xff] }
 0x79c   : > { %v7901_v1 = vadd.f32 %v3047_v61, %v7707_v44  ;;  %v3193_v44 = vunpack.c.h.s8.bf16 %v7881_v18  ;;  %v3196_v18 = vunpack.c.l.s8.bf16 %v6188_v17  ;;  %v3217_v23 = vunpack.c.h.s8.bf16 %v6197_v38  ;;  %v6211_v17 = vld [vmem:[%s7216_s10 + $0xdd8] sm:$0xff]  ;;  %v6212_v38 = vld [vmem:[%s7216_s10 + $0xde0] sm:$0xff] }
 0x79d   : > { %v7906_v4 = vadd.f32 %v3048_v0, %v7712_v48  ;;  %v7909_v5 = vadd.f32 %v3050_v46, %v7715_v49  ;;  %v3195_v48 = vunpack.c.h.s8.bf16 %v7884_v19  ;;  %v3198_v19 = vunpack.c.l.s8.bf16 %v6190_v55 }
 0x79e   : > { %v3055_v10 = vpack.c.bf16 %v7901_v1, %v7901_v1  ;;  %v3219_v56 = vunpack.c.h.s8.bf16 %v6199_v45  ;;  %v3216_v24 = vunpack.c.h.s8.bf16 %v6196_v51  ;;  %v3218_v58 = vunpack.c.h.s8.bf16 %v6198_v52  ;;  %v6214_v45 = vld [vmem:[%s7216_s10 + $0xdf0] sm:$0xff] }
 0x79f   : > { %v3056_v6 = vpack.c.bf16 %v7906_v4, %v7906_v4  ;;  %v3058_v49 = vpack.c.bf16 %v7909_v5, %v7909_v5  ;;  %v3221_v60 = vunpack.c.l.s8.bf16 %v6201_v41  ;;  %v3223_v61 = vunpack.c.l.s8.bf16 %v6203_v57 }
 0x7a0   : > { %v3220_v0 = vunpack.c.l.s8.bf16 %v6200_v62  ;;  %v3222_v46 = vunpack.c.l.s8.bf16 %v6202_v63  ;;  %v3225_v2 = vunpack.c.h.s8.bf16 %v6201_v41  ;;  %v3227_v3 = vunpack.c.h.s8.bf16 %v6203_v57 }
 0x7a1   : > { %3284 = vmatprep.mubr.bf16.mxu0 %v3056_v6  ;;  %3366 = vmatprep.mubr.bf16.mxu1 %v3056_v6  ;;  %v6205_v6 = vld [vmem:[%s7216_s10 + $0xda8] sm:$0xff]  ;;  %v3232_v55 = vunpack.c.h.s8.bf16 %v6204_v7  ;;  %vm3037_vm8 = vcmp.ge.f32.partialorder %v7898_v54, 0.0  ;;  %v3249_v51 = vunpack.c.h.s8.bf16 %v6213_v28  ;;  %v3251_v52 = vunpack.c.h.s8.bf16 %v6215_v32 }
 0x7a2   : > { %3285 = vmatmul.mubr.bf16.vlgmr.msra.gmra.mrb[24].mxu0 %v3055_v10  ;;  %3367 = vmatmul.mubr.bf16.vlgmr.msra.gmra.mrb[24].mxu1 %v3055_v10  ;;  %v3226_v10 = vunpack.c.h.s8.bf16 %v6202_v63 }
 0x7a3   : > { %3294 = vmatpush1.bf16.msra.mxu0 %v3188_v8  ;;  %3376 = vmatpush1.bf16.msra.mxu1 %v3190_v9  ;;  %v6207_v8 = vld [vmem:[%s7216_s10 + $0xdb8] sm:$0xff]  ;;  %v3224_v9 = vunpack.c.h.s8.bf16 %v6200_v62 }
 0x7a4   : > { %3325 = vmatprep.mubr.bf16.mxu0 %v3058_v49  ;;  %3407 = vmatprep.mubr.bf16.mxu1 %v3058_v49  ;;  %v3228_v49 = vunpack.c.l.s8.bf16 %v6204_v7 }
 0x7a5   : > { %3295 = vmatprep.subr.bf16.mxu0 %v3193_v44  ;;  %3377 = vmatprep.subr.bf16.mxu1 %v3195_v48  ;;  %v3229_v44 = vunpack.c.l.s8.bf16 %v6205_v6  ;;  %v3231_v48 = vunpack.c.l.s8.bf16 %v6207_v8 }
 0x7a7   : > { %3296 = vmatpush1.bf16.msra.mxu0 %v3192_v13  ;;  %3378 = vmatpush1.bf16.msra.mxu1 %v3194_v14  ;;  %v3230_v13 = vunpack.c.l.s8.bf16 %v6206_v12  ;;  %v3233_v14 = vunpack.c.h.s8.bf16 %v6205_v6 }
 0x7a8   : > { %3297 = vmatprep.subr.bf16.mxu0 %v3197_v15  ;;  %3379 = vmatprep.subr.bf16.mxu1 %v3199_v16  ;;  %v3235_v15 = vunpack.c.h.s8.bf16 %v6207_v8  ;;  %v6209_v16 = vld [vmem:[%s7216_s10 + $0xdc8] sm:$0xff] }
 0x7ab   : > { %3298 = vmatpush1.bf16.msra.mxu0 %v3196_v18  ;;  %3380 = vmatpush1.bf16.msra.mxu1 %v3198_v19  ;;  %v3234_v18 = vunpack.c.h.s8.bf16 %v6206_v12  ;;  %v3237_v19 = vunpack.c.l.s8.bf16 %v6209_v16 }
 0x7ac   : > { %3299 = vmatprep.subr.bf16.mxu0 %v3201_v21  ;;  %3381 = vmatprep.subr.bf16.mxu1 %v3203_v22  ;;  %v3239_v21 = vunpack.c.l.s8.bf16 %v6211_v17  ;;  %v6208_v22 = vld [vmem:[%s7216_s10 + $0xdc0] sm:$0xff] }
 0x7ad   : > { %v3236_v26 = vunpack.c.l.s8.bf16 %v6208_v22 }
 0x7af   : > { %3300 = vmatpush1.bf16.msra.mxu0 %v3200_v27  ;;  %3382 = vmatpush1.bf16.msra.mxu1 %v3202_v59  ;;  %v3238_v27 = vunpack.c.l.s8.bf16 %v6210_v25  ;;  %v3241_v59 = vunpack.c.h.s8.bf16 %v6209_v16 }
 0x7b0   : > { %3301 = vmatprep.subr.bf16.mxu0 %v3205_v30  ;;  %3383 = vmatprep.subr.bf16.mxu1 %v3207_v29  ;;  %v3243_v30 = vunpack.c.h.s8.bf16 %v6211_v17  ;;  %v3041_v29 = vmul.f32 0.2, %v7898_v54 }
 0x7b3   : > { %3302 = vmatpush1.bf16.msra.mxu0 %v3204_v50  ;;  %3384 = vmatpush1.bf16.msra.mxu1 %v3206_v33  ;;  %v3240_v50 = vunpack.c.h.s8.bf16 %v6208_v22  ;;  %v3242_v33 = vunpack.c.h.s8.bf16 %v6210_v25 }
 0x7b4   : > { %3303 = vmatprep.subr.bf16.mxu0 %v3209_v34  ;;  %3385 = vmatprep.subr.bf16.mxu1 %v3211_v35  ;;  %v3245_v34 = vunpack.c.l.s8.bf16 %v6213_v28  ;;  %v3247_v35 = vunpack.c.l.s8.bf16 %v6215_v32  ;;  %v6230_v32 = vld [vmem:[%s7216_s10 + $0xe60] sm:$0xff] }
 0x7b7   : > { %3304 = vmatpush1.bf16.msra.mxu0 %v3208_v42  ;;  %3386 = vmatpush1.bf16.msra.mxu1 %v3210_v43  ;;  %v3045_v42 = vsel %vm3037_vm8, %v7898_v54, %v3041_v29  ;;  %v3244_v43 = vunpack.c.l.s8.bf16 %v6212_v38 }
 0x7b8   : > { %3305 = vmatprep.subr.bf16.mxu0 %v3213_v31  ;;  %3387 = vmatprep.subr.bf16.mxu1 %v3215_v47  ;;  %v3246_v31 = vunpack.c.l.s8.bf16 %v6214_v45  ;;  %v3049_v47 = vmul.f32 1.4142135, %v3045_v42  ;;  %v6237_v42 = vld [vmem:[%s7216_s10 + $0xe98] sm:$0xff] }
 0x7ba   : > { %v7953_v41 = vadd.f32 %v3049_v47, %v7759_v11 }
 0x7bb   : > { %3306 = vmatpush1.bf16.msra.mxu0 %v3212_v53  ;;  %3388 = vmatpush1.bf16.msra.mxu1 %v3214_v20  ;;  %v6219_v53 = vld [vmem:[%s7216_s10 + $0xe08] sm:$0xff]  ;;  %v6221_v20 = vld [vmem:[%s7216_s10 + $0xe18] sm:$0xff] }
 0x7bc   : > { %3307 = vmatprep.subr.bf16.mxu0 %v3217_v23  ;;  %3389 = vmatprep.subr.bf16.mxu1 %v3219_v56  ;;  %v3248_v23 = vunpack.c.h.s8.bf16 %v6212_v38  ;;  %v3250_v56 = vunpack.c.h.s8.bf16 %v6214_v45  ;;  %v3552_v54 = vunpack.c.l.s8.bf16 %v6219_v53  ;;  %v3554_v57 = vunpack.c.l.s8.bf16 %v6221_v20  ;;  %v6235_v45 = vld [vmem:[%s7216_s10 + $0xe88] sm:$0xff] }
 0x7bd   : > { %v3057_v62 = vpack.c.bf16 %v7953_v41, %v7953_v41  ;;  %v3556_v11 = vunpack.c.h.s8.bf16 %v6219_v53  ;;  %v3558_v63 = vunpack.c.h.s8.bf16 %v6221_v20  ;;  %v3584_v47 = vunpack.c.l.s8.bf16 %v6235_v45  ;;  %v6236_v53 = vld [vmem:[%s7216_s10 + $0xe90] sm:$0xff] }
 0x7bf   : > { %3308 = vmatpush1.bf16.msra.mxu0 %v3216_v24  ;;  %3390 = vmatpush1.bf16.msra.mxu1 %v3218_v58  ;;  %v6218_v24 = vld [vmem:[%s7216_s10 + $0xe00] sm:$0xff]  ;;  %v6220_v58 = vld [vmem:[%s7216_s10 + $0xe10] sm:$0xff] }
 0x7c0   : > { %3309 = vmatprep.subr.bf16.mxu0 %v3221_v60  ;;  %3391 = vmatprep.subr.bf16.mxu1 %v3223_v61  ;;  %v3551_v60 = vunpack.c.l.s8.bf16 %v6218_v24  ;;  %v3553_v61 = vunpack.c.l.s8.bf16 %v6220_v58 }
 0x7c3   : > { %3310 = vmatpush1.bf16.msra.mxu0 %v3220_v0  ;;  %3392 = vmatpush1.bf16.msra.mxu1 %v3222_v46  ;;  %v6223_v0 = vld [vmem:[%s7216_s10 + $0xe28] sm:$0xff]  ;;  %v6225_v46 = vld [vmem:[%s7216_s10 + $0xe38] sm:$0xff] }
 0x7c4   : > { %3311 = vmatprep.subr.bf16.mxu0 %v3225_v2  ;;  %3393 = vmatprep.subr.bf16.mxu1 %v3227_v3  ;;  %v3555_v2 = vunpack.c.h.s8.bf16 %v6218_v24  ;;  %v3557_v3 = vunpack.c.h.s8.bf16 %v6220_v58  ;;  %v3560_v6 = vunpack.c.l.s8.bf16 %v6223_v0  ;;  %v3562_v8 = vunpack.c.l.s8.bf16 %v6225_v46  ;;  %v6241_v24 = vld [vmem:[%s7216_s10 + $0xeb8] sm:$0xff] }
 0x7c5   : > { %v3564_v7 = vunpack.c.h.s8.bf16 %v6223_v0  ;;  %v3566_v12 = vunpack.c.h.s8.bf16 %v6225_v46 }
 0x7c7   : > { %3312 = vmatpush1.bf16.msra.mxu0 %v3224_v9  ;;  %3394 = vmatpush1.bf16.msra.mxu1 %v3226_v10  ;;  %v6222_v9 = vld [vmem:[%s7216_s10 + $0xe20] sm:$0xff]  ;;  %v6224_v10 = vld [vmem:[%s7216_s10 + $0xe30] sm:$0xff] }
 0x7c8   : > { %3313 = vmatprep.subr.bf16.mxu0 %v3229_v44  ;;  %3395 = vmatprep.subr.bf16.mxu1 %v3231_v48  ;;  %v3559_v44 = vunpack.c.l.s8.bf16 %v6222_v9  ;;  %v3561_v48 = vunpack.c.l.s8.bf16 %v6224_v10 }
 0x7cb   : > { %3314 = vmatpush1.bf16.msra.mxu0 %v3228_v49  ;;  %3396 = vmatpush1.bf16.msra.mxu1 %v3230_v13  ;;  %v6227_v49 = vld [vmem:[%s7216_s10 + $0xe48] sm:$0xff]  ;;  %v6229_v13 = vld [vmem:[%s7216_s10 + $0xe58] sm:$0xff] }
 0x7cc   : > { %3315 = vmatprep.subr.bf16.mxu0 %v3233_v14  ;;  %3397 = vmatprep.subr.bf16.mxu1 %v3235_v15  ;;  %v3563_v14 = vunpack.c.h.s8.bf16 %v6222_v9  ;;  %v3565_v15 = vunpack.c.h.s8.bf16 %v6224_v10  ;;  %v3568_v16 = vunpack.c.l.s8.bf16 %v6227_v49  ;;  %v3570_v17 = vunpack.c.l.s8.bf16 %v6229_v13 }
 0x7cd   : > { %v3572_v22 = vunpack.c.h.s8.bf16 %v6227_v49  ;;  %v3574_v25 = vunpack.c.h.s8.bf16 %v6229_v13 }
 0x7cf   : > { %3316 = vmatpush1.bf16.msra.mxu0 %v3232_v55  ;;  %3398 = vmatpush1.bf16.msra.mxu1 %v3234_v18  ;;  %v6226_v55 = vld [vmem:[%s7216_s10 + $0xe40] sm:$0xff]  ;;  %v6228_v18 = vld [vmem:[%s7216_s10 + $0xe50] sm:$0xff] }
 0x7d0   : > { %3317 = vmatprep.subr.bf16.mxu0 %v3237_v19  ;;  %3399 = vmatprep.subr.bf16.mxu1 %v3239_v21  ;;  %v3567_v19 = vunpack.c.l.s8.bf16 %v6226_v55  ;;  %v3569_v21 = vunpack.c.l.s8.bf16 %v6228_v18 }
 0x7d3   : > { %3318 = vmatpush1.bf16.msra.mxu0 %v3236_v26  ;;  %3400 = vmatpush1.bf16.msra.mxu1 %v3238_v27  ;;  %v6231_v26 = vld [vmem:[%s7216_s10 + $0xe68] sm:$0xff]  ;;  %v6233_v27 = vld [vmem:[%s7216_s10 + $0xe78] sm:$0xff] }
 0x7d4   : > { %3319 = vmatprep.subr.bf16.mxu0 %v3241_v59  ;;  %3401 = vmatprep.subr.bf16.mxu1 %v3243_v30  ;;  %v3571_v59 = vunpack.c.h.s8.bf16 %v6226_v55  ;;  %v3573_v30 = vunpack.c.h.s8.bf16 %v6228_v18  ;;  %v3576_v29 = vunpack.c.l.s8.bf16 %v6231_v26  ;;  %v3578_v28 = vunpack.c.l.s8.bf16 %v6233_v27  ;;  %v6247_v55 = vld [vmem:[%s7216_s10 + $0xee8] sm:$0xff]  ;;  %v6249_v18 = vld [vmem:[%s7216_s10 + $0xef8] sm:$0xff] }
 0x7d5   : > { %v3582_v38 = vunpack.c.h.s8.bf16 %v6233_v27 }
 0x7d7   : > { %3320 = vmatpush1.bf16.msra.mxu0 %v3240_v50  ;;  %3402 = vmatpush1.bf16.msra.mxu1 %v3242_v33  ;;  %v6232_v50 = vld [vmem:[%s7216_s10 + $0xe70] sm:$0xff]  ;;  %v3575_v33 = vunpack.c.l.s8.bf16 %v6230_v32 }
 0x7d8   : > { %3321 = vmatprep.subr.bf16.mxu0 %v3245_v34  ;;  %3403 = vmatprep.subr.bf16.mxu1 %v3247_v35  ;;  %v3577_v34 = vunpack.c.l.s8.bf16 %v6232_v50  ;;  %v3580_v35 = vunpack.c.h.s8.bf16 %v6231_v26 }
 0x7db   : > { %3322 = vmatpush1.bf16.msra.mxu0 %v3244_v43  ;;  %3404 = vmatpush1.bf16.msra.mxu1 %v3246_v31  ;;  %v3579_v43 = vunpack.c.h.s8.bf16 %v6230_v32  ;;  %v3581_v31 = vunpack.c.h.s8.bf16 %v6232_v50  ;;  %v7988_v32 = vld [vmem:[%s7216_s10 + $0xf08] sm:$0xff]  ;;  %v7991_v50 = vld [vmem:[%s7216_s10 + $0xf18] sm:$0xff] }
 0x7dc   : > { %3323 = vmatprep.subr.bf16.mxu0 %v3249_v51  ;;  %3405 = vmatprep.subr.bf16.mxu1 %v3251_v52  ;;  %v3586_v51 = vunpack.c.l.s8.bf16 %v6237_v42  ;;  %v6234_v52 = vld [vmem:[%s7216_s10 + $0xe80] sm:$0xff] }
 0x7dd   : > { %v3583_v20 = vunpack.c.l.s8.bf16 %v6234_v52  ;;  %v3587_v58 = vunpack.c.h.s8.bf16 %v6234_v52 }
 0x7df   : > { %3324 = vmatpush1.bf16.msra.mxu0 %v3248_v23  ;;  %3406 = vmatpush1.bf16.msra.mxu1 %v3250_v56  ;;  %v3585_v23 = vunpack.c.l.s8.bf16 %v6236_v53  ;;  %v3588_v56 = vunpack.c.h.s8.bf16 %v6235_v45 }
 0x7e0   : > { %3679 = vmatprep.subr.bf16.mxu0 %v3552_v54  ;;  %3761 = vmatprep.subr.bf16.mxu1 %v3554_v57  ;;  %v3590_v54 = vunpack.c.h.s8.bf16 %v6237_v42  ;;  %v6239_v57 = vld [vmem:[%s7216_s10 + $0xea8] sm:$0xff] }
 0x7e2   : > { %3326 = vmatmul.mubr.bf16.vlgmr.msra.gmra.mrb[24].mxu0 %v3057_v62  ;;  %3408 = vmatmul.mubr.bf16.vlgmr.msra.gmra.mrb[24].mxu1 %v3057_v62  ;;  %v3594_v62 = vunpack.c.l.s8.bf16 %v6241_v24 }
 0x7e3   : > { %3680 = vmatpush1.bf16.msra.mxu0 %v3551_v60  ;;  %3762 = vmatpush1.bf16.msra.mxu1 %v3553_v61  ;;  %v3589_v60 = vunpack.c.h.s8.bf16 %v6236_v53  ;;  %v3592_v61 = vunpack.c.l.s8.bf16 %v6239_v57 }
 0x7e4   : > { %3681 = vmatprep.subr.bf16.mxu0 %v3556_v11  ;;  %3763 = vmatprep.subr.bf16.mxu1 %v3558_v63  ;;  %v6238_v11 = vld [vmem:[%s7216_s10 + $0xea0] sm:$0xff]  ;;  %v6240_v63 = vld [vmem:[%s7216_s10 + $0xeb0] sm:$0xff] }
 0x7e5   : > { %v3591_v0 = vunpack.c.l.s8.bf16 %v6238_v11  ;;  %v3593_v46 = vunpack.c.l.s8.bf16 %v6240_v63  ;;  %v3595_v9 = vunpack.c.h.s8.bf16 %v6238_v11  ;;  %v3597_v10 = vunpack.c.h.s8.bf16 %v6240_v63 }
 0x7e7   : > { %3682 = vmatpush1.bf16.msra.mxu0 %v3555_v2  ;;  %3764 = vmatpush1.bf16.msra.mxu1 %v3557_v3  ;;  %v3596_v2 = vunpack.c.h.s8.bf16 %v6239_v57  ;;  %v3598_v3 = vunpack.c.h.s8.bf16 %v6241_v24 }
 0x7e8   : > { %3683 = vmatprep.subr.bf16.mxu0 %v3560_v6  ;;  %3765 = vmatprep.subr.bf16.mxu1 %v3562_v8  ;;  %v6243_v6 = vld [vmem:[%s7216_s10 + $0xec8] sm:$0xff]  ;;  %v6245_v8 = vld [vmem:[%s7216_s10 + $0xed8] sm:$0xff] }
 0x7eb   : > { %3684 = vmatpush1.bf16.msra.mxu0 %v3559_v44  ;;  %3766 = vmatpush1.bf16.msra.mxu1 %v3561_v48  ;;  %v3600_v44 = vunpack.c.l.s8.bf16 %v6243_v6  ;;  %v3602_v48 = vunpack.c.l.s8.bf16 %v6245_v8 }
 0x7ec   : > { %3685 = vmatprep.subr.bf16.mxu0 %v3564_v7  ;;  %3767 = vmatprep.subr.bf16.mxu1 %v3566_v12  ;;  %v6242_v7 = vld [vmem:[%s7216_s10 + $0xec0] sm:$0xff]  ;;  %v6244_v12 = vld [vmem:[%s7216_s10 + $0xed0] sm:$0xff] }
 0x7ed   : > { %v3599_v49 = vunpack.c.l.s8.bf16 %v6242_v7  ;;  %v3601_v13 = vunpack.c.l.s8.bf16 %v6244_v12 }
 0x7ef   : > { %3686 = vmatpush1.bf16.msra.mxu0 %v3563_v14  ;;  %3768 = vmatpush1.bf16.msra.mxu1 %v3565_v15  ;;  %v3604_v14 = vunpack.c.h.s8.bf16 %v6243_v6  ;;  %v3606_v15 = vunpack.c.h.s8.bf16 %v6245_v8  ;;  %v6250_v8 = vld [vmem:[%s7216_s10 + $0xf00] sm:$0xff] }
 0x7f0   : > { %3687 = vmatprep.subr.bf16.mxu0 %v3568_v16  ;;  %3769 = vmatprep.subr.bf16.mxu1 %v3570_v17  ;;  %v3603_v16 = vunpack.c.h.s8.bf16 %v6242_v7  ;;  %v3605_v17 = vunpack.c.h.s8.bf16 %v6244_v12 }
 0x7f3   : > { %3688 = vmatpush1.bf16.msra.mxu0 %v3567_v19  ;;  %3770 = vmatpush1.bf16.msra.mxu1 %v3569_v21  ;;  %v3608_v19 = vunpack.c.l.s8.bf16 %v6247_v55  ;;  %v3610_v21 = vunpack.c.l.s8.bf16 %v6249_v18 }
 0x7f4   : > { %3689 = vmatprep.subr.bf16.mxu0 %v3572_v22  ;;  %3771 = vmatprep.subr.bf16.mxu1 %v3574_v25  ;;  %v6246_v22 = vld [vmem:[%s7216_s10 + $0xee0] sm:$0xff]  ;;  %v6248_v25 = vld [vmem:[%s7216_s10 + $0xef0] sm:$0xff] }
 0x7f5   : > { %v3607_v26 = vunpack.c.l.s8.bf16 %v6246_v22  ;;  %v3609_v27 = vunpack.c.l.s8.bf16 %v6248_v25 }
 0x7f7   : > { %3690 = vmatpush1.bf16.msra.mxu0 %v3571_v59  ;;  %3772 = vmatpush1.bf16.msra.mxu1 %v3573_v30  ;;  %v3612_v59 = vunpack.c.h.s8.bf16 %v6247_v55  ;;  %v3614_v30 = vunpack.c.h.s8.bf16 %v6249_v18  ;;  %v6255_v55 = vld [vmem:[%s7216_s10 + $0xf28] sm:$0xff]  ;;  %v6257_v18 = vld [vmem:[%s7216_s10 + $0xf38] sm:$0xff] }
 0x7f8   : > { %3691 = vmatprep.subr.bf16.mxu0 %v3576_v29  ;;  %3773 = vmatprep.subr.bf16.mxu1 %v3578_v28  ;;  %v3611_v29 = vunpack.c.h.s8.bf16 %v6246_v22  ;;  %v3613_v28 = vunpack.c.h.s8.bf16 %v6248_v25  ;;  %v3624_v25 = vunpack.c.l.s8.bf16 %v6255_v55 }
 0x7fb   : > { %3692 = vmatpush1.bf16.msra.mxu0 %v3575_v33  ;;  %3774 = vmatpush1.bf16.msra.mxu1 %v3577_v34  ;;  %v3616_v33 = vunpack.c.l.s8.bf16 %v7988_v32  ;;  %v3618_v34 = vunpack.c.l.s8.bf16 %v7991_v50 }
 0x7fc   : > { %3693 = vmatprep.subr.bf16.mxu0 %v3580_v35  ;;  %3775 = vmatprep.subr.bf16.mxu1 %v3582_v38  ;;  %v6216_v35 = vld [vmem:[%s7223_s1 + $0x18] sm:$0xf] }
 0x7fd   : > { %v6217_v38 = vld [vmem:[%s7226_s6 + $0x18] sm:$0xf]  ;;  %v3422_v45 = vrot.slane %v6216_v35, %v7405_v36  ;;  %v3430_v42 = vrot.slane %v6216_v35, %v7407_v37 }
 0x7ff   : > { %3694 = vmatpush1.bf16.msra.mxu0 %v3579_v43  ;;  %3776 = vmatpush1.bf16.msra.mxu1 %v3581_v31  ;;  %v3426_v43 = vrot.slane %v6216_v35, %v7410_v39  ;;  %v3434_v31 = vrot.slane %v6216_v35, %v7412_v40 }
 0x800   : > { %3695 = vmatprep.subr.bf16.mxu0 %v3584_v47  ;;  %3777 = vmatprep.subr.bf16.mxu1 %v3586_v51  ;;  %v3449_v47 = vrot.slane %v6217_v38, %v7405_v36  ;;  %v3457_v51 = vrot.slane %v6217_v38, %v7407_v37 }
 0x803   : > { %3696 = vmatpush1.bf16.msra.mxu0 %v3583_v20  ;;  %3778 = vmatpush1.bf16.msra.mxu1 %v3585_v23  ;;  %v3453_v20 = vrot.slane %v6217_v38, %v7410_v39  ;;  %v3461_v23 = vrot.slane %v6217_v38, %v7412_v40 }
 0x804   : > { %3697 = vmatprep.subr.bf16.mxu0 %v3588_v56  ;;  %3779 = vmatprep.subr.bf16.mxu1 %v3590_v54 }
 0x807   : > { %3698 = vmatpush1.bf16.msra.mxu0 %v3587_v58  ;;  %3780 = vmatpush1.bf16.msra.mxu1 %v3589_v60 }
 0x808   : > { %3699 = vmatprep.subr.bf16.mxu0 %v3592_v61  ;;  %3781 = vmatprep.subr.bf16.mxu1 %v3594_v62 }
 0x80b   : > { %3700 = vmatpush1.bf16.msra.mxu0 %v3591_v0  ;;  %3782 = vmatpush1.bf16.msra.mxu1 %v3593_v46 }
 0x80c   : > { %3701 = vmatprep.subr.bf16.mxu0 %v3596_v2  ;;  %3783 = vmatprep.subr.bf16.mxu1 %v3598_v3 }
 0x80f   : > { %3702 = vmatpush1.bf16.msra.mxu0 %v3595_v9  ;;  %3784 = vmatpush1.bf16.msra.mxu1 %v3597_v10  ;;  %v6252_v9 = vld [vmem:[%s7216_s10 + $0xf10] sm:$0xff] }
 0x810   : > { %3703 = vmatprep.subr.bf16.mxu0 %v3600_v44  ;;  %3785 = vmatprep.subr.bf16.mxu1 %v3602_v48  ;;  %v3621_v22 = vunpack.c.h.s8.bf16 %v6252_v9 }
 0x813   : > { %3704 = vmatpush1.bf16.msra.mxu0 %v3599_v49  ;;  %3786 = vmatpush1.bf16.msra.mxu1 %v3601_v13  ;;  %v3615_v49 = vunpack.c.l.s8.bf16 %v6250_v8  ;;  %v3617_v13 = vunpack.c.l.s8.bf16 %v6252_v9  ;;  %v6266_v9 = vld [vmem:[%s7216_s10 + $0xf80] sm:$0xff] }
 0x814   : > { %3705 = vmatprep.subr.bf16.mxu0 %v3604_v14  ;;  %3787 = vmatprep.subr.bf16.mxu1 %v3606_v15 }
 0x817   : > { %3706 = vmatpush1.bf16.msra.mxu0 %v3603_v16  ;;  %3788 = vmatpush1.bf16.msra.mxu1 %v3605_v17  ;;  %v3620_v16 = vunpack.c.h.s8.bf16 %v7988_v32  ;;  %v3622_v17 = vunpack.c.h.s8.bf16 %v7991_v50  ;;  %v3630_v32 = vunpack.c.h.s8.bf16 %v6257_v18  ;;  %v6259_v50 = vld [vmem:[%s7216_s10 + $0xf48] sm:$0xff] }
 0x818   : > { %3707 = vmatprep.subr.bf16.mxu0 %v3608_v19  ;;  %3789 = vmatprep.subr.bf16.mxu1 %v3610_v21  ;;  %v3619_v21 = vunpack.c.h.s8.bf16 %v6250_v8  ;;  %v3632_v38 = vunpack.c.l.s8.bf16 %v6259_v50 }
 0x81b   : > { %3708 = vmatpush1.bf16.msra.mxu0 %v3607_v26  ;;  %3790 = vmatpush1.bf16.msra.mxu1 %v3609_v27  ;;  %v3626_v26 = vunpack.c.l.s8.bf16 %v6257_v18  ;;  %v6254_v27 = vld [vmem:[%s7216_s10 + $0xf20] sm:$0xff]  ;;  %v6272_v18 = vld [vmem:[%s7216_s10 + $0xfb0] sm:$0xff] }
 0x81c   : > { %3709 = vmatprep.subr.bf16.mxu0 %v3612_v59  ;;  %3791 = vmatprep.subr.bf16.mxu1 %v3614_v30  ;;  %v6256_v59 = vld [vmem:[%s7216_s10 + $0xf30] sm:$0xff]  ;;  %v3623_v30 = vunpack.c.l.s8.bf16 %v6254_v27 }
 0x81d   : > { %v3629_v35 = vunpack.c.h.s8.bf16 %v6256_v59 }
 0x81f   : > { %3710 = vmatpush1.bf16.msra.mxu0 %v3611_v29  ;;  %3792 = vmatpush1.bf16.msra.mxu1 %v3613_v28  ;;  %v3625_v29 = vunpack.c.l.s8.bf16 %v6256_v59  ;;  %v3628_v28 = vunpack.c.h.s8.bf16 %v6255_v55  ;;  %v6270_v55 = vld [vmem:[%s7216_s10 + $0xfa0] sm:$0xff] }
 0x820   : > { %3720 = vmatprep.subr.bf16.mxu0 %v3616_v33  ;;  %3802 = vmatprep.subr.bf16.mxu1 %v3618_v34  ;;  %v6261_v33 = vld [vmem:[%s7216_s10 + $0xf58] sm:$0xff]  ;;  %v3627_v34 = vunpack.c.h.s8.bf16 %v6254_v27  ;;  %v3659_v59 = vunpack.c.h.s8.bf16 %v6270_v55 }
 0x821   : > { %v6277_v27 = vld [vmem:[%s7216_s10 + $0xfd8] sm:$0xff] }
 0x8b5   : > { %v3327_v52 = vpop.f32.mrb[24].mxu0  ;;  %v3409_v53 = vpop.f32.mrb[24].mxu1 }
 0x8b6   : > { %v3439_v56 = vmul.f32 %v3422_v45, %v3327_v52  ;;  %v3441_v54 = vmul.f32 %v3430_v42, %v3409_v53  ;;  %v3329_v57 = vpop.f32.mrb[25].mxu0  ;;  %v3411_v24 = vpop.f32.mrb[25].mxu1  ;;  %v3634_v45 = vunpack.c.l.s8.bf16 %v6261_v33  ;;  %v6258_v42 = vld [vmem:[%s7216_s10 + $0xf40] sm:$0xff]  ;;  %v3638_v52 = vunpack.c.h.s8.bf16 %v6261_v33  ;;  %v6263_v53 = vld [vmem:[%s7216_s10 + $0xf68] sm:$0xff] }
 0x8b7   : > { %v3440_v58 = vmul.f32 %v3426_v43, %v3329_v57  ;;  %v3442_v60 = vmul.f32 %v3434_v31, %v3411_v24  ;;  %v3331_v61 = vpop.f32.mrb[26].mxu0  ;;  %v3413_v62 = vpop.f32.mrb[26].mxu1  ;;  %v6260_v43 = vld [vmem:[%s7216_s10 + $0xf50] sm:$0xff]  ;;  %v3631_v31 = vunpack.c.l.s8.bf16 %v6258_v42  ;;  %v6262_v24 = vld [vmem:[%s7216_s10 + $0xf60] sm:$0xff] }
 0x8b8   : > { %v3466_v11 = vadd.f32 %v3449_v47, %v3439_v56  ;;  %v8005_v63 = vadd.f32 %v3457_v51, %v3441_v54  ;;  %v3332_v0 = vpop.f32.mrb[27].mxu0  ;;  %v3414_v46 = vpop.f32.mrb[27].mxu1  ;;  %v3633_v47 = vunpack.c.l.s8.bf16 %v6260_v43  ;;  %v3636_v51 = vunpack.c.h.s8.bf16 %v6259_v50  ;;  %v6276_v50 = vld [vmem:[%s7216_s10 + $0xfd0] sm:$0xff] }
 0x8b9   : > { %v3467_v2 = vadd.f32 %v3453_v20, %v3440_v58  ;;  %v3469_v3 = vadd.f32 %v3461_v23, %v3442_v60  ;;  %v6265_v20 = vld [vmem:[%s7216_s10 + $0xf78] sm:$0xff]  ;;  %v3635_v23 = vunpack.c.h.s8.bf16 %v6258_v42  ;;  %v3637_v56 = vunpack.c.h.s8.bf16 %v6260_v43  ;;  %v6264_v58 = vld [vmem:[%s7216_s10 + $0xf70] sm:$0xff]  ;;  %v6267_v0 = vld [vmem:[%s7216_s10 + $0xf88] sm:$0xff] }
 0x8ba   : > { %vm3470_vm9 = vcmp.ge.f32.partialorder %v3466_v11, 0.0  ;;  %v3474_v6 = vmul.f32 0.2, %v3466_v11  ;;  %v3640_v54 = vunpack.c.l.s8.bf16 %v6263_v53  ;;  %v3642_v57 = vunpack.c.l.s8.bf16 %v6265_v20  ;;  %v6269_v46 = vld [vmem:[%s7216_s10 + $0xf98] sm:$0xff] }
 0x8bb   : > { %v3475_v10 = vmul.f32 0.2, %v3467_v2  ;;  %v3477_v44 = vmul.f32 0.2, %v3469_v3  ;;  %vm3471_vm10 = vcmp.ge.f32.partialorder %v3467_v2, 0.0  ;;  %vm3473_vm11 = vcmp.ge.f32.partialorder %v3469_v3, 0.0 }
 0x8bc   : > { %v3478_v48 = vsel %vm3470_vm9, %v3466_v11, %v3474_v6  ;;  %v3639_v60 = vunpack.c.l.s8.bf16 %v6262_v24  ;;  %v3641_v61 = vunpack.c.l.s8.bf16 %v6264_v58  ;;  %v3644_v62 = vunpack.c.h.s8.bf16 %v6263_v53  ;;  %v6281_v42 = vld [vmem:[%s7216_s10 + $0xff8] sm:$0xff]  ;;  %v6280_v53 = vld [vmem:[%s7216_s10 + $0xff0] sm:$0xff] }
 0x8bd   : > { %v3479_v7 = vsel %vm3471_vm10, %v3467_v2, %v3475_v10  ;;  %v3481_v14 = vsel %vm3473_vm11, %v3469_v3, %v3477_v44  ;;  %v3482_v15 = vpack.c.bf16 %v3478_v48, %v3478_v48  ;;  %v3646_v11 = vunpack.c.h.s8.bf16 %v6265_v20  ;;  %v6268_v10 = vld [vmem:[%s7216_s10 + $0xf90] sm:$0xff] }
 0x8be   : > { %v3483_v12 = vpack.c.bf16 %v3479_v7, %v3479_v7  ;;  %v3485_v19 = vpack.c.bf16 %v3481_v14, %v3481_v14  ;;  %v3643_v2 = vunpack.c.h.s8.bf16 %v6262_v24  ;;  %v3645_v3 = vunpack.c.h.s8.bf16 %v6264_v58  ;;  %v6285_v24 = vld [vmem:[%s7216_s10 + $0x1008] sm:$0xff]  ;;  %v6287_v58 = vld [vmem:[%s7216_s10 + $0x1018] sm:$0xff] }
 0x8bf   : > { %v3648_v6 = vunpack.c.l.s8.bf16 %v6267_v0  ;;  %v3650_v8 = vunpack.c.l.s8.bf16 %v6269_v46  ;;  %v3647_v44 = vunpack.c.l.s8.bf16 %v6266_v9  ;;  %v3649_v48 = vunpack.c.l.s8.bf16 %v6268_v10 }
 0x8c0   : > { %3711 = vmatprep.mubr.bf16.mxu0 %v3483_v12  ;;  %3793 = vmatprep.mubr.bf16.mxu1 %v3483_v12  ;;  %v3652_v7 = vunpack.c.h.s8.bf16 %v6267_v0  ;;  %v3654_v12 = vunpack.c.h.s8.bf16 %v6269_v46  ;;  %v3651_v14 = vunpack.c.h.s8.bf16 %v6266_v9  ;;  %vm3472_vm12 = vcmp.ge.f32.partialorder %v8005_v63, 0.0  ;;  %v6284_v0 = vld [vmem:[%s7216_s10 + $0x1000] sm:$0xff]  ;;  %v6286_v46 = vld [vmem:[%s7216_s10 + $0x1010] sm:$0xff] }
 0x8c1   : > { %3712 = vmatmul.mubr.bf16.vlgmr.msra.gmra.mrb[28].mxu0 %v3482_v15  ;;  %3794 = vmatmul.mubr.bf16.vlgmr.msra.gmra.mrb[28].mxu1 %v3482_v15  ;;  %v3653_v15 = vunpack.c.h.s8.bf16 %v6268_v10  ;;  %v3991_v9 = vunpack.c.h.s8.bf16 %v6285_v24  ;;  %v3993_v10 = vunpack.c.h.s8.bf16 %v6287_v58 }
 0x8c2   : > { %3721 = vmatpush1.bf16.msra.mxu0 %v3615_v49  ;;  %3803 = vmatpush1.bf16.msra.mxu1 %v3617_v13  ;;  %v6271_v49 = vld [vmem:[%s7216_s10 + $0xfa8] sm:$0xff]  ;;  %v6273_v13 = vld [vmem:[%s7216_s10 + $0xfb8] sm:$0xff] }
 0x8c3   : > { %3752 = vmatprep.mubr.bf16.mxu0 %v3485_v19  ;;  %3834 = vmatprep.mubr.bf16.mxu1 %v3485_v19  ;;  %v3655_v19 = vunpack.c.l.s8.bf16 %v6270_v55 }
 0x8c4   : > { %3722 = vmatprep.subr.bf16.mxu0 %v3620_v16  ;;  %3804 = vmatprep.subr.bf16.mxu1 %v3622_v17  ;;  %v3656_v16 = vunpack.c.l.s8.bf16 %v6271_v49  ;;  %v3658_v17 = vunpack.c.l.s8.bf16 %v6273_v13 }
 0x8c6   : > { %3723 = vmatpush1.bf16.msra.mxu0 %v3619_v21  ;;  %3805 = vmatpush1.bf16.msra.mxu1 %v3621_v22  ;;  %v3657_v21 = vunpack.c.l.s8.bf16 %v6272_v18  ;;  %v3660_v22 = vunpack.c.h.s8.bf16 %v6271_v49 }
 0x8c7   : > { %3724 = vmatprep.subr.bf16.mxu0 %v3624_v25  ;;  %3806 = vmatprep.subr.bf16.mxu1 %v3626_v26  ;;  %v3662_v25 = vunpack.c.h.s8.bf16 %v6273_v13  ;;  %v6275_v26 = vld [vmem:[%s7216_s10 + $0xfc8] sm:$0xff]  ;;  %v6288_v13 = vld [vmem:[%s7216_s10 + $0x1020] sm:$0xff] }
 0x8ca   : > { %3725 = vmatpush1.bf16.msra.mxu0 %v3623_v30  ;;  %3807 = vmatpush1.bf16.msra.mxu1 %v3625_v29  ;;  %v3661_v30 = vunpack.c.h.s8.bf16 %v6272_v18  ;;  %v3664_v29 = vunpack.c.l.s8.bf16 %v6275_v26  ;;  %v6293_v18 = vld [vmem:[%s7216_s10 + $0x1048] sm:$0xff] }
 0x8cb   : > { %3726 = vmatprep.subr.bf16.mxu0 %v3628_v28  ;;  %3808 = vmatprep.subr.bf16.mxu1 %v3630_v32  ;;  %v3666_v28 = vunpack.c.l.s8.bf16 %v6277_v27  ;;  %v6274_v32 = vld [vmem:[%s7216_s10 + $0xfc0] sm:$0xff] }
 0x8cc   : > { %v3663_v33 = vunpack.c.l.s8.bf16 %v6274_v32  ;;  %v3667_v43 = vunpack.c.h.s8.bf16 %v6274_v32 }
 0x8ce   : > { %3727 = vmatpush1.bf16.msra.mxu0 %v3627_v34  ;;  %3809 = vmatpush1.bf16.msra.mxu1 %v3629_v35  ;;  %v3665_v34 = vunpack.c.l.s8.bf16 %v6276_v50  ;;  %v3668_v35 = vunpack.c.h.s8.bf16 %v6275_v26 }
 0x8cf   : > { %3728 = vmatprep.subr.bf16.mxu0 %v3632_v38  ;;  %3810 = vmatprep.subr.bf16.mxu1 %v3634_v45  ;;  %v3670_v38 = vunpack.c.h.s8.bf16 %v6277_v27  ;;  %v6279_v45 = vld [vmem:[%s7216_s10 + $0xfe8] sm:$0xff]  ;;  %v6292_v27 = vld [vmem:[%s7216_s10 + $0x1040] sm:$0xff] }
 0x8d2   : > { %3729 = vmatpush1.bf16.msra.mxu0 %v3631_v31  ;;  %3811 = vmatpush1.bf16.msra.mxu1 %v3633_v47  ;;  %v3669_v31 = vunpack.c.h.s8.bf16 %v6276_v50  ;;  %v3672_v47 = vunpack.c.l.s8.bf16 %v6279_v45  ;;  %v6297_v50 = vld [vmem:[%s7216_s10 + $0x1068] sm:$0xff] }
 0x8d3   : > { %3730 = vmatprep.subr.bf16.mxu0 %v3636_v51  ;;  %3812 = vmatprep.subr.bf16.mxu1 %v3638_v52  ;;  %v3674_v51 = vunpack.c.l.s8.bf16 %v6281_v42  ;;  %v6278_v52 = vld [vmem:[%s7216_s10 + $0xfe0] sm:$0xff] }
 0x8d4   : > { %v3671_v20 = vunpack.c.l.s8.bf16 %v6278_v52 }
 0x8d6   : > { %3731 = vmatpush1.bf16.msra.mxu0 %v3635_v23  ;;  %3813 = vmatpush1.bf16.msra.mxu1 %v3637_v56  ;;  %v3673_v23 = vunpack.c.l.s8.bf16 %v6280_v53  ;;  %v3676_v56 = vunpack.c.h.s8.bf16 %v6279_v45 }
 0x8d7   : > { %3732 = vmatprep.subr.bf16.mxu0 %v3640_v54  ;;  %3814 = vmatprep.subr.bf16.mxu1 %v3642_v57  ;;  %v3678_v54 = vunpack.c.h.s8.bf16 %v6281_v42  ;;  %v3476_v57 = vmul.f32 0.2, %v8005_v63  ;;  %v6296_v42 = vld [vmem:[%s7216_s10 + $0x1060] sm:$0xff] }
 0x8da   : > { %3733 = vmatpush1.bf16.msra.mxu0 %v3639_v60  ;;  %3815 = vmatpush1.bf16.msra.mxu1 %v3641_v61  ;;  %v3675_v60 = vunpack.c.h.s8.bf16 %v6278_v52  ;;  %v3677_v61 = vunpack.c.h.s8.bf16 %v6280_v53  ;;  %v6301_v53 = vld [vmem:[%s7216_s10 + $0x1088] sm:$0xff] }
 0x8db   : > { %3734 = vmatprep.subr.bf16.mxu0 %v3644_v62  ;;  %3816 = vmatprep.subr.bf16.mxu1 %v3646_v11  ;;  %v3987_v62 = vunpack.c.l.s8.bf16 %v6285_v24  ;;  %v3989_v11 = vunpack.c.l.s8.bf16 %v6287_v58  ;;  %v6300_v24 = vld [vmem:[%s7216_s10 + $0x1080] sm:$0xff]  ;;  %v6302_v58 = vld [vmem:[%s7216_s10 + $0x1090] sm:$0xff] }
 0x8de   : > { %3735 = vmatpush1.bf16.msra.mxu0 %v3643_v2  ;;  %3817 = vmatpush1.bf16.msra.mxu1 %v3645_v3  ;;  %v3480_v2 = vsel %vm3472_vm12, %v8005_v63, %v3476_v57  ;;  %v3986_v3 = vunpack.c.l.s8.bf16 %v6284_v0  ;;  %v3992_v63 = vunpack.c.h.s8.bf16 %v6286_v46 }
 0x8df   : > { %3736 = vmatprep.subr.bf16.mxu0 %v3648_v6  ;;  %3818 = vmatprep.subr.bf16.mxu1 %v3650_v8  ;;  %v3988_v6 = vunpack.c.l.s8.bf16 %v6286_v46  ;;  %v3484_v8 = vpack.c.bf16 %v3480_v2, %v3480_v2  ;;  %v6307_v46 = vld [vmem:[%s7216_s10 + $0x10b8] sm:$0xff]  ;;  %v4022_v2 = vunpack.c.h.s8.bf16 %v6300_v24 }
 0x8e2   : > { %3737 = vmatpush1.bf16.msra.mxu0 %v3647_v44  ;;  %3819 = vmatpush1.bf16.msra.mxu1 %v3649_v48  ;;  %v6289_v44 = vld [vmem:[%s7216_s10 + $0x1028] sm:$0xff]  ;;  %v6291_v48 = vld [vmem:[%s7216_s10 + $0x1038] sm:$0xff] }
 0x8e3   : > { %3738 = vmatprep.subr.bf16.mxu0 %v3652_v7  ;;  %3820 = vmatprep.subr.bf16.mxu1 %v3654_v12  ;;  %v3990_v7 = vunpack.c.h.s8.bf16 %v6284_v0  ;;  %v3995_v12 = vunpack.c.l.s8.bf16 %v6289_v44  ;;  %v3997_v49 = vunpack.c.l.s8.bf16 %v6291_v48  ;;  %v4001_v55 = vunpack.c.h.s8.bf16 %v6291_v48  ;;  %v6305_v0 = vld [vmem:[%s7216_s10 + $0x10a8] sm:$0xff] }
 0x8e6   : > { %3739 = vmatpush1.bf16.msra.mxu0 %v3651_v14  ;;  %3821 = vmatpush1.bf16.msra.mxu1 %v3653_v15  ;;  %v6290_v14 = vld [vmem:[%s7216_s10 + $0x1030] sm:$0xff]  ;;  %v3994_v15 = vunpack.c.l.s8.bf16 %v6288_v13 }
 0x8e7   : > { %3740 = vmatprep.subr.bf16.mxu0 %v3656_v16  ;;  %3822 = vmatprep.subr.bf16.mxu1 %v3658_v17  ;;  %v3996_v16 = vunpack.c.l.s8.bf16 %v6290_v14  ;;  %v3999_v17 = vunpack.c.h.s8.bf16 %v6289_v44 }
 0x8ea   : > { %3741 = vmatpush1.bf16.msra.mxu0 %v3655_v19  ;;  %3823 = vmatpush1.bf16.msra.mxu1 %v3657_v21  ;;  %v6295_v19 = vld [vmem:[%s7216_s10 + $0x1058] sm:$0xff]  ;;  %v3998_v21 = vunpack.c.h.s8.bf16 %v6288_v13 }
 0x8eb   : > { %3742 = vmatprep.subr.bf16.mxu0 %v3660_v22  ;;  %3824 = vmatprep.subr.bf16.mxu1 %v3662_v25  ;;  %v4000_v22 = vunpack.c.h.s8.bf16 %v6290_v14  ;;  %v4003_v25 = vunpack.c.l.s8.bf16 %v6293_v18  ;;  %v4005_v26 = vunpack.c.l.s8.bf16 %v6295_v19  ;;  %v4009_v32 = vunpack.c.h.s8.bf16 %v6295_v19 }
 0x8ee   : > { %3743 = vmatpush1.bf16.msra.mxu0 %v3659_v59  ;;  %3825 = vmatpush1.bf16.msra.mxu1 %v3661_v30  ;;  %v6294_v59 = vld [vmem:[%s7216_s10 + $0x1050] sm:$0xff]  ;;  %v4002_v30 = vunpack.c.l.s8.bf16 %v6292_v27 }
 0x8ef   : > { %3744 = vmatprep.subr.bf16.mxu0 %v3664_v29  ;;  %3826 = vmatprep.subr.bf16.mxu1 %v3666_v28  ;;  %v4004_v29 = vunpack.c.l.s8.bf16 %v6294_v59  ;;  %v4007_v28 = vunpack.c.h.s8.bf16 %v6293_v18 }
 0x8f2   : > { %3745 = vmatpush1.bf16.msra.mxu0 %v3663_v33  ;;  %3827 = vmatpush1.bf16.msra.mxu1 %v3665_v34  ;;  %v6299_v33 = vld [vmem:[%s7216_s10 + $0x1078] sm:$0xff]  ;;  %v4006_v34 = vunpack.c.h.s8.bf16 %v6292_v27  ;;  %v6313_v27 = vld [vmem:[%s7216_s10 + $0x10e8] sm:$0xff] }
 0x8f3   : > { %3746 = vmatprep.subr.bf16.mxu0 %v3668_v35  ;;  %3828 = vmatprep.subr.bf16.mxu1 %v3670_v38  ;;  %v4008_v35 = vunpack.c.h.s8.bf16 %v6294_v59  ;;  %v4011_v38 = vunpack.c.l.s8.bf16 %v6297_v50  ;;  %v4013_v45 = vunpack.c.l.s8.bf16 %v6299_v33  ;;  %v4017_v52 = vunpack.c.h.s8.bf16 %v6299_v33  ;;  %v6315_v59 = vld [vmem:[%s7216_s10 + $0x10f8] sm:$0xff] }
 0x8f6   : > { %3747 = vmatpush1.bf16.msra.mxu0 %v3667_v43  ;;  %3829 = vmatpush1.bf16.msra.mxu1 %v3669_v31  ;;  %v6298_v43 = vld [vmem:[%s7216_s10 + $0x1070] sm:$0xff]  ;;  %v4010_v31 = vunpack.c.l.s8.bf16 %v6296_v42 }
 0x8f7   : > { %3748 = vmatprep.subr.bf16.mxu0 %v3672_v47  ;;  %3830 = vmatprep.subr.bf16.mxu1 %v3674_v51  ;;  %v4012_v47 = vunpack.c.l.s8.bf16 %v6298_v43  ;;  %v4015_v51 = vunpack.c.h.s8.bf16 %v6297_v50 }
 0x8fa   : > { %3749 = vmatpush1.bf16.msra.mxu0 %v3671_v20  ;;  %3831 = vmatpush1.bf16.msra.mxu1 %v3673_v23  ;;  %v6303_v20 = vld [vmem:[%s7216_s10 + $0x1098] sm:$0xff]  ;;  %v4014_v23 = vunpack.c.h.s8.bf16 %v6296_v42  ;;  %v8075_v42 = vld [vmem:[%s7216_s10 + $0x1108] sm:$0xff] }
 0x8fb   : > { %3750 = vmatprep.subr.bf16.mxu0 %v3676_v56  ;;  %3832 = vmatprep.subr.bf16.mxu1 %v3678_v54  ;;  %v4016_v56 = vunpack.c.h.s8.bf16 %v6298_v43  ;;  %v4019_v54 = vunpack.c.l.s8.bf16 %v6301_v53  ;;  %v4021_v57 = vunpack.c.l.s8.bf16 %v6303_v20  ;;  %v8078_v43 = vld [vmem:[%s7216_s10 + $0x1118] sm:$0xff] }
 0x8fe   : > { %3751 = vmatpush1.bf16.msra.mxu0 %v3675_v60  ;;  %3833 = vmatpush1.bf16.msra.mxu1 %v3677_v61  ;;  %v4018_v60 = vunpack.c.l.s8.bf16 %v6300_v24  ;;  %v4020_v61 = vunpack.c.l.s8.bf16 %v6302_v58 }
 0x8ff   : > { %4114 = vmatprep.subr.bf16.mxu0 %v3987_v62  ;;  %4196 = vmatprep.subr.bf16.mxu1 %v3989_v11  ;;  %v4023_v62 = vunpack.c.h.s8.bf16 %v6301_v53  ;;  %v4025_v11 = vunpack.c.h.s8.bf16 %v6303_v20 }
 0x901   : > { %3753 = vmatmul.mubr.bf16.vlgmr.msra.gmra.mrb[28].mxu0 %v3484_v8  ;;  %3835 = vmatmul.mubr.bf16.vlgmr.msra.gmra.mrb[28].mxu1 %v3484_v8  ;;  %v4029_v8 = vunpack.c.l.s8.bf16 %v6307_v46 }
 0x902   : > { %4115 = vmatpush1.bf16.msra.mxu0 %v3986_v3  ;;  %4197 = vmatpush1.bf16.msra.mxu1 %v3988_v6  ;;  %v4024_v3 = vunpack.c.h.s8.bf16 %v6302_v58  ;;  %v4027_v6 = vunpack.c.l.s8.bf16 %v6305_v0 }
 0x903   : > { %4116 = vmatprep.subr.bf16.mxu0 %v3991_v9  ;;  %4198 = vmatprep.subr.bf16.mxu1 %v3993_v10  ;;  %v6304_v9 = vld [vmem:[%s7216_s10 + $0x10a0] sm:$0xff]  ;;  %v6306_v10 = vld [vmem:[%s7216_s10 + $0x10b0] sm:$0xff] }
 0x904   : > { %v4026_v44 = vunpack.c.l.s8.bf16 %v6304_v9  ;;  %v4028_v48 = vunpack.c.l.s8.bf16 %v6306_v10  ;;  %v4030_v13 = vunpack.c.h.s8.bf16 %v6304_v9  ;;  %v4032_v14 = vunpack.c.h.s8.bf16 %v6306_v10 }
 0x906   : > { %4117 = vmatpush1.bf16.msra.mxu0 %v3990_v7  ;;  %4199 = vmatpush1.bf16.msra.mxu1 %v3992_v63  ;;  %v4031_v7 = vunpack.c.h.s8.bf16 %v6305_v0  ;;  %v4033_v63 = vunpack.c.h.s8.bf16 %v6307_v46 }
 0x907   : > { %4118 = vmatprep.subr.bf16.mxu0 %v3995_v12  ;;  %4200 = vmatprep.subr.bf16.mxu1 %v3997_v49  ;;  %v6309_v12 = vld [vmem:[%s7216_s10 + $0x10c8] sm:$0xff]  ;;  %v6311_v49 = vld [vmem:[%s7216_s10 + $0x10d8] sm:$0xff] }
 0x90a   : > { %4119 = vmatpush1.bf16.msra.mxu0 %v3994_v15  ;;  %4201 = vmatpush1.bf16.msra.mxu1 %v3996_v16  ;;  %v4035_v15 = vunpack.c.l.s8.bf16 %v6309_v12  ;;  %v4037_v16 = vunpack.c.l.s8.bf16 %v6311_v49 }
 0x90b   : > { %4120 = vmatprep.subr.bf16.mxu0 %v3999_v17  ;;  %4202 = vmatprep.subr.bf16.mxu1 %v4001_v55  ;;  %v6308_v17 = vld [vmem:[%s7216_s10 + $0x10c0] sm:$0xff]  ;;  %v6310_v55 = vld [vmem:[%s7216_s10 + $0x10d0] sm:$0xff] }
 0x90c   : > { %v4034_v18 = vunpack.c.l.s8.bf16 %v6308_v17  ;;  %v4036_v19 = vunpack.c.l.s8.bf16 %v6310_v55 }
 0x90e   : > { %4121 = vmatpush1.bf16.msra.mxu0 %v3998_v21  ;;  %4203 = vmatpush1.bf16.msra.mxu1 %v4000_v22  ;;  %v4039_v21 = vunpack.c.h.s8.bf16 %v6309_v12  ;;  %v4041_v22 = vunpack.c.h.s8.bf16 %v6311_v49 }
 0x90f   : > { %4122 = vmatprep.subr.bf16.mxu0 %v4003_v25  ;;  %4204 = vmatprep.subr.bf16.mxu1 %v4005_v26  ;;  %v4038_v25 = vunpack.c.h.s8.bf16 %v6308_v17  ;;  %v4040_v26 = vunpack.c.h.s8.bf16 %v6310_v55 }
 0x912   : > { %4123 = vmatpush1.bf16.msra.mxu0 %v4002_v30  ;;  %4205 = vmatpush1.bf16.msra.mxu1 %v4004_v29  ;;  %v4043_v30 = vunpack.c.l.s8.bf16 %v6313_v27  ;;  %v4045_v29 = vunpack.c.l.s8.bf16 %v6315_v59 }
 0x913   : > { %4124 = vmatprep.subr.bf16.mxu0 %v4007_v28  ;;  %4206 = vmatprep.subr.bf16.mxu1 %v4009_v32  ;;  %v6312_v28 = vld [vmem:[%s7216_s10 + $0x10e0] sm:$0xff]  ;;  %v6314_v32 = vld [vmem:[%s7216_s10 + $0x10f0] sm:$0xff] }
 0x914   : > { %v4042_v50 = vunpack.c.l.s8.bf16 %v6312_v28  ;;  %v4044_v33 = vunpack.c.l.s8.bf16 %v6314_v32 }
 0x916   : > { %4125 = vmatpush1.bf16.msra.mxu0 %v4006_v34  ;;  %4207 = vmatpush1.bf16.msra.mxu1 %v4008_v35  ;;  %v4047_v34 = vunpack.c.h.s8.bf16 %v6313_v27  ;;  %v4049_v35 = vunpack.c.h.s8.bf16 %v6315_v59 }
 0x917   : > { %4126 = vmatprep.subr.bf16.mxu0 %v4011_v38  ;;  %4208 = vmatprep.subr.bf16.mxu1 %v4013_v45  ;;  %v4046_v38 = vunpack.c.h.s8.bf16 %v6312_v28  ;;  %v4048_v45 = vunpack.c.h.s8.bf16 %v6314_v32  ;;  %v6321_v28 = vld [vmem:[%s7216_s10 + $0x1128] sm:$0xff]  ;;  %v6323_v32 = vld [vmem:[%s7216_s10 + $0x1138] sm:$0xff] }
 0x91a   : > { %4127 = vmatpush1.bf16.msra.mxu0 %v4010_v31  ;;  %4209 = vmatpush1.bf16.msra.mxu1 %v4012_v47  ;;  %v4051_v31 = vunpack.c.l.s8.bf16 %v8075_v42  ;;  %v4053_v47 = vunpack.c.l.s8.bf16 %v8078_v43 }
 0x91b   : > { %4128 = vmatprep.subr.bf16.mxu0 %v4015_v51  ;;  %4210 = vmatprep.subr.bf16.mxu1 %v4017_v52  ;;  %v6282_v51 = vld [vmem:[%s7223_s1 + $0x1c] sm:$0xf] }
 0x91c   : > { %v6283_v52 = vld [vmem:[%s7226_s6 + $0x1c] sm:$0xf]  ;;  %v3849_v53 = vrot.slane %v6282_v51, %v7405_v36  ;;  %v3857_v20 = vrot.slane %v6282_v51, %v7407_v37 }
 0x91e   : > { %4129 = vmatpush1.bf16.msra.mxu0 %v4014_v23  ;;  %4211 = vmatpush1.bf16.msra.mxu1 %v4016_v56  ;;  %v3853_v23 = vrot.slane %v6282_v51, %v7410_v39  ;;  %v3861_v56 = vrot.slane %v6282_v51, %v7412_v40  ;;  %v6325_v51 = vld [vmem:[%s7216_s10 + $0x1148] sm:$0xff] }
 0x91f   : > { %4130 = vmatprep.subr.bf16.mxu0 %v4019_v54  ;;  %4212 = vmatprep.subr.bf16.mxu1 %v4021_v57  ;;  %v3876_v54 = vrot.slane %v6283_v52, %v7405_v36  ;;  %v3884_v57 = vrot.slane %v6283_v52, %v7407_v37 }
 0x922   : > { %4131 = vmatpush1.bf16.msra.mxu0 %v4018_v60  ;;  %4213 = vmatpush1.bf16.msra.mxu1 %v4020_v61  ;;  %v3880_v60 = vrot.slane %v6283_v52, %v7410_v39  ;;  %v3888_v61 = vrot.slane %v6283_v52, %v7412_v40  ;;  %v6327_v52 = vld [vmem:[%s7216_s10 + $0x1158] sm:$0xff] }
 0x923   : > { %4132 = vmatprep.subr.bf16.mxu0 %v4023_v62  ;;  %4214 = vmatprep.subr.bf16.mxu1 %v4025_v11 }
 0x926   : > { %4133 = vmatpush1.bf16.msra.mxu0 %v4022_v2  ;;  %4215 = vmatpush1.bf16.msra.mxu1 %v4024_v3 }
 0x927   : > { %4134 = vmatprep.subr.bf16.mxu0 %v4027_v6  ;;  %4216 = vmatprep.subr.bf16.mxu1 %v4029_v8 }
 0x92a   : > { %4135 = vmatpush1.bf16.msra.mxu0 %v4026_v44  ;;  %4217 = vmatpush1.bf16.msra.mxu1 %v4028_v48 }
 0x92b   : > { %4136 = vmatprep.subr.bf16.mxu0 %v4031_v7  ;;  %4218 = vmatprep.subr.bf16.mxu1 %v4033_v63 }
 0x92e   : > { %4137 = vmatpush1.bf16.msra.mxu0 %v4030_v13  ;;  %4219 = vmatpush1.bf16.msra.mxu1 %v4032_v14 }
 0x92f   : > { %4138 = vmatprep.subr.bf16.mxu0 %v4035_v15  ;;  %4220 = vmatprep.subr.bf16.mxu1 %v4037_v16 }
 0x932   : > { %4139 = vmatpush1.bf16.msra.mxu0 %v4034_v18  ;;  %4221 = vmatpush1.bf16.msra.mxu1 %v4036_v19 }
 0x933   : > { %4140 = vmatprep.subr.bf16.mxu0 %v4039_v21  ;;  %4222 = vmatprep.subr.bf16.mxu1 %v4041_v22  ;;  %v6316_v21 = vld [vmem:[%s7216_s10 + $0x1100] sm:$0xff]  ;;  %v6318_v22 = vld [vmem:[%s7216_s10 + $0x1110] sm:$0xff] }
 0x934   : > { %v4050_v59 = vunpack.c.l.s8.bf16 %v6316_v21 }
 0x936   : > { %4141 = vmatpush1.bf16.msra.mxu0 %v4038_v25  ;;  %4223 = vmatpush1.bf16.msra.mxu1 %v4040_v26 }
 0x937   : > { %4142 = vmatprep.subr.bf16.mxu0 %v4043_v30  ;;  %4224 = vmatprep.subr.bf16.mxu1 %v4045_v29  ;;  %v4052_v30 = vunpack.c.l.s8.bf16 %v6318_v22 }
 0x93a   : > { %4143 = vmatpush1.bf16.msra.mxu0 %v4042_v50  ;;  %4225 = vmatpush1.bf16.msra.mxu1 %v4044_v33  ;;  %v4054_v50 = vunpack.c.h.s8.bf16 %v6316_v21  ;;  %v4056_v33 = vunpack.c.h.s8.bf16 %v6318_v22 }
 0x93b   : > { %4144 = vmatprep.subr.bf16.mxu0 %v4047_v34  ;;  %4226 = vmatprep.subr.bf16.mxu1 %v4049_v35  ;;  %v4059_v34 = vunpack.c.l.s8.bf16 %v6321_v28  ;;  %v4061_v35 = vunpack.c.l.s8.bf16 %v6323_v32 }
 0x93e   : > { %4145 = vmatpush1.bf16.msra.mxu0 %v4046_v38  ;;  %4227 = vmatpush1.bf16.msra.mxu1 %v4048_v45  ;;  %v6320_v38 = vld [vmem:[%s7216_s10 + $0x1120] sm:$0xff]  ;;  %v6322_v45 = vld [vmem:[%s7216_s10 + $0x1130] sm:$0xff] }
 0x93f   : > { %4155 = vmatprep.subr.bf16.mxu0 %v4051_v31  ;;  %4237 = vmatprep.subr.bf16.mxu1 %v4053_v47  ;;  %v4063_v31 = vunpack.c.h.s8.bf16 %v6321_v28  ;;  %v4065_v47 = vunpack.c.h.s8.bf16 %v6323_v32  ;;  %v6336_v28 = vld [vmem:[%s7216_s10 + $0x11a0] sm:$0xff]  ;;  %v6338_v32 = vld [vmem:[%s7216_s10 + $0x11b0] sm:$0xff] }
 0x9d4   : > { %v3754_v24 = vpop.f32.mrb[28].mxu0  ;;  %v3836_v58 = vpop.f32.mrb[28].mxu1 }
 0x9d5   : > { %v3866_v62 = vmul.f32 %v3849_v53, %v3754_v24  ;;  %v3868_v11 = vmul.f32 %v3857_v20, %v3836_v58  ;;  %v3756_v0 = vpop.f32.mrb[29].mxu0  ;;  %v3838_v46 = vpop.f32.mrb[29].mxu1  ;;  %v4062_v53 = vunpack.c.h.s8.bf16 %v6320_v38  ;;  %v4064_v20 = vunpack.c.h.s8.bf16 %v6322_v45 }
 0x9d6   : > { %v3867_v2 = vmul.f32 %v3853_v23, %v3756_v0  ;;  %v3869_v3 = vmul.f32 %v3861_v56, %v3838_v46  ;;  %v3758_v6 = vpop.f32.mrb[30].mxu0  ;;  %v3840_v8 = vpop.f32.mrb[30].mxu1  ;;  %v4067_v23 = vunpack.c.l.s8.bf16 %v6325_v51  ;;  %v4069_v56 = vunpack.c.l.s8.bf16 %v6327_v52 }
 0x9d7   : > { %v3893_v9 = vadd.f32 %v3876_v54, %v3866_v62  ;;  %v8092_v10 = vadd.f32 %v3884_v57, %v3868_v11  ;;  %v3759_v44 = vpop.f32.mrb[31].mxu0  ;;  %v3841_v48 = vpop.f32.mrb[31].mxu1  ;;  %v6324_v54 = vld [vmem:[%s7216_s10 + $0x1140] sm:$0xff]  ;;  %v6326_v57 = vld [vmem:[%s7216_s10 + $0x1150] sm:$0xff]  ;;  %v6329_v62 = vld [vmem:[%s7216_s10 + $0x1168] sm:$0xff] }
 0x9d8   : > { %v3894_v7 = vadd.f32 %v3880_v60, %v3867_v2  ;;  %v3896_v63 = vadd.f32 %v3888_v61, %v3869_v3  ;;  %v4066_v24 = vunpack.c.l.s8.bf16 %v6324_v54  ;;  %v4068_v58 = vunpack.c.l.s8.bf16 %v6326_v57  ;;  %v6331_v11 = vld [vmem:[%s7216_s10 + $0x1178] sm:$0xff]  ;;  %v6328_v6 = vld [vmem:[%s7216_s10 + $0x1160] sm:$0xff]  ;;  %v6330_v8 = vld [vmem:[%s7216_s10 + $0x1170] sm:$0xff] }
 0x9d9   : > { %vm3897_vm13 = vcmp.ge.f32.partialorder %v3893_v9, 0.0  ;;  %v3901_v12 = vmul.f32 0.2, %v3893_v9  ;;  %v4071_v60 = vunpack.c.h.s8.bf16 %v6325_v51  ;;  %v4073_v61 = vunpack.c.h.s8.bf16 %v6327_v52  ;;  %v6342_v51 = vld [vmem:[%s7216_s10 + $0x11d0] sm:$0xff] }
 0x9da   : > { %vm3898_vm14 = vcmp.ge.f32.partialorder %v3894_v7, 0.0  ;;  %v3902_v49 = vmul.f32 0.2, %v3894_v7  ;;  %vm3900_vm15 = vcmp.ge.f32.partialorder %v3896_v63, 0.0  ;;  %v3904_v13 = vmul.f32 0.2, %v3896_v63 }
 0x9db   : > { %v3905_v14 = vsel %vm3897_vm13, %v3893_v9, %v3901_v12  ;;  %v4070_v0 = vunpack.c.h.s8.bf16 %v6324_v54  ;;  %v4072_v46 = vunpack.c.h.s8.bf16 %v6326_v57  ;;  %v4075_v2 = vunpack.c.l.s8.bf16 %v6329_v62  ;;  %v6335_v12 = vld [vmem:[%s7216_s10 + $0x1198] sm:$0xff]  ;;  %v6345_v54 = vld [vmem:[%s7216_s10 + $0x11e8] sm:$0xff] }
 0x9dc   : > { %v3909_v15 = vmul.f32 1.4142135, %v3905_v14  ;;  %v3906_v16 = vsel %vm3898_vm14, %v3894_v7, %v3902_v49  ;;  %v3908_v17 = vsel %vm3900_vm15, %v3896_v63, %v3904_v13  ;;  %v4077_v3 = vunpack.c.l.s8.bf16 %v6331_v11  ;;  %v6333_v63 = vld [vmem:[%s7216_s10 + $0x1188] sm:$0xff]  ;;  %v6347_v57 = vld [vmem:[%s7216_s10 + $0x11f8] sm:$0xff] }
 0x9dd   : > { %v3910_v55 = vmul.f32 1.4142135, %v3906_v16  ;;  %v3912_v18 = vmul.f32 1.4142135, %v3908_v17  ;;  %v4074_v9 = vunpack.c.l.s8.bf16 %v6328_v6  ;;  %v4076_v44 = vunpack.c.l.s8.bf16 %v6330_v8  ;;  %v6332_v16 = vld [vmem:[%s7216_s10 + $0x1180] sm:$0xff]  ;;  %v6334_v17 = vld [vmem:[%s7216_s10 + $0x1190] sm:$0xff] }
 0x9de   : > { %v8095_v19 = vadd.f32 %v3909_v15, %v7901_v1  ;;  %v4055_v1 = vunpack.c.h.s8.bf16 %v8075_v42  ;;  %v4058_v42 = vunpack.c.l.s8.bf16 %v6320_v38  ;;  %v4079_v48 = vunpack.c.h.s8.bf16 %v6329_v62  ;;  %v6343_v38 = vld [vmem:[%s7216_s10 + $0x11d8] sm:$0xff]  ;;  %v6344_v62 = vld [vmem:[%s7216_s10 + $0x11e0] sm:$0xff] }
 0x9df   : > { %v8100_v25 = vadd.f32 %v3910_v55, %v7906_v4  ;;  %v8103_v26 = vadd.f32 %v3912_v18, %v7909_v5  ;;  %v4057_v4 = vunpack.c.h.s8.bf16 %v8078_v43  ;;  %v4060_v43 = vunpack.c.l.s8.bf16 %v6322_v45 }
 0x9e0   : > { %v3917_v29 = vpack.c.bf16 %v8095_v19, %v8095_v19  ;;  %v4081_v7 = vunpack.c.h.s8.bf16 %v6331_v11  ;;  %v4078_v49 = vunpack.c.h.s8.bf16 %v6328_v6  ;;  %v4080_v13 = vunpack.c.h.s8.bf16 %v6330_v8  ;;  %v6346_v11 = vld [vmem:[%s7216_s10 + $0x11f0] sm:$0xff] }
 0x9e1   : > { %v3918_v27 = vpack.c.bf16 %v8100_v25, %v8100_v25  ;;  %v3920_v5 = vpack.c.bf16 %v8103_v26, %v8103_v26  ;;  %v4083_v14 = vunpack.c.l.s8.bf16 %v6333_v63  ;;  %v4085_v15 = vunpack.c.l.s8.bf16 %v6335_v12 }
 0x9e2   : > { %v4082_v55 = vunpack.c.l.s8.bf16 %v6332_v16  ;;  %v4084_v18 = vunpack.c.l.s8.bf16 %v6334_v17  ;;  %v4087_v21 = vunpack.c.h.s8.bf16 %v6333_v63  ;;  %v4089_v22 = vunpack.c.h.s8.bf16 %v6335_v12 }
 0x9e3   : > { %4146 = vmatprep.mubr.bf16.mxu0 %v3918_v27  ;;  %4228 = vmatprep.mubr.bf16.mxu1 %v3918_v27  ;;  %v6337_v27 = vld [vmem:[%s7216_s10 + $0x11a8] sm:$0xff]  ;;  %v4094_v45 = vunpack.c.h.s8.bf16 %v6336_v28  ;;  %vm3899_vm0 = vcmp.ge.f32.partialorder %v8092_v10, 0.0  ;;  %v4111_v6 = vunpack.c.h.s8.bf16 %v6345_v54  ;;  %v4113_v8 = vunpack.c.h.s8.bf16 %v6347_v57 }
 0x9e4   : > { %4147 = vmatmul.mubr.bf16.vlgmr.msra.gmra.mrb[32].mxu0 %v3917_v29  ;;  %4229 = vmatmul.mubr.bf16.vlgmr.msra.gmra.mrb[32].mxu1 %v3917_v29  ;;  %v4088_v29 = vunpack.c.h.s8.bf16 %v6334_v17 }
 0x9e5   : > { %4156 = vmatpush1.bf16.msra.mxu0 %v4050_v59  ;;  %4238 = vmatpush1.bf16.msra.mxu1 %v4052_v30  ;;  %v6339_v59 = vld [vmem:[%s7216_s10 + $0x11b8] sm:$0xff]  ;;  %v4086_v30 = vunpack.c.h.s8.bf16 %v6332_v16 }
 0x9e6   : > { %4187 = vmatprep.mubr.bf16.mxu0 %v3920_v5  ;;  %4269 = vmatprep.mubr.bf16.mxu1 %v3920_v5  ;;  %v4090_v5 = vunpack.c.l.s8.bf16 %v6336_v28 }
 0x9e7   : > { %4157 = vmatprep.subr.bf16.mxu0 %v4055_v1  ;;  %4239 = vmatprep.subr.bf16.mxu1 %v4057_v4  ;;  %v4091_v1 = vunpack.c.l.s8.bf16 %v6337_v27  ;;  %v4093_v4 = vunpack.c.l.s8.bf16 %v6339_v59 }
 0x9e9   : > { %4158 = vmatpush1.bf16.msra.mxu0 %v4054_v50  ;;  %4240 = vmatpush1.bf16.msra.mxu1 %v4056_v33  ;;  %v4092_v50 = vunpack.c.l.s8.bf16 %v6338_v32  ;;  %v4095_v33 = vunpack.c.h.s8.bf16 %v6337_v27 }
 0x9ea   : > { %4159 = vmatprep.subr.bf16.mxu0 %v4059_v34  ;;  %4241 = vmatprep.subr.bf16.mxu1 %v4061_v35  ;;  %v4097_v34 = vunpack.c.h.s8.bf16 %v6339_v59  ;;  %v6341_v35 = vld [vmem:[%s7216_s10 + $0x11c8] sm:$0xff] }
 0x9ed   : > { %4160 = vmatpush1.bf16.msra.mxu0 %v4058_v42  ;;  %4242 = vmatpush1.bf16.msra.mxu1 %v4060_v43  ;;  %v4096_v42 = vunpack.c.h.s8.bf16 %v6338_v32  ;;  %v4099_v43 = vunpack.c.l.s8.bf16 %v6341_v35 }
 0x9ee   : > { %4161 = vmatprep.subr.bf16.mxu0 %v4063_v31  ;;  %4243 = vmatprep.subr.bf16.mxu1 %v4065_v47  ;;  %v4101_v31 = vunpack.c.l.s8.bf16 %v6343_v38  ;;  %v6340_v47 = vld [vmem:[%s7216_s10 + $0x11c0] sm:$0xff] }
 0x9ef   : > { %v4098_v52 = vunpack.c.l.s8.bf16 %v6340_v47 }
 0x9f1   : > { %4162 = vmatpush1.bf16.msra.mxu0 %v4062_v53  ;;  %4244 = vmatpush1.bf16.msra.mxu1 %v4064_v20  ;;  %v4100_v53 = vunpack.c.l.s8.bf16 %v6342_v51  ;;  %v4103_v20 = vunpack.c.h.s8.bf16 %v6341_v35 }
 0x9f2   : > { %4163 = vmatprep.subr.bf16.mxu0 %v4067_v23  ;;  %4245 = vmatprep.subr.bf16.mxu1 %v4069_v56  ;;  %v4105_v23 = vunpack.c.h.s8.bf16 %v6343_v38  ;;  %v3903_v56 = vmul.f32 0.2, %v8092_v10 }
 0x9f5   : > { %4164 = vmatpush1.bf16.msra.mxu0 %v4066_v24  ;;  %4246 = vmatpush1.bf16.msra.mxu1 %v4068_v58  ;;  %v4102_v24 = vunpack.c.h.s8.bf16 %v6340_v47  ;;  %v4104_v58 = vunpack.c.h.s8.bf16 %v6342_v51 }
 0x9f6   : > { %4165 = vmatprep.subr.bf16.mxu0 %v4071_v60  ;;  %4247 = vmatprep.subr.bf16.mxu1 %v4073_v61  ;;  %v4107_v60 = vunpack.c.l.s8.bf16 %v6345_v54  ;;  %v4109_v61 = vunpack.c.l.s8.bf16 %v6347_v57  ;;  %v6362_v57 = vld [vmem:[%s7216_s10 + $0x1260] sm:$0xff] }
 0x9f9   : > { %4166 = vmatpush1.bf16.msra.mxu0 %v4070_v0  ;;  %4248 = vmatpush1.bf16.msra.mxu1 %v4072_v46  ;;  %v3907_v0 = vsel %vm3899_vm0, %v8092_v10, %v3903_v56  ;;  %v4106_v46 = vunpack.c.l.s8.bf16 %v6344_v62 }
 0x9fa   : > { %4167 = vmatprep.subr.bf16.mxu0 %v4075_v2  ;;  %4249 = vmatprep.subr.bf16.mxu1 %v4077_v3  ;;  %v4108_v2 = vunpack.c.l.s8.bf16 %v6346_v11  ;;  %v3911_v3 = vmul.f32 1.4142135, %v3907_v0  ;;  %v6369_v0 = vld [vmem:[%s7216_s10 + $0x1298] sm:$0xff] }
 0x9fc   : > { %v8147_v63 = vadd.f32 %v3911_v3, %v7953_v41 }
 0x9fd   : > { %4168 = vmatpush1.bf16.msra.mxu0 %v4074_v9  ;;  %4250 = vmatpush1.bf16.msra.mxu1 %v4076_v44  ;;  %v6351_v9 = vld [vmem:[%s7216_s10 + $0x1208] sm:$0xff]  ;;  %v6353_v44 = vld [vmem:[%s7216_s10 + $0x1218] sm:$0xff] }
 0x9fe   : > { %4169 = vmatprep.subr.bf16.mxu0 %v4079_v48  ;;  %4251 = vmatprep.subr.bf16.mxu1 %v4081_v7  ;;  %v4110_v48 = vunpack.c.h.s8.bf16 %v6344_v62  ;;  %v4112_v7 = vunpack.c.h.s8.bf16 %v6346_v11  ;;  %v4414_v10 = vunpack.c.l.s8.bf16 %v6351_v9  ;;  %v4416_v12 = vunpack.c.l.s8.bf16 %v6353_v44  ;;  %v6367_v11 = vld [vmem:[%s7216_s10 + $0x1288] sm:$0xff] }
 0x9ff   : > { %v3919_v16 = vpack.c.bf16 %v8147_v63, %v8147_v63  ;;  %v4418_v41 = vunpack.c.h.s8.bf16 %v6351_v9  ;;  %v4420_v17 = vunpack.c.h.s8.bf16 %v6353_v44  ;;  %v4446_v3 = vunpack.c.l.s8.bf16 %v6367_v11  ;;  %v6368_v9 = vld [vmem:[%s7216_s10 + $0x1290] sm:$0xff] }
 0xa01   : > { %4170 = vmatpush1.bf16.msra.mxu0 %v4078_v49  ;;  %4252 = vmatpush1.bf16.msra.mxu1 %v4080_v13  ;;  %v6350_v49 = vld [vmem:[%s7216_s10 + $0x1200] sm:$0xff]  ;;  %v6352_v13 = vld [vmem:[%s7216_s10 + $0x1210] sm:$0xff] }
 0xa02   : > { %4171 = vmatprep.subr.bf16.mxu0 %v4083_v14  ;;  %4253 = vmatprep.subr.bf16.mxu1 %v4085_v15  ;;  %v4413_v14 = vunpack.c.l.s8.bf16 %v6350_v49  ;;  %v4415_v15 = vunpack.c.l.s8.bf16 %v6352_v13 }
 0xa05   : > { %4172 = vmatpush1.bf16.msra.mxu0 %v4082_v55  ;;  %4254 = vmatpush1.bf16.msra.mxu1 %v4084_v18  ;;  %v6355_v55 = vld [vmem:[%s7216_s10 + $0x1228] sm:$0xff]  ;;  %v6357_v18 = vld [vmem:[%s7216_s10 + $0x1238] sm:$0xff] }
 0xa06   : > { %4173 = vmatprep.subr.bf16.mxu0 %v4087_v21  ;;  %4255 = vmatprep.subr.bf16.mxu1 %v4089_v22  ;;  %v4417_v21 = vunpack.c.h.s8.bf16 %v6350_v49  ;;  %v4419_v22 = vunpack.c.h.s8.bf16 %v6352_v13  ;;  %v4422_v27 = vunpack.c.l.s8.bf16 %v6355_v55  ;;  %v4424_v59 = vunpack.c.l.s8.bf16 %v6357_v18  ;;  %v6373_v49 = vld [vmem:[%s7216_s10 + $0x12b8] sm:$0xff] }
 0xa07   : > { %v4426_v28 = vunpack.c.h.s8.bf16 %v6355_v55  ;;  %v4428_v32 = vunpack.c.h.s8.bf16 %v6357_v18 }
 0xa09   : > { %4174 = vmatpush1.bf16.msra.mxu0 %v4086_v30  ;;  %4256 = vmatpush1.bf16.msra.mxu1 %v4088_v29  ;;  %v6354_v30 = vld [vmem:[%s7216_s10 + $0x1220] sm:$0xff]  ;;  %v6356_v29 = vld [vmem:[%s7216_s10 + $0x1230] sm:$0xff] }
 0xa0a   : > { %4175 = vmatprep.subr.bf16.mxu0 %v4091_v1  ;;  %4257 = vmatprep.subr.bf16.mxu1 %v4093_v4  ;;  %v4421_v1 = vunpack.c.l.s8.bf16 %v6354_v30  ;;  %v4423_v4 = vunpack.c.l.s8.bf16 %v6356_v29 }
 0xa0d   : > { %4176 = vmatpush1.bf16.msra.mxu0 %v4090_v5  ;;  %4258 = vmatpush1.bf16.msra.mxu1 %v4092_v50  ;;  %v6359_v5 = vld [vmem:[%s7216_s10 + $0x1248] sm:$0xff]  ;;  %v6361_v50 = vld [vmem:[%s7216_s10 + $0x1258] sm:$0xff] }
 0xa0e   : > { %4177 = vmatprep.subr.bf16.mxu0 %v4095_v33  ;;  %4259 = vmatprep.subr.bf16.mxu1 %v4097_v34  ;;  %v4425_v33 = vunpack.c.h.s8.bf16 %v6354_v30  ;;  %v4427_v34 = vunpack.c.h.s8.bf16 %v6356_v29  ;;  %v4430_v35 = vunpack.c.l.s8.bf16 %v6359_v5  ;;  %v4432_v38 = vunpack.c.l.s8.bf16 %v6361_v50 }
 0xa0f   : > { %v4434_v47 = vunpack.c.h.s8.bf16 %v6359_v5  ;;  %v4436_v51 = vunpack.c.h.s8.bf16 %v6361_v50 }
 0xa11   : > { %4178 = vmatpush1.bf16.msra.mxu0 %v4094_v45  ;;  %4260 = vmatpush1.bf16.msra.mxu1 %v4096_v42  ;;  %v6358_v45 = vld [vmem:[%s7216_s10 + $0x1240] sm:$0xff]  ;;  %v6360_v42 = vld [vmem:[%s7216_s10 + $0x1250] sm:$0xff] }
 0xa12   : > { %4179 = vmatprep.subr.bf16.mxu0 %v4099_v43  ;;  %4261 = vmatprep.subr.bf16.mxu1 %v4101_v31  ;;  %v4429_v43 = vunpack.c.l.s8.bf16 %v6358_v45  ;;  %v4431_v31 = vunpack.c.l.s8.bf16 %v6360_v42 }
 0xa15   : > { %4180 = vmatpush1.bf16.msra.mxu0 %v4098_v52  ;;  %4262 = vmatpush1.bf16.msra.mxu1 %v4100_v53  ;;  %v6363_v52 = vld [vmem:[%s7216_s10 + $0x1268] sm:$0xff]  ;;  %v6365_v53 = vld [vmem:[%s7216_s10 + $0x1278] sm:$0xff] }
 0xa16   : > { %4181 = vmatprep.subr.bf16.mxu0 %v4103_v20  ;;  %4263 = vmatprep.subr.bf16.mxu1 %v4105_v23  ;;  %v4433_v20 = vunpack.c.h.s8.bf16 %v6358_v45  ;;  %v4435_v23 = vunpack.c.h.s8.bf16 %v6360_v42  ;;  %v4438_v56 = vunpack.c.l.s8.bf16 %v6363_v52  ;;  %v4440_v54 = vunpack.c.l.s8.bf16 %v6365_v53  ;;  %v6379_v45 = vld [vmem:[%s7216_s10 + $0x12e8] sm:$0xff]  ;;  %v6381_v42 = vld [vmem:[%s7216_s10 + $0x12f8] sm:$0xff] }
 0xa17   : > { %v4444_v62 = vunpack.c.h.s8.bf16 %v6365_v53 }
 0xa19   : > { %4182 = vmatpush1.bf16.msra.mxu0 %v4102_v24  ;;  %4264 = vmatpush1.bf16.msra.mxu1 %v4104_v58  ;;  %v6364_v24 = vld [vmem:[%s7216_s10 + $0x1270] sm:$0xff]  ;;  %v4437_v58 = vunpack.c.l.s8.bf16 %v6362_v57 }
 0xa1a   : > { %4183 = vmatprep.subr.bf16.mxu0 %v4107_v60  ;;  %4265 = vmatprep.subr.bf16.mxu1 %v4109_v61  ;;  %v4439_v60 = vunpack.c.l.s8.bf16 %v6364_v24  ;;  %v4442_v61 = vunpack.c.h.s8.bf16 %v6363_v52 }
 0xa1d   : > { %4184 = vmatpush1.bf16.msra.mxu0 %v4106_v46  ;;  %4266 = vmatpush1.bf16.msra.mxu1 %v4108_v2  ;;  %v4441_v46 = vunpack.c.h.s8.bf16 %v6362_v57  ;;  %v4443_v2 = vunpack.c.h.s8.bf16 %v6364_v24  ;;  %v8182_v57 = vld [vmem:[%s7216_s10 + $0x1308] sm:$0xff]  ;;  %v8185_v24 = vld [vmem:[%s7216_s10 + $0x1318] sm:$0xff] }
 0xa1e   : > { %4185 = vmatprep.subr.bf16.mxu0 %v4111_v6  ;;  %4267 = vmatprep.subr.bf16.mxu1 %v4113_v8  ;;  %v4448_v6 = vunpack.c.l.s8.bf16 %v6369_v0  ;;  %v6366_v8 = vld [vmem:[%s7216_s10 + $0x1280] sm:$0xff] }
 0xa1f   : > { %v4445_v44 = vunpack.c.l.s8.bf16 %v6366_v8  ;;  %v4449_v13 = vunpack.c.h.s8.bf16 %v6366_v8 }
 0xa21   : > { %4186 = vmatpush1.bf16.msra.mxu0 %v4110_v48  ;;  %4268 = vmatpush1.bf16.msra.mxu1 %v4112_v7  ;;  %v4447_v48 = vunpack.c.l.s8.bf16 %v6368_v9  ;;  %v4450_v7 = vunpack.c.h.s8.bf16 %v6367_v11 }
 0xa22   : > { %4541 = vmatprep.subr.bf16.mxu0 %v4414_v10  ;;  %4623 = vmatprep.subr.bf16.mxu1 %v4416_v12  ;;  %v4452_v10 = vunpack.c.h.s8.bf16 %v6369_v0  ;;  %v6371_v12 = vld [vmem:[%s7216_s10 + $0x12a8] sm:$0xff] }
 0xa24   : > { %4188 = vmatmul.mubr.bf16.vlgmr.msra.gmra.mrb[32].mxu0 %v3919_v16  ;;  %4270 = vmatmul.mubr.bf16.vlgmr.msra.gmra.mrb[32].mxu1 %v3919_v16  ;;  %v4456_v16 = vunpack.c.l.s8.bf16 %v6373_v49 }
 0xa25   : > { %4542 = vmatpush1.bf16.msra.mxu0 %v4413_v14  ;;  %4624 = vmatpush1.bf16.msra.mxu1 %v4415_v15  ;;  %v4451_v14 = vunpack.c.h.s8.bf16 %v6368_v9  ;;  %v4454_v15 = vunpack.c.l.s8.bf16 %v6371_v12 }
 0xa26   : > { %4543 = vmatprep.subr.bf16.mxu0 %v4418_v41  ;;  %4625 = vmatprep.subr.bf16.mxu1 %v4420_v17  ;;  %v6370_v41 = vld [vmem:[%s7216_s10 + $0x12a0] sm:$0xff]  ;;  %v6372_v17 = vld [vmem:[%s7216_s10 + $0x12b0] sm:$0xff] }
 0xa27   : > { %v4453_v55 = vunpack.c.l.s8.bf16 %v6370_v41  ;;  %v4455_v18 = vunpack.c.l.s8.bf16 %v6372_v17  ;;  %v4457_v30 = vunpack.c.h.s8.bf16 %v6370_v41  ;;  %v4459_v29 = vunpack.c.h.s8.bf16 %v6372_v17 }
 0xa29   : > { %4544 = vmatpush1.bf16.msra.mxu0 %v4417_v21  ;;  %4626 = vmatpush1.bf16.msra.mxu1 %v4419_v22  ;;  %v4458_v21 = vunpack.c.h.s8.bf16 %v6371_v12  ;;  %v4460_v22 = vunpack.c.h.s8.bf16 %v6373_v49 }
 0xa2a   : > { %4545 = vmatprep.subr.bf16.mxu0 %v4422_v27  ;;  %4627 = vmatprep.subr.bf16.mxu1 %v4424_v59  ;;  %v6375_v27 = vld [vmem:[%s7216_s10 + $0x12c8] sm:$0xff]  ;;  %v6377_v59 = vld [vmem:[%s7216_s10 + $0x12d8] sm:$0xff] }
 0xa2d   : > { %4546 = vmatpush1.bf16.msra.mxu0 %v4421_v1  ;;  %4628 = vmatpush1.bf16.msra.mxu1 %v4423_v4  ;;  %v4462_v1 = vunpack.c.l.s8.bf16 %v6375_v27  ;;  %v4464_v4 = vunpack.c.l.s8.bf16 %v6377_v59 }
 0xa2e   : > { %4547 = vmatprep.subr.bf16.mxu0 %v4426_v28  ;;  %4629 = vmatprep.subr.bf16.mxu1 %v4428_v32  ;;  %v6374_v28 = vld [vmem:[%s7216_s10 + $0x12c0] sm:$0xff]  ;;  %v6376_v32 = vld [vmem:[%s7216_s10 + $0x12d0] sm:$0xff] }
 0xa2f   : > { %v4461_v5 = vunpack.c.l.s8.bf16 %v6374_v28  ;;  %v4463_v50 = vunpack.c.l.s8.bf16 %v6376_v32 }
 0xa31   : > { %4548 = vmatpush1.bf16.msra.mxu0 %v4425_v33  ;;  %4630 = vmatpush1.bf16.msra.mxu1 %v4427_v34  ;;  %v4466_v33 = vunpack.c.h.s8.bf16 %v6375_v27  ;;  %v4468_v34 = vunpack.c.h.s8.bf16 %v6377_v59  ;;  %v6382_v59 = vld [vmem:[%s7216_s10 + $0x1300] sm:$0xff] }
 0xa32   : > { %4549 = vmatprep.subr.bf16.mxu0 %v4430_v35  ;;  %4631 = vmatprep.subr.bf16.mxu1 %v4432_v38  ;;  %v4465_v35 = vunpack.c.h.s8.bf16 %v6374_v28  ;;  %v4467_v38 = vunpack.c.h.s8.bf16 %v6376_v32 }
 0xa35   : > { %4550 = vmatpush1.bf16.msra.mxu0 %v4429_v43  ;;  %4632 = vmatpush1.bf16.msra.mxu1 %v4431_v31  ;;  %v4470_v43 = vunpack.c.l.s8.bf16 %v6379_v45  ;;  %v4472_v31 = vunpack.c.l.s8.bf16 %v6381_v42 }
 0xa36   : > { %4551 = vmatprep.subr.bf16.mxu0 %v4434_v47  ;;  %4633 = vmatprep.subr.bf16.mxu1 %v4436_v51  ;;  %v6378_v47 = vld [vmem:[%s7216_s10 + $0x12e0] sm:$0xff]  ;;  %v6380_v51 = vld [vmem:[%s7216_s10 + $0x12f0] sm:$0xff] }
 0xa37   : > { %v4469_v52 = vunpack.c.l.s8.bf16 %v6378_v47  ;;  %v4471_v53 = vunpack.c.l.s8.bf16 %v6380_v51 }
 0xa39   : > { %4552 = vmatpush1.bf16.msra.mxu0 %v4433_v20  ;;  %4634 = vmatpush1.bf16.msra.mxu1 %v4435_v23  ;;  %v4474_v20 = vunpack.c.h.s8.bf16 %v6379_v45  ;;  %v4476_v23 = vunpack.c.h.s8.bf16 %v6381_v42  ;;  %v6387_v45 = vld [vmem:[%s7216_s10 + $0x1328] sm:$0xff]  ;;  %v6389_v42 = vld [vmem:[%s7216_s10 + $0x1338] sm:$0xff] }
 0xa3a   : > { %4553 = vmatprep.subr.bf16.mxu0 %v4438_v56  ;;  %4635 = vmatprep.subr.bf16.mxu1 %v4440_v54  ;;  %v4473_v56 = vunpack.c.h.s8.bf16 %v6378_v47  ;;  %v4475_v54 = vunpack.c.h.s8.bf16 %v6380_v51  ;;  %v4486_v51 = vunpack.c.l.s8.bf16 %v6387_v45 }
 0xa3d   : > { %4554 = vmatpush1.bf16.msra.mxu0 %v4437_v58  ;;  %4636 = vmatpush1.bf16.msra.mxu1 %v4439_v60  ;;  %v4478_v58 = vunpack.c.l.s8.bf16 %v8182_v57  ;;  %v4480_v60 = vunpack.c.l.s8.bf16 %v8185_v24 }
 0xa3e   : > { %4555 = vmatprep.subr.bf16.mxu0 %v4442_v61  ;;  %4637 = vmatprep.subr.bf16.mxu1 %v4444_v62  ;;  %v6348_v61 = vld [vmem:[%s7223_s1 + $0x20] sm:$0xf] }
 0xa3f   : > { %v6349_v62 = vld [vmem:[%s7226_s6 + $0x20] sm:$0xf]  ;;  %v4284_v11 = vrot.slane %v6348_v61, %v7405_v36  ;;  %v4292_v0 = vrot.slane %v6348_v61, %v7407_v37 }
 0xa41   : > { %4556 = vmatpush1.bf16.msra.mxu0 %v4441_v46  ;;  %4638 = vmatpush1.bf16.msra.mxu1 %v4443_v2  ;;  %v4288_v46 = vrot.slane %v6348_v61, %v7410_v39  ;;  %v4296_v2 = vrot.slane %v6348_v61, %v7412_v40 }
 0xa42   : > { %4557 = vmatprep.subr.bf16.mxu0 %v4446_v3  ;;  %4639 = vmatprep.subr.bf16.mxu1 %v4448_v6  ;;  %v4311_v3 = vrot.slane %v6349_v62, %v7405_v36  ;;  %v4319_v6 = vrot.slane %v6349_v62, %v7407_v37 }
 0xa45   : > { %4558 = vmatpush1.bf16.msra.mxu0 %v4445_v44  ;;  %4640 = vmatpush1.bf16.msra.mxu1 %v4447_v48  ;;  %v4315_v44 = vrot.slane %v6349_v62, %v7410_v39  ;;  %v4323_v48 = vrot.slane %v6349_v62, %v7412_v40 }
 0xa46   : > { %4559 = vmatprep.subr.bf16.mxu0 %v4450_v7  ;;  %4641 = vmatprep.subr.bf16.mxu1 %v4452_v10 }
 0xa49   : > { %4560 = vmatpush1.bf16.msra.mxu0 %v4449_v13  ;;  %4642 = vmatpush1.bf16.msra.mxu1 %v4451_v14 }
 0xa4a   : > { %4561 = vmatprep.subr.bf16.mxu0 %v4454_v15  ;;  %4643 = vmatprep.subr.bf16.mxu1 %v4456_v16 }
 0xa4d   : > { %4562 = vmatpush1.bf16.msra.mxu0 %v4453_v55  ;;  %4644 = vmatpush1.bf16.msra.mxu1 %v4455_v18 }
 0xa4e   : > { %4563 = vmatprep.subr.bf16.mxu0 %v4458_v21  ;;  %4645 = vmatprep.subr.bf16.mxu1 %v4460_v22 }
 0xa51   : > { %4564 = vmatpush1.bf16.msra.mxu0 %v4457_v30  ;;  %4646 = vmatpush1.bf16.msra.mxu1 %v4459_v29  ;;  %v6384_v30 = vld [vmem:[%s7216_s10 + $0x1310] sm:$0xff] }
 0xa52   : > { %4565 = vmatprep.subr.bf16.mxu0 %v4462_v1  ;;  %4647 = vmatprep.subr.bf16.mxu1 %v4464_v4  ;;  %v4483_v47 = vunpack.c.h.s8.bf16 %v6384_v30 }
 0xa55   : > { %4566 = vmatpush1.bf16.msra.mxu0 %v4461_v5  ;;  %4648 = vmatpush1.bf16.msra.mxu1 %v4463_v50  ;;  %v4477_v5 = vunpack.c.l.s8.bf16 %v6382_v59  ;;  %v4479_v50 = vunpack.c.l.s8.bf16 %v6384_v30  ;;  %v6398_v30 = vld [vmem:[%s7216_s10 + $0x1380] sm:$0xff] }
 0xa56   : > { %4567 = vmatprep.subr.bf16.mxu0 %v4466_v33  ;;  %4649 = vmatprep.subr.bf16.mxu1 %v4468_v34 }
 0xa59   : > { %4568 = vmatpush1.bf16.msra.mxu0 %v4465_v35  ;;  %4650 = vmatpush1.bf16.msra.mxu1 %v4467_v38  ;;  %v4482_v35 = vunpack.c.h.s8.bf16 %v8182_v57  ;;  %v4484_v38 = vunpack.c.h.s8.bf16 %v8185_v24  ;;  %v4492_v57 = vunpack.c.h.s8.bf16 %v6389_v42  ;;  %v6391_v24 = vld [vmem:[%s7216_s10 + $0x1348] sm:$0xff] }
 0xa5a   : > { %4569 = vmatprep.subr.bf16.mxu0 %v4470_v43  ;;  %4651 = vmatprep.subr.bf16.mxu1 %v4472_v31  ;;  %v4481_v31 = vunpack.c.h.s8.bf16 %v6382_v59  ;;  %v4494_v62 = vunpack.c.l.s8.bf16 %v6391_v24 }
 0xa5d   : > { %4570 = vmatpush1.bf16.msra.mxu0 %v4469_v52  ;;  %4652 = vmatpush1.bf16.msra.mxu1 %v4471_v53  ;;  %v4488_v52 = vunpack.c.l.s8.bf16 %v6389_v42  ;;  %v6386_v53 = vld [vmem:[%s7216_s10 + $0x1320] sm:$0xff]  ;;  %v6404_v42 = vld [vmem:[%s7216_s10 + $0x13b0] sm:$0xff] }
 0xa5e   : > { %4571 = vmatprep.subr.bf16.mxu0 %v4474_v20  ;;  %4653 = vmatprep.subr.bf16.mxu1 %v4476_v23  ;;  %v6388_v20 = vld [vmem:[%s7216_s10 + $0x1330] sm:$0xff]  ;;  %v4485_v23 = vunpack.c.l.s8.bf16 %v6386_v53 }
 0xa5f   : > { %v4491_v61 = vunpack.c.h.s8.bf16 %v6388_v20 }
 0xa61   : > { %4572 = vmatpush1.bf16.msra.mxu0 %v4473_v56  ;;  %4654 = vmatpush1.bf16.msra.mxu1 %v4475_v54  ;;  %v4487_v56 = vunpack.c.l.s8.bf16 %v6388_v20  ;;  %v4490_v54 = vunpack.c.h.s8.bf16 %v6387_v45  ;;  %v6402_v45 = vld [vmem:[%s7216_s10 + $0x13a0] sm:$0xff] }
 0xa62   : > { %4582 = vmatprep.subr.bf16.mxu0 %v4478_v58  ;;  %4664 = vmatprep.subr.bf16.mxu1 %v4480_v60  ;;  %v6393_v58 = vld [vmem:[%s7216_s10 + $0x1358] sm:$0xff]  ;;  %v4489_v60 = vunpack.c.h.s8.bf16 %v6386_v53  ;;  %v4521_v20 = vunpack.c.h.s8.bf16 %v6402_v45 }
 0xa63   : > { %v6409_v53 = vld [vmem:[%s7216_s10 + $0x13d8] sm:$0xff] }
 0xaf7   : > { %v4189_v8 = vpop.f32.mrb[32].mxu0  ;;  %v4271_v9 = vpop.f32.mrb[32].mxu1 }
 0xaf8   : > { %v4301_v7 = vmul.f32 %v4284_v11, %v4189_v8  ;;  %v4303_v10 = vmul.f32 %v4292_v0, %v4271_v9  ;;  %v4191_v12 = vpop.f32.mrb[33].mxu0  ;;  %v4273_v49 = vpop.f32.mrb[33].mxu1  ;;  %v4496_v11 = vunpack.c.l.s8.bf16 %v6393_v58  ;;  %v6390_v0 = vld [vmem:[%s7216_s10 + $0x1340] sm:$0xff]  ;;  %v4500_v8 = vunpack.c.h.s8.bf16 %v6393_v58  ;;  %v6395_v9 = vld [vmem:[%s7216_s10 + $0x1368] sm:$0xff] }
 0xaf9   : > { %v4302_v13 = vmul.f32 %v4288_v46, %v4191_v12  ;;  %v4304_v14 = vmul.f32 %v4296_v2, %v4273_v49  ;;  %v4193_v15 = vpop.f32.mrb[34].mxu0  ;;  %v4275_v16 = vpop.f32.mrb[34].mxu1  ;;  %v6392_v46 = vld [vmem:[%s7216_s10 + $0x1350] sm:$0xff]  ;;  %v4493_v2 = vunpack.c.l.s8.bf16 %v6390_v0  ;;  %v6394_v49 = vld [vmem:[%s7216_s10 + $0x1360] sm:$0xff] }
 0xafa   : > { %v4328_v41 = vadd.f32 %v4311_v3, %v4301_v7  ;;  %v8199_v17 = vadd.f32 %v4319_v6, %v4303_v10  ;;  %v4194_v55 = vpop.f32.mrb[35].mxu0  ;;  %v4276_v18 = vpop.f32.mrb[35].mxu1  ;;  %v4495_v3 = vunpack.c.l.s8.bf16 %v6392_v46  ;;  %v4498_v6 = vunpack.c.h.s8.bf16 %v6391_v24  ;;  %v6408_v24 = vld [vmem:[%s7216_s10 + $0x13d0] sm:$0xff] }
 0xafb   : > { %v4329_v21 = vadd.f32 %v4315_v44, %v4302_v13  ;;  %v4331_v22 = vadd.f32 %v4323_v48, %v4304_v14  ;;  %v6397_v44 = vld [vmem:[%s7216_s10 + $0x1378] sm:$0xff]  ;;  %v4497_v48 = vunpack.c.h.s8.bf16 %v6390_v0  ;;  %v4499_v7 = vunpack.c.h.s8.bf16 %v6392_v46  ;;  %v6396_v13 = vld [vmem:[%s7216_s10 + $0x1370] sm:$0xff]  ;;  %v6399_v55 = vld [vmem:[%s7216_s10 + $0x1388] sm:$0xff] }
 0xafc   : > { %vm4332_vm1 = vcmp.ge.f32.partialorder %v4328_v41, 0.0  ;;  %v4336_v27 = vmul.f32 0.2, %v4328_v41  ;;  %v4502_v10 = vunpack.c.l.s8.bf16 %v6395_v9  ;;  %v4504_v12 = vunpack.c.l.s8.bf16 %v6397_v44  ;;  %v6401_v18 = vld [vmem:[%s7216_s10 + $0x1398] sm:$0xff] }
 0xafd   : > { %v4337_v29 = vmul.f32 0.2, %v4329_v21  ;;  %v4339_v1 = vmul.f32 0.2, %v4331_v22  ;;  %vm4333_vm2 = vcmp.ge.f32.partialorder %v4329_v21, 0.0  ;;  %vm4335_vm3 = vcmp.ge.f32.partialorder %v4331_v22, 0.0 }
 0xafe   : > { %v4340_v4 = vsel %vm4332_vm1, %v4328_v41, %v4336_v27  ;;  %v4501_v14 = vunpack.c.l.s8.bf16 %v6394_v49  ;;  %v4503_v15 = vunpack.c.l.s8.bf16 %v6396_v13  ;;  %v4506_v16 = vunpack.c.h.s8.bf16 %v6395_v9  ;;  %v6413_v0 = vld [vmem:[%s7216_s10 + $0x13f8] sm:$0xff]  ;;  %v6412_v9 = vld [vmem:[%s7216_s10 + $0x13f0] sm:$0xff] }
 0xaff   : > { %v4341_v28 = vsel %vm4333_vm2, %v4329_v21, %v4337_v29  ;;  %v4343_v33 = vsel %vm4335_vm3, %v4331_v22, %v4339_v1  ;;  %v4344_v34 = vpack.c.bf16 %v4340_v4, %v4340_v4  ;;  %v4508_v41 = vunpack.c.h.s8.bf16 %v6397_v44  ;;  %v6400_v29 = vld [vmem:[%s7216_s10 + $0x1390] sm:$0xff] }
 0xb00   : > { %v4345_v32 = vpack.c.bf16 %v4341_v28, %v4341_v28  ;;  %v4347_v43 = vpack.c.bf16 %v4343_v33, %v4343_v33  ;;  %v4505_v21 = vunpack.c.h.s8.bf16 %v6394_v49  ;;  %v4507_v22 = vunpack.c.h.s8.bf16 %v6396_v13  ;;  %v6417_v49 = vld [vmem:[%s7216_s10 + $0x1408] sm:$0xff]  ;;  %v6419_v13 = vld [vmem:[%s7216_s10 + $0x1418] sm:$0xff] }
 0xb01   : > { %v4510_v27 = vunpack.c.l.s8.bf16 %v6399_v55  ;;  %v4512_v59 = vunpack.c.l.s8.bf16 %v6401_v18  ;;  %v4509_v1 = vunpack.c.l.s8.bf16 %v6398_v30  ;;  %v4511_v4 = vunpack.c.l.s8.bf16 %v6400_v29 }
 0xb02   : > { %4573 = vmatprep.mubr.bf16.mxu0 %v4345_v32  ;;  %4655 = vmatprep.mubr.bf16.mxu1 %v4345_v32  ;;  %v4514_v28 = vunpack.c.h.s8.bf16 %v6399_v55  ;;  %v4516_v32 = vunpack.c.h.s8.bf16 %v6401_v18  ;;  %v4513_v33 = vunpack.c.h.s8.bf16 %v6398_v30  ;;  %vm4334_vm4 = vcmp.ge.f32.partialorder %v8199_v17, 0.0  ;;  %v6416_v55 = vld [vmem:[%s7216_s10 + $0x1400] sm:$0xff]  ;;  %v6418_v18 = vld [vmem:[%s7216_s10 + $0x1410] sm:$0xff] }
 0xb03   : > { %4574 = vmatmul.mubr.bf16.vlgmr.msra.gmra.mrb[36].mxu0 %v4344_v34  ;;  %4656 = vmatmul.mubr.bf16.vlgmr.msra.gmra.mrb[36].mxu1 %v4344_v34  ;;  %v4515_v34 = vunpack.c.h.s8.bf16 %v6400_v29  ;;  %v4853_v30 = vunpack.c.h.s8.bf16 %v6417_v49  ;;  %v4855_v29 = vunpack.c.h.s8.bf16 %v6419_v13 }
 0xb04   : > { %4583 = vmatpush1.bf16.msra.mxu0 %v4477_v5  ;;  %4665 = vmatpush1.bf16.msra.mxu1 %v4479_v50  ;;  %v6403_v5 = vld [vmem:[%s7216_s10 + $0x13a8] sm:$0xff]  ;;  %v6405_v50 = vld [vmem:[%s7216_s10 + $0x13b8] sm:$0xff] }
 0xb05   : > { %4614 = vmatprep.mubr.bf16.mxu0 %v4347_v43  ;;  %4696 = vmatprep.mubr.bf16.mxu1 %v4347_v43  ;;  %v4517_v43 = vunpack.c.l.s8.bf16 %v6402_v45 }
 0xb06   : > { %4584 = vmatprep.subr.bf16.mxu0 %v4482_v35  ;;  %4666 = vmatprep.subr.bf16.mxu1 %v4484_v38  ;;  %v4518_v35 = vunpack.c.l.s8.bf16 %v6403_v5  ;;  %v4520_v38 = vunpack.c.l.s8.bf16 %v6405_v50 }
 0xb08   : > { %4585 = vmatpush1.bf16.msra.mxu0 %v4481_v31  ;;  %4667 = vmatpush1.bf16.msra.mxu1 %v4483_v47  ;;  %v4519_v31 = vunpack.c.l.s8.bf16 %v6404_v42  ;;  %v4522_v47 = vunpack.c.h.s8.bf16 %v6403_v5 }
 0xb09   : > { %4586 = vmatprep.subr.bf16.mxu0 %v4486_v51  ;;  %4668 = vmatprep.subr.bf16.mxu1 %v4488_v52  ;;  %v4524_v51 = vunpack.c.h.s8.bf16 %v6405_v50  ;;  %v6407_v52 = vld [vmem:[%s7216_s10 + $0x13c8] sm:$0xff]  ;;  %v6420_v50 = vld [vmem:[%s7216_s10 + $0x1420] sm:$0xff] }
 0xb0c   : > { %4587 = vmatpush1.bf16.msra.mxu0 %v4485_v23  ;;  %4669 = vmatpush1.bf16.msra.mxu1 %v4487_v56  ;;  %v4523_v23 = vunpack.c.h.s8.bf16 %v6404_v42  ;;  %v4526_v56 = vunpack.c.l.s8.bf16 %v6407_v52  ;;  %v6425_v42 = vld [vmem:[%s7216_s10 + $0x1448] sm:$0xff] }
 0xb0d   : > { %4588 = vmatprep.subr.bf16.mxu0 %v4490_v54  ;;  %4670 = vmatprep.subr.bf16.mxu1 %v4492_v57  ;;  %v4528_v54 = vunpack.c.l.s8.bf16 %v6409_v53  ;;  %v6406_v57 = vld [vmem:[%s7216_s10 + $0x13c0] sm:$0xff] }
 0xb0e   : > { %v4525_v58 = vunpack.c.l.s8.bf16 %v6406_v57  ;;  %v4529_v46 = vunpack.c.h.s8.bf16 %v6406_v57 }
 0xb10   : > { %4589 = vmatpush1.bf16.msra.mxu0 %v4489_v60  ;;  %4671 = vmatpush1.bf16.msra.mxu1 %v4491_v61  ;;  %v4527_v60 = vunpack.c.l.s8.bf16 %v6408_v24  ;;  %v4530_v61 = vunpack.c.h.s8.bf16 %v6407_v52 }
 0xb11   : > { %4590 = vmatprep.subr.bf16.mxu0 %v4494_v62  ;;  %4672 = vmatprep.subr.bf16.mxu1 %v4496_v11  ;;  %v4532_v62 = vunpack.c.h.s8.bf16 %v6409_v53  ;;  %v6411_v11 = vld [vmem:[%s7216_s10 + $0x13e8] sm:$0xff]  ;;  %v6424_v53 = vld [vmem:[%s7216_s10 + $0x1440] sm:$0xff] }
 0xb14   : > { %4591 = vmatpush1.bf16.msra.mxu0 %v4493_v2  ;;  %4673 = vmatpush1.bf16.msra.mxu1 %v4495_v3  ;;  %v4531_v2 = vunpack.c.h.s8.bf16 %v6408_v24  ;;  %v4534_v3 = vunpack.c.l.s8.bf16 %v6411_v11  ;;  %v6429_v24 = vld [vmem:[%s7216_s10 + $0x1468] sm:$0xff] }
 0xb15   : > { %4592 = vmatprep.subr.bf16.mxu0 %v4498_v6  ;;  %4674 = vmatprep.subr.bf16.mxu1 %v4500_v8  ;;  %v4536_v6 = vunpack.c.l.s8.bf16 %v6413_v0  ;;  %v6410_v8 = vld [vmem:[%s7216_s10 + $0x13e0] sm:$0xff] }
 0xb16   : > { %v4533_v44 = vunpack.c.l.s8.bf16 %v6410_v8 }
 0xb18   : > { %4593 = vmatpush1.bf16.msra.mxu0 %v4497_v48  ;;  %4675 = vmatpush1.bf16.msra.mxu1 %v4499_v7  ;;  %v4535_v48 = vunpack.c.l.s8.bf16 %v6412_v9  ;;  %v4538_v7 = vunpack.c.h.s8.bf16 %v6411_v11 }
 0xb19   : > { %4594 = vmatprep.subr.bf16.mxu0 %v4502_v10  ;;  %4676 = vmatprep.subr.bf16.mxu1 %v4504_v12  ;;  %v4540_v10 = vunpack.c.h.s8.bf16 %v6413_v0  ;;  %v4338_v12 = vmul.f32 0.2, %v8199_v17  ;;  %v6428_v0 = vld [vmem:[%s7216_s10 + $0x1460] sm:$0xff] }
 0xb1c   : > { %4595 = vmatpush1.bf16.msra.mxu0 %v4501_v14  ;;  %4677 = vmatpush1.bf16.msra.mxu1 %v4503_v15  ;;  %v4537_v14 = vunpack.c.h.s8.bf16 %v6410_v8  ;;  %v4539_v15 = vunpack.c.h.s8.bf16 %v6412_v9  ;;  %v6433_v9 = vld [vmem:[%s7216_s10 + $0x1488] sm:$0xff] }
 0xb1d   : > { %4596 = vmatprep.subr.bf16.mxu0 %v4506_v16  ;;  %4678 = vmatprep.subr.bf16.mxu1 %v4508_v41  ;;  %v4849_v16 = vunpack.c.l.s8.bf16 %v6417_v49  ;;  %v4851_v41 = vunpack.c.l.s8.bf16 %v6419_v13  ;;  %v6432_v49 = vld [vmem:[%s7216_s10 + $0x1480] sm:$0xff]  ;;  %v6434_v13 = vld [vmem:[%s7216_s10 + $0x1490] sm:$0xff] }
 0xb20   : > { %4597 = vmatpush1.bf16.msra.mxu0 %v4505_v21  ;;  %4679 = vmatpush1.bf16.msra.mxu1 %v4507_v22  ;;  %v4342_v21 = vsel %vm4334_vm4, %v8199_v17, %v4338_v12  ;;  %v4848_v22 = vunpack.c.l.s8.bf16 %v6416_v55  ;;  %v4854_v17 = vunpack.c.h.s8.bf16 %v6418_v18 }
 0xb21   : > { %4598 = vmatprep.subr.bf16.mxu0 %v4510_v27  ;;  %4680 = vmatprep.subr.bf16.mxu1 %v4512_v59  ;;  %v4850_v27 = vunpack.c.l.s8.bf16 %v6418_v18  ;;  %v4346_v59 = vpack.c.bf16 %v4342_v21, %v4342_v21  ;;  %v6439_v18 = vld [vmem:[%s7216_s10 + $0x14b8] sm:$0xff]  ;;  %v4884_v21 = vunpack.c.h.s8.bf16 %v6432_v49 }
 0xb24   : > { %4599 = vmatpush1.bf16.msra.mxu0 %v4509_v1  ;;  %4681 = vmatpush1.bf16.msra.mxu1 %v4511_v4  ;;  %v6421_v1 = vld [vmem:[%s7216_s10 + $0x1428] sm:$0xff]  ;;  %v6423_v4 = vld [vmem:[%s7216_s10 + $0x1438] sm:$0xff] }
 0xb25   : > { %4600 = vmatprep.subr.bf16.mxu0 %v4514_v28  ;;  %4682 = vmatprep.subr.bf16.mxu1 %v4516_v32  ;;  %v4852_v28 = vunpack.c.h.s8.bf16 %v6416_v55  ;;  %v4857_v32 = vunpack.c.l.s8.bf16 %v6421_v1  ;;  %v4859_v5 = vunpack.c.l.s8.bf16 %v6423_v4  ;;  %v4863_v45 = vunpack.c.h.s8.bf16 %v6423_v4  ;;  %v6437_v55 = vld [vmem:[%s7216_s10 + $0x14a8] sm:$0xff] }
 0xb28   : > { %4601 = vmatpush1.bf16.msra.mxu0 %v4513_v33  ;;  %4683 = vmatpush1.bf16.msra.mxu1 %v4515_v34  ;;  %v6422_v33 = vld [vmem:[%s7216_s10 + $0x1430] sm:$0xff]  ;;  %v4856_v34 = vunpack.c.l.s8.bf16 %v6420_v50 }
 0xb29   : > { %4602 = vmatprep.subr.bf16.mxu0 %v4518_v35  ;;  %4684 = vmatprep.subr.bf16.mxu1 %v4520_v38  ;;  %v4858_v35 = vunpack.c.l.s8.bf16 %v6422_v33  ;;  %v4861_v38 = vunpack.c.h.s8.bf16 %v6421_v1 }
 0xb2c   : > { %4603 = vmatpush1.bf16.msra.mxu0 %v4517_v43  ;;  %4685 = vmatpush1.bf16.msra.mxu1 %v4519_v31  ;;  %v6427_v43 = vld [vmem:[%s7216_s10 + $0x1458] sm:$0xff]  ;;  %v4860_v31 = vunpack.c.h.s8.bf16 %v6420_v50 }
 0xb2d   : > { %4604 = vmatprep.subr.bf16.mxu0 %v4522_v47  ;;  %4686 = vmatprep.subr.bf16.mxu1 %v4524_v51  ;;  %v4862_v47 = vunpack.c.h.s8.bf16 %v6422_v33  ;;  %v4865_v51 = vunpack.c.l.s8.bf16 %v6425_v42  ;;  %v4867_v52 = vunpack.c.l.s8.bf16 %v6427_v43  ;;  %v4871_v57 = vunpack.c.h.s8.bf16 %v6427_v43 }
 0xb30   : > { %4605 = vmatpush1.bf16.msra.mxu0 %v4521_v20  ;;  %4687 = vmatpush1.bf16.msra.mxu1 %v4523_v23  ;;  %v6426_v20 = vld [vmem:[%s7216_s10 + $0x1450] sm:$0xff]  ;;  %v4864_v23 = vunpack.c.l.s8.bf16 %v6424_v53 }
 0xb31   : > { %4606 = vmatprep.subr.bf16.mxu0 %v4526_v56  ;;  %4688 = vmatprep.subr.bf16.mxu1 %v4528_v54  ;;  %v4866_v56 = vunpack.c.l.s8.bf16 %v6426_v20  ;;  %v4869_v54 = vunpack.c.h.s8.bf16 %v6425_v42 }
 0xb34   : > { %4607 = vmatpush1.bf16.msra.mxu0 %v4525_v58  ;;  %4689 = vmatpush1.bf16.msra.mxu1 %v4527_v60  ;;  %v6431_v58 = vld [vmem:[%s7216_s10 + $0x1478] sm:$0xff]  ;;  %v4868_v60 = vunpack.c.h.s8.bf16 %v6424_v53  ;;  %v6445_v53 = vld [vmem:[%s7216_s10 + $0x14e8] sm:$0xff] }
 0xb35   : > { %4608 = vmatprep.subr.bf16.mxu0 %v4530_v61  ;;  %4690 = vmatprep.subr.bf16.mxu1 %v4532_v62  ;;  %v4870_v61 = vunpack.c.h.s8.bf16 %v6426_v20  ;;  %v4873_v62 = vunpack.c.l.s8.bf16 %v6429_v24  ;;  %v4875_v11 = vunpack.c.l.s8.bf16 %v6431_v58  ;;  %v4879_v8 = vunpack.c.h.s8.bf16 %v6431_v58  ;;  %v6447_v20 = vld [vmem:[%s7216_s10 + $0x14f8] sm:$0xff] }
 0xb38   : > { %4609 = vmatpush1.bf16.msra.mxu0 %v4529_v46  ;;  %4691 = vmatpush1.bf16.msra.mxu1 %v4531_v2  ;;  %v6430_v46 = vld [vmem:[%s7216_s10 + $0x1470] sm:$0xff]  ;;  %v4872_v2 = vunpack.c.l.s8.bf16 %v6428_v0 }
 0xb39   : > { %4610 = vmatprep.subr.bf16.mxu0 %v4534_v3  ;;  %4692 = vmatprep.subr.bf16.mxu1 %v4536_v6  ;;  %v4874_v3 = vunpack.c.l.s8.bf16 %v6430_v46  ;;  %v4877_v6 = vunpack.c.h.s8.bf16 %v6429_v24 }
 0xb3c   : > { %4611 = vmatpush1.bf16.msra.mxu0 %v4533_v44  ;;  %4693 = vmatpush1.bf16.msra.mxu1 %v4535_v48  ;;  %v6435_v44 = vld [vmem:[%s7216_s10 + $0x1498] sm:$0xff]  ;;  %v4876_v48 = vunpack.c.h.s8.bf16 %v6428_v0  ;;  %v8269_v0 = vld [vmem:[%s7216_s10 + $0x1508] sm:$0xff] }
 0xb3d   : > { %4612 = vmatprep.subr.bf16.mxu0 %v4538_v7  ;;  %4694 = vmatprep.subr.bf16.mxu1 %v4540_v10  ;;  %v4878_v7 = vunpack.c.h.s8.bf16 %v6430_v46  ;;  %v4881_v10 = vunpack.c.l.s8.bf16 %v6433_v9  ;;  %v4883_v12 = vunpack.c.l.s8.bf16 %v6435_v44  ;;  %v8272_v46 = vld [vmem:[%s7216_s10 + $0x1518] sm:$0xff] }
 0xb40   : > { %4613 = vmatpush1.bf16.msra.mxu0 %v4537_v14  ;;  %4695 = vmatpush1.bf16.msra.mxu1 %v4539_v15  ;;  %v4880_v14 = vunpack.c.l.s8.bf16 %v6432_v49  ;;  %v4882_v15 = vunpack.c.l.s8.bf16 %v6434_v13 }
 0xb41   : > { %4976 = vmatprep.subr.bf16.mxu0 %v4849_v16  ;;  %5058 = vmatprep.subr.bf16.mxu1 %v4851_v41  ;;  %v4885_v16 = vunpack.c.h.s8.bf16 %v6433_v9  ;;  %v4887_v41 = vunpack.c.h.s8.bf16 %v6435_v44 }
 0xb43   : > { %4615 = vmatmul.mubr.bf16.vlgmr.msra.gmra.mrb[36].mxu0 %v4346_v59  ;;  %4697 = vmatmul.mubr.bf16.vlgmr.msra.gmra.mrb[36].mxu1 %v4346_v59  ;;  %v4891_v59 = vunpack.c.l.s8.bf16 %v6439_v18 }
 0xb44   : > { %4977 = vmatpush1.bf16.msra.mxu0 %v4848_v22  ;;  %5059 = vmatpush1.bf16.msra.mxu1 %v4850_v27  ;;  %v4886_v22 = vunpack.c.h.s8.bf16 %v6434_v13  ;;  %v4889_v27 = vunpack.c.l.s8.bf16 %v6437_v55 }
 0xb45   : > { %4978 = vmatprep.subr.bf16.mxu0 %v4853_v30  ;;  %5060 = vmatprep.subr.bf16.mxu1 %v4855_v29  ;;  %v6436_v30 = vld [vmem:[%s7216_s10 + $0x14a0] sm:$0xff]  ;;  %v6438_v29 = vld [vmem:[%s7216_s10 + $0x14b0] sm:$0xff] }
 0xb46   : > { %v4888_v1 = vunpack.c.l.s8.bf16 %v6436_v30  ;;  %v4890_v4 = vunpack.c.l.s8.bf16 %v6438_v29  ;;  %v4892_v50 = vunpack.c.h.s8.bf16 %v6436_v30  ;;  %v4894_v33 = vunpack.c.h.s8.bf16 %v6438_v29 }
 0xb48   : > { %4979 = vmatpush1.bf16.msra.mxu0 %v4852_v28  ;;  %5061 = vmatpush1.bf16.msra.mxu1 %v4854_v17  ;;  %v4893_v28 = vunpack.c.h.s8.bf16 %v6437_v55  ;;  %v4895_v17 = vunpack.c.h.s8.bf16 %v6439_v18 }
 0xb49   : > { %4980 = vmatprep.subr.bf16.mxu0 %v4857_v32  ;;  %5062 = vmatprep.subr.bf16.mxu1 %v4859_v5  ;;  %v6441_v32 = vld [vmem:[%s7216_s10 + $0x14c8] sm:$0xff]  ;;  %v6443_v5 = vld [vmem:[%s7216_s10 + $0x14d8] sm:$0xff] }
 0xb4c   : > { %4981 = vmatpush1.bf16.msra.mxu0 %v4856_v34  ;;  %5063 = vmatpush1.bf16.msra.mxu1 %v4858_v35  ;;  %v4897_v34 = vunpack.c.l.s8.bf16 %v6441_v32  ;;  %v4899_v35 = vunpack.c.l.s8.bf16 %v6443_v5 }
 0xb4d   : > { %4982 = vmatprep.subr.bf16.mxu0 %v4861_v38  ;;  %5064 = vmatprep.subr.bf16.mxu1 %v4863_v45  ;;  %v6440_v38 = vld [vmem:[%s7216_s10 + $0x14c0] sm:$0xff]  ;;  %v6442_v45 = vld [vmem:[%s7216_s10 + $0x14d0] sm:$0xff] }
 0xb4e   : > { %v4896_v42 = vunpack.c.l.s8.bf16 %v6440_v38  ;;  %v4898_v43 = vunpack.c.l.s8.bf16 %v6442_v45 }
 0xb50   : > { %4983 = vmatpush1.bf16.msra.mxu0 %v4860_v31  ;;  %5065 = vmatpush1.bf16.msra.mxu1 %v4862_v47  ;;  %v4901_v31 = vunpack.c.h.s8.bf16 %v6441_v32  ;;  %v4903_v47 = vunpack.c.h.s8.bf16 %v6443_v5 }
 0xb51   : > { %4984 = vmatprep.subr.bf16.mxu0 %v4865_v51  ;;  %5066 = vmatprep.subr.bf16.mxu1 %v4867_v52  ;;  %v4900_v51 = vunpack.c.h.s8.bf16 %v6440_v38  ;;  %v4902_v52 = vunpack.c.h.s8.bf16 %v6442_v45 }
 0xb54   : > { %4985 = vmatpush1.bf16.msra.mxu0 %v4864_v23  ;;  %5067 = vmatpush1.bf16.msra.mxu1 %v4866_v56  ;;  %v4905_v23 = vunpack.c.l.s8.bf16 %v6445_v53  ;;  %v4907_v56 = vunpack.c.l.s8.bf16 %v6447_v20 }
 0xb55   : > { %4986 = vmatprep.subr.bf16.mxu0 %v4869_v54  ;;  %5068 = vmatprep.subr.bf16.mxu1 %v4871_v57  ;;  %v6444_v54 = vld [vmem:[%s7216_s10 + $0x14e0] sm:$0xff]  ;;  %v6446_v57 = vld [vmem:[%s7216_s10 + $0x14f0] sm:$0xff] }
 0xb56   : > { %v4904_v24 = vunpack.c.l.s8.bf16 %v6444_v54  ;;  %v4906_v58 = vunpack.c.l.s8.bf16 %v6446_v57 }
 0xb58   : > { %4987 = vmatpush1.bf16.msra.mxu0 %v4868_v60  ;;  %5069 = vmatpush1.bf16.msra.mxu1 %v4870_v61  ;;  %v4909_v60 = vunpack.c.h.s8.bf16 %v6445_v53  ;;  %v4911_v61 = vunpack.c.h.s8.bf16 %v6447_v20 }
 0xb59   : > { %4988 = vmatprep.subr.bf16.mxu0 %v4873_v62  ;;  %5070 = vmatprep.subr.bf16.mxu1 %v4875_v11  ;;  %v4908_v62 = vunpack.c.h.s8.bf16 %v6444_v54  ;;  %v4910_v11 = vunpack.c.h.s8.bf16 %v6446_v57  ;;  %v6453_v54 = vld [vmem:[%s7216_s10 + $0x1528] sm:$0xff]  ;;  %v6455_v57 = vld [vmem:[%s7216_s10 + $0x1538] sm:$0xff] }
 0xb5c   : > { %4989 = vmatpush1.bf16.msra.mxu0 %v4872_v2  ;;  %5071 = vmatpush1.bf16.msra.mxu1 %v4874_v3  ;;  %v4913_v2 = vunpack.c.l.s8.bf16 %v8269_v0  ;;  %v4915_v3 = vunpack.c.l.s8.bf16 %v8272_v46 }
 0xb5d   : > { %4990 = vmatprep.subr.bf16.mxu0 %v4877_v6  ;;  %5072 = vmatprep.subr.bf16.mxu1 %v4879_v8  ;;  %v6414_v6 = vld [vmem:[%s7223_s1 + $0x24] sm:$0xf] }
 0xb5e   : > { %v6415_v8 = vld [vmem:[%s7226_s6 + $0x24] sm:$0xf]  ;;  %v4711_v9 = vrot.slane %v6414_v6, %v7405_v36  ;;  %v4719_v44 = vrot.slane %v6414_v6, %v7407_v37 }
 0xb60   : > { %4991 = vmatpush1.bf16.msra.mxu0 %v4876_v48  ;;  %5073 = vmatpush1.bf16.msra.mxu1 %v4878_v7  ;;  %v4715_v48 = vrot.slane %v6414_v6, %v7410_v39  ;;  %v4723_v7 = vrot.slane %v6414_v6, %v7412_v40  ;;  %v6457_v6 = vld [vmem:[%s7216_s10 + $0x1548] sm:$0xff] }
 0xb61   : > { %4992 = vmatprep.subr.bf16.mxu0 %v4881_v10  ;;  %5074 = vmatprep.subr.bf16.mxu1 %v4883_v12  ;;  %v4738_v10 = vrot.slane %v6415_v8, %v7405_v36  ;;  %v4746_v12 = vrot.slane %v6415_v8, %v7407_v37 }
 0xb64   : > { %4993 = vmatpush1.bf16.msra.mxu0 %v4880_v14  ;;  %5075 = vmatpush1.bf16.msra.mxu1 %v4882_v15  ;;  %v4742_v14 = vrot.slane %v6415_v8, %v7410_v39  ;;  %v4750_v15 = vrot.slane %v6415_v8, %v7412_v40  ;;  %v6459_v8 = vld [vmem:[%s7216_s10 + $0x1558] sm:$0xff] }
 0xb65   : > { %4994 = vmatprep.subr.bf16.mxu0 %v4885_v16  ;;  %5076 = vmatprep.subr.bf16.mxu1 %v4887_v41 }
 0xb68   : > { %4995 = vmatpush1.bf16.msra.mxu0 %v4884_v21  ;;  %5077 = vmatpush1.bf16.msra.mxu1 %v4886_v22 }
 0xb69   : > { %4996 = vmatprep.subr.bf16.mxu0 %v4889_v27  ;;  %5078 = vmatprep.subr.bf16.mxu1 %v4891_v59 }
 0xb6c   : > { %4997 = vmatpush1.bf16.msra.mxu0 %v4888_v1  ;;  %5079 = vmatpush1.bf16.msra.mxu1 %v4890_v4 }
 0xb6d   : > { %4998 = vmatprep.subr.bf16.mxu0 %v4893_v28  ;;  %5080 = vmatprep.subr.bf16.mxu1 %v4895_v17 }
 0xb70   : > { %4999 = vmatpush1.bf16.msra.mxu0 %v4892_v50  ;;  %5081 = vmatpush1.bf16.msra.mxu1 %v4894_v33 }
 0xb71   : > { %5000 = vmatprep.subr.bf16.mxu0 %v4897_v34  ;;  %5082 = vmatprep.subr.bf16.mxu1 %v4899_v35 }
 0xb74   : > { %5001 = vmatpush1.bf16.msra.mxu0 %v4896_v42  ;;  %5083 = vmatpush1.bf16.msra.mxu1 %v4898_v43 }
 0xb75   : > { %5002 = vmatprep.subr.bf16.mxu0 %v4901_v31  ;;  %5084 = vmatprep.subr.bf16.mxu1 %v4903_v47  ;;  %v6448_v31 = vld [vmem:[%s7216_s10 + $0x1500] sm:$0xff]  ;;  %v6450_v47 = vld [vmem:[%s7216_s10 + $0x1510] sm:$0xff] }
 0xb76   : > { %v4912_v20 = vunpack.c.l.s8.bf16 %v6448_v31 }
 0xb78   : > { %5003 = vmatpush1.bf16.msra.mxu0 %v4900_v51  ;;  %5085 = vmatpush1.bf16.msra.mxu1 %v4902_v52 }
 0xb79   : > { %5004 = vmatprep.subr.bf16.mxu0 %v4905_v23  ;;  %5086 = vmatprep.subr.bf16.mxu1 %v4907_v56  ;;  %v4914_v23 = vunpack.c.l.s8.bf16 %v6450_v47 }
 0xb7c   : > { %5005 = vmatpush1.bf16.msra.mxu0 %v4904_v24  ;;  %5087 = vmatpush1.bf16.msra.mxu1 %v4906_v58  ;;  %v4916_v24 = vunpack.c.h.s8.bf16 %v6448_v31  ;;  %v4918_v58 = vunpack.c.h.s8.bf16 %v6450_v47 }
 0xb7d   : > { %5006 = vmatprep.subr.bf16.mxu0 %v4909_v60  ;;  %5088 = vmatprep.subr.bf16.mxu1 %v4911_v61  ;;  %v4921_v60 = vunpack.c.l.s8.bf16 %v6453_v54  ;;  %v4923_v61 = vunpack.c.l.s8.bf16 %v6455_v57 }
 0xb80   : > { %5007 = vmatpush1.bf16.msra.mxu0 %v4908_v62  ;;  %5089 = vmatpush1.bf16.msra.mxu1 %v4910_v11  ;;  %v6452_v62 = vld [vmem:[%s7216_s10 + $0x1520] sm:$0xff]  ;;  %v6454_v11 = vld [vmem:[%s7216_s10 + $0x1530] sm:$0xff] }
 0xb81   : > { %5017 = vmatprep.subr.bf16.mxu0 %v4913_v2  ;;  %5099 = vmatprep.subr.bf16.mxu1 %v4915_v3  ;;  %v4925_v2 = vunpack.c.h.s8.bf16 %v6453_v54  ;;  %v4927_v3 = vunpack.c.h.s8.bf16 %v6455_v57  ;;  %v6468_v54 = vld [vmem:[%s7216_s10 + $0x15a0] sm:$0xff]  ;;  %v6470_v57 = vld [vmem:[%s7216_s10 + $0x15b0] sm:$0xff] }
 0xc16   : > { %v4616_v49 = vpop.f32.mrb[36].mxu0  ;;  %v4698_v13 = vpop.f32.mrb[36].mxu1 }
 0xc17   : > { %v4728_v16 = vmul.f32 %v4711_v9, %v4616_v49  ;;  %v4730_v41 = vmul.f32 %v4719_v44, %v4698_v13  ;;  %v4618_v55 = vpop.f32.mrb[37].mxu0  ;;  %v4700_v18 = vpop.f32.mrb[37].mxu1  ;;  %v4924_v9 = vunpack.c.h.s8.bf16 %v6452_v62  ;;  %v4926_v44 = vunpack.c.h.s8.bf16 %v6454_v11 }
 0xc18   : > { %v4729_v21 = vmul.f32 %v4715_v48, %v4618_v55  ;;  %v4731_v22 = vmul.f32 %v4723_v7, %v4700_v18  ;;  %v4620_v27 = vpop.f32.mrb[38].mxu0  ;;  %v4702_v59 = vpop.f32.mrb[38].mxu1  ;;  %v4929_v48 = vunpack.c.l.s8.bf16 %v6457_v6  ;;  %v4931_v7 = vunpack.c.l.s8.bf16 %v6459_v8 }
 0xc19   : > { %v4755_v30 = vadd.f32 %v4738_v10, %v4728_v16  ;;  %v8286_v29 = vadd.f32 %v4746_v12, %v4730_v41  ;;  %v4621_v1 = vpop.f32.mrb[39].mxu0  ;;  %v4703_v4 = vpop.f32.mrb[39].mxu1  ;;  %v6456_v10 = vld [vmem:[%s7216_s10 + $0x1540] sm:$0xff]  ;;  %v6458_v12 = vld [vmem:[%s7216_s10 + $0x1550] sm:$0xff]  ;;  %v6461_v16 = vld [vmem:[%s7216_s10 + $0x1568] sm:$0xff] }
 0xc1a   : > { %v4756_v28 = vadd.f32 %v4742_v14, %v4729_v21  ;;  %v4758_v17 = vadd.f32 %v4750_v15, %v4731_v22  ;;  %v4928_v49 = vunpack.c.l.s8.bf16 %v6456_v10  ;;  %v4930_v13 = vunpack.c.l.s8.bf16 %v6458_v12  ;;  %v6463_v41 = vld [vmem:[%s7216_s10 + $0x1578] sm:$0xff]  ;;  %v6460_v27 = vld [vmem:[%s7216_s10 + $0x1560] sm:$0xff]  ;;  %v6462_v59 = vld [vmem:[%s7216_s10 + $0x1570] sm:$0xff] }
 0xc1b   : > { %vm4759_vm5 = vcmp.ge.f32.partialorder %v4755_v30, 0.0  ;;  %v4763_v32 = vmul.f32 0.2, %v4755_v30  ;;  %v4933_v14 = vunpack.c.h.s8.bf16 %v6457_v6  ;;  %v4935_v15 = vunpack.c.h.s8.bf16 %v6459_v8  ;;  %v6474_v6 = vld [vmem:[%s7216_s10 + $0x15d0] sm:$0xff] }
 0xc1c   : > { %vm4760_vm6 = vcmp.ge.f32.partialorder %v4756_v28, 0.0  ;;  %v4764_v5 = vmul.f32 0.2, %v4756_v28  ;;  %vm4762_vm7 = vcmp.ge.f32.partialorder %v4758_v17, 0.0  ;;  %v4766_v50 = vmul.f32 0.2, %v4758_v17 }
 0xc1d   : > { %v4767_v33 = vsel %vm4759_vm5, %v4755_v30, %v4763_v32  ;;  %v4932_v55 = vunpack.c.h.s8.bf16 %v6456_v10  ;;  %v4934_v18 = vunpack.c.h.s8.bf16 %v6458_v12  ;;  %v4937_v21 = vunpack.c.l.s8.bf16 %v6461_v16  ;;  %v6467_v32 = vld [vmem:[%s7216_s10 + $0x1598] sm:$0xff]  ;;  %v6477_v10 = vld [vmem:[%s7216_s10 + $0x15e8] sm:$0xff] }
 0xc1e   : > { %v4771_v34 = vmul.f32 1.4142135, %v4767_v33  ;;  %v4768_v35 = vsel %vm4760_vm6, %v4756_v28, %v4764_v5  ;;  %v4770_v38 = vsel %vm4762_vm7, %v4758_v17, %v4766_v50  ;;  %v4939_v22 = vunpack.c.l.s8.bf16 %v6463_v41  ;;  %v6465_v17 = vld [vmem:[%s7216_s10 + $0x1588] sm:$0xff]  ;;  %v6479_v12 = vld [vmem:[%s7216_s10 + $0x15f8] sm:$0xff] }
 0xc1f   : > { %v4772_v45 = vmul.f32 1.4142135, %v4768_v35  ;;  %v4774_v42 = vmul.f32 1.4142135, %v4770_v38  ;;  %v4936_v30 = vunpack.c.l.s8.bf16 %v6460_v27  ;;  %v4938_v1 = vunpack.c.l.s8.bf16 %v6462_v59  ;;  %v6464_v35 = vld [vmem:[%s7216_s10 + $0x1580] sm:$0xff]  ;;  %v6466_v38 = vld [vmem:[%s7216_s10 + $0x1590] sm:$0xff] }
 0xc20   : > { %v8289_v43 = vadd.f32 %v4771_v34, %v8095_v19  ;;  %v4917_v19 = vunpack.c.h.s8.bf16 %v8269_v0  ;;  %v4920_v0 = vunpack.c.l.s8.bf16 %v6452_v62  ;;  %v4941_v4 = vunpack.c.h.s8.bf16 %v6461_v16  ;;  %v6475_v62 = vld [vmem:[%s7216_s10 + $0x15d8] sm:$0xff]  ;;  %v6476_v16 = vld [vmem:[%s7216_s10 + $0x15e0] sm:$0xff] }
 0xc21   : > { %v8294_v51 = vadd.f32 %v4772_v45, %v8100_v25  ;;  %v8297_v52 = vadd.f32 %v4774_v42, %v8103_v26  ;;  %v4919_v25 = vunpack.c.h.s8.bf16 %v8272_v46  ;;  %v4922_v46 = vunpack.c.l.s8.bf16 %v6454_v11 }
 0xc22   : > { %v4779_v56 = vpack.c.bf16 %v8289_v43, %v8289_v43  ;;  %v4943_v28 = vunpack.c.h.s8.bf16 %v6463_v41  ;;  %v4940_v5 = vunpack.c.h.s8.bf16 %v6460_v27  ;;  %v4942_v50 = vunpack.c.h.s8.bf16 %v6462_v59  ;;  %v6478_v41 = vld [vmem:[%s7216_s10 + $0x15f0] sm:$0xff] }
 0xc23   : > { %v4780_v53 = vpack.c.bf16 %v8294_v51, %v8294_v51  ;;  %v4782_v26 = vpack.c.bf16 %v8297_v52, %v8297_v52  ;;  %v4945_v33 = vunpack.c.l.s8.bf16 %v6465_v17  ;;  %v4947_v34 = vunpack.c.l.s8.bf16 %v6467_v32 }
 0xc24   : > { %v4944_v45 = vunpack.c.l.s8.bf16 %v6464_v35  ;;  %v4946_v42 = vunpack.c.l.s8.bf16 %v6466_v38  ;;  %v4949_v31 = vunpack.c.h.s8.bf16 %v6465_v17  ;;  %v4951_v47 = vunpack.c.h.s8.bf16 %v6467_v32 }
 0xc25   : > { %5008 = vmatprep.mubr.bf16.mxu0 %v4780_v53  ;;  %5090 = vmatprep.mubr.bf16.mxu1 %v4780_v53  ;;  %v6469_v53 = vld [vmem:[%s7216_s10 + $0x15a8] sm:$0xff]  ;;  %v4956_v11 = vunpack.c.h.s8.bf16 %v6468_v54  ;;  %vm4761_vm8 = vcmp.ge.f32.partialorder %v8286_v29, 0.0  ;;  %v4973_v27 = vunpack.c.h.s8.bf16 %v6477_v10  ;;  %v4975_v59 = vunpack.c.h.s8.bf16 %v6479_v12 }
 0xc26   : > { %5009 = vmatmul.mubr.bf16.vlgmr.msra.gmra.mrb[40].mxu0 %v4779_v56  ;;  %5091 = vmatmul.mubr.bf16.vlgmr.msra.gmra.mrb[40].mxu1 %v4779_v56  ;;  %v4950_v56 = vunpack.c.h.s8.bf16 %v6466_v38 }
 0xc27   : > { %5018 = vmatpush1.bf16.msra.mxu0 %v4912_v20  ;;  %5100 = vmatpush1.bf16.msra.mxu1 %v4914_v23  ;;  %v6471_v20 = vld [vmem:[%s7216_s10 + $0x15b8] sm:$0xff]  ;;  %v4948_v23 = vunpack.c.h.s8.bf16 %v6464_v35 }
 0xc28   : > { %5049 = vmatprep.mubr.bf16.mxu0 %v4782_v26  ;;  %5131 = vmatprep.mubr.bf16.mxu1 %v4782_v26  ;;  %v4952_v26 = vunpack.c.l.s8.bf16 %v6468_v54 }
 0xc29   : > { %5019 = vmatprep.subr.bf16.mxu0 %v4917_v19  ;;  %5101 = vmatprep.subr.bf16.mxu1 %v4919_v25  ;;  %v4953_v19 = vunpack.c.l.s8.bf16 %v6469_v53  ;;  %v4955_v25 = vunpack.c.l.s8.bf16 %v6471_v20 }
 0xc2b   : > { %5020 = vmatpush1.bf16.msra.mxu0 %v4916_v24  ;;  %5102 = vmatpush1.bf16.msra.mxu1 %v4918_v58  ;;  %v4954_v24 = vunpack.c.l.s8.bf16 %v6470_v57  ;;  %v4957_v58 = vunpack.c.h.s8.bf16 %v6469_v53 }
 0xc2c   : > { %5021 = vmatprep.subr.bf16.mxu0 %v4921_v60  ;;  %5103 = vmatprep.subr.bf16.mxu1 %v4923_v61  ;;  %v4959_v60 = vunpack.c.h.s8.bf16 %v6471_v20  ;;  %v6473_v61 = vld [vmem:[%s7216_s10 + $0x15c8] sm:$0xff] }
 0xc2f   : > { %5022 = vmatpush1.bf16.msra.mxu0 %v4920_v0  ;;  %5104 = vmatpush1.bf16.msra.mxu1 %v4922_v46  ;;  %v4958_v0 = vunpack.c.h.s8.bf16 %v6470_v57  ;;  %v4961_v46 = vunpack.c.l.s8.bf16 %v6473_v61 }
 0xc30   : > { %5023 = vmatprep.subr.bf16.mxu0 %v4925_v2  ;;  %5105 = vmatprep.subr.bf16.mxu1 %v4927_v3  ;;  %v4963_v2 = vunpack.c.l.s8.bf16 %v6475_v62  ;;  %v6472_v3 = vld [vmem:[%s7216_s10 + $0x15c0] sm:$0xff] }
 0xc31   : > { %v4960_v8 = vunpack.c.l.s8.bf16 %v6472_v3 }
 0xc33   : > { %5024 = vmatpush1.bf16.msra.mxu0 %v4924_v9  ;;  %5106 = vmatpush1.bf16.msra.mxu1 %v4926_v44  ;;  %v4962_v9 = vunpack.c.l.s8.bf16 %v6474_v6  ;;  %v4965_v44 = vunpack.c.h.s8.bf16 %v6473_v61 }
 0xc34   : > { %5025 = vmatprep.subr.bf16.mxu0 %v4929_v48  ;;  %5107 = vmatprep.subr.bf16.mxu1 %v4931_v7  ;;  %v4967_v48 = vunpack.c.h.s8.bf16 %v6475_v62  ;;  %v4765_v7 = vmul.f32 0.2, %v8286_v29 }
 0xc37   : > { %5026 = vmatpush1.bf16.msra.mxu0 %v4928_v49  ;;  %5108 = vmatpush1.bf16.msra.mxu1 %v4930_v13  ;;  %v4964_v49 = vunpack.c.h.s8.bf16 %v6472_v3  ;;  %v4966_v13 = vunpack.c.h.s8.bf16 %v6474_v6 }
 0xc38   : > { %5027 = vmatprep.subr.bf16.mxu0 %v4933_v14  ;;  %5109 = vmatprep.subr.bf16.mxu1 %v4935_v15  ;;  %v4969_v14 = vunpack.c.l.s8.bf16 %v6477_v10  ;;  %v4971_v15 = vunpack.c.l.s8.bf16 %v6479_v12  ;;  %v6494_v12 = vld [vmem:[%s7216_s10 + $0x1660] sm:$0xff] }
 0xc3b   : > { %5028 = vmatpush1.bf16.msra.mxu0 %v4932_v55  ;;  %5110 = vmatpush1.bf16.msra.mxu1 %v4934_v18  ;;  %v4769_v55 = vsel %vm4761_vm8, %v8286_v29, %v4765_v7  ;;  %v4968_v18 = vunpack.c.l.s8.bf16 %v6476_v16 }
 0xc3c   : > { %5029 = vmatprep.subr.bf16.mxu0 %v4937_v21  ;;  %5111 = vmatprep.subr.bf16.mxu1 %v4939_v22  ;;  %v4970_v21 = vunpack.c.l.s8.bf16 %v6478_v41  ;;  %v4773_v22 = vmul.f32 1.4142135, %v4769_v55  ;;  %v6501_v55 = vld [vmem:[%s7216_s10 + $0x1698] sm:$0xff] }
 0xc3e   : > { %v8341_v17 = vadd.f32 %v4773_v22, %v8147_v63 }
 0xc3f   : > { %5030 = vmatpush1.bf16.msra.mxu0 %v4936_v30  ;;  %5112 = vmatpush1.bf16.msra.mxu1 %v4938_v1  ;;  %v6483_v30 = vld [vmem:[%s7216_s10 + $0x1608] sm:$0xff]  ;;  %v6485_v1 = vld [vmem:[%s7216_s10 + $0x1618] sm:$0xff] }
 0xc40   : > { %5031 = vmatprep.subr.bf16.mxu0 %v4941_v4  ;;  %5113 = vmatprep.subr.bf16.mxu1 %v4943_v28  ;;  %v4972_v4 = vunpack.c.h.s8.bf16 %v6476_v16  ;;  %v4974_v28 = vunpack.c.h.s8.bf16 %v6478_v41  ;;  %v5276_v29 = vunpack.c.l.s8.bf16 %v6483_v30  ;;  %v5278_v32 = vunpack.c.l.s8.bf16 %v6485_v1  ;;  %v6499_v41 = vld [vmem:[%s7216_s10 + $0x1688] sm:$0xff] }
 0xc41   : > { %v4781_v35 = vpack.c.bf16 %v8341_v17, %v8341_v17  ;;  %v5280_v63 = vunpack.c.h.s8.bf16 %v6483_v30  ;;  %v5282_v38 = vunpack.c.h.s8.bf16 %v6485_v1  ;;  %v5308_v22 = vunpack.c.l.s8.bf16 %v6499_v41  ;;  %v6500_v30 = vld [vmem:[%s7216_s10 + $0x1690] sm:$0xff] }
 0xc43   : > { %5032 = vmatpush1.bf16.msra.mxu0 %v4940_v5  ;;  %5114 = vmatpush1.bf16.msra.mxu1 %v4942_v50  ;;  %v6482_v5 = vld [vmem:[%s7216_s10 + $0x1600] sm:$0xff]  ;;  %v6484_v50 = vld [vmem:[%s7216_s10 + $0x1610] sm:$0xff] }
 0xc44   : > { %5033 = vmatprep.subr.bf16.mxu0 %v4945_v33  ;;  %5115 = vmatprep.subr.bf16.mxu1 %v4947_v34  ;;  %v5275_v33 = vunpack.c.l.s8.bf16 %v6482_v5  ;;  %v5277_v34 = vunpack.c.l.s8.bf16 %v6484_v50 }
 0xc47   : > { %5034 = vmatpush1.bf16.msra.mxu0 %v4944_v45  ;;  %5116 = vmatpush1.bf16.msra.mxu1 %v4946_v42  ;;  %v6487_v45 = vld [vmem:[%s7216_s10 + $0x1628] sm:$0xff]  ;;  %v6489_v42 = vld [vmem:[%s7216_s10 + $0x1638] sm:$0xff] }
 0xc48   : > { %5035 = vmatprep.subr.bf16.mxu0 %v4949_v31  ;;  %5117 = vmatprep.subr.bf16.mxu1 %v4951_v47  ;;  %v5279_v31 = vunpack.c.h.s8.bf16 %v6482_v5  ;;  %v5281_v47 = vunpack.c.h.s8.bf16 %v6484_v50  ;;  %v5284_v53 = vunpack.c.l.s8.bf16 %v6487_v45  ;;  %v5286_v20 = vunpack.c.l.s8.bf16 %v6489_v42  ;;  %v6505_v5 = vld [vmem:[%s7216_s10 + $0x16b8] sm:$0xff] }
 0xc49   : > { %v5288_v54 = vunpack.c.h.s8.bf16 %v6487_v45  ;;  %v5290_v57 = vunpack.c.h.s8.bf16 %v6489_v42 }
 0xc4b   : > { %5036 = vmatpush1.bf16.msra.mxu0 %v4948_v23  ;;  %5118 = vmatpush1.bf16.msra.mxu1 %v4950_v56  ;;  %v6486_v23 = vld [vmem:[%s7216_s10 + $0x1620] sm:$0xff]  ;;  %v6488_v56 = vld [vmem:[%s7216_s10 + $0x1630] sm:$0xff] }
 0xc4c   : > { %5037 = vmatprep.subr.bf16.mxu0 %v4953_v19  ;;  %5119 = vmatprep.subr.bf16.mxu1 %v4955_v25  ;;  %v5283_v19 = vunpack.c.l.s8.bf16 %v6486_v23  ;;  %v5285_v25 = vunpack.c.l.s8.bf16 %v6488_v56 }
 0xc4f   : > { %5038 = vmatpush1.bf16.msra.mxu0 %v4952_v26  ;;  %5120 = vmatpush1.bf16.msra.mxu1 %v4954_v24  ;;  %v6491_v26 = vld [vmem:[%s7216_s10 + $0x1648] sm:$0xff]  ;;  %v6493_v24 = vld [vmem:[%s7216_s10 + $0x1658] sm:$0xff] }
 0xc50   : > { %5039 = vmatprep.subr.bf16.mxu0 %v4957_v58  ;;  %5121 = vmatprep.subr.bf16.mxu1 %v4959_v60  ;;  %v5287_v58 = vunpack.c.h.s8.bf16 %v6486_v23  ;;  %v5289_v60 = vunpack.c.h.s8.bf16 %v6488_v56  ;;  %v5292_v61 = vunpack.c.l.s8.bf16 %v6491_v26  ;;  %v5294_v62 = vunpack.c.l.s8.bf16 %v6493_v24 }
 0xc51   : > { %v5296_v3 = vunpack.c.h.s8.bf16 %v6491_v26  ;;  %v5298_v6 = vunpack.c.h.s8.bf16 %v6493_v24 }
 0xc53   : > { %5040 = vmatpush1.bf16.msra.mxu0 %v4956_v11  ;;  %5122 = vmatpush1.bf16.msra.mxu1 %v4958_v0  ;;  %v6490_v11 = vld [vmem:[%s7216_s10 + $0x1640] sm:$0xff]  ;;  %v6492_v0 = vld [vmem:[%s7216_s10 + $0x1650] sm:$0xff] }
 0xc54   : > { %5041 = vmatprep.subr.bf16.mxu0 %v4961_v46  ;;  %5123 = vmatprep.subr.bf16.mxu1 %v4963_v2  ;;  %v5291_v46 = vunpack.c.l.s8.bf16 %v6490_v11  ;;  %v5293_v2 = vunpack.c.l.s8.bf16 %v6492_v0 }
 0xc57   : > { %5042 = vmatpush1.bf16.msra.mxu0 %v4960_v8  ;;  %5124 = vmatpush1.bf16.msra.mxu1 %v4962_v9  ;;  %v6495_v8 = vld [vmem:[%s7216_s10 + $0x1668] sm:$0xff]  ;;  %v6497_v9 = vld [vmem:[%s7216_s10 + $0x1678] sm:$0xff] }
 0xc58   : > { %5043 = vmatprep.subr.bf16.mxu0 %v4965_v44  ;;  %5125 = vmatprep.subr.bf16.mxu1 %v4967_v48  ;;  %v5295_v44 = vunpack.c.h.s8.bf16 %v6490_v11  ;;  %v5297_v48 = vunpack.c.h.s8.bf16 %v6492_v0  ;;  %v5300_v7 = vunpack.c.l.s8.bf16 %v6495_v8  ;;  %v5302_v10 = vunpack.c.l.s8.bf16 %v6497_v9  ;;  %v6511_v11 = vld [vmem:[%s7216_s10 + $0x16e8] sm:$0xff]  ;;  %v6513_v0 = vld [vmem:[%s7216_s10 + $0x16f8] sm:$0xff] }
 0xc59   : > { %v5306_v16 = vunpack.c.h.s8.bf16 %v6497_v9 }
 0xc5b   : > { %5044 = vmatpush1.bf16.msra.mxu0 %v4964_v49  ;;  %5126 = vmatpush1.bf16.msra.mxu1 %v4966_v13  ;;  %v6496_v49 = vld [vmem:[%s7216_s10 + $0x1670] sm:$0xff]  ;;  %v5299_v13 = vunpack.c.l.s8.bf16 %v6494_v12 }
 0xc5c   : > { %5045 = vmatprep.subr.bf16.mxu0 %v4969_v14  ;;  %5127 = vmatprep.subr.bf16.mxu1 %v4971_v15  ;;  %v5301_v14 = vunpack.c.l.s8.bf16 %v6496_v49  ;;  %v5304_v15 = vunpack.c.h.s8.bf16 %v6495_v8 }
 0xc5f   : > { %5046 = vmatpush1.bf16.msra.mxu0 %v4968_v18  ;;  %5128 = vmatpush1.bf16.msra.mxu1 %v4970_v21  ;;  %v5303_v18 = vunpack.c.h.s8.bf16 %v6494_v12  ;;  %v5305_v21 = vunpack.c.h.s8.bf16 %v6496_v49  ;;  %v8376_v12 = vld [vmem:[%s7216_s10 + $0x1708] sm:$0xff]  ;;  %v8379_v49 = vld [vmem:[%s7216_s10 + $0x1718] sm:$0xff] }
 0xc60   : > { %5047 = vmatprep.subr.bf16.mxu0 %v4973_v27  ;;  %5129 = vmatprep.subr.bf16.mxu1 %v4975_v59  ;;  %v5310_v27 = vunpack.c.l.s8.bf16 %v6501_v55  ;;  %v6498_v59 = vld [vmem:[%s7216_s10 + $0x1680] sm:$0xff] }
 0xc61   : > { %v5307_v1 = vunpack.c.l.s8.bf16 %v6498_v59  ;;  %v5311_v50 = vunpack.c.h.s8.bf16 %v6498_v59 }
 0xc63   : > { %5048 = vmatpush1.bf16.msra.mxu0 %v4972_v4  ;;  %5130 = vmatpush1.bf16.msra.mxu1 %v4974_v28  ;;  %v5309_v4 = vunpack.c.l.s8.bf16 %v6500_v30  ;;  %v5312_v28 = vunpack.c.h.s8.bf16 %v6499_v41 }
 0xc64   : > { %5403 = vmatprep.subr.bf16.mxu0 %v5276_v29  ;;  %5485 = vmatprep.subr.bf16.mxu1 %v5278_v32  ;;  %v5314_v29 = vunpack.c.h.s8.bf16 %v6501_v55  ;;  %v6503_v32 = vld [vmem:[%s7216_s10 + $0x16a8] sm:$0xff] }
 0xc66   : > { %5050 = vmatmul.mubr.bf16.vlgmr.msra.gmra.mrb[40].mxu0 %v4781_v35  ;;  %5132 = vmatmul.mubr.bf16.vlgmr.msra.gmra.mrb[40].mxu1 %v4781_v35  ;;  %v5318_v35 = vunpack.c.l.s8.bf16 %v6505_v5 }
 0xc67   : > { %5404 = vmatpush1.bf16.msra.mxu0 %v5275_v33  ;;  %5486 = vmatpush1.bf16.msra.mxu1 %v5277_v34  ;;  %v5313_v33 = vunpack.c.h.s8.bf16 %v6500_v30  ;;  %v5316_v34 = vunpack.c.l.s8.bf16 %v6503_v32 }
 0xc68   : > { %5405 = vmatprep.subr.bf16.mxu0 %v5280_v63  ;;  %5487 = vmatprep.subr.bf16.mxu1 %v5282_v38  ;;  %v6502_v63 = vld [vmem:[%s7216_s10 + $0x16a0] sm:$0xff]  ;;  %v6504_v38 = vld [vmem:[%s7216_s10 + $0x16b0] sm:$0xff] }
 0xc69   : > { %v5315_v45 = vunpack.c.l.s8.bf16 %v6502_v63  ;;  %v5317_v42 = vunpack.c.l.s8.bf16 %v6504_v38  ;;  %v5319_v23 = vunpack.c.h.s8.bf16 %v6502_v63  ;;  %v5321_v56 = vunpack.c.h.s8.bf16 %v6504_v38 }
 0xc6b   : > { %5406 = vmatpush1.bf16.msra.mxu0 %v5279_v31  ;;  %5488 = vmatpush1.bf16.msra.mxu1 %v5281_v47  ;;  %v5320_v31 = vunpack.c.h.s8.bf16 %v6503_v32  ;;  %v5322_v47 = vunpack.c.h.s8.bf16 %v6505_v5 }
 0xc6c   : > { %5407 = vmatprep.subr.bf16.mxu0 %v5284_v53  ;;  %5489 = vmatprep.subr.bf16.mxu1 %v5286_v20  ;;  %v6507_v53 = vld [vmem:[%s7216_s10 + $0x16c8] sm:$0xff]  ;;  %v6509_v20 = vld [vmem:[%s7216_s10 + $0x16d8] sm:$0xff] }
 0xc6f   : > { %5408 = vmatpush1.bf16.msra.mxu0 %v5283_v19  ;;  %5490 = vmatpush1.bf16.msra.mxu1 %v5285_v25  ;;  %v5324_v19 = vunpack.c.l.s8.bf16 %v6507_v53  ;;  %v5326_v25 = vunpack.c.l.s8.bf16 %v6509_v20 }
 0xc70   : > { %5409 = vmatprep.subr.bf16.mxu0 %v5288_v54  ;;  %5491 = vmatprep.subr.bf16.mxu1 %v5290_v57  ;;  %v6506_v54 = vld [vmem:[%s7216_s10 + $0x16c0] sm:$0xff]  ;;  %v6508_v57 = vld [vmem:[%s7216_s10 + $0x16d0] sm:$0xff] }
 0xc71   : > { %v5323_v26 = vunpack.c.l.s8.bf16 %v6506_v54  ;;  %v5325_v24 = vunpack.c.l.s8.bf16 %v6508_v57 }
 0xc73   : > { %5410 = vmatpush1.bf16.msra.mxu0 %v5287_v58  ;;  %5492 = vmatpush1.bf16.msra.mxu1 %v5289_v60  ;;  %v5328_v58 = vunpack.c.h.s8.bf16 %v6507_v53  ;;  %v5330_v60 = vunpack.c.h.s8.bf16 %v6509_v20  ;;  %v6514_v20 = vld [vmem:[%s7216_s10 + $0x1700] sm:$0xff] }
 0xc74   : > { %5411 = vmatprep.subr.bf16.mxu0 %v5292_v61  ;;  %5493 = vmatprep.subr.bf16.mxu1 %v5294_v62  ;;  %v5327_v61 = vunpack.c.h.s8.bf16 %v6506_v54  ;;  %v5329_v62 = vunpack.c.h.s8.bf16 %v6508_v57 }
 0xc77   : > { %5412 = vmatpush1.bf16.msra.mxu0 %v5291_v46  ;;  %5494 = vmatpush1.bf16.msra.mxu1 %v5293_v2  ;;  %v5332_v46 = vunpack.c.l.s8.bf16 %v6511_v11  ;;  %v5334_v2 = vunpack.c.l.s8.bf16 %v6513_v0 }
 0xc78   : > { %5413 = vmatprep.subr.bf16.mxu0 %v5296_v3  ;;  %5495 = vmatprep.subr.bf16.mxu1 %v5298_v6  ;;  %v6510_v3 = vld [vmem:[%s7216_s10 + $0x16e0] sm:$0xff]  ;;  %v6512_v6 = vld [vmem:[%s7216_s10 + $0x16f0] sm:$0xff] }
 0xc79   : > { %v5331_v8 = vunpack.c.l.s8.bf16 %v6510_v3  ;;  %v5333_v9 = vunpack.c.l.s8.bf16 %v6512_v6 }
 0xc7b   : > { %5414 = vmatpush1.bf16.msra.mxu0 %v5295_v44  ;;  %5496 = vmatpush1.bf16.msra.mxu1 %v5297_v48  ;;  %v5336_v44 = vunpack.c.h.s8.bf16 %v6511_v11  ;;  %v5338_v48 = vunpack.c.h.s8.bf16 %v6513_v0  ;;  %v6519_v11 = vld [vmem:[%s7216_s10 + $0x1728] sm:$0xff]  ;;  %v6521_v0 = vld [vmem:[%s7216_s10 + $0x1738] sm:$0xff] }
 0xc7c   : > { %5415 = vmatprep.subr.bf16.mxu0 %v5300_v7  ;;  %5497 = vmatprep.subr.bf16.mxu1 %v5302_v10  ;;  %v5335_v7 = vunpack.c.h.s8.bf16 %v6510_v3  ;;  %v5337_v10 = vunpack.c.h.s8.bf16 %v6512_v6  ;;  %v5348_v6 = vunpack.c.l.s8.bf16 %v6519_v11 }
 0xc7f   : > { %5416 = vmatpush1.bf16.msra.mxu0 %v5299_v13  ;;  %5498 = vmatpush1.bf16.msra.mxu1 %v5301_v14  ;;  %v5340_v13 = vunpack.c.l.s8.bf16 %v8376_v12  ;;  %v5342_v14 = vunpack.c.l.s8.bf16 %v8379_v49 }
 0xc80   : > { %5417 = vmatprep.subr.bf16.mxu0 %v5304_v15  ;;  %5499 = vmatprep.subr.bf16.mxu1 %v5306_v16  ;;  %v6480_v15 = vld [vmem:[%s7223_s1 + $0x28] sm:$0xf] }
 0xc81   : > { %v6481_v16 = vld [vmem:[%s7226_s6 + $0x28] sm:$0xf]  ;;  %v5146_v41 = vrot.slane %v6480_v15, %v7405_v36  ;;  %v5154_v55 = vrot.slane %v6480_v15, %v7407_v37 }
 0xc83   : > { %5418 = vmatpush1.bf16.msra.mxu0 %v5303_v18  ;;  %5500 = vmatpush1.bf16.msra.mxu1 %v5305_v21  ;;  %v5150_v18 = vrot.slane %v6480_v15, %v7410_v39  ;;  %v5158_v21 = vrot.slane %v6480_v15, %v7412_v40 }
 0xc84   : > { %5419 = vmatprep.subr.bf16.mxu0 %v5308_v22  ;;  %5501 = vmatprep.subr.bf16.mxu1 %v5310_v27  ;;  %v5173_v22 = vrot.slane %v6481_v16, %v7405_v36  ;;  %v5181_v27 = vrot.slane %v6481_v16, %v7407_v37 }
 0xc87   : > { %5420 = vmatpush1.bf16.msra.mxu0 %v5307_v1  ;;  %5502 = vmatpush1.bf16.msra.mxu1 %v5309_v4  ;;  %v5177_v1 = vrot.slane %v6481_v16, %v7410_v39  ;;  %v5185_v4 = vrot.slane %v6481_v16, %v7412_v40 }
 0xc88   : > { %5421 = vmatprep.subr.bf16.mxu0 %v5312_v28  ;;  %5503 = vmatprep.subr.bf16.mxu1 %v5314_v29 }
 0xc8b   : > { %5422 = vmatpush1.bf16.msra.mxu0 %v5311_v50  ;;  %5504 = vmatpush1.bf16.msra.mxu1 %v5313_v33 }
 0xc8c   : > { %5423 = vmatprep.subr.bf16.mxu0 %v5316_v34  ;;  %5505 = vmatprep.subr.bf16.mxu1 %v5318_v35 }
 0xc8f   : > { %5424 = vmatpush1.bf16.msra.mxu0 %v5315_v45  ;;  %5506 = vmatpush1.bf16.msra.mxu1 %v5317_v42 }
 0xc90   : > { %5425 = vmatprep.subr.bf16.mxu0 %v5320_v31  ;;  %5507 = vmatprep.subr.bf16.mxu1 %v5322_v47 }
 0xc93   : > { %5426 = vmatpush1.bf16.msra.mxu0 %v5319_v23  ;;  %5508 = vmatpush1.bf16.msra.mxu1 %v5321_v56  ;;  %v6516_v23 = vld [vmem:[%s7216_s10 + $0x1710] sm:$0xff] }
 0xc94   : > { %5427 = vmatprep.subr.bf16.mxu0 %v5324_v19  ;;  %5509 = vmatprep.subr.bf16.mxu1 %v5326_v25  ;;  %v5345_v3 = vunpack.c.h.s8.bf16 %v6516_v23 }
 0xc97   : > { %5428 = vmatpush1.bf16.msra.mxu0 %v5323_v26  ;;  %5510 = vmatpush1.bf16.msra.mxu1 %v5325_v24  ;;  %v5339_v26 = vunpack.c.l.s8.bf16 %v6514_v20  ;;  %v5341_v24 = vunpack.c.l.s8.bf16 %v6516_v23  ;;  %v6530_v23 = vld [vmem:[%s7216_s10 + $0x1780] sm:$0xff] }
 0xc98   : > { %5429 = vmatprep.subr.bf16.mxu0 %v5328_v58  ;;  %5511 = vmatprep.subr.bf16.mxu1 %v5330_v60 }
 0xc9b   : > { %5430 = vmatpush1.bf16.msra.mxu0 %v5327_v61  ;;  %5512 = vmatpush1.bf16.msra.mxu1 %v5329_v62  ;;  %v5344_v61 = vunpack.c.h.s8.bf16 %v8376_v12  ;;  %v5346_v62 = vunpack.c.h.s8.bf16 %v8379_v49  ;;  %v5354_v12 = vunpack.c.h.s8.bf16 %v6521_v0  ;;  %v6523_v49 = vld [vmem:[%s7216_s10 + $0x1748] sm:$0xff] }
 0xc9c   : > { %5431 = vmatprep.subr.bf16.mxu0 %v5332_v46  ;;  %5513 = vmatprep.subr.bf16.mxu1 %v5334_v2  ;;  %v5343_v2 = vunpack.c.h.s8.bf16 %v6514_v20  ;;  %v5356_v16 = vunpack.c.l.s8.bf16 %v6523_v49 }
 0xc9f   : > { %5432 = vmatpush1.bf16.msra.mxu0 %v5331_v8  ;;  %5514 = vmatpush1.bf16.msra.mxu1 %v5333_v9  ;;  %v5350_v8 = vunpack.c.l.s8.bf16 %v6521_v0  ;;  %v6518_v9 = vld [vmem:[%s7216_s10 + $0x1720] sm:$0xff]  ;;  %v6536_v0 = vld [vmem:[%s7216_s10 + $0x17b0] sm:$0xff] }
 0xca0   : > { %5433 = vmatprep.subr.bf16.mxu0 %v5336_v44  ;;  %5515 = vmatprep.subr.bf16.mxu1 %v5338_v48  ;;  %v6520_v44 = vld [vmem:[%s7216_s10 + $0x1730] sm:$0xff]  ;;  %v5347_v48 = vunpack.c.l.s8.bf16 %v6518_v9 }
 0xca1   : > { %v5353_v15 = vunpack.c.h.s8.bf16 %v6520_v44 }
 0xca3   : > { %5434 = vmatpush1.bf16.msra.mxu0 %v5335_v7  ;;  %5516 = vmatpush1.bf16.msra.mxu1 %v5337_v10  ;;  %v5349_v7 = vunpack.c.l.s8.bf16 %v6520_v44  ;;  %v5352_v10 = vunpack.c.h.s8.bf16 %v6519_v11  ;;  %v6534_v11 = vld [vmem:[%s7216_s10 + $0x17a0] sm:$0xff] }
 0xca4   : > { %5444 = vmatprep.subr.bf16.mxu0 %v5340_v13  ;;  %5526 = vmatprep.subr.bf16.mxu1 %v5342_v14  ;;  %v6525_v13 = vld [vmem:[%s7216_s10 + $0x1758] sm:$0xff]  ;;  %v5351_v14 = vunpack.c.h.s8.bf16 %v6518_v9  ;;  %v5383_v44 = vunpack.c.h.s8.bf16 %v6534_v11 }
 0xca5   : > { %v6541_v9 = vld [vmem:[%s7216_s10 + $0x17d8] sm:$0xff] }
 0xd39   : > { %v5051_v59 = vpop.f32.mrb[40].mxu0  ;;  %v5133_v30 = vpop.f32.mrb[40].mxu1 }
 0xd3a   : > { %v5163_v28 = vmul.f32 %v5146_v41, %v5051_v59  ;;  %v5165_v29 = vmul.f32 %v5154_v55, %v5133_v30  ;;  %v5053_v32 = vpop.f32.mrb[41].mxu0  ;;  %v5135_v5 = vpop.f32.mrb[41].mxu1  ;;  %v5358_v41 = vunpack.c.l.s8.bf16 %v6525_v13  ;;  %v6522_v55 = vld [vmem:[%s7216_s10 + $0x1740] sm:$0xff]  ;;  %v5362_v59 = vunpack.c.h.s8.bf16 %v6525_v13  ;;  %v6527_v30 = vld [vmem:[%s7216_s10 + $0x1768] sm:$0xff] }
 0xd3b   : > { %v5164_v50 = vmul.f32 %v5150_v18, %v5053_v32  ;;  %v5166_v33 = vmul.f32 %v5158_v21, %v5135_v5  ;;  %v5055_v34 = vpop.f32.mrb[42].mxu0  ;;  %v5137_v35 = vpop.f32.mrb[42].mxu1  ;;  %v6524_v18 = vld [vmem:[%s7216_s10 + $0x1750] sm:$0xff]  ;;  %v5355_v21 = vunpack.c.l.s8.bf16 %v6522_v55  ;;  %v6526_v5 = vld [vmem:[%s7216_s10 + $0x1760] sm:$0xff] }
 0xd3c   : > { %v5190_v63 = vadd.f32 %v5173_v22, %v5163_v28  ;;  %v8393_v38 = vadd.f32 %v5181_v27, %v5165_v29  ;;  %v5056_v45 = vpop.f32.mrb[43].mxu0  ;;  %v5138_v42 = vpop.f32.mrb[43].mxu1  ;;  %v5357_v22 = vunpack.c.l.s8.bf16 %v6524_v18  ;;  %v5360_v27 = vunpack.c.h.s8.bf16 %v6523_v49  ;;  %v6540_v49 = vld [vmem:[%s7216_s10 + $0x17d0] sm:$0xff] }
 0xd3d   : > { %v5191_v31 = vadd.f32 %v5177_v1, %v5164_v50  ;;  %v5193_v47 = vadd.f32 %v5185_v4, %v5166_v33  ;;  %v6529_v1 = vld [vmem:[%s7216_s10 + $0x1778] sm:$0xff]  ;;  %v5359_v4 = vunpack.c.h.s8.bf16 %v6522_v55  ;;  %v5361_v28 = vunpack.c.h.s8.bf16 %v6524_v18  ;;  %v6528_v50 = vld [vmem:[%s7216_s10 + $0x1770] sm:$0xff]  ;;  %v6531_v45 = vld [vmem:[%s7216_s10 + $0x1788] sm:$0xff] }
 0xd3e   : > { %vm5194_vm9 = vcmp.ge.f32.partialorder %v5190_v63, 0.0  ;;  %v5198_v53 = vmul.f32 0.2, %v5190_v63  ;;  %v5364_v29 = vunpack.c.l.s8.bf16 %v6527_v30  ;;  %v5366_v32 = vunpack.c.l.s8.bf16 %v6529_v1  ;;  %v6533_v42 = vld [vmem:[%s7216_s10 + $0x1798] sm:$0xff] }
 0xd3f   : > { %v5199_v56 = vmul.f32 0.2, %v5191_v31  ;;  %v5201_v19 = vmul.f32 0.2, %v5193_v47  ;;  %vm5195_vm10 = vcmp.ge.f32.partialorder %v5191_v31, 0.0  ;;  %vm5197_vm11 = vcmp.ge.f32.partialorder %v5193_v47, 0.0 }
 0xd40   : > { %v5202_v25 = vsel %vm5194_vm9, %v5190_v63, %v5198_v53  ;;  %v5363_v33 = vunpack.c.l.s8.bf16 %v6526_v5  ;;  %v5365_v34 = vunpack.c.l.s8.bf16 %v6528_v50  ;;  %v5368_v35 = vunpack.c.h.s8.bf16 %v6527_v30  ;;  %v6545_v55 = vld [vmem:[%s7216_s10 + $0x17f8] sm:$0xff]  ;;  %v6544_v30 = vld [vmem:[%s7216_s10 + $0x17f0] sm:$0xff] }
 0xd41   : > { %v5203_v54 = vsel %vm5195_vm10, %v5191_v31, %v5199_v56  ;;  %v5205_v58 = vsel %vm5197_vm11, %v5193_v47, %v5201_v19  ;;  %v5206_v60 = vpack.c.bf16 %v5202_v25, %v5202_v25  ;;  %v5370_v63 = vunpack.c.h.s8.bf16 %v6529_v1  ;;  %v6532_v56 = vld [vmem:[%s7216_s10 + $0x1790] sm:$0xff] }
 0xd42   : > { %v5207_v57 = vpack.c.bf16 %v5203_v54, %v5203_v54  ;;  %v5209_v46 = vpack.c.bf16 %v5205_v58, %v5205_v58  ;;  %v5367_v31 = vunpack.c.h.s8.bf16 %v6526_v5  ;;  %v5369_v47 = vunpack.c.h.s8.bf16 %v6528_v50 }
 0xd43   : > { %v5372_v53 = vunpack.c.l.s8.bf16 %v6531_v45  ;;  %v5374_v20 = vunpack.c.l.s8.bf16 %v6533_v42  ;;  %v5371_v19 = vunpack.c.l.s8.bf16 %v6530_v23  ;;  %v5373_v25 = vunpack.c.l.s8.bf16 %v6532_v56 }
 0xd44   : > { %5435 = vmatprep.mubr.bf16.mxu0 %v5207_v57  ;;  %5517 = vmatprep.mubr.bf16.mxu1 %v5207_v57  ;;  %v5376_v54 = vunpack.c.h.s8.bf16 %v6531_v45  ;;  %v5378_v57 = vunpack.c.h.s8.bf16 %v6533_v42  ;;  %v5375_v58 = vunpack.c.h.s8.bf16 %v6530_v23  ;;  %vm5196_vm12 = vcmp.ge.f32.partialorder %v8393_v38, 0.0 }
 0xd45   : > { %5436 = vmatmul.mubr.bf16.vlgmr.msra.gmra.mrb[44].mxu0 %v5206_v60  ;;  %5518 = vmatmul.mubr.bf16.vlgmr.msra.gmra.mrb[44].mxu1 %v5206_v60  ;;  %v5377_v60 = vunpack.c.h.s8.bf16 %v6532_v56  ;;  %v5401_v50 = vunpack.c.h.s8.bf16 %v6544_v30 }
 0xd46   : > { %5445 = vmatpush1.bf16.msra.mxu0 %v5339_v26  ;;  %5527 = vmatpush1.bf16.msra.mxu1 %v5341_v24  ;;  %v6535_v26 = vld [vmem:[%s7216_s10 + $0x17a8] sm:$0xff]  ;;  %v6537_v24 = vld [vmem:[%s7216_s10 + $0x17b8] sm:$0xff] }
 0xd47   : > { %5476 = vmatprep.mubr.bf16.mxu0 %v5209_v46  ;;  %5558 = vmatprep.mubr.bf16.mxu1 %v5209_v46  ;;  %v5379_v46 = vunpack.c.l.s8.bf16 %v6534_v11 }
 0xd48   : > { %5446 = vmatprep.subr.bf16.mxu0 %v5344_v61  ;;  %5528 = vmatprep.subr.bf16.mxu1 %v5346_v62  ;;  %v5380_v61 = vunpack.c.l.s8.bf16 %v6535_v26  ;;  %v5382_v62 = vunpack.c.l.s8.bf16 %v6537_v24 }
 0xd4a   : > { %5447 = vmatpush1.bf16.msra.mxu0 %v5343_v2  ;;  %5529 = vmatpush1.bf16.msra.mxu1 %v5345_v3  ;;  %v5381_v2 = vunpack.c.l.s8.bf16 %v6536_v0  ;;  %v5384_v3 = vunpack.c.h.s8.bf16 %v6535_v26 }
 0xd4b   : > { %5448 = vmatprep.subr.bf16.mxu0 %v5348_v6  ;;  %5530 = vmatprep.subr.bf16.mxu1 %v5350_v8  ;;  %v5386_v6 = vunpack.c.h.s8.bf16 %v6537_v24  ;;  %v6539_v8 = vld [vmem:[%s7216_s10 + $0x17c8] sm:$0xff] }
 0xd4e   : > { %5449 = vmatpush1.bf16.msra.mxu0 %v5347_v48  ;;  %5531 = vmatpush1.bf16.msra.mxu1 %v5349_v7  ;;  %v5385_v48 = vunpack.c.h.s8.bf16 %v6536_v0  ;;  %v5388_v7 = vunpack.c.l.s8.bf16 %v6539_v8 }
 0xd4f   : > { %5450 = vmatprep.subr.bf16.mxu0 %v5352_v10  ;;  %5532 = vmatprep.subr.bf16.mxu1 %v5354_v12  ;;  %v5390_v10 = vunpack.c.l.s8.bf16 %v6541_v9  ;;  %v6538_v12 = vld [vmem:[%s7216_s10 + $0x17c0] sm:$0xff] }
 0xd50   : > { %v5387_v13 = vunpack.c.l.s8.bf16 %v6538_v12  ;;  %v5391_v18 = vunpack.c.h.s8.bf16 %v6538_v12 }
 0xd52   : > { %5451 = vmatpush1.bf16.msra.mxu0 %v5351_v14  ;;  %5533 = vmatpush1.bf16.msra.mxu1 %v5353_v15  ;;  %v5389_v14 = vunpack.c.l.s8.bf16 %v6540_v49  ;;  %v5392_v15 = vunpack.c.h.s8.bf16 %v6539_v8 }
 0xd53   : > { %5452 = vmatprep.subr.bf16.mxu0 %v5356_v16  ;;  %5534 = vmatprep.subr.bf16.mxu1 %v5358_v41  ;;  %v5394_v16 = vunpack.c.h.s8.bf16 %v6541_v9  ;;  %v6543_v41 = vld [vmem:[%s7216_s10 + $0x17e8] sm:$0xff] }
 0xd56   : > { %5453 = vmatpush1.bf16.msra.mxu0 %v5355_v21  ;;  %5535 = vmatpush1.bf16.msra.mxu1 %v5357_v22  ;;  %v5393_v21 = vunpack.c.h.s8.bf16 %v6540_v49  ;;  %v5396_v22 = vunpack.c.l.s8.bf16 %v6543_v41 }
 0xd57   : > { %5454 = vmatprep.subr.bf16.mxu0 %v5360_v27  ;;  %5536 = vmatprep.subr.bf16.mxu1 %v5362_v59  ;;  %v5398_v27 = vunpack.c.l.s8.bf16 %v6545_v55  ;;  %v6542_v59 = vld [vmem:[%s7216_s10 + $0x17e0] sm:$0xff] }
 0xd58   : > { %v5395_v1 = vunpack.c.l.s8.bf16 %v6542_v59  ;;  %v5399_v5 = vunpack.c.h.s8.bf16 %v6542_v59 }
 0xd5a   : > { %5455 = vmatpush1.bf16.msra.mxu0 %v5359_v4  ;;  %5537 = vmatpush1.bf16.msra.mxu1 %v5361_v28  ;;  %v5397_v4 = vunpack.c.l.s8.bf16 %v6544_v30  ;;  %v5400_v28 = vunpack.c.h.s8.bf16 %v6543_v41 }
 0xd5b   : > { %5456 = vmatprep.subr.bf16.mxu0 %v5364_v29  ;;  %5538 = vmatprep.subr.bf16.mxu1 %v5366_v32  ;;  %v5402_v29 = vunpack.c.h.s8.bf16 %v6545_v55  ;;  %v5200_v32 = vmul.f32 0.2, %v8393_v38 }
 0xd5e   : > { %5457 = vmatpush1.bf16.msra.mxu0 %v5363_v33  ;;  %5539 = vmatpush1.bf16.msra.mxu1 %v5365_v34  ;;  %v5204_v33 = vsel %vm5196_vm12, %v8393_v38, %v5200_v32 }
 0xd5f   : > { %5458 = vmatprep.subr.bf16.mxu0 %v5368_v35  ;;  %5540 = vmatprep.subr.bf16.mxu1 %v5370_v63  ;;  %v5208_v34 = vpack.c.bf16 %v5204_v33, %v5204_v33  ;;  %v6546_v35 = vld [vmem:[%s7223_s1 + $0x2c] sm:$0xf] }
 0xd60   : > { %v6547_v63 = vld [vmem:[%s7226_s6 + $0x2c] sm:$0xf]  ;;  %v5573_v45 = vrot.slane %v6546_v35, %v7405_v36  ;;  %v5581_v42 = vrot.slane %v6546_v35, %v7407_v37 }
 0xd61   : > { %v5604_v56 = vrot.slane %v6547_v63, %v7410_v39 }
 0xd62   : > { %5459 = vmatpush1.bf16.msra.mxu0 %v5367_v31  ;;  %5541 = vmatpush1.bf16.msra.mxu1 %v5369_v47  ;;  %v5577_v31 = vrot.slane %v6546_v35, %v7410_v39  ;;  %v5585_v47 = vrot.slane %v6546_v35, %v7412_v40 }
 0xd63   : > { %5460 = vmatprep.subr.bf16.mxu0 %v5372_v53  ;;  %5542 = vmatprep.subr.bf16.mxu1 %v5374_v20  ;;  %v5600_v53 = vrot.slane %v6547_v63, %v7405_v36  ;;  %v5608_v20 = vrot.slane %v6547_v63, %v7407_v37 }
 0xd66   : > { %5461 = vmatpush1.bf16.msra.mxu0 %v5371_v19  ;;  %5543 = vmatpush1.bf16.msra.mxu1 %v5373_v25  ;;  %v5612_v19 = vrot.slane %v6547_v63, %v7412_v40 }
 0xd67   : > { %5462 = vmatprep.subr.bf16.mxu0 %v5376_v54  ;;  %5544 = vmatprep.subr.bf16.mxu1 %v5378_v57 }
 0xd6a   : > { %5463 = vmatpush1.bf16.msra.mxu0 %v5375_v58  ;;  %5545 = vmatpush1.bf16.msra.mxu1 %v5377_v60 }
 0xd6b   : > { %5464 = vmatprep.subr.bf16.mxu0 %v5380_v61  ;;  %5546 = vmatprep.subr.bf16.mxu1 %v5382_v62 }
 0xd6e   : > { %5465 = vmatpush1.bf16.msra.mxu0 %v5379_v46  ;;  %5547 = vmatpush1.bf16.msra.mxu1 %v5381_v2 }
 0xd6f   : > { %5466 = vmatprep.subr.bf16.mxu0 %v5384_v3  ;;  %5548 = vmatprep.subr.bf16.mxu1 %v5386_v6 }
 0xd72   : > { %5467 = vmatpush1.bf16.msra.mxu0 %v5383_v44  ;;  %5549 = vmatpush1.bf16.msra.mxu1 %v5385_v48 }
 0xd73   : > { %5468 = vmatprep.subr.bf16.mxu0 %v5388_v7  ;;  %5550 = vmatprep.subr.bf16.mxu1 %v5390_v10 }
 0xd76   : > { %5469 = vmatpush1.bf16.msra.mxu0 %v5387_v13  ;;  %5551 = vmatpush1.bf16.msra.mxu1 %v5389_v14 }
 0xd77   : > { %5470 = vmatprep.subr.bf16.mxu0 %v5392_v15  ;;  %5552 = vmatprep.subr.bf16.mxu1 %v5394_v16 }
 0xd7a   : > { %5471 = vmatpush1.bf16.msra.mxu0 %v5391_v18  ;;  %5553 = vmatpush1.bf16.msra.mxu1 %v5393_v21 }
 0xd7b   : > { %5472 = vmatprep.subr.bf16.mxu0 %v5396_v22  ;;  %5554 = vmatprep.subr.bf16.mxu1 %v5398_v27 }
 0xd7e   : > { %5473 = vmatpush1.bf16.msra.mxu0 %v5395_v1  ;;  %5555 = vmatpush1.bf16.msra.mxu1 %v5397_v4 }
 0xd7f   : > { %5474 = vmatprep.subr.bf16.mxu0 %v5400_v28  ;;  %5556 = vmatprep.subr.bf16.mxu1 %v5402_v29 }
 0xd82   : > { %5475 = vmatpush1.bf16.msra.mxu0 %v5399_v5  ;;  %5557 = vmatpush1.bf16.msra.mxu1 %v5401_v50 }
 0xd85   : > { %5477 = vmatmul.mubr.bf16.vlgmr.msra.gmra.mrb[44].mxu0 %v5208_v34  ;;  %5559 = vmatmul.mubr.bf16.vlgmr.msra.gmra.mrb[44].mxu1 %v5208_v34 }
 0xe58   : > { %v5478_v38 = vpop.f32.mrb[44].mxu0  ;;  %v5560_v23 = vpop.f32.mrb[44].mxu1 }
 0xe59   : > { %v5590_v25 = vmul.f32 %v5573_v45, %v5478_v38  ;;  %v5592_v54 = vmul.f32 %v5581_v42, %v5560_v23  ;;  %v5480_v57 = vpop.f32.mrb[45].mxu0  ;;  %v5562_v26 = vpop.f32.mrb[45].mxu1 }
 0xe5a   : > { %v5591_v24 = vmul.f32 %v5577_v31, %v5480_v57  ;;  %v5593_v58 = vmul.f32 %v5585_v47, %v5562_v26  ;;  %v5482_v60 = vpop.f32.mrb[46].mxu0  ;;  %v5564_v61 = vpop.f32.mrb[46].mxu1 }
 0xe5b   : > { %v5617_v62 = vadd.f32 %v5600_v53, %v5590_v25  ;;  %v5619_v11 = vadd.f32 %v5608_v20, %v5592_v54  ;;  %v5483_v0 = vpop.f32.mrb[47].mxu0  ;;  %v5565_v36 = vpop.f32.mrb[47].mxu1 }
 0xe5c   : > { %v5618_v46 = vadd.f32 %v5604_v56, %v5591_v24  ;;  %v5620_v37 = vadd.f32 %v5612_v19, %v5593_v58 }
 0xe5d   : > { %vm5621_vm13 = vcmp.ge.f32.partialorder %v5617_v62, 0.0  ;;  %v5625_v2 = vmul.f32 0.2, %v5617_v62  ;;  %vm5623_vm14 = vcmp.ge.f32.partialorder %v5619_v11, 0.0  ;;  %v5627_v39 = vmul.f32 0.2, %v5619_v11 }
 0xe5e   : > { %vm5622_vm15 = vcmp.ge.f32.partialorder %v5618_v46, 0.0  ;;  %v5626_v40 = vmul.f32 0.2, %v5618_v46  ;;  %vm5624_vm0 = vcmp.ge.f32.partialorder %v5620_v37, 0.0  ;;  %v5628_v3 = vmul.f32 0.2, %v5620_v37 }
 0xe5f   : > { %v5629_v6 = vsel %vm5621_vm13, %v5617_v62, %v5625_v2  ;;  %v5631_v8 = vsel %vm5623_vm14, %v5619_v11, %v5627_v39 }
 0xe60   : > { %v5633_v9 = vmul.f32 1.4142135, %v5629_v6  ;;  %v5635_v44 = vmul.f32 1.4142135, %v5631_v8  ;;  %v5630_v48 = vsel %vm5622_vm15, %v5618_v46, %v5626_v40  ;;  %v5632_v7 = vsel %vm5624_vm0, %v5620_v37, %v5628_v3 }
 0xe61   : > { %v5634_v10 = vmul.f32 1.4142135, %v5630_v48  ;;  %v5636_v12 = vmul.f32 1.4142135, %v5632_v7 }
 0xe62   : > { %v5637_v49 = vadd.f32 %v5633_v9, %v8289_v43  ;;  %v5639_v13 = vadd.f32 %v5635_v44, %v8341_v17 }
 0xe63   : > { %v5638_v14 = vadd.f32 %v5634_v10, %v8294_v51  ;;  %v5640_v15 = vadd.f32 %v5636_v12, %v8297_v52 }
 0xe65   : > { %v5645_v16 = vcombine.low %v5637_v49, %v5638_v14  ;;  %v5646_v41 = vcombine.high %v5637_v49, %v5638_v14  ;;  %v5647_v43 = vcombine.low %v5639_v13, %v5640_v15  ;;  %v5648_v55 = vcombine.high %v5639_v13, %v5640_v15 }
 0xe67   : > { %5653 = vst [vmem:[%s332_s11] sm:$0xff] %v5645_v16  ;;  %5655 = vst [vmem:[%s332_s11 + $0x10] sm:$0xff] %v5646_v41 }
 0xe68   : > { %5654 = vst [vmem:[%s332_s11 + $0x8] sm:$0xff] %v5647_v43  ;;  %5656 = vst [vmem:[%s332_s11 + $0x18] sm:$0xff] %v5648_v55 }
 0xe69   : > { %6879 = shalt.err (!%p6876_p7)
}
 0xe6a   : > { %s6880_s5 = scalar_lea.hbm %s8450_s12, 512  ;;  %s6884_s23 = scalar_lea.hbm %s8499_s4, 1536 }
 0xe6b   : > { %p6881_p6 = scmp.ne.s32.totalorder %s8450_s12, %s6880_s5  ;;  %p6885_p4 = scmp.lt.u32.totalorder %s8450_s12, %s8499_s4 }
 0xe6c   : > { %p6886_p12 = scmp.lt.u32.totalorder %s6884_s23, %s6880_s5  ;;  %p6888_p8 = scmp.lt.u32.totalorder %s6880_s5, %s8450_s12 }
 0xe6d   : > { %p6882_p11 = pnand %p6881_p6, %p8517_p9 }
 0xe6e   : > { %p6887_p13 = por %p6886_p12, %p6885_p4 }
 0xe6f   : > { %p6883_p1 = pneg %p6882_p11 }
 0xe70   : > { %p6889_p10 = por %p6888_p8, %p6887_p13 }
 0xe72   : > { %p6890_p3 = pnand %p6889_p10, %p6883_p1 }
 0xe74   : > { %6893 = shalt.err (!%p6890_p3)
}
 0xe75   : > { %s6953_s6 = smov 256   ;;  %s6954_s25 = smov 16  }
 0xe76   : > { %6667 = dma.vmem_to_hbm [thread:$0]  (%p8517_p9), %s8452_s8, 512, %s8450_s12, %s5658_s19, %s6953_s6, %s6953_s6, %s6954_s25  }
 0xe77 PF: > { %p6687_p2 = scmp.ge.s32.totalorder %s6940_s18, 2  ;;  %s5686_s20 = sand.u32 1, %s6928_s15  }
 0xe78   : > { %p8518_p5 = scmp.ne.s32.totalorder %s8507_s27, 0  ;;  %s5687_s11 = scalar_lea.sflag [#allocation4], %s5686_s20 }
 0xe7a   : > { %p6683_p0 = pnand %p6687_p2, %p8518_p5 }
 0xe7c   : > { %6923 = dma.done.wait (!%p6683_p0), %s5687_s11, 512  }
 0xe7d   : > { %6925 = vsyncadd (!%p6683_p0), %s5687_s11, 4294966784  ;;  %p23_p7 = scmp.ge.s32.totalorder %s7005_s21, 5   ;;  %s8519_s15 = smov %s6932_s16 }
 0xe7e   : > { %s8520_s16 = smov %s6936_s17  ;;  %s8521_s17 = smov %s7017_s24 }
 0xe7f   : > { %s8522_s18 = smov %s7005_s21  ;;  %25 = sbr.rel (!%p23_p7) target bundleno = 12 (0xc), region = 151 }
 0xe86   :  { %5692 = vsyncpa [#allocation3], 1 }
 0xe87   :  { %5694 = vsyncpa [#allocation3 + $0x1], 1 }
 0xe88   :  { %5695 = vsyncpa [#allocation6], 1 }
 0xe89   :  { %5697 = vsyncpa [#allocation6 + $0x1], 1 }
 0xe8a   :  { %5698 = vsyncpa [#allocation9], 1 }
 0xe8b   :  { %5700 = vsyncpa [#allocation9 + $0x1], 1 }
 0xe8c   :  { %5701 = vsyncpa [#allocation4], 1 }
 0xe8d   :  { %5703 = vsyncpa [#allocation4 + $0x1], 1 }

</bundles_post_ra>
